<compile_context>
chip_gen: v6e
topology: v6e:2x2x1
jax: 0.10.0
libtpu: 0.0.40
codegen_flags: <defaults>
</compile_context>

<pallas_src>
import numpy as np
import jax
import jax.numpy as jnp
from jax.experimental import pallas as pl
from jax.experimental.pallas import tpu as pltpu

# dtype fed to the MXU for the conv / upsample matmuls (f32 accumulation).
_MXU_DTYPE = jnp.bfloat16


# --------------------------------------------------------------------------
# Per-branch body (runs on one batch element, entirely in VMEM / vregs):
#   ChannelAttention -> SpatialAttention -> conv3x3 (im2col matmul)
#   -> folded BatchNorm -> ReLU
# --------------------------------------------------------------------------
def _attention_conv_block(x, w1, w2, wsa_ref, wconv, bias,
                          cpad_ref, spad_ref, stack_ref, H, W, C, Cout):
    """x: (C, H*W) f32, channel-major, spatial flattened on the lane axis.
    wsa_ref: (98,) f32 SMEM ref  ([0:49] mean-channel taps, [49:98] max-channel).
    wconv:  (Cout, 9*C) bf16, BN-folded, tap-major (kh, kw, cin).
    Returns (Cout, H*W) f32."""
    HW = H * W
    PAD3 = W + 1          # zero-border width of the 3x3 pad scratch
    PAD7 = 3 * W + 3      # zero-border width of the 7x7 pad scratch

    # ---------------- channel attention (tiny FCs; MXU fill irrelevant) -----
    avg = jnp.mean(x, axis=1, keepdims=True)                     # (C, 1)
    mxv = jnp.max(x, axis=1, keepdims=True)                      # (C, 1)

    def _ca_fc(v):                                               # v: (C, 1)
        h = jnp.maximum(
            jnp.dot(w1, v, preferred_element_type=jnp.float32), 0.0)
        return jnp.dot(w2, h, preferred_element_type=jnp.float32)

    ca = jax.nn.sigmoid(_ca_fc(avg) + _ca_fc(mxv))               # (C, 1)
    x1 = x * ca                                                  # (C, HW)

    # ----- column-wrap masks, generated in-kernel from an iota (no HBM input)
    col = jax.lax.broadcasted_iota(jnp.int32, (1, HW), 1) % W    # (1, HW)

    def col_mask(db):    # 1 where the source column (out_col + db) is in [0, W)
        return jnp.logical_and(col + db >= 0, col + db < W).astype(jnp.float32)

    cmask = {db: col_mask(db) for db in range(-3, 4) if db != 0}  # hoisted

    # ---------------- spatial attention (7x7 conv on [mean;max], VPU) -------
    m_sp = jnp.mean(x1, axis=0, keepdims=True)                   # (1, HW)
    x_sp = jnp.max(x1, axis=0, keepdims=True)                    # (1, HW)
    # only the border strips are zeroed (interior fully overwritten each step)
    spad_ref[:, 0:PAD7] = jnp.zeros((2, PAD7), jnp.float32)
    spad_ref[:, PAD7 + HW:PAD7 + HW + PAD7] = jnp.zeros((2, PAD7), jnp.float32)
    spad_ref[0:1, PAD7:PAD7 + HW] = m_sp
    spad_ref[1:2, PAD7:PAD7 + HW] = x_sp

    logits = jnp.zeros((1, HW), jnp.float32)
    for a in range(7):
        for b in range(7):
            start = PAD7 + (a - 3) * W + (b - 3)
            sm = spad_ref[0:1, start:start + HW]                 # (1, HW)
            sx = spad_ref[1:2, start:start + HW]                 # (1, HW)
            term = wsa_ref[a * 7 + b] * sm + wsa_ref[49 + a * 7 + b] * sx
            if b != 3:                                           # kill column wrap
                term = term * cmask[b - 3]
            logits = logits + term
    sa = jax.nn.sigmoid(logits)                                  # (1, HW)
    x2 = x1 * sa                                                 # (C, HW) f32

    # -------- conv3x3 + folded BN + ReLU as ONE im2col matmul (K = 9*C) -----
    cpad_ref[:, 0:PAD3] = jnp.zeros((C, PAD3), jnp.float32)
    cpad_ref[:, PAD3 + HW:PAD3 + HW + PAD3] = jnp.zeros((C, PAD3), jnp.float32)
    cpad_ref[:, PAD3:PAD3 + HW] = x2                             # f32 interior

    k = 0
    for da in (-1, 0, 1):
        for db in (-1, 0, 1):
            start = PAD3 + da * W + db
            sl = cpad_ref[:, start:start + HW]                   # (C, HW) f32
            if db != 0:
                sl = sl * cmask[db]                              # mask in f32, then cast
            stack_ref[k * C:(k + 1) * C, :] = sl.astype(stack_ref.dtype)
            k += 1

    conv = jnp.dot(wconv, stack_ref[...],
                   preferred_element_type=jnp.float32)           # (Cout, HW)
    return jnp.maximum(conv + bias, 0.0)


def _make_fused_kernel(C0, H0, W0, C1, H1, W1, Cout):
    def kernel(x0_ref, x1_ref,
               w1_0, w2_0, wsa_0, wk_0, b_0,
               w1_1, w2_1, wsa_1, wk_1, b_1,
               kron_ref,
               o0_ref, o1_ref,
               cpad0, spad0, stack0, cpad1, spad1, stack1):
        # ---- coarse branch (level 1) first: its output feeds level 0's add ----
        y1 = _attention_conv_block(x1_ref[0], w1_1[...], w2_1[...], wsa_1,
                                   wk_1[...], b_1[...], cpad1, spad1, stack1,
                                   H1, W1, C1, Cout)
        o1_ref[0] = y1

        # ---- fine branch (level 0) ----
        y0 = _attention_conv_block(x0_ref[0], w1_0[...], w2_0[...], wsa_0,
                                   wk_0[...], b_0[...], cpad0, spad0, stack0,
                                   H0, W0, C0, Cout)
        # fuse='add': bilinear upsample (align_corners=True) of y1 folded into a
        # single (Cout, HW1) @ (HW1, HW0) bf16 matmul, accumulated onto y0.
        up = jnp.dot(y1.astype(kron_ref.dtype), kron_ref[...],
                     preferred_element_type=jnp.float32)
        o0_ref[0] = y0 + up

    return kernel


# --------------------------------------------------------------------------
# Host-side constant builders (bilinear upsample, align_corners=True).
# --------------------------------------------------------------------------
def _interp_matrix(dst, src):
    """1-D bilinear interpolation matrix (dst, src), align_corners=True."""
    A = np.zeros((dst, src), np.float32)
    if dst == 1:
        A[0, 0] = 1.0
        return A
    scale = (src - 1) / (dst - 1)
    for i in range(dst):
        s = i * scale
        j0 = min(int(np.floor(s)), src - 1)
        frac = s - j0
        if j0 + 1 <= src - 1:
            A[i, j0] += 1.0 - frac
            A[i, j0 + 1] += frac
        else:
            A[i, j0] += 1.0
    return A


def _bilinear_kron(src_h, src_w, dst_h, dst_w):
    """(src_h*src_w, dst_h*dst_w) matrix s.t. flat(x) @ K == flat(upsample(x))."""
    Ah = _interp_matrix(dst_h, src_h)                    # (dst_h, src_h)
    Aw = _interp_matrix(dst_w, src_w)                    # (dst_w, src_w)
    K = np.einsum('ai,bj->ijab', Ah, Aw).reshape(src_h * src_w, dst_h * dst_w)
    return jnp.asarray(K, jnp.float32)


# --------------------------------------------------------------------------
# FuseModule forward: one pallas_call for both branches.
# --------------------------------------------------------------------------
def fuse_module_forward(xs_nchw, params, fuse="add"):
    assert len(xs_nchw) == 2 and fuse == "add", "only the exercised config is implemented"
    # TODO(synk): fuse='concat', dilation!=None, att in {'se_a','ses_a',False} and
    # level_num>2 variants of FuseModule are not implemented in this fused kernel.

    x0, x1 = xs_nchw
    B, C0, H0, W0 = x0.shape
    B1, C1, H1, W1 = x1.shape
    assert B1 == B
    HW0, HW1 = H0 * W0, H1 * W1
    p0, p1 = params
    Cout = p0["bias_col"].shape[0]
    Cr0, Cr1 = p0["w1"].shape[0], p1["w1"].shape[0]

    x0f = x0.reshape(B, C0, HW0)       # free reshapes: NCHW is already channel-major
    x1f = x1.reshape(B, C1, HW1)
    kron = _bilinear_kron(H1, W1, H0, W0).astype(_MXU_DTYPE)      # (HW1, HW0)

    kernel = _make_fused_kernel(C0, H0, W0, C1, H1, W1, Cout)
    smem = pl.BlockSpec(memory_space=pltpu.MemorySpace.SMEM)

    in_specs = [
        pl.BlockSpec((1, C0, HW0), lambda b: (b, 0, 0)),          # x0
        pl.BlockSpec((1, C1, HW1), lambda b: (b, 0, 0)),          # x1
        pl.BlockSpec((Cr0, C0), lambda b: (0, 0)),                # br0 CA fc1
        pl.BlockSpec((C0, Cr0), lambda b: (0, 0)),                # br0 CA fc2
        smem,                                                     # br0 SA 7x7 w (98,)
        pl.BlockSpec((Cout, 9 * C0), lambda b: (0, 0)),           # br0 conv (im2col, BN-folded)
        pl.BlockSpec((Cout, 1), lambda b: (0, 0)),                # br0 BN bias
        pl.BlockSpec((Cr1, C1), lambda b: (0, 0)),                # br1 CA fc1
        pl.BlockSpec((C1, Cr1), lambda b: (0, 0)),                # br1 CA fc2
        smem,                                                     # br1 SA 7x7 w
        pl.BlockSpec((Cout, 9 * C1), lambda b: (0, 0)),           # br1 conv
        pl.BlockSpec((Cout, 1), lambda b: (0, 0)),                # br1 BN bias
        pl.BlockSpec((HW1, HW0), lambda b: (0, 0)),               # bilinear kron (bf16)
    ]
    out_specs = (
        pl.BlockSpec((1, Cout, HW0), lambda b: (b, 0, 0)),
        pl.BlockSpec((1, Cout, HW1), lambda b: (b, 0, 0)),
    )
    scratch_shapes = [
        pltpu.VMEM((C0, HW0 + 2 * W0 + 2), jnp.float32),          # cpad0 (3x3 pad)
        pltpu.VMEM((2, HW0 + 6 * W0 + 6), jnp.float32),           # spad0 (7x7 pad)
        pltpu.VMEM((9 * C0, HW0), _MXU_DTYPE),                    # stack0 (im2col)
        pltpu.VMEM((C1, HW1 + 2 * W1 + 2), jnp.float32),          # cpad1
        pltpu.VMEM((2, HW1 + 6 * W1 + 6), jnp.float32),           # spad1
        pltpu.VMEM((9 * C1, HW1), _MXU_DTYPE),                    # stack1
    ]

    out0, out1 = pl.pallas_call(
        kernel,
        out_shape=(jax.ShapeDtypeStruct((B, Cout, HW0), jnp.float32),
                   jax.ShapeDtypeStruct((B, Cout, HW1), jnp.float32)),
        grid_spec=pltpu.PrefetchScalarGridSpec(
            num_scalar_prefetch=0,
            grid=(B,),
            in_specs=in_specs,
            out_specs=out_specs,
            scratch_shapes=scratch_shapes,
        ),
        compiler_params=pltpu.CompilerParams(
            dimension_semantics=("parallel",)),   # size-B parallel axis (v7x: 2 TCs)
    )(x0f, x1f,
      p0["w1"], p0["w2"], p0["w_sa_flat"], p0["w_im2col"], p0["bias_col"],
      p1["w1"], p1["w2"], p1["w_sa_flat"], p1["w_im2col"], p1["bias_col"],
      kron)
    return [out0.reshape(B, Cout, H0, W0), out1.reshape(B, Cout, H1, W1)]


# --------------------------------------------------------------------------
# Parameter initialization (synthetic, deterministic; shapes from __init__),
# with inference BatchNorm folded into the conv weight / bias on the host.
# --------------------------------------------------------------------------
def init_branch_params(key, c_in, c_out):
    ks = jax.random.split(key, 7)
    cr = max(c_in // 16, 1)
    # ChannelAttention 1x1 convs (no bias), PyTorch (out, in) orientation.
    w1 = 0.2 * jax.random.normal(ks[0], (cr, c_in), jnp.float32)
    w2 = 0.2 * jax.random.normal(ks[1], (c_in, cr), jnp.float32)
    # SpatialAttention 7x7 conv weight (1, 2, 7, 7) -> (2, 7, 7).
    w_sa = 0.1 * jax.random.normal(ks[2], (2, 7, 7), jnp.float32)
    # Block conv3x3 weight (Cout, Cin, 3, 3), no bias.
    w_conv = jax.random.normal(ks[3], (c_out, c_in, 3, 3), jnp.float32) / np.sqrt(9 * c_in)
    # BatchNorm (inference) folded: y = conv(x) * scale + bias.
    gamma = 1.0 + 0.1 * jax.random.normal(ks[4], (c_out,), jnp.float32)
    beta = 0.1 * jax.random.normal(ks[5], (c_out,), jnp.float32)
    rmean = 0.05 * jax.random.normal(ks[6], (c_out,), jnp.float32)
    rvar = jnp.ones((c_out,), jnp.float32)
    scale = gamma / jnp.sqrt(rvar + 1e-5)
    bias = beta - rmean * scale
    w_scaled = w_conv * scale[:, None, None, None]
    # im2col layout: w_im2col[o, (kh*3+kw)*Cin + i] = w_scaled[o, i, kh, kw]
    w_im2col = jnp.transpose(w_scaled, (0, 2, 3, 1)).reshape(c_out, 9 * c_in)
    return {
        "w1": w1, "w2": w2,
        "w_sa": w_sa,                                  # reference (f32)
        "w_sa_flat": w_sa.reshape(-1),                 # kernel, (98,) f32 in SMEM
        "w_conv_scaled": w_scaled,                     # reference (f32, BN folded)
        "w_im2col": w_im2col.astype(_MXU_DTYPE),       # kernel, (Cout, 9*Cin)
        "bias": bias,                                  # reference (Cout,)
        "bias_col": bias.reshape(c_out, 1),            # kernel (Cout, 1)
    }


# --------------------------------------------------------------------------
# Pure-JAX f32 reference of the same forward pass (validation only).
# --------------------------------------------------------------------------
def fuse_module_reference(xs_nchw, params):
    def branch(x, p):
        avg = jnp.mean(x, axis=(2, 3))
        mxv = jnp.max(x, axis=(2, 3))

        def fc(v):
            return jnp.maximum(v @ p["w1"].T, 0.0) @ p["w2"].T

        ca = jax.nn.sigmoid(fc(avg) + fc(mxv))
        x1 = x * ca[:, :, None, None]
        m = jnp.mean(x1, axis=1, keepdims=True)
        mx = jnp.max(x1, axis=1, keepdims=True)
        s = jnp.concatenate([m, mx], axis=1)
        logit = jax.lax.conv_general_dilated(
            s, p["w_sa"][None], (1, 1), ((3, 3), (3, 3)),
            dimension_numbers=("NCHW", "OIHW", "NCHW"))
        x2 = x1 * jax.nn.sigmoid(logit)
        y = jax.lax.conv_general_dilated(
            x2, p["w_conv_scaled"], (1, 1), ((1, 1), (1, 1)),
            dimension_numbers=("NCHW", "OIHW", "NCHW"))
        return jnp.maximum(y + p["bias"][None, :, None, None], 0.0)

    y0 = branch(xs_nchw[0], params[0])
    y1 = branch(xs_nchw[1], params[1])
    H0, W0 = xs_nchw[0].shape[2:]
    H1, W1 = xs_nchw[1].shape[2:]
    if (H1, W1) != (H0, W0):
        Ah = jnp.asarray(_interp_matrix(H0, H1))
        Aw = jnp.asarray(_interp_matrix(W0, W1))
        up = jnp.einsum("ai,bj,ncij->ncab", Ah, Aw, y1)
    else:
        up = y1
    return [y0 + up, y1]


if __name__ == "__main__":
    key = jax.random.PRNGKey(0)
    B = 2
    level_num = 2
    input_channels = [32, 32]   # >=16 so ChannelAttention's C//16 reduction is valid
    base_channel = 32
    spatial = [16, 8]

    k_in, k_par = jax.random.split(key)
    kins = jax.random.split(k_in, level_num)
    kpars = jax.random.split(k_par, level_num)

    xs = [
        jax.random.normal(kins[i],
                          (B, input_channels[i], spatial[i], spatial[i]),
                          jnp.float32)
        for i in range(level_num)
    ]
    params = [
        init_branch_params(kpars[i], input_channels[i], base_channel)
        for i in range(level_num)
    ]

    outs = fuse_module_forward(xs, params, fuse="add")
    outs = [jax.block_until_ready(o) for o in outs]

    assert outs[0].shape == (B, base_channel, spatial[0], spatial[0])
    assert outs[1].shape == (B, base_channel, spatial[1], spatial[1])

    # Pure-JAX f32 reference check (bf16 MXU path => tolerance ~1e-2 scale).
    refs = fuse_module_reference(xs, params)
    for got, ref in zip(outs, refs):
        assert bool(jnp.all(jnp.isfinite(got)))
        scale = float(jnp.max(jnp.abs(ref))) + 1e-6
        err = float(jnp.max(jnp.abs(got - ref)))
        assert err <= 5e-2 * scale + 5e-3, (err, scale)

    print("KERNEL_OK")
</pallas_src>

<mosaic_0001>
module attributes {stable_mosaic.version = 11 : i64} {
  func.func @kernel(%arg0: i32, %arg1: memref<1x32x256xf32, #tpu.memory_space<vmem>>, %arg2: memref<1x32x64xf32, #tpu.memory_space<vmem>>, %arg3: memref<2x32xf32, #tpu.memory_space<vmem>>, %arg4: memref<32x2xf32, #tpu.memory_space<vmem>>, %arg5: memref<98xf32, #tpu.memory_space<smem>>, %arg6: memref<32x288xbf16, #tpu.memory_space<vmem>>, %arg7: memref<32x1xf32, #tpu.memory_space<vmem>>, %arg8: memref<2x32xf32, #tpu.memory_space<vmem>>, %arg9: memref<32x2xf32, #tpu.memory_space<vmem>>, %arg10: memref<98xf32, #tpu.memory_space<smem>>, %arg11: memref<32x288xbf16, #tpu.memory_space<vmem>>, %arg12: memref<32x1xf32, #tpu.memory_space<vmem>>, %arg13: memref<64x256xbf16, #tpu.memory_space<vmem>>, %arg14: memref<1x32x256xf32, #tpu.memory_space<vmem>>, %arg15: memref<1x32x64xf32, #tpu.memory_space<vmem>>, %arg16: memref<32x290xf32, #tpu.memory_space<vmem>>, %arg17: memref<2x358xf32, #tpu.memory_space<vmem>>, %arg18: memref<288x256xbf16, #tpu.memory_space<vmem>>, %arg19: memref<32x82xf32, #tpu.memory_space<vmem>>, %arg20: memref<2x118xf32, #tpu.memory_space<vmem>>, %arg21: memref<288x64xbf16, #tpu.memory_space<vmem>>) attributes {dimension_semantics = [#tpu.dimension_semantics<parallel>], iteration_bounds = array<i64: 2>, scalar_prefetch = 0 : i64, scratch_operands = 6 : i64, tpu.core_type = #tpu.core_type<tc>, window_params = [{transform_indices = @transform_0, window_bounds = array<i64: 1, 32, 256>}, {transform_indices = @transform_1, window_bounds = array<i64: 1, 32, 64>}, {pipeline_mode = #tpu.pipeline_mode<synchronous>, transform_indices = @transform_2, window_bounds = array<i64: 2, 32>}, {pipeline_mode = #tpu.pipeline_mode<synchronous>, transform_indices = @transform_3, window_bounds = array<i64: 32, 2>}, {transform_indices = @transform_4, window_bounds = array<i64: 98>}, {pipeline_mode = #tpu.pipeline_mode<synchronous>, transform_indices = @transform_5, window_bounds = array<i64: 32, 288>}, {pipeline_mode = #tpu.pipeline_mode<synchronous>, transform_indices = @transform_6, window_bounds = array<i64: 32, 1>}, {pipeline_mode = #tpu.pipeline_mode<synchronous>, transform_indices = @transform_7, window_bounds = array<i64: 2, 32>}, {pipeline_mode = #tpu.pipeline_mode<synchronous>, transform_indices = @transform_8, window_bounds = array<i64: 32, 2>}, {transform_indices = @transform_9, window_bounds = array<i64: 98>}, {pipeline_mode = #tpu.pipeline_mode<synchronous>, transform_indices = @transform_10, window_bounds = array<i64: 32, 288>}, {pipeline_mode = #tpu.pipeline_mode<synchronous>, transform_indices = @transform_11, window_bounds = array<i64: 32, 1>}, {pipeline_mode = #tpu.pipeline_mode<synchronous>, transform_indices = @transform_12, window_bounds = array<i64: 64, 256>}, {transform_indices = @transform_13, window_bounds = array<i64: 1, 32, 256>}, {transform_indices = @transform_14, window_bounds = array<i64: 1, 32, 64>}]} {
    %c0 = arith.constant 0 : index
    %c0_0 = arith.constant 0 : index
    %c0_1 = arith.constant 0 : index
    %0 = vector.load %arg2[%c0, %c0_0, %c0_1] : memref<1x32x64xf32, #tpu.memory_space<vmem>>, vector<1x32x64xf32>
    %1 = vector.shape_cast %0 : vector<1x32x64xf32> to vector<32x64xf32>
    %c0_2 = arith.constant 0 : index
    %c0_3 = arith.constant 0 : index
    %2 = vector.load %arg8[%c0_2, %c0_3] : memref<2x32xf32, #tpu.memory_space<vmem>>, vector<2x32xf32>
    %c0_4 = arith.constant 0 : index
    %c0_5 = arith.constant 0 : index
    %3 = vector.load %arg9[%c0_4, %c0_5] : memref<32x2xf32, #tpu.memory_space<vmem>>, vector<32x2xf32>
    %c0_6 = arith.constant 0 : index
    %c0_7 = arith.constant 0 : index
    %4 = vector.load %arg11[%c0_6, %c0_7] : memref<32x288xbf16, #tpu.memory_space<vmem>>, vector<32x288xbf16>
    %c0_8 = arith.constant 0 : index
    %c0_9 = arith.constant 0 : index
    %5 = vector.load %arg12[%c0_8, %c0_9] : memref<32x1xf32, #tpu.memory_space<vmem>>, vector<32x1xf32>
    %cst = arith.constant dense<0.000000e+00> : vector<32xf32>
    %6 = vector.multi_reduction <add>, %1, %cst [1] : vector<32x64xf32> to vector<32xf32>
    %7 = vector.shape_cast %6 : vector<32xf32> to vector<32x1xf32>
    %cst_10 = arith.constant 6.400000e+01 : f32
    %8 = vector.broadcast %cst_10 : f32 to vector<32x1xf32>
    %9 = arith.divf %7, %8 : vector<32x1xf32>
    %cst_11 = arith.constant dense<0xFF800000> : vector<32xf32>
    %10 = vector.multi_reduction <maximumf>, %1, %cst_11 [1] : vector<32x64xf32> to vector<32xf32>
    %11 = vector.shape_cast %10 : vector<32xf32> to vector<32x1xf32>
    %cst_12 = arith.constant dense<0.000000e+00> : vector<2x1xf32>
    %12 = tpu.matmul %2, %9, %cst_12 {dimension_numbers = #tpu.dot_dimension_numbers<[1], [0], [0], [1], [0, 0, 1, 1], [], []>} : vector<2x32xf32>, vector<32x1xf32>, vector<2x1xf32> -> vector<2x1xf32>
    %cst_13 = arith.constant 0.000000e+00 : f32
    %13 = vector.broadcast %cst_13 : f32 to vector<2x1xf32>
    %14 = arith.maximumf %12, %13 : vector<2x1xf32>
    %cst_14 = arith.constant dense<0.000000e+00> : vector<32x1xf32>
    %15 = tpu.matmul %3, %14, %cst_14 {dimension_numbers = #tpu.dot_dimension_numbers<[1], [0], [0], [1], [0, 0, 1, 1], [], []>} : vector<32x2xf32>, vector<2x1xf32>, vector<32x1xf32> -> vector<32x1xf32>
    %cst_15 = arith.constant dense<0.000000e+00> : vector<2x1xf32>
    %16 = tpu.matmul %2, %11, %cst_15 {dimension_numbers = #tpu.dot_dimension_numbers<[1], [0], [0], [1], [0, 0, 1, 1], [], []>} : vector<2x32xf32>, vector<32x1xf32>, vector<2x1xf32> -> vector<2x1xf32>
    %cst_16 = arith.constant 0.000000e+00 : f32
    %17 = vector.broadcast %cst_16 : f32 to vector<2x1xf32>
    %18 = arith.maximumf %16, %17 : vector<2x1xf32>
    %cst_17 = arith.constant dense<0.000000e+00> : vector<32x1xf32>
    %19 = tpu.matmul %3, %18, %cst_17 {dimension_numbers = #tpu.dot_dimension_numbers<[1], [0], [0], [1], [0, 0, 1, 1], [], []>} : vector<32x2xf32>, vector<2x1xf32>, vector<32x1xf32> -> vector<32x1xf32>
    %20 = arith.addf %15, %19 : vector<32x1xf32>
    %21 = arith.negf %20 : vector<32x1xf32>
    %22 = math.exp %21 : vector<32x1xf32>
    %cst_18 = arith.constant 1.000000e+00 : f32
    %23 = vector.broadcast %cst_18 : f32 to vector<32x1xf32>
    %24 = arith.addf %23, %22 : vector<32x1xf32>
    %25 = arith.divf %23, %24 : vector<32x1xf32>
    %26 = vector.broadcast %25 : vector<32x1xf32> to vector<32x64xf32>
    %27 = arith.mulf %1, %26 : vector<32x64xf32>
    %28 = tpu.iota {dimensions = array<i32: 1>} : vector<1x64xi32>
    %c8_i32 = arith.constant 8 : i32
    %c0_i32 = arith.constant 0 : i32
    %29 = arith.cmpi eq, %c8_i32, %c0_i32 : i32
    %c1_i32 = arith.constant 1 : i32
    %30 = arith.select %29, %c1_i32, %c8_i32 : i32
    %31 = vector.broadcast %30 : i32 to vector<1x64xi32>
    %32 = arith.remsi %28, %31 : vector<1x64xi32>
    %c0_i32_19 = arith.constant 0 : i32
    %33 = vector.broadcast %c0_i32_19 : i32 to vector<1x64xi32>
    %34 = arith.cmpi ne, %32, %33 : vector<1x64xi32>
    %c0_i32_20 = arith.constant 0 : i32
    %35 = vector.broadcast %c0_i32_20 : i32 to vector<1x64xi32>
    %36 = arith.cmpi slt, %32, %35 : vector<1x64xi32>
    %c0_i32_21 = arith.constant 0 : i32
    %37 = arith.cmpi slt, %30, %c0_i32_21 : i32
    %38 = vector.broadcast %37 : i1 to vector<1x64xi1>
    %39 = vector.broadcast %38 : vector<1x64xi1> to vector<1x64xi1>
    %40 = arith.xori %36, %39 : vector<1x64xi1>
    %41 = arith.andi %40, %34 : vector<1x64xi1>
    %42 = vector.broadcast %30 : i32 to vector<1x64xi32>
    %43 = arith.addi %32, %42 : vector<1x64xi32>
    %44 = arith.select %41, %43, %32 : vector<1x64xi1>, vector<1x64xi32>
    %c-3_i32 = arith.constant -3 : i32
    %45 = vector.broadcast %c-3_i32 : i32 to vector<1x64xi32>
    %46 = arith.addi %44, %45 : vector<1x64xi32>
    %c0_i32_22 = arith.constant 0 : i32
    %47 = vector.broadcast %c0_i32_22 : i32 to vector<1x64xi32>
    %48 = arith.cmpi sge, %46, %47 : vector<1x64xi32>
    %c-3_i32_23 = arith.constant -3 : i32
    %49 = vector.broadcast %c-3_i32_23 : i32 to vector<1x64xi32>
    %50 = arith.addi %44, %49 : vector<1x64xi32>
    %c8_i32_24 = arith.constant 8 : i32
    %51 = vector.broadcast %c8_i32_24 : i32 to vector<1x64xi32>
    %52 = arith.cmpi slt, %50, %51 : vector<1x64xi32>
    %53 = arith.andi %48, %52 : vector<1x64xi1>
    %54 = arith.extui %53 : vector<1x64xi1> to vector<1x64xi32>
    %55 = arith.sitofp %54 : vector<1x64xi32> to vector<1x64xf32>
    %c-2_i32 = arith.constant -2 : i32
    %56 = vector.broadcast %c-2_i32 : i32 to vector<1x64xi32>
    %57 = arith.addi %44, %56 : vector<1x64xi32>
    %c0_i32_25 = arith.constant 0 : i32
    %58 = vector.broadcast %c0_i32_25 : i32 to vector<1x64xi32>
    %59 = arith.cmpi sge, %57, %58 : vector<1x64xi32>
    %c-2_i32_26 = arith.constant -2 : i32
    %60 = vector.broadcast %c-2_i32_26 : i32 to vector<1x64xi32>
    %61 = arith.addi %44, %60 : vector<1x64xi32>
    %c8_i32_27 = arith.constant 8 : i32
    %62 = vector.broadcast %c8_i32_27 : i32 to vector<1x64xi32>
    %63 = arith.cmpi slt, %61, %62 : vector<1x64xi32>
    %64 = arith.andi %59, %63 : vector<1x64xi1>
    %65 = arith.extui %64 : vector<1x64xi1> to vector<1x64xi32>
    %66 = arith.sitofp %65 : vector<1x64xi32> to vector<1x64xf32>
    %c-1_i32 = arith.constant -1 : i32
    %67 = vector.broadcast %c-1_i32 : i32 to vector<1x64xi32>
    %68 = arith.addi %44, %67 : vector<1x64xi32>
    %c0_i32_28 = arith.constant 0 : i32
    %69 = vector.broadcast %c0_i32_28 : i32 to vector<1x64xi32>
    %70 = arith.cmpi sge, %68, %69 : vector<1x64xi32>
    %c-1_i32_29 = arith.constant -1 : i32
    %71 = vector.broadcast %c-1_i32_29 : i32 to vector<1x64xi32>
    %72 = arith.addi %44, %71 : vector<1x64xi32>
    %c8_i32_30 = arith.constant 8 : i32
    %73 = vector.broadcast %c8_i32_30 : i32 to vector<1x64xi32>
    %74 = arith.cmpi slt, %72, %73 : vector<1x64xi32>
    %75 = arith.andi %70, %74 : vector<1x64xi1>
    %76 = arith.extui %75 : vector<1x64xi1> to vector<1x64xi32>
    %77 = arith.sitofp %76 : vector<1x64xi32> to vector<1x64xf32>
    %c1_i32_31 = arith.constant 1 : i32
    %78 = vector.broadcast %c1_i32_31 : i32 to vector<1x64xi32>
    %79 = arith.addi %44, %78 : vector<1x64xi32>
    %c0_i32_32 = arith.constant 0 : i32
    %80 = vector.broadcast %c0_i32_32 : i32 to vector<1x64xi32>
    %81 = arith.cmpi sge, %79, %80 : vector<1x64xi32>
    %c1_i32_33 = arith.constant 1 : i32
    %82 = vector.broadcast %c1_i32_33 : i32 to vector<1x64xi32>
    %83 = arith.addi %44, %82 : vector<1x64xi32>
    %c8_i32_34 = arith.constant 8 : i32
    %84 = vector.broadcast %c8_i32_34 : i32 to vector<1x64xi32>
    %85 = arith.cmpi slt, %83, %84 : vector<1x64xi32>
    %86 = arith.andi %81, %85 : vector<1x64xi1>
    %87 = arith.extui %86 : vector<1x64xi1> to vector<1x64xi32>
    %88 = arith.sitofp %87 : vector<1x64xi32> to vector<1x64xf32>
    %c2_i32 = arith.constant 2 : i32
    %89 = vector.broadcast %c2_i32 : i32 to vector<1x64xi32>
    %90 = arith.addi %44, %89 : vector<1x64xi32>
    %c0_i32_35 = arith.constant 0 : i32
    %91 = vector.broadcast %c0_i32_35 : i32 to vector<1x64xi32>
    %92 = arith.cmpi sge, %90, %91 : vector<1x64xi32>
    %c2_i32_36 = arith.constant 2 : i32
    %93 = vector.broadcast %c2_i32_36 : i32 to vector<1x64xi32>
    %94 = arith.addi %44, %93 : vector<1x64xi32>
    %c8_i32_37 = arith.constant 8 : i32
    %95 = vector.broadcast %c8_i32_37 : i32 to vector<1x64xi32>
    %96 = arith.cmpi slt, %94, %95 : vector<1x64xi32>
    %97 = arith.andi %92, %96 : vector<1x64xi1>
    %98 = arith.extui %97 : vector<1x64xi1> to vector<1x64xi32>
    %99 = arith.sitofp %98 : vector<1x64xi32> to vector<1x64xf32>
    %c3_i32 = arith.constant 3 : i32
    %100 = vector.broadcast %c3_i32 : i32 to vector<1x64xi32>
    %101 = arith.addi %44, %100 : vector<1x64xi32>
    %c0_i32_38 = arith.constant 0 : i32
    %102 = vector.broadcast %c0_i32_38 : i32 to vector<1x64xi32>
    %103 = arith.cmpi sge, %101, %102 : vector<1x64xi32>
    %c3_i32_39 = arith.constant 3 : i32
    %104 = vector.broadcast %c3_i32_39 : i32 to vector<1x64xi32>
    %105 = arith.addi %44, %104 : vector<1x64xi32>
    %c8_i32_40 = arith.constant 8 : i32
    %106 = vector.broadcast %c8_i32_40 : i32 to vector<1x64xi32>
    %107 = arith.cmpi slt, %105, %106 : vector<1x64xi32>
    %108 = arith.andi %103, %107 : vector<1x64xi1>
    %109 = arith.extui %108 : vector<1x64xi1> to vector<1x64xi32>
    %110 = arith.sitofp %109 : vector<1x64xi32> to vector<1x64xf32>
    %cst_41 = arith.constant dense<0.000000e+00> : vector<64xf32>
    %111 = vector.multi_reduction <add>, %27, %cst_41 [0] : vector<32x64xf32> to vector<64xf32>
    %112 = vector.shape_cast %111 : vector<64xf32> to vector<1x64xf32>
    %cst_42 = arith.constant 3.200000e+01 : f32
    %113 = vector.broadcast %cst_42 : f32 to vector<1x64xf32>
    %114 = arith.divf %112, %113 : vector<1x64xf32>
    %cst_43 = arith.constant dense<0xFF800000> : vector<64xf32>
    %115 = vector.multi_reduction <maximumf>, %27, %cst_43 [0] : vector<32x64xf32> to vector<64xf32>
    %116 = vector.shape_cast %115 : vector<64xf32> to vector<1x64xf32>
    %cst_44 = arith.constant 0.000000e+00 : f32
    %117 = vector.broadcast %cst_44 : f32 to vector<2x27xf32>
    %c0_45 = arith.constant 0 : index
    %c0_46 = arith.constant 0 : index
    %118 = vector.load %arg20[%c0_45, %c0_46] : memref<2x118xf32, #tpu.memory_space<vmem>>, vector<2x27xf32>
    tpu.vector_store %arg20[%c0_45, %c0_46], %117 {strides = array<i32>} : memref<2x118xf32, #tpu.memory_space<vmem>>, vector<2x27xf32>,
    %cst_47 = arith.constant 0.000000e+00 : f32
    %119 = vector.broadcast %cst_47 : f32 to vector<2x27xf32>
    %c0_48 = arith.constant 0 : index
    %c91 = arith.constant 91 : index
    %120 = vector.load %arg20[%c0_48, %c91] : memref<2x118xf32, #tpu.memory_space<vmem>>, vector<2x27xf32>
    tpu.vector_store %arg20[%c0_48, %c91], %119 {strides = array<i32>} : memref<2x118xf32, #tpu.memory_space<vmem>>, vector<2x27xf32>,
    %c0_49 = arith.constant 0 : index
    %c27 = arith.constant 27 : index
    %121 = vector.load %arg20[%c0_49, %c27] : memref<2x118xf32, #tpu.memory_space<vmem>>, vector<1x64xf32>
    tpu.vector_store %arg20[%c0_49, %c27], %114 {strides = array<i32>} : memref<2x118xf32, #tpu.memory_space<vmem>>, vector<1x64xf32>,
    %c1 = arith.constant 1 : index
    %c27_50 = arith.constant 27 : index
    %122 = vector.load %arg20[%c1, %c27_50] : memref<2x118xf32, #tpu.memory_space<vmem>>, vector<1x64xf32>
    tpu.vector_store %arg20[%c1, %c27_50], %116 {strides = array<i32>} : memref<2x118xf32, #tpu.memory_space<vmem>>, vector<1x64xf32>,
    %cst_51 = arith.constant 0.000000e+00 : f32
    %123 = vector.broadcast %cst_51 : f32 to vector<1x64xf32>
    %c0_52 = arith.constant 0 : index
    %c0_53 = arith.constant 0 : index
    %124 = vector.load %arg20[%c0_52, %c0_53] : memref<2x118xf32, #tpu.memory_space<vmem>>, vector<1x64xf32>
    %c1_54 = arith.constant 1 : index
    %c0_55 = arith.constant 0 : index
    %125 = vector.load %arg20[%c1_54, %c0_55] : memref<2x118xf32, #tpu.memory_space<vmem>>, vector<1x64xf32>
    %c0_56 = arith.constant 0 : index
    %126 = memref.load %arg10[%c0_56] : memref<98xf32, #tpu.memory_space<smem>>
    %127 = vector.broadcast %126 : f32 to vector<1x64xf32>
    %128 = arith.mulf %127, %124 : vector<1x64xf32>
    %c49 = arith.constant 49 : index
    %129 = memref.load %arg10[%c49] : memref<98xf32, #tpu.memory_space<smem>>
    %130 = vector.broadcast %129 : f32 to vector<1x64xf32>
    %131 = arith.mulf %130, %125 : vector<1x64xf32>
    %132 = arith.addf %128, %131 : vector<1x64xf32>
    %133 = arith.mulf %132, %55 : vector<1x64xf32>
    %134 = arith.addf %123, %133 : vector<1x64xf32>
    %c0_57 = arith.constant 0 : index
    %c1_58 = arith.constant 1 : index
    %135 = vector.load %arg20[%c0_57, %c1_58] : memref<2x118xf32, #tpu.memory_space<vmem>>, vector<1x64xf32>
    %c1_59 = arith.constant 1 : index
    %c1_60 = arith.constant 1 : index
    %136 = vector.load %arg20[%c1_59, %c1_60] : memref<2x118xf32, #tpu.memory_space<vmem>>, vector<1x64xf32>
    %c1_61 = arith.constant 1 : index
    %137 = memref.load %arg10[%c1_61] : memref<98xf32, #tpu.memory_space<smem>>
    %138 = vector.broadcast %137 : f32 to vector<1x64xf32>
    %139 = arith.mulf %138, %135 : vector<1x64xf32>
    %c50 = arith.constant 50 : index
    %140 = memref.load %arg10[%c50] : memref<98xf32, #tpu.memory_space<smem>>
    %141 = vector.broadcast %140 : f32 to vector<1x64xf32>
    %142 = arith.mulf %141, %136 : vector<1x64xf32>
    %143 = arith.addf %139, %142 : vector<1x64xf32>
    %144 = arith.mulf %143, %66 : vector<1x64xf32>
    %145 = arith.addf %134, %144 : vector<1x64xf32>
    %c0_62 = arith.constant 0 : index
    %c2 = arith.constant 2 : index
    %146 = vector.load %arg20[%c0_62, %c2] : memref<2x118xf32, #tpu.memory_space<vmem>>, vector<1x64xf32>
    %c1_63 = arith.constant 1 : index
    %c2_64 = arith.constant 2 : index
    %147 = vector.load %arg20[%c1_63, %c2_64] : memref<2x118xf32, #tpu.memory_space<vmem>>, vector<1x64xf32>
    %c2_65 = arith.constant 2 : index
    %148 = memref.load %arg10[%c2_65] : memref<98xf32, #tpu.memory_space<smem>>
    %149 = vector.broadcast %148 : f32 to vector<1x64xf32>
    %150 = arith.mulf %149, %146 : vector<1x64xf32>
    %c51 = arith.constant 51 : index
    %151 = memref.load %arg10[%c51] : memref<98xf32, #tpu.memory_space<smem>>
    %152 = vector.broadcast %151 : f32 to vector<1x64xf32>
    %153 = arith.mulf %152, %147 : vector<1x64xf32>
    %154 = arith.addf %150, %153 : vector<1x64xf32>
    %155 = arith.mulf %154, %77 : vector<1x64xf32>
    %156 = arith.addf %145, %155 : vector<1x64xf32>
    %c0_66 = arith.constant 0 : index
    %c3 = arith.constant 3 : index
    %157 = vector.load %arg20[%c0_66, %c3] : memref<2x118xf32, #tpu.memory_space<vmem>>, vector<1x64xf32>
    %c1_67 = arith.constant 1 : index
    %c3_68 = arith.constant 3 : index
    %158 = vector.load %arg20[%c1_67, %c3_68] : memref<2x118xf32, #tpu.memory_space<vmem>>, vector<1x64xf32>
    %c3_69 = arith.constant 3 : index
    %159 = memref.load %arg10[%c3_69] : memref<98xf32, #tpu.memory_space<smem>>
    %160 = vector.broadcast %159 : f32 to vector<1x64xf32>
    %161 = arith.mulf %160, %157 : vector<1x64xf32>
    %c52 = arith.constant 52 : index
    %162 = memref.load %arg10[%c52] : memref<98xf32, #tpu.memory_space<smem>>
    %163 = vector.broadcast %162 : f32 to vector<1x64xf32>
    %164 = arith.mulf %163, %158 : vector<1x64xf32>
    %165 = arith.addf %161, %164 : vector<1x64xf32>
    %166 = arith.addf %156, %165 : vector<1x64xf32>
    %c0_70 = arith.constant 0 : index
    %c4 = arith.constant 4 : index
    %167 = vector.load %arg20[%c0_70, %c4] : memref<2x118xf32, #tpu.memory_space<vmem>>, vector<1x64xf32>
    %c1_71 = arith.constant 1 : index
    %c4_72 = arith.constant 4 : index
    %168 = vector.load %arg20[%c1_71, %c4_72] : memref<2x118xf32, #tpu.memory_space<vmem>>, vector<1x64xf32>
    %c4_73 = arith.constant 4 : index
    %169 = memref.load %arg10[%c4_73] : memref<98xf32, #tpu.memory_space<smem>>
    %170 = vector.broadcast %169 : f32 to vector<1x64xf32>
    %171 = arith.mulf %170, %167 : vector<1x64xf32>
    %c53 = arith.constant 53 : index
    %172 = memref.load %arg10[%c53] : memref<98xf32, #tpu.memory_space<smem>>
    %173 = vector.broadcast %172 : f32 to vector<1x64xf32>
    %174 = arith.mulf %173, %168 : vector<1x64xf32>
    %175 = arith.addf %171, %174 : vector<1x64xf32>
    %176 = arith.mulf %175, %88 : vector<1x64xf32>
    %177 = arith.addf %166, %176 : vector<1x64xf32>
    %c0_74 = arith.constant 0 : index
    %c5 = arith.constant 5 : index
    %178 = vector.load %arg20[%c0_74, %c5] : memref<2x118xf32, #tpu.memory_space<vmem>>, vector<1x64xf32>
    %c1_75 = arith.constant 1 : index
    %c5_76 = arith.constant 5 : index
    %179 = vector.load %arg20[%c1_75, %c5_76] : memref<2x118xf32, #tpu.memory_space<vmem>>, vector<1x64xf32>
    %c5_77 = arith.constant 5 : index
    %180 = memref.load %arg10[%c5_77] : memref<98xf32, #tpu.memory_space<smem>>
    %181 = vector.broadcast %180 : f32 to vector<1x64xf32>
    %182 = arith.mulf %181, %178 : vector<1x64xf32>
    %c54 = arith.constant 54 : index
    %183 = memref.load %arg10[%c54] : memref<98xf32, #tpu.memory_space<smem>>
    %184 = vector.broadcast %183 : f32 to vector<1x64xf32>
    %185 = arith.mulf %184, %179 : vector<1x64xf32>
    %186 = arith.addf %182, %185 : vector<1x64xf32>
    %187 = arith.mulf %186, %99 : vector<1x64xf32>
    %188 = arith.addf %177, %187 : vector<1x64xf32>
    %c0_78 = arith.constant 0 : index
    %c6 = arith.constant 6 : index
    %189 = vector.load %arg20[%c0_78, %c6] : memref<2x118xf32, #tpu.memory_space<vmem>>, vector<1x64xf32>
    %c1_79 = arith.constant 1 : index
    %c6_80 = arith.constant 6 : index
    %190 = vector.load %arg20[%c1_79, %c6_80] : memref<2x118xf32, #tpu.memory_space<vmem>>, vector<1x64xf32>
    %c6_81 = arith.constant 6 : index
    %191 = memref.load %arg10[%c6_81] : memref<98xf32, #tpu.memory_space<smem>>
    %192 = vector.broadcast %191 : f32 to vector<1x64xf32>
    %193 = arith.mulf %192, %189 : vector<1x64xf32>
    %c55 = arith.constant 55 : index
    %194 = memref.load %arg10[%c55] : memref<98xf32, #tpu.memory_space<smem>>
    %195 = vector.broadcast %194 : f32 to vector<1x64xf32>
    %196 = arith.mulf %195, %190 : vector<1x64xf32>
    %197 = arith.addf %193, %196 : vector<1x64xf32>
    %198 = arith.mulf %197, %110 : vector<1x64xf32>
    %199 = arith.addf %188, %198 : vector<1x64xf32>
    %c0_82 = arith.constant 0 : index
    %c8 = arith.constant 8 : index
    %200 = vector.load %arg20[%c0_82, %c8] : memref<2x118xf32, #tpu.memory_space<vmem>>, vector<1x64xf32>
    %c1_83 = arith.constant 1 : index
    %c8_84 = arith.constant 8 : index
    %201 = vector.load %arg20[%c1_83, %c8_84] : memref<2x118xf32, #tpu.memory_space<vmem>>, vector<1x64xf32>
    %c7 = arith.constant 7 : index
    %202 = memref.load %arg10[%c7] : memref<98xf32, #tpu.memory_space<smem>>
    %203 = vector.broadcast %202 : f32 to vector<1x64xf32>
    %204 = arith.mulf %203, %200 : vector<1x64xf32>
    %c56 = arith.constant 56 : index
    %205 = memref.load %arg10[%c56] : memref<98xf32, #tpu.memory_space<smem>>
    %206 = vector.broadcast %205 : f32 to vector<1x64xf32>
    %207 = arith.mulf %206, %201 : vector<1x64xf32>
    %208 = arith.addf %204, %207 : vector<1x64xf32>
    %209 = arith.mulf %208, %55 : vector<1x64xf32>
    %210 = arith.addf %199, %209 : vector<1x64xf32>
    %c0_85 = arith.constant 0 : index
    %c9 = arith.constant 9 : index
    %211 = vector.load %arg20[%c0_85, %c9] : memref<2x118xf32, #tpu.memory_space<vmem>>, vector<1x64xf32>
    %c1_86 = arith.constant 1 : index
    %c9_87 = arith.constant 9 : index
    %212 = vector.load %arg20[%c1_86, %c9_87] : memref<2x118xf32, #tpu.memory_space<vmem>>, vector<1x64xf32>
    %c8_88 = arith.constant 8 : index
    %213 = memref.load %arg10[%c8_88] : memref<98xf32, #tpu.memory_space<smem>>
    %214 = vector.broadcast %213 : f32 to vector<1x64xf32>
    %215 = arith.mulf %214, %211 : vector<1x64xf32>
    %c57 = arith.constant 57 : index
    %216 = memref.load %arg10[%c57] : memref<98xf32, #tpu.memory_space<smem>>
    %217 = vector.broadcast %216 : f32 to vector<1x64xf32>
    %218 = arith.mulf %217, %212 : vector<1x64xf32>
    %219 = arith.addf %215, %218 : vector<1x64xf32>
    %220 = arith.mulf %219, %66 : vector<1x64xf32>
    %221 = arith.addf %210, %220 : vector<1x64xf32>
    %c0_89 = arith.constant 0 : index
    %c10 = arith.constant 10 : index
    %222 = vector.load %arg20[%c0_89, %c10] : memref<2x118xf32, #tpu.memory_space<vmem>>, vector<1x64xf32>
    %c1_90 = arith.constant 1 : index
    %c10_91 = arith.constant 10 : index
    %223 = vector.load %arg20[%c1_90, %c10_91] : memref<2x118xf32, #tpu.memory_space<vmem>>, vector<1x64xf32>
    %c9_92 = arith.constant 9 : index
    %224 = memref.load %arg10[%c9_92] : memref<98xf32, #tpu.memory_space<smem>>
    %225 = vector.broadcast %224 : f32 to vector<1x64xf32>
    %226 = arith.mulf %225, %222 : vector<1x64xf32>
    %c58 = arith.constant 58 : index
    %227 = memref.load %arg10[%c58] : memref<98xf32, #tpu.memory_space<smem>>
    %228 = vector.broadcast %227 : f32 to vector<1x64xf32>
    %229 = arith.mulf %228, %223 : vector<1x64xf32>
    %230 = arith.addf %226, %229 : vector<1x64xf32>
    %231 = arith.mulf %230, %77 : vector<1x64xf32>
    %232 = arith.addf %221, %231 : vector<1x64xf32>
    %c0_93 = arith.constant 0 : index
    %c11 = arith.constant 11 : index
    %233 = vector.load %arg20[%c0_93, %c11] : memref<2x118xf32, #tpu.memory_space<vmem>>, vector<1x64xf32>
    %c1_94 = arith.constant 1 : index
    %c11_95 = arith.constant 11 : index
    %234 = vector.load %arg20[%c1_94, %c11_95] : memref<2x118xf32, #tpu.memory_space<vmem>>, vector<1x64xf32>
    %c10_96 = arith.constant 10 : index
    %235 = memref.load %arg10[%c10_96] : memref<98xf32, #tpu.memory_space<smem>>
    %236 = vector.broadcast %235 : f32 to vector<1x64xf32>
    %237 = arith.mulf %236, %233 : vector<1x64xf32>
    %c59 = arith.constant 59 : index
    %238 = memref.load %arg10[%c59] : memref<98xf32, #tpu.memory_space<smem>>
    %239 = vector.broadcast %238 : f32 to vector<1x64xf32>
    %240 = arith.mulf %239, %234 : vector<1x64xf32>
    %241 = arith.addf %237, %240 : vector<1x64xf32>
    %242 = arith.addf %232, %241 : vector<1x64xf32>
    %c0_97 = arith.constant 0 : index
    %c12 = arith.constant 12 : index
    %243 = vector.load %arg20[%c0_97, %c12] : memref<2x118xf32, #tpu.memory_space<vmem>>, vector<1x64xf32>
    %c1_98 = arith.constant 1 : index
    %c12_99 = arith.constant 12 : index
    %244 = vector.load %arg20[%c1_98, %c12_99] : memref<2x118xf32, #tpu.memory_space<vmem>>, vector<1x64xf32>
    %c11_100 = arith.constant 11 : index
    %245 = memref.load %arg10[%c11_100] : memref<98xf32, #tpu.memory_space<smem>>
    %246 = vector.broadcast %245 : f32 to vector<1x64xf32>
    %247 = arith.mulf %246, %243 : vector<1x64xf32>
    %c60 = arith.constant 60 : index
    %248 = memref.load %arg10[%c60] : memref<98xf32, #tpu.memory_space<smem>>
    %249 = vector.broadcast %248 : f32 to vector<1x64xf32>
    %250 = arith.mulf %249, %244 : vector<1x64xf32>
    %251 = arith.addf %247, %250 : vector<1x64xf32>
    %252 = arith.mulf %251, %88 : vector<1x64xf32>
    %253 = arith.addf %242, %252 : vector<1x64xf32>
    %c0_101 = arith.constant 0 : index
    %c13 = arith.constant 13 : index
    %254 = vector.load %arg20[%c0_101, %c13] : memref<2x118xf32, #tpu.memory_space<vmem>>, vector<1x64xf32>
    %c1_102 = arith.constant 1 : index
    %c13_103 = arith.constant 13 : index
    %255 = vector.load %arg20[%c1_102, %c13_103] : memref<2x118xf32, #tpu.memory_space<vmem>>, vector<1x64xf32>
    %c12_104 = arith.constant 12 : index
    %256 = memref.load %arg10[%c12_104] : memref<98xf32, #tpu.memory_space<smem>>
    %257 = vector.broadcast %256 : f32 to vector<1x64xf32>
    %258 = arith.mulf %257, %254 : vector<1x64xf32>
    %c61 = arith.constant 61 : index
    %259 = memref.load %arg10[%c61] : memref<98xf32, #tpu.memory_space<smem>>
    %260 = vector.broadcast %259 : f32 to vector<1x64xf32>
    %261 = arith.mulf %260, %255 : vector<1x64xf32>
    %262 = arith.addf %258, %261 : vector<1x64xf32>
    %263 = arith.mulf %262, %99 : vector<1x64xf32>
    %264 = arith.addf %253, %263 : vector<1x64xf32>
    %c0_105 = arith.constant 0 : index
    %c14 = arith.constant 14 : index
    %265 = vector.load %arg20[%c0_105, %c14] : memref<2x118xf32, #tpu.memory_space<vmem>>, vector<1x64xf32>
    %c1_106 = arith.constant 1 : index
    %c14_107 = arith.constant 14 : index
    %266 = vector.load %arg20[%c1_106, %c14_107] : memref<2x118xf32, #tpu.memory_space<vmem>>, vector<1x64xf32>
    %c13_108 = arith.constant 13 : index
    %267 = memref.load %arg10[%c13_108] : memref<98xf32, #tpu.memory_space<smem>>
    %268 = vector.broadcast %267 : f32 to vector<1x64xf32>
    %269 = arith.mulf %268, %265 : vector<1x64xf32>
    %c62 = arith.constant 62 : index
    %270 = memref.load %arg10[%c62] : memref<98xf32, #tpu.memory_space<smem>>
    %271 = vector.broadcast %270 : f32 to vector<1x64xf32>
    %272 = arith.mulf %271, %266 : vector<1x64xf32>
    %273 = arith.addf %269, %272 : vector<1x64xf32>
    %274 = arith.mulf %273, %110 : vector<1x64xf32>
    %275 = arith.addf %264, %274 : vector<1x64xf32>
    %c0_109 = arith.constant 0 : index
    %c16 = arith.constant 16 : index
    %276 = vector.load %arg20[%c0_109, %c16] : memref<2x118xf32, #tpu.memory_space<vmem>>, vector<1x64xf32>
    %c1_110 = arith.constant 1 : index
    %c16_111 = arith.constant 16 : index
    %277 = vector.load %arg20[%c1_110, %c16_111] : memref<2x118xf32, #tpu.memory_space<vmem>>, vector<1x64xf32>
    %c14_112 = arith.constant 14 : index
    %278 = memref.load %arg10[%c14_112] : memref<98xf32, #tpu.memory_space<smem>>
    %279 = vector.broadcast %278 : f32 to vector<1x64xf32>
    %280 = arith.mulf %279, %276 : vector<1x64xf32>
    %c63 = arith.constant 63 : index
    %281 = memref.load %arg10[%c63] : memref<98xf32, #tpu.memory_space<smem>>
    %282 = vector.broadcast %281 : f32 to vector<1x64xf32>
    %283 = arith.mulf %282, %277 : vector<1x64xf32>
    %284 = arith.addf %280, %283 : vector<1x64xf32>
    %285 = arith.mulf %284, %55 : vector<1x64xf32>
    %286 = arith.addf %275, %285 : vector<1x64xf32>
    %c0_113 = arith.constant 0 : index
    %c17 = arith.constant 17 : index
    %287 = vector.load %arg20[%c0_113, %c17] : memref<2x118xf32, #tpu.memory_space<vmem>>, vector<1x64xf32>
    %c1_114 = arith.constant 1 : index
    %c17_115 = arith.constant 17 : index
    %288 = vector.load %arg20[%c1_114, %c17_115] : memref<2x118xf32, #tpu.memory_space<vmem>>, vector<1x64xf32>
    %c15 = arith.constant 15 : index
    %289 = memref.load %arg10[%c15] : memref<98xf32, #tpu.memory_space<smem>>
    %290 = vector.broadcast %289 : f32 to vector<1x64xf32>
    %291 = arith.mulf %290, %287 : vector<1x64xf32>
    %c64 = arith.constant 64 : index
    %292 = memref.load %arg10[%c64] : memref<98xf32, #tpu.memory_space<smem>>
    %293 = vector.broadcast %292 : f32 to vector<1x64xf32>
    %294 = arith.mulf %293, %288 : vector<1x64xf32>
    %295 = arith.addf %291, %294 : vector<1x64xf32>
    %296 = arith.mulf %295, %66 : vector<1x64xf32>
    %297 = arith.addf %286, %296 : vector<1x64xf32>
    %c0_116 = arith.constant 0 : index
    %c18 = arith.constant 18 : index
    %298 = vector.load %arg20[%c0_116, %c18] : memref<2x118xf32, #tpu.memory_space<vmem>>, vector<1x64xf32>
    %c1_117 = arith.constant 1 : index
    %c18_118 = arith.constant 18 : index
    %299 = vector.load %arg20[%c1_117, %c18_118] : memref<2x118xf32, #tpu.memory_space<vmem>>, vector<1x64xf32>
    %c16_119 = arith.constant 16 : index
    %300 = memref.load %arg10[%c16_119] : memref<98xf32, #tpu.memory_space<smem>>
    %301 = vector.broadcast %300 : f32 to vector<1x64xf32>
    %302 = arith.mulf %301, %298 : vector<1x64xf32>
    %c65 = arith.constant 65 : index
    %303 = memref.load %arg10[%c65] : memref<98xf32, #tpu.memory_space<smem>>
    %304 = vector.broadcast %303 : f32 to vector<1x64xf32>
    %305 = arith.mulf %304, %299 : vector<1x64xf32>
    %306 = arith.addf %302, %305 : vector<1x64xf32>
    %307 = arith.mulf %306, %77 : vector<1x64xf32>
    %308 = arith.addf %297, %307 : vector<1x64xf32>
    %c0_120 = arith.constant 0 : index
    %c19 = arith.constant 19 : index
    %309 = vector.load %arg20[%c0_120, %c19] : memref<2x118xf32, #tpu.memory_space<vmem>>, vector<1x64xf32>
    %c1_121 = arith.constant 1 : index
    %c19_122 = arith.constant 19 : index
    %310 = vector.load %arg20[%c1_121, %c19_122] : memref<2x118xf32, #tpu.memory_space<vmem>>, vector<1x64xf32>
    %c17_123 = arith.constant 17 : index
    %311 = memref.load %arg10[%c17_123] : memref<98xf32, #tpu.memory_space<smem>>
    %312 = vector.broadcast %311 : f32 to vector<1x64xf32>
    %313 = arith.mulf %312, %309 : vector<1x64xf32>
    %c66 = arith.constant 66 : index
    %314 = memref.load %arg10[%c66] : memref<98xf32, #tpu.memory_space<smem>>
    %315 = vector.broadcast %314 : f32 to vector<1x64xf32>
    %316 = arith.mulf %315, %310 : vector<1x64xf32>
    %317 = arith.addf %313, %316 : vector<1x64xf32>
    %318 = arith.addf %308, %317 : vector<1x64xf32>
    %c0_124 = arith.constant 0 : index
    %c20 = arith.constant 20 : index
    %319 = vector.load %arg20[%c0_124, %c20] : memref<2x118xf32, #tpu.memory_space<vmem>>, vector<1x64xf32>
    %c1_125 = arith.constant 1 : index
    %c20_126 = arith.constant 20 : index
    %320 = vector.load %arg20[%c1_125, %c20_126] : memref<2x118xf32, #tpu.memory_space<vmem>>, vector<1x64xf32>
    %c18_127 = arith.constant 18 : index
    %321 = memref.load %arg10[%c18_127] : memref<98xf32, #tpu.memory_space<smem>>
    %322 = vector.broadcast %321 : f32 to vector<1x64xf32>
    %323 = arith.mulf %322, %319 : vector<1x64xf32>
    %c67 = arith.constant 67 : index
    %324 = memref.load %arg10[%c67] : memref<98xf32, #tpu.memory_space<smem>>
    %325 = vector.broadcast %324 : f32 to vector<1x64xf32>
    %326 = arith.mulf %325, %320 : vector<1x64xf32>
    %327 = arith.addf %323, %326 : vector<1x64xf32>
    %328 = arith.mulf %327, %88 : vector<1x64xf32>
    %329 = arith.addf %318, %328 : vector<1x64xf32>
    %c0_128 = arith.constant 0 : index
    %c21 = arith.constant 21 : index
    %330 = vector.load %arg20[%c0_128, %c21] : memref<2x118xf32, #tpu.memory_space<vmem>>, vector<1x64xf32>
    %c1_129 = arith.constant 1 : index
    %c21_130 = arith.constant 21 : index
    %331 = vector.load %arg20[%c1_129, %c21_130] : memref<2x118xf32, #tpu.memory_space<vmem>>, vector<1x64xf32>
    %c19_131 = arith.constant 19 : index
    %332 = memref.load %arg10[%c19_131] : memref<98xf32, #tpu.memory_space<smem>>
    %333 = vector.broadcast %332 : f32 to vector<1x64xf32>
    %334 = arith.mulf %333, %330 : vector<1x64xf32>
    %c68 = arith.constant 68 : index
    %335 = memref.load %arg10[%c68] : memref<98xf32, #tpu.memory_space<smem>>
    %336 = vector.broadcast %335 : f32 to vector<1x64xf32>
    %337 = arith.mulf %336, %331 : vector<1x64xf32>
    %338 = arith.addf %334, %337 : vector<1x64xf32>
    %339 = arith.mulf %338, %99 : vector<1x64xf32>
    %340 = arith.addf %329, %339 : vector<1x64xf32>
    %c0_132 = arith.constant 0 : index
    %c22 = arith.constant 22 : index
    %341 = vector.load %arg20[%c0_132, %c22] : memref<2x118xf32, #tpu.memory_space<vmem>>, vector<1x64xf32>
    %c1_133 = arith.constant 1 : index
    %c22_134 = arith.constant 22 : index
    %342 = vector.load %arg20[%c1_133, %c22_134] : memref<2x118xf32, #tpu.memory_space<vmem>>, vector<1x64xf32>
    %c20_135 = arith.constant 20 : index
    %343 = memref.load %arg10[%c20_135] : memref<98xf32, #tpu.memory_space<smem>>
    %344 = vector.broadcast %343 : f32 to vector<1x64xf32>
    %345 = arith.mulf %344, %341 : vector<1x64xf32>
    %c69 = arith.constant 69 : index
    %346 = memref.load %arg10[%c69] : memref<98xf32, #tpu.memory_space<smem>>
    %347 = vector.broadcast %346 : f32 to vector<1x64xf32>
    %348 = arith.mulf %347, %342 : vector<1x64xf32>
    %349 = arith.addf %345, %348 : vector<1x64xf32>
    %350 = arith.mulf %349, %110 : vector<1x64xf32>
    %351 = arith.addf %340, %350 : vector<1x64xf32>
    %c0_136 = arith.constant 0 : index
    %c24 = arith.constant 24 : index
    %352 = vector.load %arg20[%c0_136, %c24] : memref<2x118xf32, #tpu.memory_space<vmem>>, vector<1x64xf32>
    %c1_137 = arith.constant 1 : index
    %c24_138 = arith.constant 24 : index
    %353 = vector.load %arg20[%c1_137, %c24_138] : memref<2x118xf32, #tpu.memory_space<vmem>>, vector<1x64xf32>
    %c21_139 = arith.constant 21 : index
    %354 = memref.load %arg10[%c21_139] : memref<98xf32, #tpu.memory_space<smem>>
    %355 = vector.broadcast %354 : f32 to vector<1x64xf32>
    %356 = arith.mulf %355, %352 : vector<1x64xf32>
    %c70 = arith.constant 70 : index
    %357 = memref.load %arg10[%c70] : memref<98xf32, #tpu.memory_space<smem>>
    %358 = vector.broadcast %357 : f32 to vector<1x64xf32>
    %359 = arith.mulf %358, %353 : vector<1x64xf32>
    %360 = arith.addf %356, %359 : vector<1x64xf32>
    %361 = arith.mulf %360, %55 : vector<1x64xf32>
    %362 = arith.addf %351, %361 : vector<1x64xf32>
    %c0_140 = arith.constant 0 : index
    %c25 = arith.constant 25 : index
    %363 = vector.load %arg20[%c0_140, %c25] : memref<2x118xf32, #tpu.memory_space<vmem>>, vector<1x64xf32>
    %c1_141 = arith.constant 1 : index
    %c25_142 = arith.constant 25 : index
    %364 = vector.load %arg20[%c1_141, %c25_142] : memref<2x118xf32, #tpu.memory_space<vmem>>, vector<1x64xf32>
    %c22_143 = arith.constant 22 : index
    %365 = memref.load %arg10[%c22_143] : memref<98xf32, #tpu.memory_space<smem>>
    %366 = vector.broadcast %365 : f32 to vector<1x64xf32>
    %367 = arith.mulf %366, %363 : vector<1x64xf32>
    %c71 = arith.constant 71 : index
    %368 = memref.load %arg10[%c71] : memref<98xf32, #tpu.memory_space<smem>>
    %369 = vector.broadcast %368 : f32 to vector<1x64xf32>
    %370 = arith.mulf %369, %364 : vector<1x64xf32>
    %371 = arith.addf %367, %370 : vector<1x64xf32>
    %372 = arith.mulf %371, %66 : vector<1x64xf32>
    %373 = arith.addf %362, %372 : vector<1x64xf32>
    %c0_144 = arith.constant 0 : index
    %c26 = arith.constant 26 : index
    %374 = vector.load %arg20[%c0_144, %c26] : memref<2x118xf32, #tpu.memory_space<vmem>>, vector<1x64xf32>
    %c1_145 = arith.constant 1 : index
    %c26_146 = arith.constant 26 : index
    %375 = vector.load %arg20[%c1_145, %c26_146] : memref<2x118xf32, #tpu.memory_space<vmem>>, vector<1x64xf32>
    %c23 = arith.constant 23 : index
    %376 = memref.load %arg10[%c23] : memref<98xf32, #tpu.memory_space<smem>>
    %377 = vector.broadcast %376 : f32 to vector<1x64xf32>
    %378 = arith.mulf %377, %374 : vector<1x64xf32>
    %c72 = arith.constant 72 : index
    %379 = memref.load %arg10[%c72] : memref<98xf32, #tpu.memory_space<smem>>
    %380 = vector.broadcast %379 : f32 to vector<1x64xf32>
    %381 = arith.mulf %380, %375 : vector<1x64xf32>
    %382 = arith.addf %378, %381 : vector<1x64xf32>
    %383 = arith.mulf %382, %77 : vector<1x64xf32>
    %384 = arith.addf %373, %383 : vector<1x64xf32>
    %c0_147 = arith.constant 0 : index
    %c27_148 = arith.constant 27 : index
    %385 = vector.load %arg20[%c0_147, %c27_148] : memref<2x118xf32, #tpu.memory_space<vmem>>, vector<1x64xf32>
    %c1_149 = arith.constant 1 : index
    %c27_150 = arith.constant 27 : index
    %386 = vector.load %arg20[%c1_149, %c27_150] : memref<2x118xf32, #tpu.memory_space<vmem>>, vector<1x64xf32>
    %c24_151 = arith.constant 24 : index
    %387 = memref.load %arg10[%c24_151] : memref<98xf32, #tpu.memory_space<smem>>
    %388 = vector.broadcast %387 : f32 to vector<1x64xf32>
    %389 = arith.mulf %388, %385 : vector<1x64xf32>
    %c73 = arith.constant 73 : index
    %390 = memref.load %arg10[%c73] : memref<98xf32, #tpu.memory_space<smem>>
    %391 = vector.broadcast %390 : f32 to vector<1x64xf32>
    %392 = arith.mulf %391, %386 : vector<1x64xf32>
    %393 = arith.addf %389, %392 : vector<1x64xf32>
    %394 = arith.addf %384, %393 : vector<1x64xf32>
    %c0_152 = arith.constant 0 : index
    %c28 = arith.constant 28 : index
    %395 = vector.load %arg20[%c0_152, %c28] : memref<2x118xf32, #tpu.memory_space<vmem>>, vector<1x64xf32>
    %c1_153 = arith.constant 1 : index
    %c28_154 = arith.constant 28 : index
    %396 = vector.load %arg20[%c1_153, %c28_154] : memref<2x118xf32, #tpu.memory_space<vmem>>, vector<1x64xf32>
    %c25_155 = arith.constant 25 : index
    %397 = memref.load %arg10[%c25_155] : memref<98xf32, #tpu.memory_space<smem>>
    %398 = vector.broadcast %397 : f32 to vector<1x64xf32>
    %399 = arith.mulf %398, %395 : vector<1x64xf32>
    %c74 = arith.constant 74 : index
    %400 = memref.load %arg10[%c74] : memref<98xf32, #tpu.memory_space<smem>>
    %401 = vector.broadcast %400 : f32 to vector<1x64xf32>
    %402 = arith.mulf %401, %396 : vector<1x64xf32>
    %403 = arith.addf %399, %402 : vector<1x64xf32>
    %404 = arith.mulf %403, %88 : vector<1x64xf32>
    %405 = arith.addf %394, %404 : vector<1x64xf32>
    %c0_156 = arith.constant 0 : index
    %c29 = arith.constant 29 : index
    %406 = vector.load %arg20[%c0_156, %c29] : memref<2x118xf32, #tpu.memory_space<vmem>>, vector<1x64xf32>
    %c1_157 = arith.constant 1 : index
    %c29_158 = arith.constant 29 : index
    %407 = vector.load %arg20[%c1_157, %c29_158] : memref<2x118xf32, #tpu.memory_space<vmem>>, vector<1x64xf32>
    %c26_159 = arith.constant 26 : index
    %408 = memref.load %arg10[%c26_159] : memref<98xf32, #tpu.memory_space<smem>>
    %409 = vector.broadcast %408 : f32 to vector<1x64xf32>
    %410 = arith.mulf %409, %406 : vector<1x64xf32>
    %c75 = arith.constant 75 : index
    %411 = memref.load %arg10[%c75] : memref<98xf32, #tpu.memory_space<smem>>
    %412 = vector.broadcast %411 : f32 to vector<1x64xf32>
    %413 = arith.mulf %412, %407 : vector<1x64xf32>
    %414 = arith.addf %410, %413 : vector<1x64xf32>
    %415 = arith.mulf %414, %99 : vector<1x64xf32>
    %416 = arith.addf %405, %415 : vector<1x64xf32>
    %c0_160 = arith.constant 0 : index
    %c30 = arith.constant 30 : index
    %417 = vector.load %arg20[%c0_160, %c30] : memref<2x118xf32, #tpu.memory_space<vmem>>, vector<1x64xf32>
    %c1_161 = arith.constant 1 : index
    %c30_162 = arith.constant 30 : index
    %418 = vector.load %arg20[%c1_161, %c30_162] : memref<2x118xf32, #tpu.memory_space<vmem>>, vector<1x64xf32>
    %c27_163 = arith.constant 27 : index
    %419 = memref.load %arg10[%c27_163] : memref<98xf32, #tpu.memory_space<smem>>
    %420 = vector.broadcast %419 : f32 to vector<1x64xf32>
    %421 = arith.mulf %420, %417 : vector<1x64xf32>
    %c76 = arith.constant 76 : index
    %422 = memref.load %arg10[%c76] : memref<98xf32, #tpu.memory_space<smem>>
    %423 = vector.broadcast %422 : f32 to vector<1x64xf32>
    %424 = arith.mulf %423, %418 : vector<1x64xf32>
    %425 = arith.addf %421, %424 : vector<1x64xf32>
    %426 = arith.mulf %425, %110 : vector<1x64xf32>
    %427 = arith.addf %416, %426 : vector<1x64xf32>
    %c0_164 = arith.constant 0 : index
    %c32 = arith.constant 32 : index
    %428 = vector.load %arg20[%c0_164, %c32] : memref<2x118xf32, #tpu.memory_space<vmem>>, vector<1x64xf32>
    %c1_165 = arith.constant 1 : index
    %c32_166 = arith.constant 32 : index
    %429 = vector.load %arg20[%c1_165, %c32_166] : memref<2x118xf32, #tpu.memory_space<vmem>>, vector<1x64xf32>
    %c28_167 = arith.constant 28 : index
    %430 = memref.load %arg10[%c28_167] : memref<98xf32, #tpu.memory_space<smem>>
    %431 = vector.broadcast %430 : f32 to vector<1x64xf32>
    %432 = arith.mulf %431, %428 : vector<1x64xf32>
    %c77 = arith.constant 77 : index
    %433 = memref.load %arg10[%c77] : memref<98xf32, #tpu.memory_space<smem>>
    %434 = vector.broadcast %433 : f32 to vector<1x64xf32>
    %435 = arith.mulf %434, %429 : vector<1x64xf32>
    %436 = arith.addf %432, %435 : vector<1x64xf32>
    %437 = arith.mulf %436, %55 : vector<1x64xf32>
    %438 = arith.addf %427, %437 : vector<1x64xf32>
    %c0_168 = arith.constant 0 : index
    %c33 = arith.constant 33 : index
    %439 = vector.load %arg20[%c0_168, %c33] : memref<2x118xf32, #tpu.memory_space<vmem>>, vector<1x64xf32>
    %c1_169 = arith.constant 1 : index
    %c33_170 = arith.constant 33 : index
    %440 = vector.load %arg20[%c1_169, %c33_170] : memref<2x118xf32, #tpu.memory_space<vmem>>, vector<1x64xf32>
    %c29_171 = arith.constant 29 : index
    %441 = memref.load %arg10[%c29_171] : memref<98xf32, #tpu.memory_space<smem>>
    %442 = vector.broadcast %441 : f32 to vector<1x64xf32>
    %443 = arith.mulf %442, %439 : vector<1x64xf32>
    %c78 = arith.constant 78 : index
    %444 = memref.load %arg10[%c78] : memref<98xf32, #tpu.memory_space<smem>>
    %445 = vector.broadcast %444 : f32 to vector<1x64xf32>
    %446 = arith.mulf %445, %440 : vector<1x64xf32>
    %447 = arith.addf %443, %446 : vector<1x64xf32>
    %448 = arith.mulf %447, %66 : vector<1x64xf32>
    %449 = arith.addf %438, %448 : vector<1x64xf32>
    %c0_172 = arith.constant 0 : index
    %c34 = arith.constant 34 : index
    %450 = vector.load %arg20[%c0_172, %c34] : memref<2x118xf32, #tpu.memory_space<vmem>>, vector<1x64xf32>
    %c1_173 = arith.constant 1 : index
    %c34_174 = arith.constant 34 : index
    %451 = vector.load %arg20[%c1_173, %c34_174] : memref<2x118xf32, #tpu.memory_space<vmem>>, vector<1x64xf32>
    %c30_175 = arith.constant 30 : index
    %452 = memref.load %arg10[%c30_175] : memref<98xf32, #tpu.memory_space<smem>>
    %453 = vector.broadcast %452 : f32 to vector<1x64xf32>
    %454 = arith.mulf %453, %450 : vector<1x64xf32>
    %c79 = arith.constant 79 : index
    %455 = memref.load %arg10[%c79] : memref<98xf32, #tpu.memory_space<smem>>
    %456 = vector.broadcast %455 : f32 to vector<1x64xf32>
    %457 = arith.mulf %456, %451 : vector<1x64xf32>
    %458 = arith.addf %454, %457 : vector<1x64xf32>
    %459 = arith.mulf %458, %77 : vector<1x64xf32>
    %460 = arith.addf %449, %459 : vector<1x64xf32>
    %c0_176 = arith.constant 0 : index
    %c35 = arith.constant 35 : index
    %461 = vector.load %arg20[%c0_176, %c35] : memref<2x118xf32, #tpu.memory_space<vmem>>, vector<1x64xf32>
    %c1_177 = arith.constant 1 : index
    %c35_178 = arith.constant 35 : index
    %462 = vector.load %arg20[%c1_177, %c35_178] : memref<2x118xf32, #tpu.memory_space<vmem>>, vector<1x64xf32>
    %c31 = arith.constant 31 : index
    %463 = memref.load %arg10[%c31] : memref<98xf32, #tpu.memory_space<smem>>
    %464 = vector.broadcast %463 : f32 to vector<1x64xf32>
    %465 = arith.mulf %464, %461 : vector<1x64xf32>
    %c80 = arith.constant 80 : index
    %466 = memref.load %arg10[%c80] : memref<98xf32, #tpu.memory_space<smem>>
    %467 = vector.broadcast %466 : f32 to vector<1x64xf32>
    %468 = arith.mulf %467, %462 : vector<1x64xf32>
    %469 = arith.addf %465, %468 : vector<1x64xf32>
    %470 = arith.addf %460, %469 : vector<1x64xf32>
    %c0_179 = arith.constant 0 : index
    %c36 = arith.constant 36 : index
    %471 = vector.load %arg20[%c0_179, %c36] : memref<2x118xf32, #tpu.memory_space<vmem>>, vector<1x64xf32>
    %c1_180 = arith.constant 1 : index
    %c36_181 = arith.constant 36 : index
    %472 = vector.load %arg20[%c1_180, %c36_181] : memref<2x118xf32, #tpu.memory_space<vmem>>, vector<1x64xf32>
    %c32_182 = arith.constant 32 : index
    %473 = memref.load %arg10[%c32_182] : memref<98xf32, #tpu.memory_space<smem>>
    %474 = vector.broadcast %473 : f32 to vector<1x64xf32>
    %475 = arith.mulf %474, %471 : vector<1x64xf32>
    %c81 = arith.constant 81 : index
    %476 = memref.load %arg10[%c81] : memref<98xf32, #tpu.memory_space<smem>>
    %477 = vector.broadcast %476 : f32 to vector<1x64xf32>
    %478 = arith.mulf %477, %472 : vector<1x64xf32>
    %479 = arith.addf %475, %478 : vector<1x64xf32>
    %480 = arith.mulf %479, %88 : vector<1x64xf32>
    %481 = arith.addf %470, %480 : vector<1x64xf32>
    %c0_183 = arith.constant 0 : index
    %c37 = arith.constant 37 : index
    %482 = vector.load %arg20[%c0_183, %c37] : memref<2x118xf32, #tpu.memory_space<vmem>>, vector<1x64xf32>
    %c1_184 = arith.constant 1 : index
    %c37_185 = arith.constant 37 : index
    %483 = vector.load %arg20[%c1_184, %c37_185] : memref<2x118xf32, #tpu.memory_space<vmem>>, vector<1x64xf32>
    %c33_186 = arith.constant 33 : index
    %484 = memref.load %arg10[%c33_186] : memref<98xf32, #tpu.memory_space<smem>>
    %485 = vector.broadcast %484 : f32 to vector<1x64xf32>
    %486 = arith.mulf %485, %482 : vector<1x64xf32>
    %c82 = arith.constant 82 : index
    %487 = memref.load %arg10[%c82] : memref<98xf32, #tpu.memory_space<smem>>
    %488 = vector.broadcast %487 : f32 to vector<1x64xf32>
    %489 = arith.mulf %488, %483 : vector<1x64xf32>
    %490 = arith.addf %486, %489 : vector<1x64xf32>
    %491 = arith.mulf %490, %99 : vector<1x64xf32>
    %492 = arith.addf %481, %491 : vector<1x64xf32>
    %c0_187 = arith.constant 0 : index
    %c38 = arith.constant 38 : index
    %493 = vector.load %arg20[%c0_187, %c38] : memref<2x118xf32, #tpu.memory_space<vmem>>, vector<1x64xf32>
    %c1_188 = arith.constant 1 : index
    %c38_189 = arith.constant 38 : index
    %494 = vector.load %arg20[%c1_188, %c38_189] : memref<2x118xf32, #tpu.memory_space<vmem>>, vector<1x64xf32>
    %c34_190 = arith.constant 34 : index
    %495 = memref.load %arg10[%c34_190] : memref<98xf32, #tpu.memory_space<smem>>
    %496 = vector.broadcast %495 : f32 to vector<1x64xf32>
    %497 = arith.mulf %496, %493 : vector<1x64xf32>
    %c83 = arith.constant 83 : index
    %498 = memref.load %arg10[%c83] : memref<98xf32, #tpu.memory_space<smem>>
    %499 = vector.broadcast %498 : f32 to vector<1x64xf32>
    %500 = arith.mulf %499, %494 : vector<1x64xf32>
    %501 = arith.addf %497, %500 : vector<1x64xf32>
    %502 = arith.mulf %501, %110 : vector<1x64xf32>
    %503 = arith.addf %492, %502 : vector<1x64xf32>
    %c0_191 = arith.constant 0 : index
    %c40 = arith.constant 40 : index
    %504 = vector.load %arg20[%c0_191, %c40] : memref<2x118xf32, #tpu.memory_space<vmem>>, vector<1x64xf32>
    %c1_192 = arith.constant 1 : index
    %c40_193 = arith.constant 40 : index
    %505 = vector.load %arg20[%c1_192, %c40_193] : memref<2x118xf32, #tpu.memory_space<vmem>>, vector<1x64xf32>
    %c35_194 = arith.constant 35 : index
    %506 = memref.load %arg10[%c35_194] : memref<98xf32, #tpu.memory_space<smem>>
    %507 = vector.broadcast %506 : f32 to vector<1x64xf32>
    %508 = arith.mulf %507, %504 : vector<1x64xf32>
    %c84 = arith.constant 84 : index
    %509 = memref.load %arg10[%c84] : memref<98xf32, #tpu.memory_space<smem>>
    %510 = vector.broadcast %509 : f32 to vector<1x64xf32>
    %511 = arith.mulf %510, %505 : vector<1x64xf32>
    %512 = arith.addf %508, %511 : vector<1x64xf32>
    %513 = arith.mulf %512, %55 : vector<1x64xf32>
    %514 = arith.addf %503, %513 : vector<1x64xf32>
    %c0_195 = arith.constant 0 : index
    %c41 = arith.constant 41 : index
    %515 = vector.load %arg20[%c0_195, %c41] : memref<2x118xf32, #tpu.memory_space<vmem>>, vector<1x64xf32>
    %c1_196 = arith.constant 1 : index
    %c41_197 = arith.constant 41 : index
    %516 = vector.load %arg20[%c1_196, %c41_197] : memref<2x118xf32, #tpu.memory_space<vmem>>, vector<1x64xf32>
    %c36_198 = arith.constant 36 : index
    %517 = memref.load %arg10[%c36_198] : memref<98xf32, #tpu.memory_space<smem>>
    %518 = vector.broadcast %517 : f32 to vector<1x64xf32>
    %519 = arith.mulf %518, %515 : vector<1x64xf32>
    %c85 = arith.constant 85 : index
    %520 = memref.load %arg10[%c85] : memref<98xf32, #tpu.memory_space<smem>>
    %521 = vector.broadcast %520 : f32 to vector<1x64xf32>
    %522 = arith.mulf %521, %516 : vector<1x64xf32>
    %523 = arith.addf %519, %522 : vector<1x64xf32>
    %524 = arith.mulf %523, %66 : vector<1x64xf32>
    %525 = arith.addf %514, %524 : vector<1x64xf32>
    %c0_199 = arith.constant 0 : index
    %c42 = arith.constant 42 : index
    %526 = vector.load %arg20[%c0_199, %c42] : memref<2x118xf32, #tpu.memory_space<vmem>>, vector<1x64xf32>
    %c1_200 = arith.constant 1 : index
    %c42_201 = arith.constant 42 : index
    %527 = vector.load %arg20[%c1_200, %c42_201] : memref<2x118xf32, #tpu.memory_space<vmem>>, vector<1x64xf32>
    %c37_202 = arith.constant 37 : index
    %528 = memref.load %arg10[%c37_202] : memref<98xf32, #tpu.memory_space<smem>>
    %529 = vector.broadcast %528 : f32 to vector<1x64xf32>
    %530 = arith.mulf %529, %526 : vector<1x64xf32>
    %c86 = arith.constant 86 : index
    %531 = memref.load %arg10[%c86] : memref<98xf32, #tpu.memory_space<smem>>
    %532 = vector.broadcast %531 : f32 to vector<1x64xf32>
    %533 = arith.mulf %532, %527 : vector<1x64xf32>
    %534 = arith.addf %530, %533 : vector<1x64xf32>
    %535 = arith.mulf %534, %77 : vector<1x64xf32>
    %536 = arith.addf %525, %535 : vector<1x64xf32>
    %c0_203 = arith.constant 0 : index
    %c43 = arith.constant 43 : index
    %537 = vector.load %arg20[%c0_203, %c43] : memref<2x118xf32, #tpu.memory_space<vmem>>, vector<1x64xf32>
    %c1_204 = arith.constant 1 : index
    %c43_205 = arith.constant 43 : index
    %538 = vector.load %arg20[%c1_204, %c43_205] : memref<2x118xf32, #tpu.memory_space<vmem>>, vector<1x64xf32>
    %c38_206 = arith.constant 38 : index
    %539 = memref.load %arg10[%c38_206] : memref<98xf32, #tpu.memory_space<smem>>
    %540 = vector.broadcast %539 : f32 to vector<1x64xf32>
    %541 = arith.mulf %540, %537 : vector<1x64xf32>
    %c87 = arith.constant 87 : index
    %542 = memref.load %arg10[%c87] : memref<98xf32, #tpu.memory_space<smem>>
    %543 = vector.broadcast %542 : f32 to vector<1x64xf32>
    %544 = arith.mulf %543, %538 : vector<1x64xf32>
    %545 = arith.addf %541, %544 : vector<1x64xf32>
    %546 = arith.addf %536, %545 : vector<1x64xf32>
    %c0_207 = arith.constant 0 : index
    %c44 = arith.constant 44 : index
    %547 = vector.load %arg20[%c0_207, %c44] : memref<2x118xf32, #tpu.memory_space<vmem>>, vector<1x64xf32>
    %c1_208 = arith.constant 1 : index
    %c44_209 = arith.constant 44 : index
    %548 = vector.load %arg20[%c1_208, %c44_209] : memref<2x118xf32, #tpu.memory_space<vmem>>, vector<1x64xf32>
    %c39 = arith.constant 39 : index
    %549 = memref.load %arg10[%c39] : memref<98xf32, #tpu.memory_space<smem>>
    %550 = vector.broadcast %549 : f32 to vector<1x64xf32>
    %551 = arith.mulf %550, %547 : vector<1x64xf32>
    %c88 = arith.constant 88 : index
    %552 = memref.load %arg10[%c88] : memref<98xf32, #tpu.memory_space<smem>>
    %553 = vector.broadcast %552 : f32 to vector<1x64xf32>
    %554 = arith.mulf %553, %548 : vector<1x64xf32>
    %555 = arith.addf %551, %554 : vector<1x64xf32>
    %556 = arith.mulf %555, %88 : vector<1x64xf32>
    %557 = arith.addf %546, %556 : vector<1x64xf32>
    %c0_210 = arith.constant 0 : index
    %c45 = arith.constant 45 : index
    %558 = vector.load %arg20[%c0_210, %c45] : memref<2x118xf32, #tpu.memory_space<vmem>>, vector<1x64xf32>
    %c1_211 = arith.constant 1 : index
    %c45_212 = arith.constant 45 : index
    %559 = vector.load %arg20[%c1_211, %c45_212] : memref<2x118xf32, #tpu.memory_space<vmem>>, vector<1x64xf32>
    %c40_213 = arith.constant 40 : index
    %560 = memref.load %arg10[%c40_213] : memref<98xf32, #tpu.memory_space<smem>>
    %561 = vector.broadcast %560 : f32 to vector<1x64xf32>
    %562 = arith.mulf %561, %558 : vector<1x64xf32>
    %c89 = arith.constant 89 : index
    %563 = memref.load %arg10[%c89] : memref<98xf32, #tpu.memory_space<smem>>
    %564 = vector.broadcast %563 : f32 to vector<1x64xf32>
    %565 = arith.mulf %564, %559 : vector<1x64xf32>
    %566 = arith.addf %562, %565 : vector<1x64xf32>
    %567 = arith.mulf %566, %99 : vector<1x64xf32>
    %568 = arith.addf %557, %567 : vector<1x64xf32>
    %c0_214 = arith.constant 0 : index
    %c46 = arith.constant 46 : index
    %569 = vector.load %arg20[%c0_214, %c46] : memref<2x118xf32, #tpu.memory_space<vmem>>, vector<1x64xf32>
    %c1_215 = arith.constant 1 : index
    %c46_216 = arith.constant 46 : index
    %570 = vector.load %arg20[%c1_215, %c46_216] : memref<2x118xf32, #tpu.memory_space<vmem>>, vector<1x64xf32>
    %c41_217 = arith.constant 41 : index
    %571 = memref.load %arg10[%c41_217] : memref<98xf32, #tpu.memory_space<smem>>
    %572 = vector.broadcast %571 : f32 to vector<1x64xf32>
    %573 = arith.mulf %572, %569 : vector<1x64xf32>
    %c90 = arith.constant 90 : index
    %574 = memref.load %arg10[%c90] : memref<98xf32, #tpu.memory_space<smem>>
    %575 = vector.broadcast %574 : f32 to vector<1x64xf32>
    %576 = arith.mulf %575, %570 : vector<1x64xf32>
    %577 = arith.addf %573, %576 : vector<1x64xf32>
    %578 = arith.mulf %577, %110 : vector<1x64xf32>
    %579 = arith.addf %568, %578 : vector<1x64xf32>
    %c0_218 = arith.constant 0 : index
    %c48 = arith.constant 48 : index
    %580 = vector.load %arg20[%c0_218, %c48] : memref<2x118xf32, #tpu.memory_space<vmem>>, vector<1x64xf32>
    %c1_219 = arith.constant 1 : index
    %c48_220 = arith.constant 48 : index
    %581 = vector.load %arg20[%c1_219, %c48_220] : memref<2x118xf32, #tpu.memory_space<vmem>>, vector<1x64xf32>
    %c42_221 = arith.constant 42 : index
    %582 = memref.load %arg10[%c42_221] : memref<98xf32, #tpu.memory_space<smem>>
    %583 = vector.broadcast %582 : f32 to vector<1x64xf32>
    %584 = arith.mulf %583, %580 : vector<1x64xf32>
    %c91_222 = arith.constant 91 : index
    %585 = memref.load %arg10[%c91_222] : memref<98xf32, #tpu.memory_space<smem>>
    %586 = vector.broadcast %585 : f32 to vector<1x64xf32>
    %587 = arith.mulf %586, %581 : vector<1x64xf32>
    %588 = arith.addf %584, %587 : vector<1x64xf32>
    %589 = arith.mulf %588, %55 : vector<1x64xf32>
    %590 = arith.addf %579, %589 : vector<1x64xf32>
    %c0_223 = arith.constant 0 : index
    %c49_224 = arith.constant 49 : index
    %591 = vector.load %arg20[%c0_223, %c49_224] : memref<2x118xf32, #tpu.memory_space<vmem>>, vector<1x64xf32>
    %c1_225 = arith.constant 1 : index
    %c49_226 = arith.constant 49 : index
    %592 = vector.load %arg20[%c1_225, %c49_226] : memref<2x118xf32, #tpu.memory_space<vmem>>, vector<1x64xf32>
    %c43_227 = arith.constant 43 : index
    %593 = memref.load %arg10[%c43_227] : memref<98xf32, #tpu.memory_space<smem>>
    %594 = vector.broadcast %593 : f32 to vector<1x64xf32>
    %595 = arith.mulf %594, %591 : vector<1x64xf32>
    %c92 = arith.constant 92 : index
    %596 = memref.load %arg10[%c92] : memref<98xf32, #tpu.memory_space<smem>>
    %597 = vector.broadcast %596 : f32 to vector<1x64xf32>
    %598 = arith.mulf %597, %592 : vector<1x64xf32>
    %599 = arith.addf %595, %598 : vector<1x64xf32>
    %600 = arith.mulf %599, %66 : vector<1x64xf32>
    %601 = arith.addf %590, %600 : vector<1x64xf32>
    %c0_228 = arith.constant 0 : index
    %c50_229 = arith.constant 50 : index
    %602 = vector.load %arg20[%c0_228, %c50_229] : memref<2x118xf32, #tpu.memory_space<vmem>>, vector<1x64xf32>
    %c1_230 = arith.constant 1 : index
    %c50_231 = arith.constant 50 : index
    %603 = vector.load %arg20[%c1_230, %c50_231] : memref<2x118xf32, #tpu.memory_space<vmem>>, vector<1x64xf32>
    %c44_232 = arith.constant 44 : index
    %604 = memref.load %arg10[%c44_232] : memref<98xf32, #tpu.memory_space<smem>>
    %605 = vector.broadcast %604 : f32 to vector<1x64xf32>
    %606 = arith.mulf %605, %602 : vector<1x64xf32>
    %c93 = arith.constant 93 : index
    %607 = memref.load %arg10[%c93] : memref<98xf32, #tpu.memory_space<smem>>
    %608 = vector.broadcast %607 : f32 to vector<1x64xf32>
    %609 = arith.mulf %608, %603 : vector<1x64xf32>
    %610 = arith.addf %606, %609 : vector<1x64xf32>
    %611 = arith.mulf %610, %77 : vector<1x64xf32>
    %612 = arith.addf %601, %611 : vector<1x64xf32>
    %c0_233 = arith.constant 0 : index
    %c51_234 = arith.constant 51 : index
    %613 = vector.load %arg20[%c0_233, %c51_234] : memref<2x118xf32, #tpu.memory_space<vmem>>, vector<1x64xf32>
    %c1_235 = arith.constant 1 : index
    %c51_236 = arith.constant 51 : index
    %614 = vector.load %arg20[%c1_235, %c51_236] : memref<2x118xf32, #tpu.memory_space<vmem>>, vector<1x64xf32>
    %c45_237 = arith.constant 45 : index
    %615 = memref.load %arg10[%c45_237] : memref<98xf32, #tpu.memory_space<smem>>
    %616 = vector.broadcast %615 : f32 to vector<1x64xf32>
    %617 = arith.mulf %616, %613 : vector<1x64xf32>
    %c94 = arith.constant 94 : index
    %618 = memref.load %arg10[%c94] : memref<98xf32, #tpu.memory_space<smem>>
    %619 = vector.broadcast %618 : f32 to vector<1x64xf32>
    %620 = arith.mulf %619, %614 : vector<1x64xf32>
    %621 = arith.addf %617, %620 : vector<1x64xf32>
    %622 = arith.addf %612, %621 : vector<1x64xf32>
    %c0_238 = arith.constant 0 : index
    %c52_239 = arith.constant 52 : index
    %623 = vector.load %arg20[%c0_238, %c52_239] : memref<2x118xf32, #tpu.memory_space<vmem>>, vector<1x64xf32>
    %c1_240 = arith.constant 1 : index
    %c52_241 = arith.constant 52 : index
    %624 = vector.load %arg20[%c1_240, %c52_241] : memref<2x118xf32, #tpu.memory_space<vmem>>, vector<1x64xf32>
    %c46_242 = arith.constant 46 : index
    %625 = memref.load %arg10[%c46_242] : memref<98xf32, #tpu.memory_space<smem>>
    %626 = vector.broadcast %625 : f32 to vector<1x64xf32>
    %627 = arith.mulf %626, %623 : vector<1x64xf32>
    %c95 = arith.constant 95 : index
    %628 = memref.load %arg10[%c95] : memref<98xf32, #tpu.memory_space<smem>>
    %629 = vector.broadcast %628 : f32 to vector<1x64xf32>
    %630 = arith.mulf %629, %624 : vector<1x64xf32>
    %631 = arith.addf %627, %630 : vector<1x64xf32>
    %632 = arith.mulf %631, %88 : vector<1x64xf32>
    %633 = arith.addf %622, %632 : vector<1x64xf32>
    %c0_243 = arith.constant 0 : index
    %c53_244 = arith.constant 53 : index
    %634 = vector.load %arg20[%c0_243, %c53_244] : memref<2x118xf32, #tpu.memory_space<vmem>>, vector<1x64xf32>
    %c1_245 = arith.constant 1 : index
    %c53_246 = arith.constant 53 : index
    %635 = vector.load %arg20[%c1_245, %c53_246] : memref<2x118xf32, #tpu.memory_space<vmem>>, vector<1x64xf32>
    %c47 = arith.constant 47 : index
    %636 = memref.load %arg10[%c47] : memref<98xf32, #tpu.memory_space<smem>>
    %637 = vector.broadcast %636 : f32 to vector<1x64xf32>
    %638 = arith.mulf %637, %634 : vector<1x64xf32>
    %c96 = arith.constant 96 : index
    %639 = memref.load %arg10[%c96] : memref<98xf32, #tpu.memory_space<smem>>
    %640 = vector.broadcast %639 : f32 to vector<1x64xf32>
    %641 = arith.mulf %640, %635 : vector<1x64xf32>
    %642 = arith.addf %638, %641 : vector<1x64xf32>
    %643 = arith.mulf %642, %99 : vector<1x64xf32>
    %644 = arith.addf %633, %643 : vector<1x64xf32>
    %c0_247 = arith.constant 0 : index
    %c54_248 = arith.constant 54 : index
    %645 = vector.load %arg20[%c0_247, %c54_248] : memref<2x118xf32, #tpu.memory_space<vmem>>, vector<1x64xf32>
    %c1_249 = arith.constant 1 : index
    %c54_250 = arith.constant 54 : index
    %646 = vector.load %arg20[%c1_249, %c54_250] : memref<2x118xf32, #tpu.memory_space<vmem>>, vector<1x64xf32>
    %c48_251 = arith.constant 48 : index
    %647 = memref.load %arg10[%c48_251] : memref<98xf32, #tpu.memory_space<smem>>
    %648 = vector.broadcast %647 : f32 to vector<1x64xf32>
    %649 = arith.mulf %648, %645 : vector<1x64xf32>
    %c97 = arith.constant 97 : index
    %650 = memref.load %arg10[%c97] : memref<98xf32, #tpu.memory_space<smem>>
    %651 = vector.broadcast %650 : f32 to vector<1x64xf32>
    %652 = arith.mulf %651, %646 : vector<1x64xf32>
    %653 = arith.addf %649, %652 : vector<1x64xf32>
    %654 = arith.mulf %653, %110 : vector<1x64xf32>
    %655 = arith.addf %644, %654 : vector<1x64xf32>
    %656 = arith.negf %655 : vector<1x64xf32>
    %657 = math.exp %656 : vector<1x64xf32>
    %cst_252 = arith.constant 1.000000e+00 : f32
    %658 = vector.broadcast %cst_252 : f32 to vector<1x64xf32>
    %659 = arith.addf %658, %657 : vector<1x64xf32>
    %660 = arith.divf %658, %659 : vector<1x64xf32>
    %661 = vector.broadcast %660 : vector<1x64xf32> to vector<32x64xf32>
    %662 = arith.mulf %27, %661 : vector<32x64xf32>
    %cst_253 = arith.constant 0.000000e+00 : f32
    %663 = vector.broadcast %cst_253 : f32 to vector<32x9xf32>
    %c0_254 = arith.constant 0 : index
    %c0_255 = arith.constant 0 : index
    %664 = vector.load %arg19[%c0_254, %c0_255] : memref<32x82xf32, #tpu.memory_space<vmem>>, vector<32x9xf32>
    tpu.vector_store %arg19[%c0_254, %c0_255], %663 {strides = array<i32>} : memref<32x82xf32, #tpu.memory_space<vmem>>, vector<32x9xf32>,
    %cst_256 = arith.constant 0.000000e+00 : f32
    %665 = vector.broadcast %cst_256 : f32 to vector<32x9xf32>
    %c0_257 = arith.constant 0 : index
    %c73_258 = arith.constant 73 : index
    %666 = vector.load %arg19[%c0_257, %c73_258] : memref<32x82xf32, #tpu.memory_space<vmem>>, vector<32x9xf32>
    tpu.vector_store %arg19[%c0_257, %c73_258], %665 {strides = array<i32>} : memref<32x82xf32, #tpu.memory_space<vmem>>, vector<32x9xf32>,
    %c0_259 = arith.constant 0 : index
    %c9_260 = arith.constant 9 : index
    %667 = vector.load %arg19[%c0_259, %c9_260] : memref<32x82xf32, #tpu.memory_space<vmem>>, vector<32x64xf32>
    tpu.vector_store %arg19[%c0_259, %c9_260], %662 {strides = array<i32>} : memref<32x82xf32, #tpu.memory_space<vmem>>, vector<32x64xf32>,
    %c0_261 = arith.constant 0 : index
    %c0_262 = arith.constant 0 : index
    %668 = vector.load %arg19[%c0_261, %c0_262] : memref<32x82xf32, #tpu.memory_space<vmem>>, vector<32x64xf32>
    %669 = vector.broadcast %77 : vector<1x64xf32> to vector<32x64xf32>
    %670 = arith.mulf %668, %669 : vector<32x64xf32>
    %671 = arith.truncf %670 : vector<32x64xf32> to vector<32x64xbf16>
    %c0_263 = arith.constant 0 : index
    %c0_264 = arith.constant 0 : index
    %672 = vector.load %arg21[%c0_263, %c0_264] : memref<288x64xbf16, #tpu.memory_space<vmem>>, vector<32x64xbf16>
    tpu.vector_store %arg21[%c0_263, %c0_264], %671 {strides = array<i32>} : memref<288x64xbf16, #tpu.memory_space<vmem>>, vector<32x64xbf16>,
    %c0_265 = arith.constant 0 : index
    %c1_266 = arith.constant 1 : index
    %673 = vector.load %arg19[%c0_265, %c1_266] : memref<32x82xf32, #tpu.memory_space<vmem>>, vector<32x64xf32>
    %674 = arith.truncf %673 : vector<32x64xf32> to vector<32x64xbf16>
    %c32_267 = arith.constant 32 : index
    %c0_268 = arith.constant 0 : index
    %675 = vector.load %arg21[%c32_267, %c0_268] : memref<288x64xbf16, #tpu.memory_space<vmem>>, vector<32x64xbf16>
    tpu.vector_store %arg21[%c32_267, %c0_268], %674 {strides = array<i32>} : memref<288x64xbf16, #tpu.memory_space<vmem>>, vector<32x64xbf16>,
    %c0_269 = arith.constant 0 : index
    %c2_270 = arith.constant 2 : index
    %676 = vector.load %arg19[%c0_269, %c2_270] : memref<32x82xf32, #tpu.memory_space<vmem>>, vector<32x64xf32>
    %677 = vector.broadcast %88 : vector<1x64xf32> to vector<32x64xf32>
    %678 = arith.mulf %676, %677 : vector<32x64xf32>
    %679 = arith.truncf %678 : vector<32x64xf32> to vector<32x64xbf16>
    %c64_271 = arith.constant 64 : index
    %c0_272 = arith.constant 0 : index
    %680 = vector.load %arg21[%c64_271, %c0_272] : memref<288x64xbf16, #tpu.memory_space<vmem>>, vector<32x64xbf16>
    tpu.vector_store %arg21[%c64_271, %c0_272], %679 {strides = array<i32>} : memref<288x64xbf16, #tpu.memory_space<vmem>>, vector<32x64xbf16>,
    %c0_273 = arith.constant 0 : index
    %c8_274 = arith.constant 8 : index
    %681 = vector.load %arg19[%c0_273, %c8_274] : memref<32x82xf32, #tpu.memory_space<vmem>>, vector<32x64xf32>
    %682 = vector.broadcast %77 : vector<1x64xf32> to vector<32x64xf32>
    %683 = arith.mulf %681, %682 : vector<32x64xf32>
    %684 = arith.truncf %683 : vector<32x64xf32> to vector<32x64xbf16>
    %c96_275 = arith.constant 96 : index
    %c0_276 = arith.constant 0 : index
    %685 = vector.load %arg21[%c96_275, %c0_276] : memref<288x64xbf16, #tpu.memory_space<vmem>>, vector<32x64xbf16>
    tpu.vector_store %arg21[%c96_275, %c0_276], %684 {strides = array<i32>} : memref<288x64xbf16, #tpu.memory_space<vmem>>, vector<32x64xbf16>,
    %c0_277 = arith.constant 0 : index
    %c9_278 = arith.constant 9 : index
    %686 = vector.load %arg19[%c0_277, %c9_278] : memref<32x82xf32, #tpu.memory_space<vmem>>, vector<32x64xf32>
    %687 = arith.truncf %686 : vector<32x64xf32> to vector<32x64xbf16>
    %c128 = arith.constant 128 : index
    %c0_279 = arith.constant 0 : index
    %688 = vector.load %arg21[%c128, %c0_279] : memref<288x64xbf16, #tpu.memory_space<vmem>>, vector<32x64xbf16>
    tpu.vector_store %arg21[%c128, %c0_279], %687 {strides = array<i32>} : memref<288x64xbf16, #tpu.memory_space<vmem>>, vector<32x64xbf16>,
    %c0_280 = arith.constant 0 : index
    %c10_281 = arith.constant 10 : index
    %689 = vector.load %arg19[%c0_280, %c10_281] : memref<32x82xf32, #tpu.memory_space<vmem>>, vector<32x64xf32>
    %690 = vector.broadcast %88 : vector<1x64xf32> to vector<32x64xf32>
    %691 = arith.mulf %689, %690 : vector<32x64xf32>
    %692 = arith.truncf %691 : vector<32x64xf32> to vector<32x64xbf16>
    %c160 = arith.constant 160 : index
    %c0_282 = arith.constant 0 : index
    %693 = vector.load %arg21[%c160, %c0_282] : memref<288x64xbf16, #tpu.memory_space<vmem>>, vector<32x64xbf16>
    tpu.vector_store %arg21[%c160, %c0_282], %692 {strides = array<i32>} : memref<288x64xbf16, #tpu.memory_space<vmem>>, vector<32x64xbf16>,
    %c0_283 = arith.constant 0 : index
    %c16_284 = arith.constant 16 : index
    %694 = vector.load %arg19[%c0_283, %c16_284] : memref<32x82xf32, #tpu.memory_space<vmem>>, vector<32x64xf32>
    %695 = vector.broadcast %77 : vector<1x64xf32> to vector<32x64xf32>
    %696 = arith.mulf %694, %695 : vector<32x64xf32>
    %697 = arith.truncf %696 : vector<32x64xf32> to vector<32x64xbf16>
    %c192 = arith.constant 192 : index
    %c0_285 = arith.constant 0 : index
    %698 = vector.load %arg21[%c192, %c0_285] : memref<288x64xbf16, #tpu.memory_space<vmem>>, vector<32x64xbf16>
    tpu.vector_store %arg21[%c192, %c0_285], %697 {strides = array<i32>} : memref<288x64xbf16, #tpu.memory_space<vmem>>, vector<32x64xbf16>,
    %c0_286 = arith.constant 0 : index
    %c17_287 = arith.constant 17 : index
    %699 = vector.load %arg19[%c0_286, %c17_287] : memref<32x82xf32, #tpu.memory_space<vmem>>, vector<32x64xf32>
    %700 = arith.truncf %699 : vector<32x64xf32> to vector<32x64xbf16>
    %c224 = arith.constant 224 : index
    %c0_288 = arith.constant 0 : index
    %701 = vector.load %arg21[%c224, %c0_288] : memref<288x64xbf16, #tpu.memory_space<vmem>>, vector<32x64xbf16>
    tpu.vector_store %arg21[%c224, %c0_288], %700 {strides = array<i32>} : memref<288x64xbf16, #tpu.memory_space<vmem>>, vector<32x64xbf16>,
    %c0_289 = arith.constant 0 : index
    %c18_290 = arith.constant 18 : index
    %702 = vector.load %arg19[%c0_289, %c18_290] : memref<32x82xf32, #tpu.memory_space<vmem>>, vector<32x64xf32>
    %703 = vector.broadcast %88 : vector<1x64xf32> to vector<32x64xf32>
    %704 = arith.mulf %702, %703 : vector<32x64xf32>
    %705 = arith.truncf %704 : vector<32x64xf32> to vector<32x64xbf16>
    %c256 = arith.constant 256 : index
    %c0_291 = arith.constant 0 : index
    %706 = vector.load %arg21[%c256, %c0_291] : memref<288x64xbf16, #tpu.memory_space<vmem>>, vector<32x64xbf16>
    tpu.vector_store %arg21[%c256, %c0_291], %705 {strides = array<i32>} : memref<288x64xbf16, #tpu.memory_space<vmem>>, vector<32x64xbf16>,
    %c0_292 = arith.constant 0 : index
    %c0_293 = arith.constant 0 : index
    %707 = vector.load %arg21[%c0_292, %c0_293] : memref<288x64xbf16, #tpu.memory_space<vmem>>, vector<288x64xbf16>
    %cst_294 = arith.constant dense<0.000000e+00> : vector<32x64xf32>
    %708 = tpu.matmul %4, %707, %cst_294 {dimension_numbers = #tpu.dot_dimension_numbers<[1], [0], [0], [1], [0, 0, 1, 1], [], []>} : vector<32x288xbf16>, vector<288x64xbf16>, vector<32x64xf32> -> vector<32x64xf32>
    %709 = vector.broadcast %5 : vector<32x1xf32> to vector<32x64xf32>
    %710 = arith.addf %708, %709 : vector<32x64xf32>
    %cst_295 = arith.constant 0.000000e+00 : f32
    %711 = vector.broadcast %cst_295 : f32 to vector<32x64xf32>
    %712 = arith.maximumf %710, %711 : vector<32x64xf32>
    %c0_296 = arith.constant 0 : index
    %c0_297 = arith.constant 0 : index
    %c0_298 = arith.constant 0 : index
    %713 = vector.load %arg15[%c0_296, %c0_297, %c0_298] : memref<1x32x64xf32, #tpu.memory_space<vmem>>, vector<1x32x64xf32>
    %714 = vector.shape_cast %713 : vector<1x32x64xf32> to vector<32x64xf32>
    %715 = vector.shape_cast %712 : vector<32x64xf32> to vector<1x32x64xf32>
    tpu.vector_store %arg15[%c0_296, %c0_297, %c0_298], %715 {strides = array<i32>} : memref<1x32x64xf32, #tpu.memory_space<vmem>>, vector<1x32x64xf32>,
    %c0_299 = arith.constant 0 : index
    %c0_300 = arith.constant 0 : index
    %c0_301 = arith.constant 0 : index
    %716 = vector.load %arg1[%c0_299, %c0_300, %c0_301] : memref<1x32x256xf32, #tpu.memory_space<vmem>>, vector<1x32x256xf32>
    %717 = vector.shape_cast %716 : vector<1x32x256xf32> to vector<32x256xf32>
    %c0_302 = arith.constant 0 : index
    %c0_303 = arith.constant 0 : index
    %718 = vector.load %arg3[%c0_302, %c0_303] : memref<2x32xf32, #tpu.memory_space<vmem>>, vector<2x32xf32>
    %c0_304 = arith.constant 0 : index
    %c0_305 = arith.constant 0 : index
    %719 = vector.load %arg4[%c0_304, %c0_305] : memref<32x2xf32, #tpu.memory_space<vmem>>, vector<32x2xf32>
    %c0_306 = arith.constant 0 : index
    %c0_307 = arith.constant 0 : index
    %720 = vector.load %arg6[%c0_306, %c0_307] : memref<32x288xbf16, #tpu.memory_space<vmem>>, vector<32x288xbf16>
    %c0_308 = arith.constant 0 : index
    %c0_309 = arith.constant 0 : index
    %721 = vector.load %arg7[%c0_308, %c0_309] : memref<32x1xf32, #tpu.memory_space<vmem>>, vector<32x1xf32>
    %cst_310 = arith.constant dense<0.000000e+00> : vector<32xf32>
    %722 = vector.multi_reduction <add>, %717, %cst_310 [1] : vector<32x256xf32> to vector<32xf32>
    %723 = vector.shape_cast %722 : vector<32xf32> to vector<32x1xf32>
    %cst_311 = arith.constant 2.560000e+02 : f32
    %724 = vector.broadcast %cst_311 : f32 to vector<32x1xf32>
    %725 = arith.divf %723, %724 : vector<32x1xf32>
    %cst_312 = arith.constant dense<0xFF800000> : vector<32xf32>
    %726 = vector.multi_reduction <maximumf>, %717, %cst_312 [1] : vector<32x256xf32> to vector<32xf32>
    %727 = vector.shape_cast %726 : vector<32xf32> to vector<32x1xf32>
    %cst_313 = arith.constant dense<0.000000e+00> : vector<2x1xf32>
    %728 = tpu.matmul %718, %725, %cst_313 {dimension_numbers = #tpu.dot_dimension_numbers<[1], [0], [0], [1], [0, 0, 1, 1], [], []>} : vector<2x32xf32>, vector<32x1xf32>, vector<2x1xf32> -> vector<2x1xf32>
    %cst_314 = arith.constant 0.000000e+00 : f32
    %729 = vector.broadcast %cst_314 : f32 to vector<2x1xf32>
    %730 = arith.maximumf %728, %729 : vector<2x1xf32>
    %cst_315 = arith.constant dense<0.000000e+00> : vector<32x1xf32>
    %731 = tpu.matmul %719, %730, %cst_315 {dimension_numbers = #tpu.dot_dimension_numbers<[1], [0], [0], [1], [0, 0, 1, 1], [], []>} : vector<32x2xf32>, vector<2x1xf32>, vector<32x1xf32> -> vector<32x1xf32>
    %cst_316 = arith.constant dense<0.000000e+00> : vector<2x1xf32>
    %732 = tpu.matmul %718, %727, %cst_316 {dimension_numbers = #tpu.dot_dimension_numbers<[1], [0], [0], [1], [0, 0, 1, 1], [], []>} : vector<2x32xf32>, vector<32x1xf32>, vector<2x1xf32> -> vector<2x1xf32>
    %cst_317 = arith.constant 0.000000e+00 : f32
    %733 = vector.broadcast %cst_317 : f32 to vector<2x1xf32>
    %734 = arith.maximumf %732, %733 : vector<2x1xf32>
    %cst_318 = arith.constant dense<0.000000e+00> : vector<32x1xf32>
    %735 = tpu.matmul %719, %734, %cst_318 {dimension_numbers = #tpu.dot_dimension_numbers<[1], [0], [0], [1], [0, 0, 1, 1], [], []>} : vector<32x2xf32>, vector<2x1xf32>, vector<32x1xf32> -> vector<32x1xf32>
    %736 = arith.addf %731, %735 : vector<32x1xf32>
    %737 = arith.negf %736 : vector<32x1xf32>
    %738 = math.exp %737 : vector<32x1xf32>
    %cst_319 = arith.constant 1.000000e+00 : f32
    %739 = vector.broadcast %cst_319 : f32 to vector<32x1xf32>
    %740 = arith.addf %739, %738 : vector<32x1xf32>
    %741 = arith.divf %739, %740 : vector<32x1xf32>
    %742 = vector.broadcast %741 : vector<32x1xf32> to vector<32x256xf32>
    %743 = arith.mulf %717, %742 : vector<32x256xf32>
    %744 = tpu.iota {dimensions = array<i32: 1>} : vector<1x256xi32>
    %c16_i32 = arith.constant 16 : i32
    %c0_i32_320 = arith.constant 0 : i32
    %745 = arith.cmpi eq, %c16_i32, %c0_i32_320 : i32
    %c1_i32_321 = arith.constant 1 : i32
    %746 = arith.select %745, %c1_i32_321, %c16_i32 : i32
    %747 = vector.broadcast %746 : i32 to vector<1x256xi32>
    %748 = arith.remsi %744, %747 : vector<1x256xi32>
    %c0_i32_322 = arith.constant 0 : i32
    %749 = vector.broadcast %c0_i32_322 : i32 to vector<1x256xi32>
    %750 = arith.cmpi ne, %748, %749 : vector<1x256xi32>
    %c0_i32_323 = arith.constant 0 : i32
    %751 = vector.broadcast %c0_i32_323 : i32 to vector<1x256xi32>
    %752 = arith.cmpi slt, %748, %751 : vector<1x256xi32>
    %c0_i32_324 = arith.constant 0 : i32
    %753 = arith.cmpi slt, %746, %c0_i32_324 : i32
    %754 = vector.broadcast %753 : i1 to vector<1x256xi1>
    %755 = vector.broadcast %754 : vector<1x256xi1> to vector<1x256xi1>
    %756 = arith.xori %752, %755 : vector<1x256xi1>
    %757 = arith.andi %756, %750 : vector<1x256xi1>
    %758 = vector.broadcast %746 : i32 to vector<1x256xi32>
    %759 = arith.addi %748, %758 : vector<1x256xi32>
    %760 = arith.select %757, %759, %748 : vector<1x256xi1>, vector<1x256xi32>
    %c-3_i32_325 = arith.constant -3 : i32
    %761 = vector.broadcast %c-3_i32_325 : i32 to vector<1x256xi32>
    %762 = arith.addi %760, %761 : vector<1x256xi32>
    %c0_i32_326 = arith.constant 0 : i32
    %763 = vector.broadcast %c0_i32_326 : i32 to vector<1x256xi32>
    %764 = arith.cmpi sge, %762, %763 : vector<1x256xi32>
    %c-3_i32_327 = arith.constant -3 : i32
    %765 = vector.broadcast %c-3_i32_327 : i32 to vector<1x256xi32>
    %766 = arith.addi %760, %765 : vector<1x256xi32>
    %c16_i32_328 = arith.constant 16 : i32
    %767 = vector.broadcast %c16_i32_328 : i32 to vector<1x256xi32>
    %768 = arith.cmpi slt, %766, %767 : vector<1x256xi32>
    %769 = arith.andi %764, %768 : vector<1x256xi1>
    %770 = arith.extui %769 : vector<1x256xi1> to vector<1x256xi32>
    %771 = arith.sitofp %770 : vector<1x256xi32> to vector<1x256xf32>
    %c-2_i32_329 = arith.constant -2 : i32
    %772 = vector.broadcast %c-2_i32_329 : i32 to vector<1x256xi32>
    %773 = arith.addi %760, %772 : vector<1x256xi32>
    %c0_i32_330 = arith.constant 0 : i32
    %774 = vector.broadcast %c0_i32_330 : i32 to vector<1x256xi32>
    %775 = arith.cmpi sge, %773, %774 : vector<1x256xi32>
    %c-2_i32_331 = arith.constant -2 : i32
    %776 = vector.broadcast %c-2_i32_331 : i32 to vector<1x256xi32>
    %777 = arith.addi %760, %776 : vector<1x256xi32>
    %c16_i32_332 = arith.constant 16 : i32
    %778 = vector.broadcast %c16_i32_332 : i32 to vector<1x256xi32>
    %779 = arith.cmpi slt, %777, %778 : vector<1x256xi32>
    %780 = arith.andi %775, %779 : vector<1x256xi1>
    %781 = arith.extui %780 : vector<1x256xi1> to vector<1x256xi32>
    %782 = arith.sitofp %781 : vector<1x256xi32> to vector<1x256xf32>
    %c-1_i32_333 = arith.constant -1 : i32
    %783 = vector.broadcast %c-1_i32_333 : i32 to vector<1x256xi32>
    %784 = arith.addi %760, %783 : vector<1x256xi32>
    %c0_i32_334 = arith.constant 0 : i32
    %785 = vector.broadcast %c0_i32_334 : i32 to vector<1x256xi32>
    %786 = arith.cmpi sge, %784, %785 : vector<1x256xi32>
    %c-1_i32_335 = arith.constant -1 : i32
    %787 = vector.broadcast %c-1_i32_335 : i32 to vector<1x256xi32>
    %788 = arith.addi %760, %787 : vector<1x256xi32>
    %c16_i32_336 = arith.constant 16 : i32
    %789 = vector.broadcast %c16_i32_336 : i32 to vector<1x256xi32>
    %790 = arith.cmpi slt, %788, %789 : vector<1x256xi32>
    %791 = arith.andi %786, %790 : vector<1x256xi1>
    %792 = arith.extui %791 : vector<1x256xi1> to vector<1x256xi32>
    %793 = arith.sitofp %792 : vector<1x256xi32> to vector<1x256xf32>
    %c1_i32_337 = arith.constant 1 : i32
    %794 = vector.broadcast %c1_i32_337 : i32 to vector<1x256xi32>
    %795 = arith.addi %760, %794 : vector<1x256xi32>
    %c0_i32_338 = arith.constant 0 : i32
    %796 = vector.broadcast %c0_i32_338 : i32 to vector<1x256xi32>
    %797 = arith.cmpi sge, %795, %796 : vector<1x256xi32>
    %c1_i32_339 = arith.constant 1 : i32
    %798 = vector.broadcast %c1_i32_339 : i32 to vector<1x256xi32>
    %799 = arith.addi %760, %798 : vector<1x256xi32>
    %c16_i32_340 = arith.constant 16 : i32
    %800 = vector.broadcast %c16_i32_340 : i32 to vector<1x256xi32>
    %801 = arith.cmpi slt, %799, %800 : vector<1x256xi32>
    %802 = arith.andi %797, %801 : vector<1x256xi1>
    %803 = arith.extui %802 : vector<1x256xi1> to vector<1x256xi32>
    %804 = arith.sitofp %803 : vector<1x256xi32> to vector<1x256xf32>
    %c2_i32_341 = arith.constant 2 : i32
    %805 = vector.broadcast %c2_i32_341 : i32 to vector<1x256xi32>
    %806 = arith.addi %760, %805 : vector<1x256xi32>
    %c0_i32_342 = arith.constant 0 : i32
    %807 = vector.broadcast %c0_i32_342 : i32 to vector<1x256xi32>
    %808 = arith.cmpi sge, %806, %807 : vector<1x256xi32>
    %c2_i32_343 = arith.constant 2 : i32
    %809 = vector.broadcast %c2_i32_343 : i32 to vector<1x256xi32>
    %810 = arith.addi %760, %809 : vector<1x256xi32>
    %c16_i32_344 = arith.constant 16 : i32
    %811 = vector.broadcast %c16_i32_344 : i32 to vector<1x256xi32>
    %812 = arith.cmpi slt, %810, %811 : vector<1x256xi32>
    %813 = arith.andi %808, %812 : vector<1x256xi1>
    %814 = arith.extui %813 : vector<1x256xi1> to vector<1x256xi32>
    %815 = arith.sitofp %814 : vector<1x256xi32> to vector<1x256xf32>
    %c3_i32_345 = arith.constant 3 : i32
    %816 = vector.broadcast %c3_i32_345 : i32 to vector<1x256xi32>
    %817 = arith.addi %760, %816 : vector<1x256xi32>
    %c0_i32_346 = arith.constant 0 : i32
    %818 = vector.broadcast %c0_i32_346 : i32 to vector<1x256xi32>
    %819 = arith.cmpi sge, %817, %818 : vector<1x256xi32>
    %c3_i32_347 = arith.constant 3 : i32
    %820 = vector.broadcast %c3_i32_347 : i32 to vector<1x256xi32>
    %821 = arith.addi %760, %820 : vector<1x256xi32>
    %c16_i32_348 = arith.constant 16 : i32
    %822 = vector.broadcast %c16_i32_348 : i32 to vector<1x256xi32>
    %823 = arith.cmpi slt, %821, %822 : vector<1x256xi32>
    %824 = arith.andi %819, %823 : vector<1x256xi1>
    %825 = arith.extui %824 : vector<1x256xi1> to vector<1x256xi32>
    %826 = arith.sitofp %825 : vector<1x256xi32> to vector<1x256xf32>
    %cst_349 = arith.constant dense<0.000000e+00> : vector<256xf32>
    %827 = vector.multi_reduction <add>, %743, %cst_349 [0] : vector<32x256xf32> to vector<256xf32>
    %828 = vector.shape_cast %827 : vector<256xf32> to vector<1x256xf32>
    %cst_350 = arith.constant 3.200000e+01 : f32
    %829 = vector.broadcast %cst_350 : f32 to vector<1x256xf32>
    %830 = arith.divf %828, %829 : vector<1x256xf32>
    %cst_351 = arith.constant dense<0xFF800000> : vector<256xf32>
    %831 = vector.multi_reduction <maximumf>, %743, %cst_351 [0] : vector<32x256xf32> to vector<256xf32>
    %832 = vector.shape_cast %831 : vector<256xf32> to vector<1x256xf32>
    %cst_352 = arith.constant 0.000000e+00 : f32
    %833 = vector.broadcast %cst_352 : f32 to vector<2x51xf32>
    %c0_353 = arith.constant 0 : index
    %c0_354 = arith.constant 0 : index
    %834 = vector.load %arg17[%c0_353, %c0_354] : memref<2x358xf32, #tpu.memory_space<vmem>>, vector<2x51xf32>
    tpu.vector_store %arg17[%c0_353, %c0_354], %833 {strides = array<i32>} : memref<2x358xf32, #tpu.memory_space<vmem>>, vector<2x51xf32>,
    %cst_355 = arith.constant 0.000000e+00 : f32
    %835 = vector.broadcast %cst_355 : f32 to vector<2x51xf32>
    %c0_356 = arith.constant 0 : index
    %c307 = arith.constant 307 : index
    %836 = vector.load %arg17[%c0_356, %c307] : memref<2x358xf32, #tpu.memory_space<vmem>>, vector<2x51xf32>
    tpu.vector_store %arg17[%c0_356, %c307], %835 {strides = array<i32>} : memref<2x358xf32, #tpu.memory_space<vmem>>, vector<2x51xf32>,
    %c0_357 = arith.constant 0 : index
    %c51_358 = arith.constant 51 : index
    %837 = vector.load %arg17[%c0_357, %c51_358] : memref<2x358xf32, #tpu.memory_space<vmem>>, vector<1x256xf32>
    tpu.vector_store %arg17[%c0_357, %c51_358], %830 {strides = array<i32>} : memref<2x358xf32, #tpu.memory_space<vmem>>, vector<1x256xf32>,
    %c1_359 = arith.constant 1 : index
    %c51_360 = arith.constant 51 : index
    %838 = vector.load %arg17[%c1_359, %c51_360] : memref<2x358xf32, #tpu.memory_space<vmem>>, vector<1x256xf32>
    tpu.vector_store %arg17[%c1_359, %c51_360], %832 {strides = array<i32>} : memref<2x358xf32, #tpu.memory_space<vmem>>, vector<1x256xf32>,
    %cst_361 = arith.constant 0.000000e+00 : f32
    %839 = vector.broadcast %cst_361 : f32 to vector<1x256xf32>
    %c0_362 = arith.constant 0 : index
    %c0_363 = arith.constant 0 : index
    %840 = vector.load %arg17[%c0_362, %c0_363] : memref<2x358xf32, #tpu.memory_space<vmem>>, vector<1x256xf32>
    %c1_364 = arith.constant 1 : index
    %c0_365 = arith.constant 0 : index
    %841 = vector.load %arg17[%c1_364, %c0_365] : memref<2x358xf32, #tpu.memory_space<vmem>>, vector<1x256xf32>
    %c0_366 = arith.constant 0 : index
    %842 = memref.load %arg5[%c0_366] : memref<98xf32, #tpu.memory_space<smem>>
    %843 = vector.broadcast %842 : f32 to vector<1x256xf32>
    %844 = arith.mulf %843, %840 : vector<1x256xf32>
    %c49_367 = arith.constant 49 : index
    %845 = memref.load %arg5[%c49_367] : memref<98xf32, #tpu.memory_space<smem>>
    %846 = vector.broadcast %845 : f32 to vector<1x256xf32>
    %847 = arith.mulf %846, %841 : vector<1x256xf32>
    %848 = arith.addf %844, %847 : vector<1x256xf32>
    %849 = arith.mulf %848, %771 : vector<1x256xf32>
    %850 = arith.addf %839, %849 : vector<1x256xf32>
    %c0_368 = arith.constant 0 : index
    %c1_369 = arith.constant 1 : index
    %851 = vector.load %arg17[%c0_368, %c1_369] : memref<2x358xf32, #tpu.memory_space<vmem>>, vector<1x256xf32>
    %c1_370 = arith.constant 1 : index
    %c1_371 = arith.constant 1 : index
    %852 = vector.load %arg17[%c1_370, %c1_371] : memref<2x358xf32, #tpu.memory_space<vmem>>, vector<1x256xf32>
    %c1_372 = arith.constant 1 : index
    %853 = memref.load %arg5[%c1_372] : memref<98xf32, #tpu.memory_space<smem>>
    %854 = vector.broadcast %853 : f32 to vector<1x256xf32>
    %855 = arith.mulf %854, %851 : vector<1x256xf32>
    %c50_373 = arith.constant 50 : index
    %856 = memref.load %arg5[%c50_373] : memref<98xf32, #tpu.memory_space<smem>>
    %857 = vector.broadcast %856 : f32 to vector<1x256xf32>
    %858 = arith.mulf %857, %852 : vector<1x256xf32>
    %859 = arith.addf %855, %858 : vector<1x256xf32>
    %860 = arith.mulf %859, %782 : vector<1x256xf32>
    %861 = arith.addf %850, %860 : vector<1x256xf32>
    %c0_374 = arith.constant 0 : index
    %c2_375 = arith.constant 2 : index
    %862 = vector.load %arg17[%c0_374, %c2_375] : memref<2x358xf32, #tpu.memory_space<vmem>>, vector<1x256xf32>
    %c1_376 = arith.constant 1 : index
    %c2_377 = arith.constant 2 : index
    %863 = vector.load %arg17[%c1_376, %c2_377] : memref<2x358xf32, #tpu.memory_space<vmem>>, vector<1x256xf32>
    %c2_378 = arith.constant 2 : index
    %864 = memref.load %arg5[%c2_378] : memref<98xf32, #tpu.memory_space<smem>>
    %865 = vector.broadcast %864 : f32 to vector<1x256xf32>
    %866 = arith.mulf %865, %862 : vector<1x256xf32>
    %c51_379 = arith.constant 51 : index
    %867 = memref.load %arg5[%c51_379] : memref<98xf32, #tpu.memory_space<smem>>
    %868 = vector.broadcast %867 : f32 to vector<1x256xf32>
    %869 = arith.mulf %868, %863 : vector<1x256xf32>
    %870 = arith.addf %866, %869 : vector<1x256xf32>
    %871 = arith.mulf %870, %793 : vector<1x256xf32>
    %872 = arith.addf %861, %871 : vector<1x256xf32>
    %c0_380 = arith.constant 0 : index
    %c3_381 = arith.constant 3 : index
    %873 = vector.load %arg17[%c0_380, %c3_381] : memref<2x358xf32, #tpu.memory_space<vmem>>, vector<1x256xf32>
    %c1_382 = arith.constant 1 : index
    %c3_383 = arith.constant 3 : index
    %874 = vector.load %arg17[%c1_382, %c3_383] : memref<2x358xf32, #tpu.memory_space<vmem>>, vector<1x256xf32>
    %c3_384 = arith.constant 3 : index
    %875 = memref.load %arg5[%c3_384] : memref<98xf32, #tpu.memory_space<smem>>
    %876 = vector.broadcast %875 : f32 to vector<1x256xf32>
    %877 = arith.mulf %876, %873 : vector<1x256xf32>
    %c52_385 = arith.constant 52 : index
    %878 = memref.load %arg5[%c52_385] : memref<98xf32, #tpu.memory_space<smem>>
    %879 = vector.broadcast %878 : f32 to vector<1x256xf32>
    %880 = arith.mulf %879, %874 : vector<1x256xf32>
    %881 = arith.addf %877, %880 : vector<1x256xf32>
    %882 = arith.addf %872, %881 : vector<1x256xf32>
    %c0_386 = arith.constant 0 : index
    %c4_387 = arith.constant 4 : index
    %883 = vector.load %arg17[%c0_386, %c4_387] : memref<2x358xf32, #tpu.memory_space<vmem>>, vector<1x256xf32>
    %c1_388 = arith.constant 1 : index
    %c4_389 = arith.constant 4 : index
    %884 = vector.load %arg17[%c1_388, %c4_389] : memref<2x358xf32, #tpu.memory_space<vmem>>, vector<1x256xf32>
    %c4_390 = arith.constant 4 : index
    %885 = memref.load %arg5[%c4_390] : memref<98xf32, #tpu.memory_space<smem>>
    %886 = vector.broadcast %885 : f32 to vector<1x256xf32>
    %887 = arith.mulf %886, %883 : vector<1x256xf32>
    %c53_391 = arith.constant 53 : index
    %888 = memref.load %arg5[%c53_391] : memref<98xf32, #tpu.memory_space<smem>>
    %889 = vector.broadcast %888 : f32 to vector<1x256xf32>
    %890 = arith.mulf %889, %884 : vector<1x256xf32>
    %891 = arith.addf %887, %890 : vector<1x256xf32>
    %892 = arith.mulf %891, %804 : vector<1x256xf32>
    %893 = arith.addf %882, %892 : vector<1x256xf32>
    %c0_392 = arith.constant 0 : index
    %c5_393 = arith.constant 5 : index
    %894 = vector.load %arg17[%c0_392, %c5_393] : memref<2x358xf32, #tpu.memory_space<vmem>>, vector<1x256xf32>
    %c1_394 = arith.constant 1 : index
    %c5_395 = arith.constant 5 : index
    %895 = vector.load %arg17[%c1_394, %c5_395] : memref<2x358xf32, #tpu.memory_space<vmem>>, vector<1x256xf32>
    %c5_396 = arith.constant 5 : index
    %896 = memref.load %arg5[%c5_396] : memref<98xf32, #tpu.memory_space<smem>>
    %897 = vector.broadcast %896 : f32 to vector<1x256xf32>
    %898 = arith.mulf %897, %894 : vector<1x256xf32>
    %c54_397 = arith.constant 54 : index
    %899 = memref.load %arg5[%c54_397] : memref<98xf32, #tpu.memory_space<smem>>
    %900 = vector.broadcast %899 : f32 to vector<1x256xf32>
    %901 = arith.mulf %900, %895 : vector<1x256xf32>
    %902 = arith.addf %898, %901 : vector<1x256xf32>
    %903 = arith.mulf %902, %815 : vector<1x256xf32>
    %904 = arith.addf %893, %903 : vector<1x256xf32>
    %c0_398 = arith.constant 0 : index
    %c6_399 = arith.constant 6 : index
    %905 = vector.load %arg17[%c0_398, %c6_399] : memref<2x358xf32, #tpu.memory_space<vmem>>, vector<1x256xf32>
    %c1_400 = arith.constant 1 : index
    %c6_401 = arith.constant 6 : index
    %906 = vector.load %arg17[%c1_400, %c6_401] : memref<2x358xf32, #tpu.memory_space<vmem>>, vector<1x256xf32>
    %c6_402 = arith.constant 6 : index
    %907 = memref.load %arg5[%c6_402] : memref<98xf32, #tpu.memory_space<smem>>
    %908 = vector.broadcast %907 : f32 to vector<1x256xf32>
    %909 = arith.mulf %908, %905 : vector<1x256xf32>
    %c55_403 = arith.constant 55 : index
    %910 = memref.load %arg5[%c55_403] : memref<98xf32, #tpu.memory_space<smem>>
    %911 = vector.broadcast %910 : f32 to vector<1x256xf32>
    %912 = arith.mulf %911, %906 : vector<1x256xf32>
    %913 = arith.addf %909, %912 : vector<1x256xf32>
    %914 = arith.mulf %913, %826 : vector<1x256xf32>
    %915 = arith.addf %904, %914 : vector<1x256xf32>
    %c0_404 = arith.constant 0 : index
    %c16_405 = arith.constant 16 : index
    %916 = vector.load %arg17[%c0_404, %c16_405] : memref<2x358xf32, #tpu.memory_space<vmem>>, vector<1x256xf32>
    %c1_406 = arith.constant 1 : index
    %c16_407 = arith.constant 16 : index
    %917 = vector.load %arg17[%c1_406, %c16_407] : memref<2x358xf32, #tpu.memory_space<vmem>>, vector<1x256xf32>
    %c7_408 = arith.constant 7 : index
    %918 = memref.load %arg5[%c7_408] : memref<98xf32, #tpu.memory_space<smem>>
    %919 = vector.broadcast %918 : f32 to vector<1x256xf32>
    %920 = arith.mulf %919, %916 : vector<1x256xf32>
    %c56_409 = arith.constant 56 : index
    %921 = memref.load %arg5[%c56_409] : memref<98xf32, #tpu.memory_space<smem>>
    %922 = vector.broadcast %921 : f32 to vector<1x256xf32>
    %923 = arith.mulf %922, %917 : vector<1x256xf32>
    %924 = arith.addf %920, %923 : vector<1x256xf32>
    %925 = arith.mulf %924, %771 : vector<1x256xf32>
    %926 = arith.addf %915, %925 : vector<1x256xf32>
    %c0_410 = arith.constant 0 : index
    %c17_411 = arith.constant 17 : index
    %927 = vector.load %arg17[%c0_410, %c17_411] : memref<2x358xf32, #tpu.memory_space<vmem>>, vector<1x256xf32>
    %c1_412 = arith.constant 1 : index
    %c17_413 = arith.constant 17 : index
    %928 = vector.load %arg17[%c1_412, %c17_413] : memref<2x358xf32, #tpu.memory_space<vmem>>, vector<1x256xf32>
    %c8_414 = arith.constant 8 : index
    %929 = memref.load %arg5[%c8_414] : memref<98xf32, #tpu.memory_space<smem>>
    %930 = vector.broadcast %929 : f32 to vector<1x256xf32>
    %931 = arith.mulf %930, %927 : vector<1x256xf32>
    %c57_415 = arith.constant 57 : index
    %932 = memref.load %arg5[%c57_415] : memref<98xf32, #tpu.memory_space<smem>>
    %933 = vector.broadcast %932 : f32 to vector<1x256xf32>
    %934 = arith.mulf %933, %928 : vector<1x256xf32>
    %935 = arith.addf %931, %934 : vector<1x256xf32>
    %936 = arith.mulf %935, %782 : vector<1x256xf32>
    %937 = arith.addf %926, %936 : vector<1x256xf32>
    %c0_416 = arith.constant 0 : index
    %c18_417 = arith.constant 18 : index
    %938 = vector.load %arg17[%c0_416, %c18_417] : memref<2x358xf32, #tpu.memory_space<vmem>>, vector<1x256xf32>
    %c1_418 = arith.constant 1 : index
    %c18_419 = arith.constant 18 : index
    %939 = vector.load %arg17[%c1_418, %c18_419] : memref<2x358xf32, #tpu.memory_space<vmem>>, vector<1x256xf32>
    %c9_420 = arith.constant 9 : index
    %940 = memref.load %arg5[%c9_420] : memref<98xf32, #tpu.memory_space<smem>>
    %941 = vector.broadcast %940 : f32 to vector<1x256xf32>
    %942 = arith.mulf %941, %938 : vector<1x256xf32>
    %c58_421 = arith.constant 58 : index
    %943 = memref.load %arg5[%c58_421] : memref<98xf32, #tpu.memory_space<smem>>
    %944 = vector.broadcast %943 : f32 to vector<1x256xf32>
    %945 = arith.mulf %944, %939 : vector<1x256xf32>
    %946 = arith.addf %942, %945 : vector<1x256xf32>
    %947 = arith.mulf %946, %793 : vector<1x256xf32>
    %948 = arith.addf %937, %947 : vector<1x256xf32>
    %c0_422 = arith.constant 0 : index
    %c19_423 = arith.constant 19 : index
    %949 = vector.load %arg17[%c0_422, %c19_423] : memref<2x358xf32, #tpu.memory_space<vmem>>, vector<1x256xf32>
    %c1_424 = arith.constant 1 : index
    %c19_425 = arith.constant 19 : index
    %950 = vector.load %arg17[%c1_424, %c19_425] : memref<2x358xf32, #tpu.memory_space<vmem>>, vector<1x256xf32>
    %c10_426 = arith.constant 10 : index
    %951 = memref.load %arg5[%c10_426] : memref<98xf32, #tpu.memory_space<smem>>
    %952 = vector.broadcast %951 : f32 to vector<1x256xf32>
    %953 = arith.mulf %952, %949 : vector<1x256xf32>
    %c59_427 = arith.constant 59 : index
    %954 = memref.load %arg5[%c59_427] : memref<98xf32, #tpu.memory_space<smem>>
    %955 = vector.broadcast %954 : f32 to vector<1x256xf32>
    %956 = arith.mulf %955, %950 : vector<1x256xf32>
    %957 = arith.addf %953, %956 : vector<1x256xf32>
    %958 = arith.addf %948, %957 : vector<1x256xf32>
    %c0_428 = arith.constant 0 : index
    %c20_429 = arith.constant 20 : index
    %959 = vector.load %arg17[%c0_428, %c20_429] : memref<2x358xf32, #tpu.memory_space<vmem>>, vector<1x256xf32>
    %c1_430 = arith.constant 1 : index
    %c20_431 = arith.constant 20 : index
    %960 = vector.load %arg17[%c1_430, %c20_431] : memref<2x358xf32, #tpu.memory_space<vmem>>, vector<1x256xf32>
    %c11_432 = arith.constant 11 : index
    %961 = memref.load %arg5[%c11_432] : memref<98xf32, #tpu.memory_space<smem>>
    %962 = vector.broadcast %961 : f32 to vector<1x256xf32>
    %963 = arith.mulf %962, %959 : vector<1x256xf32>
    %c60_433 = arith.constant 60 : index
    %964 = memref.load %arg5[%c60_433] : memref<98xf32, #tpu.memory_space<smem>>
    %965 = vector.broadcast %964 : f32 to vector<1x256xf32>
    %966 = arith.mulf %965, %960 : vector<1x256xf32>
    %967 = arith.addf %963, %966 : vector<1x256xf32>
    %968 = arith.mulf %967, %804 : vector<1x256xf32>
    %969 = arith.addf %958, %968 : vector<1x256xf32>
    %c0_434 = arith.constant 0 : index
    %c21_435 = arith.constant 21 : index
    %970 = vector.load %arg17[%c0_434, %c21_435] : memref<2x358xf32, #tpu.memory_space<vmem>>, vector<1x256xf32>
    %c1_436 = arith.constant 1 : index
    %c21_437 = arith.constant 21 : index
    %971 = vector.load %arg17[%c1_436, %c21_437] : memref<2x358xf32, #tpu.memory_space<vmem>>, vector<1x256xf32>
    %c12_438 = arith.constant 12 : index
    %972 = memref.load %arg5[%c12_438] : memref<98xf32, #tpu.memory_space<smem>>
    %973 = vector.broadcast %972 : f32 to vector<1x256xf32>
    %974 = arith.mulf %973, %970 : vector<1x256xf32>
    %c61_439 = arith.constant 61 : index
    %975 = memref.load %arg5[%c61_439] : memref<98xf32, #tpu.memory_space<smem>>
    %976 = vector.broadcast %975 : f32 to vector<1x256xf32>
    %977 = arith.mulf %976, %971 : vector<1x256xf32>
    %978 = arith.addf %974, %977 : vector<1x256xf32>
    %979 = arith.mulf %978, %815 : vector<1x256xf32>
    %980 = arith.addf %969, %979 : vector<1x256xf32>
    %c0_440 = arith.constant 0 : index
    %c22_441 = arith.constant 22 : index
    %981 = vector.load %arg17[%c0_440, %c22_441] : memref<2x358xf32, #tpu.memory_space<vmem>>, vector<1x256xf32>
    %c1_442 = arith.constant 1 : index
    %c22_443 = arith.constant 22 : index
    %982 = vector.load %arg17[%c1_442, %c22_443] : memref<2x358xf32, #tpu.memory_space<vmem>>, vector<1x256xf32>
    %c13_444 = arith.constant 13 : index
    %983 = memref.load %arg5[%c13_444] : memref<98xf32, #tpu.memory_space<smem>>
    %984 = vector.broadcast %983 : f32 to vector<1x256xf32>
    %985 = arith.mulf %984, %981 : vector<1x256xf32>
    %c62_445 = arith.constant 62 : index
    %986 = memref.load %arg5[%c62_445] : memref<98xf32, #tpu.memory_space<smem>>
    %987 = vector.broadcast %986 : f32 to vector<1x256xf32>
    %988 = arith.mulf %987, %982 : vector<1x256xf32>
    %989 = arith.addf %985, %988 : vector<1x256xf32>
    %990 = arith.mulf %989, %826 : vector<1x256xf32>
    %991 = arith.addf %980, %990 : vector<1x256xf32>
    %c0_446 = arith.constant 0 : index
    %c32_447 = arith.constant 32 : index
    %992 = vector.load %arg17[%c0_446, %c32_447] : memref<2x358xf32, #tpu.memory_space<vmem>>, vector<1x256xf32>
    %c1_448 = arith.constant 1 : index
    %c32_449 = arith.constant 32 : index
    %993 = vector.load %arg17[%c1_448, %c32_449] : memref<2x358xf32, #tpu.memory_space<vmem>>, vector<1x256xf32>
    %c14_450 = arith.constant 14 : index
    %994 = memref.load %arg5[%c14_450] : memref<98xf32, #tpu.memory_space<smem>>
    %995 = vector.broadcast %994 : f32 to vector<1x256xf32>
    %996 = arith.mulf %995, %992 : vector<1x256xf32>
    %c63_451 = arith.constant 63 : index
    %997 = memref.load %arg5[%c63_451] : memref<98xf32, #tpu.memory_space<smem>>
    %998 = vector.broadcast %997 : f32 to vector<1x256xf32>
    %999 = arith.mulf %998, %993 : vector<1x256xf32>
    %1000 = arith.addf %996, %999 : vector<1x256xf32>
    %1001 = arith.mulf %1000, %771 : vector<1x256xf32>
    %1002 = arith.addf %991, %1001 : vector<1x256xf32>
    %c0_452 = arith.constant 0 : index
    %c33_453 = arith.constant 33 : index
    %1003 = vector.load %arg17[%c0_452, %c33_453] : memref<2x358xf32, #tpu.memory_space<vmem>>, vector<1x256xf32>
    %c1_454 = arith.constant 1 : index
    %c33_455 = arith.constant 33 : index
    %1004 = vector.load %arg17[%c1_454, %c33_455] : memref<2x358xf32, #tpu.memory_space<vmem>>, vector<1x256xf32>
    %c15_456 = arith.constant 15 : index
    %1005 = memref.load %arg5[%c15_456] : memref<98xf32, #tpu.memory_space<smem>>
    %1006 = vector.broadcast %1005 : f32 to vector<1x256xf32>
    %1007 = arith.mulf %1006, %1003 : vector<1x256xf32>
    %c64_457 = arith.constant 64 : index
    %1008 = memref.load %arg5[%c64_457] : memref<98xf32, #tpu.memory_space<smem>>
    %1009 = vector.broadcast %1008 : f32 to vector<1x256xf32>
    %1010 = arith.mulf %1009, %1004 : vector<1x256xf32>
    %1011 = arith.addf %1007, %1010 : vector<1x256xf32>
    %1012 = arith.mulf %1011, %782 : vector<1x256xf32>
    %1013 = arith.addf %1002, %1012 : vector<1x256xf32>
    %c0_458 = arith.constant 0 : index
    %c34_459 = arith.constant 34 : index
    %1014 = vector.load %arg17[%c0_458, %c34_459] : memref<2x358xf32, #tpu.memory_space<vmem>>, vector<1x256xf32>
    %c1_460 = arith.constant 1 : index
    %c34_461 = arith.constant 34 : index
    %1015 = vector.load %arg17[%c1_460, %c34_461] : memref<2x358xf32, #tpu.memory_space<vmem>>, vector<1x256xf32>
    %c16_462 = arith.constant 16 : index
    %1016 = memref.load %arg5[%c16_462] : memref<98xf32, #tpu.memory_space<smem>>
    %1017 = vector.broadcast %1016 : f32 to vector<1x256xf32>
    %1018 = arith.mulf %1017, %1014 : vector<1x256xf32>
    %c65_463 = arith.constant 65 : index
    %1019 = memref.load %arg5[%c65_463] : memref<98xf32, #tpu.memory_space<smem>>
    %1020 = vector.broadcast %1019 : f32 to vector<1x256xf32>
    %1021 = arith.mulf %1020, %1015 : vector<1x256xf32>
    %1022 = arith.addf %1018, %1021 : vector<1x256xf32>
    %1023 = arith.mulf %1022, %793 : vector<1x256xf32>
    %1024 = arith.addf %1013, %1023 : vector<1x256xf32>
    %c0_464 = arith.constant 0 : index
    %c35_465 = arith.constant 35 : index
    %1025 = vector.load %arg17[%c0_464, %c35_465] : memref<2x358xf32, #tpu.memory_space<vmem>>, vector<1x256xf32>
    %c1_466 = arith.constant 1 : index
    %c35_467 = arith.constant 35 : index
    %1026 = vector.load %arg17[%c1_466, %c35_467] : memref<2x358xf32, #tpu.memory_space<vmem>>, vector<1x256xf32>
    %c17_468 = arith.constant 17 : index
    %1027 = memref.load %arg5[%c17_468] : memref<98xf32, #tpu.memory_space<smem>>
    %1028 = vector.broadcast %1027 : f32 to vector<1x256xf32>
    %1029 = arith.mulf %1028, %1025 : vector<1x256xf32>
    %c66_469 = arith.constant 66 : index
    %1030 = memref.load %arg5[%c66_469] : memref<98xf32, #tpu.memory_space<smem>>
    %1031 = vector.broadcast %1030 : f32 to vector<1x256xf32>
    %1032 = arith.mulf %1031, %1026 : vector<1x256xf32>
    %1033 = arith.addf %1029, %1032 : vector<1x256xf32>
    %1034 = arith.addf %1024, %1033 : vector<1x256xf32>
    %c0_470 = arith.constant 0 : index
    %c36_471 = arith.constant 36 : index
    %1035 = vector.load %arg17[%c0_470, %c36_471] : memref<2x358xf32, #tpu.memory_space<vmem>>, vector<1x256xf32>
    %c1_472 = arith.constant 1 : index
    %c36_473 = arith.constant 36 : index
    %1036 = vector.load %arg17[%c1_472, %c36_473] : memref<2x358xf32, #tpu.memory_space<vmem>>, vector<1x256xf32>
    %c18_474 = arith.constant 18 : index
    %1037 = memref.load %arg5[%c18_474] : memref<98xf32, #tpu.memory_space<smem>>
    %1038 = vector.broadcast %1037 : f32 to vector<1x256xf32>
    %1039 = arith.mulf %1038, %1035 : vector<1x256xf32>
    %c67_475 = arith.constant 67 : index
    %1040 = memref.load %arg5[%c67_475] : memref<98xf32, #tpu.memory_space<smem>>
    %1041 = vector.broadcast %1040 : f32 to vector<1x256xf32>
    %1042 = arith.mulf %1041, %1036 : vector<1x256xf32>
    %1043 = arith.addf %1039, %1042 : vector<1x256xf32>
    %1044 = arith.mulf %1043, %804 : vector<1x256xf32>
    %1045 = arith.addf %1034, %1044 : vector<1x256xf32>
    %c0_476 = arith.constant 0 : index
    %c37_477 = arith.constant 37 : index
    %1046 = vector.load %arg17[%c0_476, %c37_477] : memref<2x358xf32, #tpu.memory_space<vmem>>, vector<1x256xf32>
    %c1_478 = arith.constant 1 : index
    %c37_479 = arith.constant 37 : index
    %1047 = vector.load %arg17[%c1_478, %c37_479] : memref<2x358xf32, #tpu.memory_space<vmem>>, vector<1x256xf32>
    %c19_480 = arith.constant 19 : index
    %1048 = memref.load %arg5[%c19_480] : memref<98xf32, #tpu.memory_space<smem>>
    %1049 = vector.broadcast %1048 : f32 to vector<1x256xf32>
    %1050 = arith.mulf %1049, %1046 : vector<1x256xf32>
    %c68_481 = arith.constant 68 : index
    %1051 = memref.load %arg5[%c68_481] : memref<98xf32, #tpu.memory_space<smem>>
    %1052 = vector.broadcast %1051 : f32 to vector<1x256xf32>
    %1053 = arith.mulf %1052, %1047 : vector<1x256xf32>
    %1054 = arith.addf %1050, %1053 : vector<1x256xf32>
    %1055 = arith.mulf %1054, %815 : vector<1x256xf32>
    %1056 = arith.addf %1045, %1055 : vector<1x256xf32>
    %c0_482 = arith.constant 0 : index
    %c38_483 = arith.constant 38 : index
    %1057 = vector.load %arg17[%c0_482, %c38_483] : memref<2x358xf32, #tpu.memory_space<vmem>>, vector<1x256xf32>
    %c1_484 = arith.constant 1 : index
    %c38_485 = arith.constant 38 : index
    %1058 = vector.load %arg17[%c1_484, %c38_485] : memref<2x358xf32, #tpu.memory_space<vmem>>, vector<1x256xf32>
    %c20_486 = arith.constant 20 : index
    %1059 = memref.load %arg5[%c20_486] : memref<98xf32, #tpu.memory_space<smem>>
    %1060 = vector.broadcast %1059 : f32 to vector<1x256xf32>
    %1061 = arith.mulf %1060, %1057 : vector<1x256xf32>
    %c69_487 = arith.constant 69 : index
    %1062 = memref.load %arg5[%c69_487] : memref<98xf32, #tpu.memory_space<smem>>
    %1063 = vector.broadcast %1062 : f32 to vector<1x256xf32>
    %1064 = arith.mulf %1063, %1058 : vector<1x256xf32>
    %1065 = arith.addf %1061, %1064 : vector<1x256xf32>
    %1066 = arith.mulf %1065, %826 : vector<1x256xf32>
    %1067 = arith.addf %1056, %1066 : vector<1x256xf32>
    %c0_488 = arith.constant 0 : index
    %c48_489 = arith.constant 48 : index
    %1068 = vector.load %arg17[%c0_488, %c48_489] : memref<2x358xf32, #tpu.memory_space<vmem>>, vector<1x256xf32>
    %c1_490 = arith.constant 1 : index
    %c48_491 = arith.constant 48 : index
    %1069 = vector.load %arg17[%c1_490, %c48_491] : memref<2x358xf32, #tpu.memory_space<vmem>>, vector<1x256xf32>
    %c21_492 = arith.constant 21 : index
    %1070 = memref.load %arg5[%c21_492] : memref<98xf32, #tpu.memory_space<smem>>
    %1071 = vector.broadcast %1070 : f32 to vector<1x256xf32>
    %1072 = arith.mulf %1071, %1068 : vector<1x256xf32>
    %c70_493 = arith.constant 70 : index
    %1073 = memref.load %arg5[%c70_493] : memref<98xf32, #tpu.memory_space<smem>>
    %1074 = vector.broadcast %1073 : f32 to vector<1x256xf32>
    %1075 = arith.mulf %1074, %1069 : vector<1x256xf32>
    %1076 = arith.addf %1072, %1075 : vector<1x256xf32>
    %1077 = arith.mulf %1076, %771 : vector<1x256xf32>
    %1078 = arith.addf %1067, %1077 : vector<1x256xf32>
    %c0_494 = arith.constant 0 : index
    %c49_495 = arith.constant 49 : index
    %1079 = vector.load %arg17[%c0_494, %c49_495] : memref<2x358xf32, #tpu.memory_space<vmem>>, vector<1x256xf32>
    %c1_496 = arith.constant 1 : index
    %c49_497 = arith.constant 49 : index
    %1080 = vector.load %arg17[%c1_496, %c49_497] : memref<2x358xf32, #tpu.memory_space<vmem>>, vector<1x256xf32>
    %c22_498 = arith.constant 22 : index
    %1081 = memref.load %arg5[%c22_498] : memref<98xf32, #tpu.memory_space<smem>>
    %1082 = vector.broadcast %1081 : f32 to vector<1x256xf32>
    %1083 = arith.mulf %1082, %1079 : vector<1x256xf32>
    %c71_499 = arith.constant 71 : index
    %1084 = memref.load %arg5[%c71_499] : memref<98xf32, #tpu.memory_space<smem>>
    %1085 = vector.broadcast %1084 : f32 to vector<1x256xf32>
    %1086 = arith.mulf %1085, %1080 : vector<1x256xf32>
    %1087 = arith.addf %1083, %1086 : vector<1x256xf32>
    %1088 = arith.mulf %1087, %782 : vector<1x256xf32>
    %1089 = arith.addf %1078, %1088 : vector<1x256xf32>
    %c0_500 = arith.constant 0 : index
    %c50_501 = arith.constant 50 : index
    %1090 = vector.load %arg17[%c0_500, %c50_501] : memref<2x358xf32, #tpu.memory_space<vmem>>, vector<1x256xf32>
    %c1_502 = arith.constant 1 : index
    %c50_503 = arith.constant 50 : index
    %1091 = vector.load %arg17[%c1_502, %c50_503] : memref<2x358xf32, #tpu.memory_space<vmem>>, vector<1x256xf32>
    %c23_504 = arith.constant 23 : index
    %1092 = memref.load %arg5[%c23_504] : memref<98xf32, #tpu.memory_space<smem>>
    %1093 = vector.broadcast %1092 : f32 to vector<1x256xf32>
    %1094 = arith.mulf %1093, %1090 : vector<1x256xf32>
    %c72_505 = arith.constant 72 : index
    %1095 = memref.load %arg5[%c72_505] : memref<98xf32, #tpu.memory_space<smem>>
    %1096 = vector.broadcast %1095 : f32 to vector<1x256xf32>
    %1097 = arith.mulf %1096, %1091 : vector<1x256xf32>
    %1098 = arith.addf %1094, %1097 : vector<1x256xf32>
    %1099 = arith.mulf %1098, %793 : vector<1x256xf32>
    %1100 = arith.addf %1089, %1099 : vector<1x256xf32>
    %c0_506 = arith.constant 0 : index
    %c51_507 = arith.constant 51 : index
    %1101 = vector.load %arg17[%c0_506, %c51_507] : memref<2x358xf32, #tpu.memory_space<vmem>>, vector<1x256xf32>
    %c1_508 = arith.constant 1 : index
    %c51_509 = arith.constant 51 : index
    %1102 = vector.load %arg17[%c1_508, %c51_509] : memref<2x358xf32, #tpu.memory_space<vmem>>, vector<1x256xf32>
    %c24_510 = arith.constant 24 : index
    %1103 = memref.load %arg5[%c24_510] : memref<98xf32, #tpu.memory_space<smem>>
    %1104 = vector.broadcast %1103 : f32 to vector<1x256xf32>
    %1105 = arith.mulf %1104, %1101 : vector<1x256xf32>
    %c73_511 = arith.constant 73 : index
    %1106 = memref.load %arg5[%c73_511] : memref<98xf32, #tpu.memory_space<smem>>
    %1107 = vector.broadcast %1106 : f32 to vector<1x256xf32>
    %1108 = arith.mulf %1107, %1102 : vector<1x256xf32>
    %1109 = arith.addf %1105, %1108 : vector<1x256xf32>
    %1110 = arith.addf %1100, %1109 : vector<1x256xf32>
    %c0_512 = arith.constant 0 : index
    %c52_513 = arith.constant 52 : index
    %1111 = vector.load %arg17[%c0_512, %c52_513] : memref<2x358xf32, #tpu.memory_space<vmem>>, vector<1x256xf32>
    %c1_514 = arith.constant 1 : index
    %c52_515 = arith.constant 52 : index
    %1112 = vector.load %arg17[%c1_514, %c52_515] : memref<2x358xf32, #tpu.memory_space<vmem>>, vector<1x256xf32>
    %c25_516 = arith.constant 25 : index
    %1113 = memref.load %arg5[%c25_516] : memref<98xf32, #tpu.memory_space<smem>>
    %1114 = vector.broadcast %1113 : f32 to vector<1x256xf32>
    %1115 = arith.mulf %1114, %1111 : vector<1x256xf32>
    %c74_517 = arith.constant 74 : index
    %1116 = memref.load %arg5[%c74_517] : memref<98xf32, #tpu.memory_space<smem>>
    %1117 = vector.broadcast %1116 : f32 to vector<1x256xf32>
    %1118 = arith.mulf %1117, %1112 : vector<1x256xf32>
    %1119 = arith.addf %1115, %1118 : vector<1x256xf32>
    %1120 = arith.mulf %1119, %804 : vector<1x256xf32>
    %1121 = arith.addf %1110, %1120 : vector<1x256xf32>
    %c0_518 = arith.constant 0 : index
    %c53_519 = arith.constant 53 : index
    %1122 = vector.load %arg17[%c0_518, %c53_519] : memref<2x358xf32, #tpu.memory_space<vmem>>, vector<1x256xf32>
    %c1_520 = arith.constant 1 : index
    %c53_521 = arith.constant 53 : index
    %1123 = vector.load %arg17[%c1_520, %c53_521] : memref<2x358xf32, #tpu.memory_space<vmem>>, vector<1x256xf32>
    %c26_522 = arith.constant 26 : index
    %1124 = memref.load %arg5[%c26_522] : memref<98xf32, #tpu.memory_space<smem>>
    %1125 = vector.broadcast %1124 : f32 to vector<1x256xf32>
    %1126 = arith.mulf %1125, %1122 : vector<1x256xf32>
    %c75_523 = arith.constant 75 : index
    %1127 = memref.load %arg5[%c75_523] : memref<98xf32, #tpu.memory_space<smem>>
    %1128 = vector.broadcast %1127 : f32 to vector<1x256xf32>
    %1129 = arith.mulf %1128, %1123 : vector<1x256xf32>
    %1130 = arith.addf %1126, %1129 : vector<1x256xf32>
    %1131 = arith.mulf %1130, %815 : vector<1x256xf32>
    %1132 = arith.addf %1121, %1131 : vector<1x256xf32>
    %c0_524 = arith.constant 0 : index
    %c54_525 = arith.constant 54 : index
    %1133 = vector.load %arg17[%c0_524, %c54_525] : memref<2x358xf32, #tpu.memory_space<vmem>>, vector<1x256xf32>
    %c1_526 = arith.constant 1 : index
    %c54_527 = arith.constant 54 : index
    %1134 = vector.load %arg17[%c1_526, %c54_527] : memref<2x358xf32, #tpu.memory_space<vmem>>, vector<1x256xf32>
    %c27_528 = arith.constant 27 : index
    %1135 = memref.load %arg5[%c27_528] : memref<98xf32, #tpu.memory_space<smem>>
    %1136 = vector.broadcast %1135 : f32 to vector<1x256xf32>
    %1137 = arith.mulf %1136, %1133 : vector<1x256xf32>
    %c76_529 = arith.constant 76 : index
    %1138 = memref.load %arg5[%c76_529] : memref<98xf32, #tpu.memory_space<smem>>
    %1139 = vector.broadcast %1138 : f32 to vector<1x256xf32>
    %1140 = arith.mulf %1139, %1134 : vector<1x256xf32>
    %1141 = arith.addf %1137, %1140 : vector<1x256xf32>
    %1142 = arith.mulf %1141, %826 : vector<1x256xf32>
    %1143 = arith.addf %1132, %1142 : vector<1x256xf32>
    %c0_530 = arith.constant 0 : index
    %c64_531 = arith.constant 64 : index
    %1144 = vector.load %arg17[%c0_530, %c64_531] : memref<2x358xf32, #tpu.memory_space<vmem>>, vector<1x256xf32>
    %c1_532 = arith.constant 1 : index
    %c64_533 = arith.constant 64 : index
    %1145 = vector.load %arg17[%c1_532, %c64_533] : memref<2x358xf32, #tpu.memory_space<vmem>>, vector<1x256xf32>
    %c28_534 = arith.constant 28 : index
    %1146 = memref.load %arg5[%c28_534] : memref<98xf32, #tpu.memory_space<smem>>
    %1147 = vector.broadcast %1146 : f32 to vector<1x256xf32>
    %1148 = arith.mulf %1147, %1144 : vector<1x256xf32>
    %c77_535 = arith.constant 77 : index
    %1149 = memref.load %arg5[%c77_535] : memref<98xf32, #tpu.memory_space<smem>>
    %1150 = vector.broadcast %1149 : f32 to vector<1x256xf32>
    %1151 = arith.mulf %1150, %1145 : vector<1x256xf32>
    %1152 = arith.addf %1148, %1151 : vector<1x256xf32>
    %1153 = arith.mulf %1152, %771 : vector<1x256xf32>
    %1154 = arith.addf %1143, %1153 : vector<1x256xf32>
    %c0_536 = arith.constant 0 : index
    %c65_537 = arith.constant 65 : index
    %1155 = vector.load %arg17[%c0_536, %c65_537] : memref<2x358xf32, #tpu.memory_space<vmem>>, vector<1x256xf32>
    %c1_538 = arith.constant 1 : index
    %c65_539 = arith.constant 65 : index
    %1156 = vector.load %arg17[%c1_538, %c65_539] : memref<2x358xf32, #tpu.memory_space<vmem>>, vector<1x256xf32>
    %c29_540 = arith.constant 29 : index
    %1157 = memref.load %arg5[%c29_540] : memref<98xf32, #tpu.memory_space<smem>>
    %1158 = vector.broadcast %1157 : f32 to vector<1x256xf32>
    %1159 = arith.mulf %1158, %1155 : vector<1x256xf32>
    %c78_541 = arith.constant 78 : index
    %1160 = memref.load %arg5[%c78_541] : memref<98xf32, #tpu.memory_space<smem>>
    %1161 = vector.broadcast %1160 : f32 to vector<1x256xf32>
    %1162 = arith.mulf %1161, %1156 : vector<1x256xf32>
    %1163 = arith.addf %1159, %1162 : vector<1x256xf32>
    %1164 = arith.mulf %1163, %782 : vector<1x256xf32>
    %1165 = arith.addf %1154, %1164 : vector<1x256xf32>
    %c0_542 = arith.constant 0 : index
    %c66_543 = arith.constant 66 : index
    %1166 = vector.load %arg17[%c0_542, %c66_543] : memref<2x358xf32, #tpu.memory_space<vmem>>, vector<1x256xf32>
    %c1_544 = arith.constant 1 : index
    %c66_545 = arith.constant 66 : index
    %1167 = vector.load %arg17[%c1_544, %c66_545] : memref<2x358xf32, #tpu.memory_space<vmem>>, vector<1x256xf32>
    %c30_546 = arith.constant 30 : index
    %1168 = memref.load %arg5[%c30_546] : memref<98xf32, #tpu.memory_space<smem>>
    %1169 = vector.broadcast %1168 : f32 to vector<1x256xf32>
    %1170 = arith.mulf %1169, %1166 : vector<1x256xf32>
    %c79_547 = arith.constant 79 : index
    %1171 = memref.load %arg5[%c79_547] : memref<98xf32, #tpu.memory_space<smem>>
    %1172 = vector.broadcast %1171 : f32 to vector<1x256xf32>
    %1173 = arith.mulf %1172, %1167 : vector<1x256xf32>
    %1174 = arith.addf %1170, %1173 : vector<1x256xf32>
    %1175 = arith.mulf %1174, %793 : vector<1x256xf32>
    %1176 = arith.addf %1165, %1175 : vector<1x256xf32>
    %c0_548 = arith.constant 0 : index
    %c67_549 = arith.constant 67 : index
    %1177 = vector.load %arg17[%c0_548, %c67_549] : memref<2x358xf32, #tpu.memory_space<vmem>>, vector<1x256xf32>
    %c1_550 = arith.constant 1 : index
    %c67_551 = arith.constant 67 : index
    %1178 = vector.load %arg17[%c1_550, %c67_551] : memref<2x358xf32, #tpu.memory_space<vmem>>, vector<1x256xf32>
    %c31_552 = arith.constant 31 : index
    %1179 = memref.load %arg5[%c31_552] : memref<98xf32, #tpu.memory_space<smem>>
    %1180 = vector.broadcast %1179 : f32 to vector<1x256xf32>
    %1181 = arith.mulf %1180, %1177 : vector<1x256xf32>
    %c80_553 = arith.constant 80 : index
    %1182 = memref.load %arg5[%c80_553] : memref<98xf32, #tpu.memory_space<smem>>
    %1183 = vector.broadcast %1182 : f32 to vector<1x256xf32>
    %1184 = arith.mulf %1183, %1178 : vector<1x256xf32>
    %1185 = arith.addf %1181, %1184 : vector<1x256xf32>
    %1186 = arith.addf %1176, %1185 : vector<1x256xf32>
    %c0_554 = arith.constant 0 : index
    %c68_555 = arith.constant 68 : index
    %1187 = vector.load %arg17[%c0_554, %c68_555] : memref<2x358xf32, #tpu.memory_space<vmem>>, vector<1x256xf32>
    %c1_556 = arith.constant 1 : index
    %c68_557 = arith.constant 68 : index
    %1188 = vector.load %arg17[%c1_556, %c68_557] : memref<2x358xf32, #tpu.memory_space<vmem>>, vector<1x256xf32>
    %c32_558 = arith.constant 32 : index
    %1189 = memref.load %arg5[%c32_558] : memref<98xf32, #tpu.memory_space<smem>>
    %1190 = vector.broadcast %1189 : f32 to vector<1x256xf32>
    %1191 = arith.mulf %1190, %1187 : vector<1x256xf32>
    %c81_559 = arith.constant 81 : index
    %1192 = memref.load %arg5[%c81_559] : memref<98xf32, #tpu.memory_space<smem>>
    %1193 = vector.broadcast %1192 : f32 to vector<1x256xf32>
    %1194 = arith.mulf %1193, %1188 : vector<1x256xf32>
    %1195 = arith.addf %1191, %1194 : vector<1x256xf32>
    %1196 = arith.mulf %1195, %804 : vector<1x256xf32>
    %1197 = arith.addf %1186, %1196 : vector<1x256xf32>
    %c0_560 = arith.constant 0 : index
    %c69_561 = arith.constant 69 : index
    %1198 = vector.load %arg17[%c0_560, %c69_561] : memref<2x358xf32, #tpu.memory_space<vmem>>, vector<1x256xf32>
    %c1_562 = arith.constant 1 : index
    %c69_563 = arith.constant 69 : index
    %1199 = vector.load %arg17[%c1_562, %c69_563] : memref<2x358xf32, #tpu.memory_space<vmem>>, vector<1x256xf32>
    %c33_564 = arith.constant 33 : index
    %1200 = memref.load %arg5[%c33_564] : memref<98xf32, #tpu.memory_space<smem>>
    %1201 = vector.broadcast %1200 : f32 to vector<1x256xf32>
    %1202 = arith.mulf %1201, %1198 : vector<1x256xf32>
    %c82_565 = arith.constant 82 : index
    %1203 = memref.load %arg5[%c82_565] : memref<98xf32, #tpu.memory_space<smem>>
    %1204 = vector.broadcast %1203 : f32 to vector<1x256xf32>
    %1205 = arith.mulf %1204, %1199 : vector<1x256xf32>
    %1206 = arith.addf %1202, %1205 : vector<1x256xf32>
    %1207 = arith.mulf %1206, %815 : vector<1x256xf32>
    %1208 = arith.addf %1197, %1207 : vector<1x256xf32>
    %c0_566 = arith.constant 0 : index
    %c70_567 = arith.constant 70 : index
    %1209 = vector.load %arg17[%c0_566, %c70_567] : memref<2x358xf32, #tpu.memory_space<vmem>>, vector<1x256xf32>
    %c1_568 = arith.constant 1 : index
    %c70_569 = arith.constant 70 : index
    %1210 = vector.load %arg17[%c1_568, %c70_569] : memref<2x358xf32, #tpu.memory_space<vmem>>, vector<1x256xf32>
    %c34_570 = arith.constant 34 : index
    %1211 = memref.load %arg5[%c34_570] : memref<98xf32, #tpu.memory_space<smem>>
    %1212 = vector.broadcast %1211 : f32 to vector<1x256xf32>
    %1213 = arith.mulf %1212, %1209 : vector<1x256xf32>
    %c83_571 = arith.constant 83 : index
    %1214 = memref.load %arg5[%c83_571] : memref<98xf32, #tpu.memory_space<smem>>
    %1215 = vector.broadcast %1214 : f32 to vector<1x256xf32>
    %1216 = arith.mulf %1215, %1210 : vector<1x256xf32>
    %1217 = arith.addf %1213, %1216 : vector<1x256xf32>
    %1218 = arith.mulf %1217, %826 : vector<1x256xf32>
    %1219 = arith.addf %1208, %1218 : vector<1x256xf32>
    %c0_572 = arith.constant 0 : index
    %c80_573 = arith.constant 80 : index
    %1220 = vector.load %arg17[%c0_572, %c80_573] : memref<2x358xf32, #tpu.memory_space<vmem>>, vector<1x256xf32>
    %c1_574 = arith.constant 1 : index
    %c80_575 = arith.constant 80 : index
    %1221 = vector.load %arg17[%c1_574, %c80_575] : memref<2x358xf32, #tpu.memory_space<vmem>>, vector<1x256xf32>
    %c35_576 = arith.constant 35 : index
    %1222 = memref.load %arg5[%c35_576] : memref<98xf32, #tpu.memory_space<smem>>
    %1223 = vector.broadcast %1222 : f32 to vector<1x256xf32>
    %1224 = arith.mulf %1223, %1220 : vector<1x256xf32>
    %c84_577 = arith.constant 84 : index
    %1225 = memref.load %arg5[%c84_577] : memref<98xf32, #tpu.memory_space<smem>>
    %1226 = vector.broadcast %1225 : f32 to vector<1x256xf32>
    %1227 = arith.mulf %1226, %1221 : vector<1x256xf32>
    %1228 = arith.addf %1224, %1227 : vector<1x256xf32>
    %1229 = arith.mulf %1228, %771 : vector<1x256xf32>
    %1230 = arith.addf %1219, %1229 : vector<1x256xf32>
    %c0_578 = arith.constant 0 : index
    %c81_579 = arith.constant 81 : index
    %1231 = vector.load %arg17[%c0_578, %c81_579] : memref<2x358xf32, #tpu.memory_space<vmem>>, vector<1x256xf32>
    %c1_580 = arith.constant 1 : index
    %c81_581 = arith.constant 81 : index
    %1232 = vector.load %arg17[%c1_580, %c81_581] : memref<2x358xf32, #tpu.memory_space<vmem>>, vector<1x256xf32>
    %c36_582 = arith.constant 36 : index
    %1233 = memref.load %arg5[%c36_582] : memref<98xf32, #tpu.memory_space<smem>>
    %1234 = vector.broadcast %1233 : f32 to vector<1x256xf32>
    %1235 = arith.mulf %1234, %1231 : vector<1x256xf32>
    %c85_583 = arith.constant 85 : index
    %1236 = memref.load %arg5[%c85_583] : memref<98xf32, #tpu.memory_space<smem>>
    %1237 = vector.broadcast %1236 : f32 to vector<1x256xf32>
    %1238 = arith.mulf %1237, %1232 : vector<1x256xf32>
    %1239 = arith.addf %1235, %1238 : vector<1x256xf32>
    %1240 = arith.mulf %1239, %782 : vector<1x256xf32>
    %1241 = arith.addf %1230, %1240 : vector<1x256xf32>
    %c0_584 = arith.constant 0 : index
    %c82_585 = arith.constant 82 : index
    %1242 = vector.load %arg17[%c0_584, %c82_585] : memref<2x358xf32, #tpu.memory_space<vmem>>, vector<1x256xf32>
    %c1_586 = arith.constant 1 : index
    %c82_587 = arith.constant 82 : index
    %1243 = vector.load %arg17[%c1_586, %c82_587] : memref<2x358xf32, #tpu.memory_space<vmem>>, vector<1x256xf32>
    %c37_588 = arith.constant 37 : index
    %1244 = memref.load %arg5[%c37_588] : memref<98xf32, #tpu.memory_space<smem>>
    %1245 = vector.broadcast %1244 : f32 to vector<1x256xf32>
    %1246 = arith.mulf %1245, %1242 : vector<1x256xf32>
    %c86_589 = arith.constant 86 : index
    %1247 = memref.load %arg5[%c86_589] : memref<98xf32, #tpu.memory_space<smem>>
    %1248 = vector.broadcast %1247 : f32 to vector<1x256xf32>
    %1249 = arith.mulf %1248, %1243 : vector<1x256xf32>
    %1250 = arith.addf %1246, %1249 : vector<1x256xf32>
    %1251 = arith.mulf %1250, %793 : vector<1x256xf32>
    %1252 = arith.addf %1241, %1251 : vector<1x256xf32>
    %c0_590 = arith.constant 0 : index
    %c83_591 = arith.constant 83 : index
    %1253 = vector.load %arg17[%c0_590, %c83_591] : memref<2x358xf32, #tpu.memory_space<vmem>>, vector<1x256xf32>
    %c1_592 = arith.constant 1 : index
    %c83_593 = arith.constant 83 : index
    %1254 = vector.load %arg17[%c1_592, %c83_593] : memref<2x358xf32, #tpu.memory_space<vmem>>, vector<1x256xf32>
    %c38_594 = arith.constant 38 : index
    %1255 = memref.load %arg5[%c38_594] : memref<98xf32, #tpu.memory_space<smem>>
    %1256 = vector.broadcast %1255 : f32 to vector<1x256xf32>
    %1257 = arith.mulf %1256, %1253 : vector<1x256xf32>
    %c87_595 = arith.constant 87 : index
    %1258 = memref.load %arg5[%c87_595] : memref<98xf32, #tpu.memory_space<smem>>
    %1259 = vector.broadcast %1258 : f32 to vector<1x256xf32>
    %1260 = arith.mulf %1259, %1254 : vector<1x256xf32>
    %1261 = arith.addf %1257, %1260 : vector<1x256xf32>
    %1262 = arith.addf %1252, %1261 : vector<1x256xf32>
    %c0_596 = arith.constant 0 : index
    %c84_597 = arith.constant 84 : index
    %1263 = vector.load %arg17[%c0_596, %c84_597] : memref<2x358xf32, #tpu.memory_space<vmem>>, vector<1x256xf32>
    %c1_598 = arith.constant 1 : index
    %c84_599 = arith.constant 84 : index
    %1264 = vector.load %arg17[%c1_598, %c84_599] : memref<2x358xf32, #tpu.memory_space<vmem>>, vector<1x256xf32>
    %c39_600 = arith.constant 39 : index
    %1265 = memref.load %arg5[%c39_600] : memref<98xf32, #tpu.memory_space<smem>>
    %1266 = vector.broadcast %1265 : f32 to vector<1x256xf32>
    %1267 = arith.mulf %1266, %1263 : vector<1x256xf32>
    %c88_601 = arith.constant 88 : index
    %1268 = memref.load %arg5[%c88_601] : memref<98xf32, #tpu.memory_space<smem>>
    %1269 = vector.broadcast %1268 : f32 to vector<1x256xf32>
    %1270 = arith.mulf %1269, %1264 : vector<1x256xf32>
    %1271 = arith.addf %1267, %1270 : vector<1x256xf32>
    %1272 = arith.mulf %1271, %804 : vector<1x256xf32>
    %1273 = arith.addf %1262, %1272 : vector<1x256xf32>
    %c0_602 = arith.constant 0 : index
    %c85_603 = arith.constant 85 : index
    %1274 = vector.load %arg17[%c0_602, %c85_603] : memref<2x358xf32, #tpu.memory_space<vmem>>, vector<1x256xf32>
    %c1_604 = arith.constant 1 : index
    %c85_605 = arith.constant 85 : index
    %1275 = vector.load %arg17[%c1_604, %c85_605] : memref<2x358xf32, #tpu.memory_space<vmem>>, vector<1x256xf32>
    %c40_606 = arith.constant 40 : index
    %1276 = memref.load %arg5[%c40_606] : memref<98xf32, #tpu.memory_space<smem>>
    %1277 = vector.broadcast %1276 : f32 to vector<1x256xf32>
    %1278 = arith.mulf %1277, %1274 : vector<1x256xf32>
    %c89_607 = arith.constant 89 : index
    %1279 = memref.load %arg5[%c89_607] : memref<98xf32, #tpu.memory_space<smem>>
    %1280 = vector.broadcast %1279 : f32 to vector<1x256xf32>
    %1281 = arith.mulf %1280, %1275 : vector<1x256xf32>
    %1282 = arith.addf %1278, %1281 : vector<1x256xf32>
    %1283 = arith.mulf %1282, %815 : vector<1x256xf32>
    %1284 = arith.addf %1273, %1283 : vector<1x256xf32>
    %c0_608 = arith.constant 0 : index
    %c86_609 = arith.constant 86 : index
    %1285 = vector.load %arg17[%c0_608, %c86_609] : memref<2x358xf32, #tpu.memory_space<vmem>>, vector<1x256xf32>
    %c1_610 = arith.constant 1 : index
    %c86_611 = arith.constant 86 : index
    %1286 = vector.load %arg17[%c1_610, %c86_611] : memref<2x358xf32, #tpu.memory_space<vmem>>, vector<1x256xf32>
    %c41_612 = arith.constant 41 : index
    %1287 = memref.load %arg5[%c41_612] : memref<98xf32, #tpu.memory_space<smem>>
    %1288 = vector.broadcast %1287 : f32 to vector<1x256xf32>
    %1289 = arith.mulf %1288, %1285 : vector<1x256xf32>
    %c90_613 = arith.constant 90 : index
    %1290 = memref.load %arg5[%c90_613] : memref<98xf32, #tpu.memory_space<smem>>
    %1291 = vector.broadcast %1290 : f32 to vector<1x256xf32>
    %1292 = arith.mulf %1291, %1286 : vector<1x256xf32>
    %1293 = arith.addf %1289, %1292 : vector<1x256xf32>
    %1294 = arith.mulf %1293, %826 : vector<1x256xf32>
    %1295 = arith.addf %1284, %1294 : vector<1x256xf32>
    %c0_614 = arith.constant 0 : index
    %c96_615 = arith.constant 96 : index
    %1296 = vector.load %arg17[%c0_614, %c96_615] : memref<2x358xf32, #tpu.memory_space<vmem>>, vector<1x256xf32>
    %c1_616 = arith.constant 1 : index
    %c96_617 = arith.constant 96 : index
    %1297 = vector.load %arg17[%c1_616, %c96_617] : memref<2x358xf32, #tpu.memory_space<vmem>>, vector<1x256xf32>
    %c42_618 = arith.constant 42 : index
    %1298 = memref.load %arg5[%c42_618] : memref<98xf32, #tpu.memory_space<smem>>
    %1299 = vector.broadcast %1298 : f32 to vector<1x256xf32>
    %1300 = arith.mulf %1299, %1296 : vector<1x256xf32>
    %c91_619 = arith.constant 91 : index
    %1301 = memref.load %arg5[%c91_619] : memref<98xf32, #tpu.memory_space<smem>>
    %1302 = vector.broadcast %1301 : f32 to vector<1x256xf32>
    %1303 = arith.mulf %1302, %1297 : vector<1x256xf32>
    %1304 = arith.addf %1300, %1303 : vector<1x256xf32>
    %1305 = arith.mulf %1304, %771 : vector<1x256xf32>
    %1306 = arith.addf %1295, %1305 : vector<1x256xf32>
    %c0_620 = arith.constant 0 : index
    %c97_621 = arith.constant 97 : index
    %1307 = vector.load %arg17[%c0_620, %c97_621] : memref<2x358xf32, #tpu.memory_space<vmem>>, vector<1x256xf32>
    %c1_622 = arith.constant 1 : index
    %c97_623 = arith.constant 97 : index
    %1308 = vector.load %arg17[%c1_622, %c97_623] : memref<2x358xf32, #tpu.memory_space<vmem>>, vector<1x256xf32>
    %c43_624 = arith.constant 43 : index
    %1309 = memref.load %arg5[%c43_624] : memref<98xf32, #tpu.memory_space<smem>>
    %1310 = vector.broadcast %1309 : f32 to vector<1x256xf32>
    %1311 = arith.mulf %1310, %1307 : vector<1x256xf32>
    %c92_625 = arith.constant 92 : index
    %1312 = memref.load %arg5[%c92_625] : memref<98xf32, #tpu.memory_space<smem>>
    %1313 = vector.broadcast %1312 : f32 to vector<1x256xf32>
    %1314 = arith.mulf %1313, %1308 : vector<1x256xf32>
    %1315 = arith.addf %1311, %1314 : vector<1x256xf32>
    %1316 = arith.mulf %1315, %782 : vector<1x256xf32>
    %1317 = arith.addf %1306, %1316 : vector<1x256xf32>
    %c0_626 = arith.constant 0 : index
    %c98 = arith.constant 98 : index
    %1318 = vector.load %arg17[%c0_626, %c98] : memref<2x358xf32, #tpu.memory_space<vmem>>, vector<1x256xf32>
    %c1_627 = arith.constant 1 : index
    %c98_628 = arith.constant 98 : index
    %1319 = vector.load %arg17[%c1_627, %c98_628] : memref<2x358xf32, #tpu.memory_space<vmem>>, vector<1x256xf32>
    %c44_629 = arith.constant 44 : index
    %1320 = memref.load %arg5[%c44_629] : memref<98xf32, #tpu.memory_space<smem>>
    %1321 = vector.broadcast %1320 : f32 to vector<1x256xf32>
    %1322 = arith.mulf %1321, %1318 : vector<1x256xf32>
    %c93_630 = arith.constant 93 : index
    %1323 = memref.load %arg5[%c93_630] : memref<98xf32, #tpu.memory_space<smem>>
    %1324 = vector.broadcast %1323 : f32 to vector<1x256xf32>
    %1325 = arith.mulf %1324, %1319 : vector<1x256xf32>
    %1326 = arith.addf %1322, %1325 : vector<1x256xf32>
    %1327 = arith.mulf %1326, %793 : vector<1x256xf32>
    %1328 = arith.addf %1317, %1327 : vector<1x256xf32>
    %c0_631 = arith.constant 0 : index
    %c99 = arith.constant 99 : index
    %1329 = vector.load %arg17[%c0_631, %c99] : memref<2x358xf32, #tpu.memory_space<vmem>>, vector<1x256xf32>
    %c1_632 = arith.constant 1 : index
    %c99_633 = arith.constant 99 : index
    %1330 = vector.load %arg17[%c1_632, %c99_633] : memref<2x358xf32, #tpu.memory_space<vmem>>, vector<1x256xf32>
    %c45_634 = arith.constant 45 : index
    %1331 = memref.load %arg5[%c45_634] : memref<98xf32, #tpu.memory_space<smem>>
    %1332 = vector.broadcast %1331 : f32 to vector<1x256xf32>
    %1333 = arith.mulf %1332, %1329 : vector<1x256xf32>
    %c94_635 = arith.constant 94 : index
    %1334 = memref.load %arg5[%c94_635] : memref<98xf32, #tpu.memory_space<smem>>
    %1335 = vector.broadcast %1334 : f32 to vector<1x256xf32>
    %1336 = arith.mulf %1335, %1330 : vector<1x256xf32>
    %1337 = arith.addf %1333, %1336 : vector<1x256xf32>
    %1338 = arith.addf %1328, %1337 : vector<1x256xf32>
    %c0_636 = arith.constant 0 : index
    %c100 = arith.constant 100 : index
    %1339 = vector.load %arg17[%c0_636, %c100] : memref<2x358xf32, #tpu.memory_space<vmem>>, vector<1x256xf32>
    %c1_637 = arith.constant 1 : index
    %c100_638 = arith.constant 100 : index
    %1340 = vector.load %arg17[%c1_637, %c100_638] : memref<2x358xf32, #tpu.memory_space<vmem>>, vector<1x256xf32>
    %c46_639 = arith.constant 46 : index
    %1341 = memref.load %arg5[%c46_639] : memref<98xf32, #tpu.memory_space<smem>>
    %1342 = vector.broadcast %1341 : f32 to vector<1x256xf32>
    %1343 = arith.mulf %1342, %1339 : vector<1x256xf32>
    %c95_640 = arith.constant 95 : index
    %1344 = memref.load %arg5[%c95_640] : memref<98xf32, #tpu.memory_space<smem>>
    %1345 = vector.broadcast %1344 : f32 to vector<1x256xf32>
    %1346 = arith.mulf %1345, %1340 : vector<1x256xf32>
    %1347 = arith.addf %1343, %1346 : vector<1x256xf32>
    %1348 = arith.mulf %1347, %804 : vector<1x256xf32>
    %1349 = arith.addf %1338, %1348 : vector<1x256xf32>
    %c0_641 = arith.constant 0 : index
    %c101 = arith.constant 101 : index
    %1350 = vector.load %arg17[%c0_641, %c101] : memref<2x358xf32, #tpu.memory_space<vmem>>, vector<1x256xf32>
    %c1_642 = arith.constant 1 : index
    %c101_643 = arith.constant 101 : index
    %1351 = vector.load %arg17[%c1_642, %c101_643] : memref<2x358xf32, #tpu.memory_space<vmem>>, vector<1x256xf32>
    %c47_644 = arith.constant 47 : index
    %1352 = memref.load %arg5[%c47_644] : memref<98xf32, #tpu.memory_space<smem>>
    %1353 = vector.broadcast %1352 : f32 to vector<1x256xf32>
    %1354 = arith.mulf %1353, %1350 : vector<1x256xf32>
    %c96_645 = arith.constant 96 : index
    %1355 = memref.load %arg5[%c96_645] : memref<98xf32, #tpu.memory_space<smem>>
    %1356 = vector.broadcast %1355 : f32 to vector<1x256xf32>
    %1357 = arith.mulf %1356, %1351 : vector<1x256xf32>
    %1358 = arith.addf %1354, %1357 : vector<1x256xf32>
    %1359 = arith.mulf %1358, %815 : vector<1x256xf32>
    %1360 = arith.addf %1349, %1359 : vector<1x256xf32>
    %c0_646 = arith.constant 0 : index
    %c102 = arith.constant 102 : index
    %1361 = vector.load %arg17[%c0_646, %c102] : memref<2x358xf32, #tpu.memory_space<vmem>>, vector<1x256xf32>
    %c1_647 = arith.constant 1 : index
    %c102_648 = arith.constant 102 : index
    %1362 = vector.load %arg17[%c1_647, %c102_648] : memref<2x358xf32, #tpu.memory_space<vmem>>, vector<1x256xf32>
    %c48_649 = arith.constant 48 : index
    %1363 = memref.load %arg5[%c48_649] : memref<98xf32, #tpu.memory_space<smem>>
    %1364 = vector.broadcast %1363 : f32 to vector<1x256xf32>
    %1365 = arith.mulf %1364, %1361 : vector<1x256xf32>
    %c97_650 = arith.constant 97 : index
    %1366 = memref.load %arg5[%c97_650] : memref<98xf32, #tpu.memory_space<smem>>
    %1367 = vector.broadcast %1366 : f32 to vector<1x256xf32>
    %1368 = arith.mulf %1367, %1362 : vector<1x256xf32>
    %1369 = arith.addf %1365, %1368 : vector<1x256xf32>
    %1370 = arith.mulf %1369, %826 : vector<1x256xf32>
    %1371 = arith.addf %1360, %1370 : vector<1x256xf32>
    %1372 = arith.negf %1371 : vector<1x256xf32>
    %1373 = math.exp %1372 : vector<1x256xf32>
    %cst_651 = arith.constant 1.000000e+00 : f32
    %1374 = vector.broadcast %cst_651 : f32 to vector<1x256xf32>
    %1375 = arith.addf %1374, %1373 : vector<1x256xf32>
    %1376 = arith.divf %1374, %1375 : vector<1x256xf32>
    %1377 = vector.broadcast %1376 : vector<1x256xf32> to vector<32x256xf32>
    %1378 = arith.mulf %743, %1377 : vector<32x256xf32>
    %cst_652 = arith.constant 0.000000e+00 : f32
    %1379 = vector.broadcast %cst_652 : f32 to vector<32x17xf32>
    %c0_653 = arith.constant 0 : index
    %c0_654 = arith.constant 0 : index
    %1380 = vector.load %arg16[%c0_653, %c0_654] : memref<32x290xf32, #tpu.memory_space<vmem>>, vector<32x17xf32>
    tpu.vector_store %arg16[%c0_653, %c0_654], %1379 {strides = array<i32>} : memref<32x290xf32, #tpu.memory_space<vmem>>, vector<32x17xf32>,
    %cst_655 = arith.constant 0.000000e+00 : f32
    %1381 = vector.broadcast %cst_655 : f32 to vector<32x17xf32>
    %c0_656 = arith.constant 0 : index
    %c273 = arith.constant 273 : index
    %1382 = vector.load %arg16[%c0_656, %c273] : memref<32x290xf32, #tpu.memory_space<vmem>>, vector<32x17xf32>
    tpu.vector_store %arg16[%c0_656, %c273], %1381 {strides = array<i32>} : memref<32x290xf32, #tpu.memory_space<vmem>>, vector<32x17xf32>,
    %c0_657 = arith.constant 0 : index
    %c17_658 = arith.constant 17 : index
    %1383 = vector.load %arg16[%c0_657, %c17_658] : memref<32x290xf32, #tpu.memory_space<vmem>>, vector<32x256xf32>
    tpu.vector_store %arg16[%c0_657, %c17_658], %1378 {strides = array<i32>} : memref<32x290xf32, #tpu.memory_space<vmem>>, vector<32x256xf32>,
    %c0_659 = arith.constant 0 : index
    %c0_660 = arith.constant 0 : index
    %1384 = vector.load %arg16[%c0_659, %c0_660] : memref<32x290xf32, #tpu.memory_space<vmem>>, vector<32x256xf32>
    %1385 = vector.broadcast %793 : vector<1x256xf32> to vector<32x256xf32>
    %1386 = arith.mulf %1384, %1385 : vector<32x256xf32>
    %1387 = arith.truncf %1386 : vector<32x256xf32> to vector<32x256xbf16>
    %c0_661 = arith.constant 0 : index
    %c0_662 = arith.constant 0 : index
    %1388 = vector.load %arg18[%c0_661, %c0_662] : memref<288x256xbf16, #tpu.memory_space<vmem>>, vector<32x256xbf16>
    tpu.vector_store %arg18[%c0_661, %c0_662], %1387 {strides = array<i32>} : memref<288x256xbf16, #tpu.memory_space<vmem>>, vector<32x256xbf16>,
    %c0_663 = arith.constant 0 : index
    %c1_664 = arith.constant 1 : index
    %1389 = vector.load %arg16[%c0_663, %c1_664] : memref<32x290xf32, #tpu.memory_space<vmem>>, vector<32x256xf32>
    %1390 = arith.truncf %1389 : vector<32x256xf32> to vector<32x256xbf16>
    %c32_665 = arith.constant 32 : index
    %c0_666 = arith.constant 0 : index
    %1391 = vector.load %arg18[%c32_665, %c0_666] : memref<288x256xbf16, #tpu.memory_space<vmem>>, vector<32x256xbf16>
    tpu.vector_store %arg18[%c32_665, %c0_666], %1390 {strides = array<i32>} : memref<288x256xbf16, #tpu.memory_space<vmem>>, vector<32x256xbf16>,
    %c0_667 = arith.constant 0 : index
    %c2_668 = arith.constant 2 : index
    %1392 = vector.load %arg16[%c0_667, %c2_668] : memref<32x290xf32, #tpu.memory_space<vmem>>, vector<32x256xf32>
    %1393 = vector.broadcast %804 : vector<1x256xf32> to vector<32x256xf32>
    %1394 = arith.mulf %1392, %1393 : vector<32x256xf32>
    %1395 = arith.truncf %1394 : vector<32x256xf32> to vector<32x256xbf16>
    %c64_669 = arith.constant 64 : index
    %c0_670 = arith.constant 0 : index
    %1396 = vector.load %arg18[%c64_669, %c0_670] : memref<288x256xbf16, #tpu.memory_space<vmem>>, vector<32x256xbf16>
    tpu.vector_store %arg18[%c64_669, %c0_670], %1395 {strides = array<i32>} : memref<288x256xbf16, #tpu.memory_space<vmem>>, vector<32x256xbf16>,
    %c0_671 = arith.constant 0 : index
    %c16_672 = arith.constant 16 : index
    %1397 = vector.load %arg16[%c0_671, %c16_672] : memref<32x290xf32, #tpu.memory_space<vmem>>, vector<32x256xf32>
    %1398 = vector.broadcast %793 : vector<1x256xf32> to vector<32x256xf32>
    %1399 = arith.mulf %1397, %1398 : vector<32x256xf32>
    %1400 = arith.truncf %1399 : vector<32x256xf32> to vector<32x256xbf16>
    %c96_673 = arith.constant 96 : index
    %c0_674 = arith.constant 0 : index
    %1401 = vector.load %arg18[%c96_673, %c0_674] : memref<288x256xbf16, #tpu.memory_space<vmem>>, vector<32x256xbf16>
    tpu.vector_store %arg18[%c96_673, %c0_674], %1400 {strides = array<i32>} : memref<288x256xbf16, #tpu.memory_space<vmem>>, vector<32x256xbf16>,
    %c0_675 = arith.constant 0 : index
    %c17_676 = arith.constant 17 : index
    %1402 = vector.load %arg16[%c0_675, %c17_676] : memref<32x290xf32, #tpu.memory_space<vmem>>, vector<32x256xf32>
    %1403 = arith.truncf %1402 : vector<32x256xf32> to vector<32x256xbf16>
    %c128_677 = arith.constant 128 : index
    %c0_678 = arith.constant 0 : index
    %1404 = vector.load %arg18[%c128_677, %c0_678] : memref<288x256xbf16, #tpu.memory_space<vmem>>, vector<32x256xbf16>
    tpu.vector_store %arg18[%c128_677, %c0_678], %1403 {strides = array<i32>} : memref<288x256xbf16, #tpu.memory_space<vmem>>, vector<32x256xbf16>,
    %c0_679 = arith.constant 0 : index
    %c18_680 = arith.constant 18 : index
    %1405 = vector.load %arg16[%c0_679, %c18_680] : memref<32x290xf32, #tpu.memory_space<vmem>>, vector<32x256xf32>
    %1406 = vector.broadcast %804 : vector<1x256xf32> to vector<32x256xf32>
    %1407 = arith.mulf %1405, %1406 : vector<32x256xf32>
    %1408 = arith.truncf %1407 : vector<32x256xf32> to vector<32x256xbf16>
    %c160_681 = arith.constant 160 : index
    %c0_682 = arith.constant 0 : index
    %1409 = vector.load %arg18[%c160_681, %c0_682] : memref<288x256xbf16, #tpu.memory_space<vmem>>, vector<32x256xbf16>
    tpu.vector_store %arg18[%c160_681, %c0_682], %1408 {strides = array<i32>} : memref<288x256xbf16, #tpu.memory_space<vmem>>, vector<32x256xbf16>,
    %c0_683 = arith.constant 0 : index
    %c32_684 = arith.constant 32 : index
    %1410 = vector.load %arg16[%c0_683, %c32_684] : memref<32x290xf32, #tpu.memory_space<vmem>>, vector<32x256xf32>
    %1411 = vector.broadcast %793 : vector<1x256xf32> to vector<32x256xf32>
    %1412 = arith.mulf %1410, %1411 : vector<32x256xf32>
    %1413 = arith.truncf %1412 : vector<32x256xf32> to vector<32x256xbf16>
    %c192_685 = arith.constant 192 : index
    %c0_686 = arith.constant 0 : index
    %1414 = vector.load %arg18[%c192_685, %c0_686] : memref<288x256xbf16, #tpu.memory_space<vmem>>, vector<32x256xbf16>
    tpu.vector_store %arg18[%c192_685, %c0_686], %1413 {strides = array<i32>} : memref<288x256xbf16, #tpu.memory_space<vmem>>, vector<32x256xbf16>,
    %c0_687 = arith.constant 0 : index
    %c33_688 = arith.constant 33 : index
    %1415 = vector.load %arg16[%c0_687, %c33_688] : memref<32x290xf32, #tpu.memory_space<vmem>>, vector<32x256xf32>
    %1416 = arith.truncf %1415 : vector<32x256xf32> to vector<32x256xbf16>
    %c224_689 = arith.constant 224 : index
    %c0_690 = arith.constant 0 : index
    %1417 = vector.load %arg18[%c224_689, %c0_690] : memref<288x256xbf16, #tpu.memory_space<vmem>>, vector<32x256xbf16>
    tpu.vector_store %arg18[%c224_689, %c0_690], %1416 {strides = array<i32>} : memref<288x256xbf16, #tpu.memory_space<vmem>>, vector<32x256xbf16>,
    %c0_691 = arith.constant 0 : index
    %c34_692 = arith.constant 34 : index
    %1418 = vector.load %arg16[%c0_691, %c34_692] : memref<32x290xf32, #tpu.memory_space<vmem>>, vector<32x256xf32>
    %1419 = vector.broadcast %804 : vector<1x256xf32> to vector<32x256xf32>
    %1420 = arith.mulf %1418, %1419 : vector<32x256xf32>
    %1421 = arith.truncf %1420 : vector<32x256xf32> to vector<32x256xbf16>
    %c256_693 = arith.constant 256 : index
    %c0_694 = arith.constant 0 : index
    %1422 = vector.load %arg18[%c256_693, %c0_694] : memref<288x256xbf16, #tpu.memory_space<vmem>>, vector<32x256xbf16>
    tpu.vector_store %arg18[%c256_693, %c0_694], %1421 {strides = array<i32>} : memref<288x256xbf16, #tpu.memory_space<vmem>>, vector<32x256xbf16>,
    %c0_695 = arith.constant 0 : index
    %c0_696 = arith.constant 0 : index
    %1423 = vector.load %arg18[%c0_695, %c0_696] : memref<288x256xbf16, #tpu.memory_space<vmem>>, vector<288x256xbf16>
    %cst_697 = arith.constant dense<0.000000e+00> : vector<32x256xf32>
    %1424 = tpu.matmul %720, %1423, %cst_697 {dimension_numbers = #tpu.dot_dimension_numbers<[1], [0], [0], [1], [0, 0, 1, 1], [], []>} : vector<32x288xbf16>, vector<288x256xbf16>, vector<32x256xf32> -> vector<32x256xf32>
    %1425 = vector.broadcast %721 : vector<32x1xf32> to vector<32x256xf32>
    %1426 = arith.addf %1424, %1425 : vector<32x256xf32>
    %cst_698 = arith.constant 0.000000e+00 : f32
    %1427 = vector.broadcast %cst_698 : f32 to vector<32x256xf32>
    %1428 = arith.maximumf %1426, %1427 : vector<32x256xf32>
    %1429 = arith.truncf %712 : vector<32x64xf32> to vector<32x64xbf16>
    %c0_699 = arith.constant 0 : index
    %c0_700 = arith.constant 0 : index
    %1430 = vector.load %arg13[%c0_699, %c0_700] : memref<64x256xbf16, #tpu.memory_space<vmem>>, vector<64x256xbf16>
    %cst_701 = arith.constant dense<0.000000e+00> : vector<32x256xf32>
    %1431 = tpu.matmul %1429, %1430, %cst_701 {dimension_numbers = #tpu.dot_dimension_numbers<[1], [0], [0], [1], [0, 0, 1, 1], [], []>} : vector<32x64xbf16>, vector<64x256xbf16>, vector<32x256xf32> -> vector<32x256xf32>
    %1432 = arith.addf %1428, %1431 : vector<32x256xf32>
    %c0_702 = arith.constant 0 : index
    %c0_703 = arith.constant 0 : index
    %c0_704 = arith.constant 0 : index
    %1433 = vector.load %arg14[%c0_702, %c0_703, %c0_704] : memref<1x32x256xf32, #tpu.memory_space<vmem>>, vector<1x32x256xf32>
    %1434 = vector.shape_cast %1433 : vector<1x32x256xf32> to vector<32x256xf32>
    %1435 = vector.shape_cast %1432 : vector<32x256xf32> to vector<1x32x256xf32>
    tpu.vector_store %arg14[%c0_702, %c0_703, %c0_704], %1435 {strides = array<i32>} : memref<1x32x256xf32, #tpu.memory_space<vmem>>, vector<1x32x256xf32>,
    return
  }
  func.func @transform_0(%arg0: i32) -> (i32, i32, i32) {
    %c0_i32 = arith.constant 0 : i32
    %c0_i32_0 = arith.constant 0 : i32
    %c0_i32_1 = arith.constant 0 : i32
    return %arg0, %c0_i32, %c0_i32_0 : i32, i32, i32
  }
  func.func @transform_1(%arg0: i32) -> (i32, i32, i32) {
    %c0_i32 = arith.constant 0 : i32
    %c0_i32_0 = arith.constant 0 : i32
    %c0_i32_1 = arith.constant 0 : i32
    return %arg0, %c0_i32, %c0_i32_0 : i32, i32, i32
  }
  func.func @transform_2(%arg0: i32) -> (i32, i32) {
    %c0_i32 = arith.constant 0 : i32
    %c0_i32_0 = arith.constant 0 : i32
    %c0_i32_1 = arith.constant 0 : i32
    return %c0_i32, %c0_i32_0 : i32, i32
  }
  func.func @transform_3(%arg0: i32) -> (i32, i32) {
    %c0_i32 = arith.constant 0 : i32
    %c0_i32_0 = arith.constant 0 : i32
    %c0_i32_1 = arith.constant 0 : i32
    return %c0_i32, %c0_i32_0 : i32, i32
  }
  func.func @transform_4(%arg0: i32) -> i32 {
    %c0_i32 = arith.constant 0 : i32
    %c0_i32_0 = arith.constant 0 : i32
    return %c0_i32 : i32
  }
  func.func @transform_5(%arg0: i32) -> (i32, i32) {
    %c0_i32 = arith.constant 0 : i32
    %c0_i32_0 = arith.constant 0 : i32
    %c0_i32_1 = arith.constant 0 : i32
    return %c0_i32, %c0_i32_0 : i32, i32
  }
  func.func @transform_6(%arg0: i32) -> (i32, i32) {
    %c0_i32 = arith.constant 0 : i32
    %c0_i32_0 = arith.constant 0 : i32
    %c0_i32_1 = arith.constant 0 : i32
    return %c0_i32, %c0_i32_0 : i32, i32
  }
  func.func @transform_7(%arg0: i32) -> (i32, i32) {
    %c0_i32 = arith.constant 0 : i32
    %c0_i32_0 = arith.constant 0 : i32
    %c0_i32_1 = arith.constant 0 : i32
    return %c0_i32, %c0_i32_0 : i32, i32
  }
  func.func @transform_8(%arg0: i32) -> (i32, i32) {
    %c0_i32 = arith.constant 0 : i32
    %c0_i32_0 = arith.constant 0 : i32
    %c0_i32_1 = arith.constant 0 : i32
    return %c0_i32, %c0_i32_0 : i32, i32
  }
  func.func @transform_9(%arg0: i32) -> i32 {
    %c0_i32 = arith.constant 0 : i32
    %c0_i32_0 = arith.constant 0 : i32
    return %c0_i32 : i32
  }
  func.func @transform_10(%arg0: i32) -> (i32, i32) {
    %c0_i32 = arith.constant 0 : i32
    %c0_i32_0 = arith.constant 0 : i32
    %c0_i32_1 = arith.constant 0 : i32
    return %c0_i32, %c0_i32_0 : i32, i32
  }
  func.func @transform_11(%arg0: i32) -> (i32, i32) {
    %c0_i32 = arith.constant 0 : i32
    %c0_i32_0 = arith.constant 0 : i32
    %c0_i32_1 = arith.constant 0 : i32
    return %c0_i32, %c0_i32_0 : i32, i32
  }
  func.func @transform_12(%arg0: i32) -> (i32, i32) {
    %c0_i32 = arith.constant 0 : i32
    %c0_i32_0 = arith.constant 0 : i32
    %c0_i32_1 = arith.constant 0 : i32
    return %c0_i32, %c0_i32_0 : i32, i32
  }
  func.func @transform_13(%arg0: i32) -> (i32, i32, i32) {
    %c0_i32 = arith.constant 0 : i32
    %c0_i32_0 = arith.constant 0 : i32
    %c0_i32_1 = arith.constant 0 : i32
    return %arg0, %c0_i32, %c0_i32_0 : i32, i32, i32
  }
  func.func @transform_14(%arg0: i32) -> (i32, i32, i32) {
    %c0_i32 = arith.constant 0 : i32
    %c0_i32_0 = arith.constant 0 : i32
    %c0_i32_1 = arith.constant 0 : i32
    return %arg0, %c0_i32, %c0_i32_0 : i32, i32, i32
  }
}

</mosaic_0001>

<bundles_post_ra>
// kernel: tpu_custom_call.1
= control target key start
LH: loop header
LB: loop body
LE: loop exit
PB: predicated region body
PF: predicated region fallthrough
CT: control target
= control target key end

     0   :  { %s10410_s0 = inlined_call_operand.vmem [shape: f32[2,32,256], index: 0, kind: input, shape index: {}]   ;;  %s10411_s1 = inlined_call_operand.hbm [shape: f32[2,32,64], index: 1, kind: input, shape index: {}]   ;;  %s10412_s2 = inlined_call_operand.vmem [shape: f32[2,32], index: 2, kind: input, shape index: {}]   ;;  %s10413_s3 = inlined_call_operand.vmem [shape: f32[32,2], index: 3, kind: input, shape index: {}]   ;;  %s10414_s4 = inlined_call_operand.vmem [shape: f32[98], index: 4, kind: input, shape index: {}]   ;;  %s10415_s5 = inlined_call_operand.hbm [shape: bf16[32,288], index: 5, kind: input, shape index: {}]   ;;  %s10416_s6 = inlined_call_operand.vmem [shape: f32[32,1], index: 6, kind: input, shape index: {}]   ;;  %s10417_s7 = inlined_call_operand.vmem [shape: f32[2,32], index: 7, kind: input, shape index: {}]   ;;  %s10418_s8 = inlined_call_operand.vmem [shape: f32[32,2], index: 8, kind: input, shape index: {}]   ;;  %s10419_s9 = inlined_call_operand.vmem [shape: f32[98], index: 9, kind: input, shape index: {}]   ;;  %s10420_s10 = inlined_call_operand.hbm [shape: bf16[32,288], index: 10, kind: input, shape index: {}]   ;;  %s10421_s11 = inlined_call_operand.vmem [shape: f32[32,1], index: 11, kind: input, shape index: {}]   ;;  %s10422_s12 = inlined_call_operand.hbm [shape: bf16[64,256], index: 12, kind: input, shape index: {}]   ;;  %s10423_s13 = inlined_call_operand.hbm [shape: f32[2,32,256], index: 13, kind: output, shape index: {0}]   ;;  %s10424_s14 = inlined_call_operand.hbm [shape: f32[2,32,64], index: 14, kind: output, shape index: {1}]  }
   0x1   :  { %10634 = sst [smem:[#allocation132_spill]] %s10410_s0 }
   0x2   :  { %10635 = sst [smem:[#allocation133_spill]] %s10411_s1 }
   0x3   :  { %10636 = sst [smem:[#allocation134_spill]] %s10412_s2 }
   0x4   :  { %10637 = sst [smem:[#allocation135_spill]] %s10413_s3 }
   0x5   :  { %10638 = sst [smem:[#allocation136_spill]] %s10414_s4 }
   0x6   :  { %10639 = sst [smem:[#allocation137_spill]] %s10415_s5 }
   0x7   :  { %10640 = sst [smem:[#allocation138_spill]] %s10416_s6 }
   0x8   :  { %10641 = sst [smem:[#allocation139_spill]] %s10417_s7 }
   0x9   :  { %10642 = sst [smem:[#allocation140_spill]] %s10418_s8 }
   0xa   :  { %10643 = sst [smem:[#allocation141_spill]] %s10419_s9 }
   0xb   :  { %10644 = sst [smem:[#allocation142_spill]] %s10420_s10 }
   0xc   :  { %10645 = sst [smem:[#allocation143_spill]] %s10421_s11 }
   0xd   :  { %10646 = sst [smem:[#allocation144_spill]] %s10422_s12 }
   0xe   :  { %10647 = sst [smem:[#allocation145_spill]] %s10423_s13 }
   0xf   :  { %10648 = sst [smem:[#allocation146_spill]] %s10424_s14 }
  0x10   :  { %20 = vsyncpa [#allocation9], 0 }
  0x11   :  { %22 = vsyncpa [#allocation9 + $0x1], 0 }
  0x12   :  { %23 = vsyncpa [#allocation11], 0 }
  0x13   :  { %24 = vsyncpa [#allocation14], 0 }
  0x14   :  { %25 = vsyncpa [#allocation16], 0 }
  0x15   :  { %26 = vsyncpa [#allocation19], 0 }
  0x16   :  { %27 = vsyncpa [#allocation10], 0 }
  0x17   :  { %29 = vsyncpa [#allocation10 + $0x1], 0 }
  0x18   :  { %30 = vsyncpa [#allocation22], 0 }
  0x19   :  { %32 = vsyncpa [#allocation22 + $0x1], 0  ;;  %s7514_s29 = smov 0   ;;  %s7516_s30 = smov 0  }
  0x1a   :  { %s7518_s15 = smov 0   ;;  %s7520_s16 = smov 0  }
  0x1b LB: > { %10649 = sst [smem:[#allocation31_spill]] %s7299_s29  ;;  %s7313_s17 = smov [#allocation13]   ;;  %s7311_s16 = sphi %s7520_s16, %s11071_s16   ;;  %s7307_s15 = sphi %s7518_s15, %s11074_s15   ;;  %s7303_s30 = sphi %s7516_s30, %s11073_s30   ;;  %s7299_s29 = sphi %s7514_s29, %s11072_s29  }
  0x1c   : > { %10650 = sst [smem:[#allocation32_spill]] %s7303_s30  ;;  %s407_s18 = sshll.u32 %s7313_s17, 4  ;;  %s408_s18 = int_to_ptr.vmem [resolvable:$true] %s407_s18 }
  0x1d   : > { %10651 = sst [smem:[#allocation33_spill]] %s7307_s15  ;;  %s7535_s19 = sadd.s32 4294967295, %s7311_s16  }
  0x1e   : > { %10652 = sst [smem:[#allocation34_spill]] %s7311_s16  ;;  %p5997_p0 = scmp.ge.s32.totalorder %s7311_s16, 1 }
  0x1f   : > { %10653 = sst [smem:[#allocation35_spill]] %s7535_s19  ;;  %p10425_p1 = scmp.eq.s32.totalorder %s7535_s19, 0 }
  0x20   : > { %p378_p2 = scmp.lt.s32.totalorder %s7311_s16, 3  ;;  %s10655_s4 = sld [smem:[#allocation136_spill]] }
  0x21   : > { %s10657_s9 = sld [smem:[#allocation141_spill]]  ;;  %s7072_s17 = scalar_lea.vmem %s408_s18, 768 }
  0x22   : > { %p7540_p3 = pnand %p5997_p0, %p378_p2  ;;  %p7073_p8 = scmp.ne.s32.totalorder %s408_s18, %s7072_s17 }
  0x23   : > { %p7080_p11 = scmp.lt.s32.totalorder %s408_s18, %s408_s18  ;;  %p7081_p12 = scmp.lt.s32.totalorder %s7072_s17, %s7072_s17 }
  0x24   : > { %s10654_s20 = scalar_select %p7540_p3, 1, 0 }
  0x25   : > { %p6750_p5 = pneg %p7540_p3  ;;  %p7082_p13 = por %p7081_p12, %p7080_p11 }
  0x26   : > { %s397_s23 = sshll.u32 %s10655_s4, 4  ;;  %s398_s23 = int_to_ptr.vmem [resolvable:$true] %s397_s23 }
  0x27   : > { %p7552_p6 = pnand %p6750_p5, %p10425_p1  ;;  %s430_s27 = sshll.u32 %s10657_s9, 4  ;;  %s7559_s27 = int_to_ptr.vmem [resolvable:$true] %s430_s27 }
  0x29   : > { %p7563_p7 = pneg %p7552_p6 }
  0x2b   : > { %p7075_p9 = pnand %p7073_p8, %p7563_p7 }
  0x2d   : > { %p7076_p10 = pneg %p7075_p9 }
  0x2f   : > { %p7083_p0 = pnand %p7082_p13, %p7076_p10 }
  0x31   : > { %7086 = shalt.err (!%p7083_p0)
}
  0x32   : > { %s10426_s21 = smov 192   ;;  %s7315_s22 = smov 12  }
  0x33   : > { %s10659_s5 = sld [smem:[#allocation137_spill]]  ;;  %s7087_s4 = scalar_lea.vmem %s398_s23, 16 }
  0x34   : > { %p7088_p2 = scmp.ne.s32.totalorder %s398_s23, %s7087_s4  ;;  %p7095_p9 = scmp.lt.s32.totalorder %s398_s23, %s398_s23 }
  0x35   : > { %p7096_p10 = scmp.lt.s32.totalorder %s7087_s4, %s7087_s4 }
  0x36   : > { %p7090_p5 = pnand %p7088_p2, %p7563_p7 }
  0x37   : > { %p7097_p11 = por %p7096_p10, %p7095_p9 }
  0x38   : > { %p7091_p8 = pneg %p7090_p5 }
  0x39   : > { %6756 = dma.hbm_to_vmem [thread:$0]  (!%p7552_p6), %s10659_s5, 768, %s408_s18, [#allocation14], %s10426_s21, %s10426_s21, %s7315_s22  }
  0x3a   : > { %p7098_p12 = pnand %p7097_p11, %p7091_p8 }
  0x3c   : > { %7101 = shalt.err (!%p7098_p12)
}
  0x3d   : > { %s7316_s17 = smov [#allocation12]   ;;  %s7102_s25 = scalar_lea.vmem %s7559_s27, 16 }
  0x3e   : > { %6753 = dma.vmem_to_smem (!%p7552_p6), %s398_s23, 16, %s7316_s17, [#allocation11]  }
  0x3f   : > { %p7103_p13 = scmp.ne.s32.totalorder %s7559_s27, %s7102_s25  ;;  %p7110_p2 = scmp.lt.s32.totalorder %s7559_s27, %s7559_s27 }
  0x40   : > { %p7111_p5 = scmp.lt.s32.totalorder %s7102_s25, %s7102_s25 }
  0x41   : > { %p7105_p0 = pnand %p7103_p13, %p7563_p7 }
  0x42   : > { %p7112_p1 = por %p7111_p5, %p7110_p2 }
  0x43   : > { %p7106_p4 = pneg %p7105_p0 }
  0x45   : > { %p7113_p9 = pnand %p7112_p1, %p7106_p4 }
  0x47   : > { %7116 = shalt.err (!%p7113_p9)
}
  0x48   : > { %s7317_s4 = smov [#allocation15]   ;;  %s7318_s18 = smov [#allocation17]  }
  0x49   : > { %6759 = dma.vmem_to_smem (!%p7552_p6), %s7559_s27, 16, %s7317_s4, [#allocation16]  }
  0x4a   : > { %s440_s26 = sshll.u32 %s7318_s18, 4  ;;  %s7319_s23 = smov [#allocation18]   ;;  %s441_s26 = int_to_ptr.vmem [resolvable:$true] %s440_s26 }
  0x4b   : > { %s456_s17 = sshll.u32 %s7319_s23, 4  ;;  %s7128_s21 = scalar_lea.vmem %s441_s26, 768  ;;  %s457_s17 = int_to_ptr.vmem [resolvable:$true] %s456_s17 }
  0x4c   : > { %p7129_p8 = scmp.ne.s32.totalorder %s441_s26, %s7128_s21  ;;  %p7136_p12 = scmp.lt.s32.totalorder %s441_s26, %s441_s26 }
  0x4d   : > { %p7137_p13 = scmp.lt.s32.totalorder %s7128_s21, %s7128_s21 }
  0x4e   : > { %p7131_p10 = pnand %p7129_p8, %p7563_p7 }
  0x4f   : > { %p7138_p1 = por %p7137_p13, %p7136_p12 }
  0x50   : > { %p7132_p11 = pneg %p7131_p10 }
  0x52   : > { %p7139_p4 = pnand %p7138_p1, %p7132_p11 }
  0x54   : > { %7142 = shalt.err (!%p7139_p4)
}
  0x55   : > { %s10660_s25 = smov 192   ;;  %s10661_s10 = sld [smem:[#allocation142_spill]] }
  0x56   : > { %s7154_s18 = scalar_lea.vmem %s457_s17, 1024  ;;  %p7162_p9 = scmp.lt.s32.totalorder %s457_s17, %s457_s17 }
  0x57   : > { %p7155_p0 = scmp.ne.s32.totalorder %s457_s17, %s7154_s18  ;;  %p7163_p8 = scmp.lt.s32.totalorder %s7154_s18, %s7154_s18 }
  0x59   : > { %p7157_p2 = pnand %p7155_p0, %p7563_p7  ;;  %p7164_p10 = por %p7163_p8, %p7162_p9 }
  0x5b   : > { %6762 = dma.hbm_to_vmem [thread:$0]  (!%p7552_p6), %s10661_s10, 768, %s441_s26, [#allocation14], %s10660_s25, %s10660_s25, %s7315_s22  }
  0x5c   : > { %p7158_p5 = pneg %p7157_p2 }
  0x5e   : > { %p7165_p11 = pnand %p7164_p10, %p7158_p5 }
  0x60   : > { %7168 = shalt.err (!%p7165_p11)
}
  0x61   : > { %s10427_s21 = smov 128   ;;  %s10428_s28 = smov 8  }
  0x62   : > { %s10662_s12 = sld [smem:[#allocation144_spill]]  ;;  %s5996_s23 = sadd.s32 4294967294, %s7311_s16  }
  0x63   : > { %s7612_s25 = sadd.s32 1, %s7311_s16   ;;  %s71_s27 = sadd.s32 1, %s7307_s15 }
  0x64   : > { %10663 = sst [smem:[#allocation36_spill]] %s7612_s25  ;;  %s68_s4 = ssub.s32 %s7311_s16, %s7612_s25 }
  0x65   : > { %p78_p7 = scmp.ne.s32.totalorder %s7307_s15, %s7303_s30  ;;  %p69_p12 = scmp.eq.s32.totalorder %s68_s4, 0 }
  0x66   : > { %p79_p13 = scmp.eq.s32.totalorder %s7311_s16, 0  ;;  %p84_p1 = scmp.ne.s32.totalorder %s7303_s30, %s7299_s29 }
  0x67   : > { %p339_p4 = scmp.eq.s32.totalorder %s7535_s19, 1  ;;  %p10665_p2 = scmp.eq.s32.totalorder %s7535_s19, 0 }
  0x68   : > { %6765 = dma.hbm_to_vmem [thread:$0]  (!%p7552_p6), %s10662_s12, 1024, %s457_s17, [#allocation19], %s10427_s21, %s10427_s21, %s10428_s28  }
  0x69   : > { %s7624_s24 = scalar_select %p69_p12, %s7307_s15, %s71_s27  }
  0x6a   : > { %p80_p0 = por %p79_p13, %p78_p7  ;;  %p7628_p5 = por %p10665_p2, %p84_p1 }
  0x6b   : > { %10664 = sst [smem:[#allocation37_spill]] %s7624_s24  ;;  %p7632_p6 = por %p339_p4, %p78_p7 }
  0x6c   : > { %s10666_s18 = scalar_select %p7628_p5, 1, 0 }
  0x6d   : > { %s10667_s17 = scalar_select %p7632_p6, 1, 0 }
  0x6e   : > { %p345_p9 = scmp.eq.s32.totalorder %s5996_s23, 1  ;;  %p6782_p8 = scmp.lt.s32.totalorder %s7311_s16, 2 }
  0x6f   : > { %10668 = sst [smem:[#allocation38_spill]] %s10667_s17  ;;  %s478_s22 = sand.u32 1, %s7307_s15  }
  0x70   : > { %p7638_p10 = por %p345_p9, %p84_p1  ;;  %s6004_s4 = sshll.u32 %s478_s22, 5 }
  0x71   : > { %s6456_s27 = sshll.u32 %s7311_s16, 9  ;;  %s10671_s1 = sld [smem:[#allocation133_spill]] }
  0x72   : > { %s10669_s26 = scalar_select %p7638_p10, 1, 0 }
  0x73   : > { %s482_s9 = scalar_lea.vmem [#allocation8], %s6004_s4  ;;  %p7648_p11 = pnand %p6782_p8, %p80_p0 }
  0x74   : > { %10670 = sst [smem:[#allocation39_spill]] %s10669_s26  ;;  %s489_s10 = sshll.u32 %s482_s9, 4  ;;  %s7652_s10 = int_to_ptr.vmem [resolvable:$true] %s489_s10 }
  0x75   : > { %s7654_s12 = scalar_lea.sflag [#allocation9], %s478_s22  ;;  %p7171_p12 = pneg %p7648_p11 }
  0x77   : > { %s7646_s5 = scalar_lea.hbm %s10671_s1, %s6456_s27  ;;  %s7174_s4 = scalar_lea.hbm %s10671_s1, 1024 }
  0x78   : > { %s7169_s24 = scalar_lea.hbm %s7646_s5, 512  ;;  %p7175_p4 = scmp.lt.s32.totalorder %s7646_s5, %s10671_s1 }
  0x79   : > { %p7170_p7 = scmp.ne.s32.totalorder %s7646_s5, %s7169_s24  ;;  %p7176_p0 = scmp.lt.s32.totalorder %s7174_s4, %s7169_s24 }
  0x7b   : > { %p7172_p13 = pnand %p7171_p12, %p7170_p7  ;;  %p7177_p2 = por %p7176_p0, %p7175_p4 }
  0x7d   : > { %p7173_p1 = pneg %p7172_p13 }
  0x7f   : > { %p7178_p9 = pnand %p7177_p2, %p7173_p1 }
  0x81   : > { %7181 = shalt.err (!%p7178_p9)
}
  0x82   : > { %s7182_s22 = scalar_lea.vmem %s7652_s10, 512  ;;  %s7322_s15 = smov [#allocation8]  }
  0x83   : > { %p7183_p8 = scmp.ne.s32.totalorder %s7652_s10, %s7182_s22  ;;  %s7187_s25 = sshll.u32 %s7322_s15, 4  ;;  %s7188_s25 = int_to_ptr.vmem [resolvable:$false] %s7187_s25 }
  0x84   : > { %s7189_s21 = scalar_lea.vmem %s7188_s25, 1024  ;;  %p7190_p13 = scmp.lt.s32.totalorder %s7652_s10, %s7188_s25 }
  0x85   : > { %p7185_p10 = pnand %p7183_p8, %p7171_p12  ;;  %p7191_p6 = scmp.lt.s32.totalorder %s7189_s21, %s7182_s22 }
  0x87   : > { %p7186_p7 = pneg %p7185_p10  ;;  %p7192_p5 = por %p7191_p6, %p7190_p13 }
  0x89   : > { %p7193_p3 = pnand %p7192_p5, %p7186_p7 }
  0x8b   : > { %7196 = shalt.err (!%p7193_p3)
}
  0x8c   : > { %s10673_s24 = smov 8   ;;  %s10674_s28 = smov 128  }
  0x8d   : > { %6769 = dma.hbm_to_vmem [thread:$0]  (!%p7648_p11), %s7646_s5, 512, %s7652_s10, %s7654_s12, %s10674_s28, %s10674_s28, %s10673_s24  }
  0x8e   : > { %p10675_p10 = scmp.ne.s32.totalorder %s10654_s20, 0 }
  0x90   : > { %501 = sbr.rel (%p10675_p10) target bundleno = 3324 (0xcfc), region = 72 }
  0x95   : > { %s7681_s15 = sand.u32 1, %s7303_s30   ;;  %p10677_p3 = scmp.ne.s32.totalorder %s10666_s18, 0 }
  0x96   : > { %10676 = sst [smem:[#allocation40_spill]] %s7681_s15  ;;  %s10435_s25 = sshll.u32 %s7681_s15, 5 }
  0x97   : > { %s504_s4 = scalar_lea.sflag [#allocation9], %s7681_s15  ;;  %s507_s23 = scalar_lea.vmem [#allocation8], %s10435_s25 }
  0x98   : > { %7266 = dma.done.wait (%p10677_p3), %s504_s4, 512  }
  0x99   : > { %7268 = vsyncadd (%p10677_p3), %s504_s4, 4294966784  ;;  %p10678_p5 = scmp.eq.s32.totalorder %s7535_s19, 0 }
  0x9b   : > { %7270 = dma.done.wait (%p10678_p5), [#allocation11], 16   ;;  %p10679_p6 = pmov %p10678_p5 }
  0x9c   : > { %p10680_p11 = pmov %p10678_p5 }
  0x9d   : > { %7272 = vsyncadd (%p10679_p6), [#allocation11], 4294967280 }
  0x9e   : > { %7274 = dma.done.wait (%p10680_p11), [#allocation14], 768   ;;  %p10681_p12 = pmov %p10678_p5 }
  0x9f   : > { %p10682_p1 = pmov %p10678_p5 }
  0xa0   : > { %7276 = vsyncadd (%p10681_p12), [#allocation14], 4294966528 }
  0xa1   : > { %7278 = dma.done.wait (%p10682_p1), [#allocation16], 16   ;;  %p10683_p4 = pmov %p10682_p1 }
  0xa2   : > { %p10684_p0 = pmov %p10682_p1 }
  0xa3   : > { %7280 = vsyncadd (%p10683_p4), [#allocation16], 4294967280 }
  0xa4   : > { %7282 = dma.done.wait (%p10684_p0), [#allocation14], 768   ;;  %p10685_p2 = pmov %p10684_p0 }
  0xa5   : > { %p10686_p9 = pmov %p10684_p0 }
  0xa6   : > { %7284 = vsyncadd (%p10685_p2), [#allocation14], 4294966528 }
  0xa7   : > { %7286 = dma.done.wait (%p10686_p9), [#allocation19], 1024   ;;  %p10687_p8 = pmov %p10684_p0 }
  0xa9   : > { %7288 = vsyncadd (%p10687_p8), [#allocation19], 4294966272 }
  0xaa   : > { %532 = sfence }
  0xab   : > { %v7711_v0 = vld [vmem:[%s507_s23 + $0x18] sm:$0xff]  ;;  %vm610_vm0 = vcmask 523264   ;;  %v7713_v1 = vld [vmem:[%s507_s23 + $0x10] sm:$0xff]  ;;  %v7715_v2 = vld [vmem:[%s507_s23 + $0x8] sm:$0xff]  ;;  %v10540_v12 = vmov 0.0   ;;  %vm7324_vm1 = vmmov 0   ;;  %v10538_v55 = vlaneseq }
  0xac   : > { %v620_v3 = vsel %vm610_vm0, %v7711_v0, 0.0  ;;  %v614_v4 = vsel %vm610_vm0, %v7715_v2, 0.0  ;;  %v7721_v5 = vld [vmem:[%s507_s23] sm:$0xff]  ;;  %v617_v6 = vsel %vm610_vm0, %v7713_v1, 0.0  ;;  %v637_v8 = vsel %vm610_vm0, %v7711_v0, -inf  ;;  %6640 = vmatprep.subr.mxu1 %v10540_v12  ;;  %6648 = vmatprep.mubr.msk.f32.mxu1 %vm7324_vm1, %v10540_v12  ;;  %s10688_s7 = sld [smem:[#allocation139_spill]] }
  0xad   : > { %621 = vadd.xlane.f32.xlu0 %v620_v3  ;;  %615 = vadd.xlane.f32.xlu1 %v614_v4  ;;  %v611_v7 = vsel %vm610_vm0, %v7721_v5, 0.0  ;;  %v634_v9 = vsel %vm610_vm0, %v7713_v1, -inf  ;;  %v631_v10 = vsel %vm610_vm0, %v7715_v2, -inf  ;;  %v628_v11 = vsel %vm610_vm0, %v7721_v5, -inf  ;;  %s10689_s8 = sld [smem:[#allocation140_spill]]  ;;  %s10463_s28 = smov 5  }
  0xae   : > { %vm640_vm2 = vcmask 261120   ;;  %vm786_vm3 = vcmask 15360   ;;  %vm799_vm4 = vcmask 1041408   ;;  %v10536_v36 = vmov 0   ;;  %s10437_s4 = smov 8   ;;  %s10436_s23 = smov 10  }
  0xaf   : > { %6945 = vset.pattern.permute.xlu1 %v10536_v36  ;;  %6944 = vset.pattern.permute.xlu0 %v10536_v36  ;;  %v7779_v59 = vand.u32 127, %v10538_v55  ;;  %s10469_s5 = smov 1   ;;  %s7330_s10 = smov 13   ;;  %vm1102_vm11 = vcmask 214016   ;;  %vm1104_vm12 = vcmask 960216   ;;  %vm1110_vm13 = vcmask 737496  }
  0xb0   : > { %s10467_s12 = smov 2   ;;  %s10452_s20 = smov 16   ;;  %1103 = vst.msk [vmem:[#allocation6] sm:$0x3] %vm1102_vm11, %v10540_v12  ;;  %vm1888_vm14 = vcmask 72704   ;;  %vm1893_vm15 = vcmask 671304  }
  0xb1   : > { %618 = vadd.xlane.f32.xlu0 %v617_v6  ;;  %612 = vadd.xlane.f32.xlu1 %v611_v7  ;;  %v1030_v63 = vand.u32 7, %v7779_v59  ;;  %s10466_s18 = smov 4   ;;  %s10470_s9 = smov 18   ;;  %1105 = vst.msk [vmem:[#allocation6] sm:$0x3] %vm1104_vm12, %v10540_v12 }
  0xb2   : > { %v593_v22 = vld [vmem:[%s10688_s7] sm:$0x3]  ;;  %s10461_s27 = smov 6   ;;  %s10450_s22 = smov 21  }
  0xb3   : > { %v594_v26 = vld [vmem:[%s10689_s8] sm:$0xff]  ;;  %v595_v32 = vld [vmem:[%s10689_s8 + $0x8] sm:$0xff]  ;;  %v596_v34 = vld [vmem:[%s10689_s8 + $0x10] sm:$0xff]  ;;  %v1062_v3 = vadd.s32 2, %v1030_v63  ;;  %v1038_v6 = vadd.s32 4294967293, %v1030_v63  ;;  %s7337_s21 = smov 24  }
  0xb4   : > { %v597_v35 = vld [vmem:[%s10689_s8 + $0x18] sm:$0xff]  ;;  %s10439_s24 = smov 26   ;;  %s10448_s25 = smov 32  }
  0xb5   : > { %638 = vmax.xlane.f32.xlu0 %v637_v8  ;;  %635 = vmax.xlane.f32.xlu1 %v634_v9  ;;  %vm1064_vm5 = vcmp.lt.s32.totalorder %v1062_v3, 8  ;;  %vm1039_vm6 = vcmp.ge.s32.totalorder %v1038_v6, 0  ;;  %v1050_v9 = vadd.s32 4294967295, %v1030_v63  ;;  %s7923_s1 = sld [smem:[#allocation15 + $0x33]] }
  0xb6   : > { %v7783_v8 = vsel %vm1064_vm5, 1.0, %v10540_v12  ;;  %s7925_s7 = sld [smem:[#allocation15 + $0x4]]  ;;  %vm1914_vm5 = vcmask 597064  }
  0xb7   : > { %vm1051_vm7 = vcmp.ge.s32.totalorder %v1050_v9, 0  ;;  %s7929_s8 = sld [smem:[#allocation15 + $0x6]] }
  0xb8   : > { %s7931_s30 = sld [smem:[#allocation15 + $0x37]] }
  0xb9   : > { %632 = vmax.xlane.f32.xlu0 %v631_v10  ;;  %629 = vmax.xlane.f32.xlu1 %v628_v11  ;;  %v1044_v11 = vadd.s32 4294967294, %v1030_v63  ;;  %s7933_s16 = sld [smem:[#allocation15 + $0x58]] }
  0xba   : > { %s7935_s26 = sld [smem:[#allocation15 + $0x27]] }
  0xbb   : > { %vm1045_vm8 = vcmp.ge.s32.totalorder %v1044_v11, 0  ;;  %10703 = sst [smem:[#allocation54_spill]] %s7923_s1 }
  0xbc   : > { %10704 = sst [smem:[#allocation55_spill]] %s7925_s7 }
  0xbd   : > { %10706 = sst [smem:[#allocation57_spill]] %s7929_s8 }
  0xbe   : > { %10707 = sst [smem:[#allocation58_spill]] %s7931_s30 }
  0xbf   : > { %s7937_s29 = sld [smem:[#allocation15 + $0x39]] }
  0xc0   : > { %s7939_s13 = sld [smem:[#allocation15 + $0x8]] }
  0xc1   : > { %s7941_s14 = sld [smem:[#allocation15 + $0x59]] }
  0xc2   : > { %s7943_s17 = sld [smem:[#allocation15 + $0x28]] }
  0xc3   : > { %s7945_s15 = sld [smem:[#allocation15 + $0x3c]] }
  0xc4   : > { %s7947_s6 = sld [smem:[#allocation15 + $0x5a]] }
  0xc5   : > { %10708 = sst [smem:[#allocation59_spill]] %s7937_s29 }
  0xc6   : > { %10709 = sst [smem:[#allocation60_spill]] %s7939_s13 }
  0xc7   : > { %10710 = sst [smem:[#allocation61_spill]] %s7941_s14 }
  0xc8   : > { %10711 = sst [smem:[#allocation62_spill]] %s7943_s17 }
  0xc9   : > { %10712 = sst [smem:[#allocation63_spill]] %s7945_s15 }
  0xca   : > { %10713 = sst [smem:[#allocation64_spill]] %s7947_s6 }
  0xcb   : > { %s7949_s11 = sld [smem:[#allocation15 + $0x3e]] }
  0xcc   : > { %s7953_s3 = sld [smem:[#allocation15 + $0x5b]] }
  0xcd   : > { %s7955_s2 = sld [smem:[#allocation15 + $0xb]] }
  0xce   : > { %s7957_s0 = sld [smem:[#allocation15 + $0x29]] }
  0xcf   : > { %s7959_s19 = sld [smem:[#allocation15 + $0xd]] }
  0xd0   : > { %s7961_s13 = sld [smem:[#allocation15 + $0x2a]] }
  0xd1   : > { %10714 = sst [smem:[#allocation65_spill]] %s7949_s11 }
  0xd2   : > { %10715 = sst [smem:[#allocation66_spill]] %s7953_s3 }
  0xd3   : > { %10716 = sst [smem:[#allocation67_spill]] %s7955_s2 }
  0xd4   : > { %10717 = sst [smem:[#allocation68_spill]] %s7957_s0 }
  0xd5   : > { %10718 = sst [smem:[#allocation69_spill]] %s7959_s19 }
  0xd6   : > { %10719 = sst [smem:[#allocation70_spill]] %s7961_s13 }
  0xd7   : > { %s7963_s14 = sld [smem:[#allocation15 + $0xa]] }
  0xd8   : > { %s7967_s15 = sld [smem:[#allocation15 + $0x3b]] }
  0xd9   : > { %s7969_s6 = sld [smem:[#allocation15 + $0x3]] }
  0xda   : > { %s7971_s11 = sld [smem:[#allocation15 + $0x34]] }
  0xdb   : > { %s7973_s17 = sld [smem:[#allocation15 + $0x1b]] }
  0xdc   : > { %s7975_s3 = sld [smem:[#allocation15 + $0x4c]] }
  0xdd   : > { %10720 = sst [smem:[#allocation71_spill]] %s7963_s14 }
  0xde   : > { %10721 = sst [smem:[#allocation72_spill]] %s7967_s15 }
  0xdf   : > { %10722 = sst [smem:[#allocation73_spill]] %s7969_s6 }
  0xe0   : > { %10723 = sst [smem:[#allocation74_spill]] %s7971_s11 }
  0xe1   : > { %10724 = sst [smem:[#allocation75_spill]] %s7973_s17 }
  0xe2   : > { %10725 = sst [smem:[#allocation76_spill]] %s7975_s3 }
  0xe3   : > { %s7977_s2 = sld [smem:[#allocation15 + $0x1d]] }
  0xe4   : > { %s7981_s19 = sld [smem:[#allocation15 + $0x4e]] }
  0xe5   : > { %s7983_s13 = sld [smem:[#allocation15 + $0x20]] }
  0xe6   : > { %s7985_s14 = sld [smem:[#allocation15 + $0x51]] }
  0xe7   : > { %s7987_s0 = sld [smem:[#allocation15 + $0x21]] }
  0xe8   : > { %s7989_s15 = sld [smem:[#allocation15 + $0x52]] }
  0xe9   : > { %10726 = sst [smem:[#allocation77_spill]] %s7977_s2 }
  0xea   : > { %s7991_s6 = sld [smem:[#allocation15 + $0x22]] }
  0xeb   : > { %10727 = sst [smem:[#allocation78_spill]] %s7983_s13 }
  0xec   : > { %s7995_s17 = sld [smem:[#allocation15 + $0x53]] }
  0xed   : > { %10728 = sst [smem:[#allocation79_spill]] %s7987_s0 }
  0xee   : > { %10729 = sst [smem:[#allocation80_spill]] %s7989_s15 }
  0xef   : > { %s7997_s3 = sld [smem:[#allocation15 + $0x23]] }
  0xf0   : > { %10730 = sst [smem:[#allocation81_spill]] %s7991_s6 }
  0xf1   : > { %s7999_s2 = sld [smem:[#allocation15 + $0x54]] }
  0xf2   : > { %10731 = sst [smem:[#allocation82_spill]] %s7995_s17 }
  0xf3   : > { %s8001_s11 = sld [smem:[#allocation15 + $0x24]] }
  0xf4   : > { %s8003_s13 = sld [smem:[#allocation15 + $0x55]] }
  0xf5   : > { %10732 = sst [smem:[#allocation83_spill]] %s7997_s3  ;;  %s10581_s3 = smov 125  }
  0xf6   : > { %s8005_s0 = sld [smem:[#allocation15 + $0x25]] }
  0xf7   : > { %10733 = sst [smem:[#allocation84_spill]] %s7999_s2 }
  0xf8   : > { %s8007_s6 = sld [smem:[#allocation15 + $0x56]] }
  0xf9   : > { %10734 = sst [smem:[#allocation85_spill]] %s8001_s11 }
  0xfa   : > { %10735 = sst [smem:[#allocation86_spill]] %s8003_s13 }
  0xfb   : > { %s8009_s17 = sld [smem:[#allocation15 + $0x1f]] }
  0xfc   : > { %10736 = sst [smem:[#allocation87_spill]] %s8005_s0 }
  0xfd   : > { %s8011_s2 = sld [smem:[#allocation15 + $0x50]] }
  0xfe   : > { %10737 = sst [smem:[#allocation88_spill]] %s8007_s6 }
  0xff   : > { %s8013_s11 = sld [smem:[#allocation15 + $0x26]] }
 0x100   : > { %s8015_s13 = sld [smem:[#allocation15 + $0x57]] }
 0x101   : > { %10738 = sst [smem:[#allocation89_spill]] %s8009_s17 }
 0x102   : > { %s8017_s0 = sld [smem:[#allocation15]] }
 0x103   : > { %10739 = sst [smem:[#allocation90_spill]] %s8011_s2 }
 0x104   : > { %s8019_s6 = sld [smem:[#allocation15 + $0x31]] }
 0x105   : > { %10740 = sst [smem:[#allocation91_spill]] %s8013_s11 }
 0x106   : > { %10741 = sst [smem:[#allocation92_spill]] %s8015_s13 }
 0x107   : > { %s8021_s17 = sld [smem:[#allocation15 + $0x2e]] }
 0x108   : > { %s8024_s2 = sld [smem:[#allocation15 + $0x5f]] }
 0x109   : > { %s8030_s13 = sld [smem:[#allocation15 + $0x2b]] }
 0x10a   : > { %s10762_s29 = sld [smem:[#allocation76_spill]] }
 0x10b   : > { %s10816_s11 = sld [smem:[#allocation82_spill]] }
 0x10f   : > { %10742 = sst [smem:[#allocation93_spill]] %s8030_s13 }
 0x110   : > { %s8076_s13 = sld [smem:[#allocation15 + $0x60]] }
 0x136   : > { %v622_v13 = vpop.xlane.xlu0 %621  ;;  %v616_v14 = vpop.xlane.xlu1 %615 }
 0x137   : > { %v627_v15 = vmul.f32 0.015625, %v622_v13  ;;  %v625_v19 = vmul.f32 0.015625, %v616_v14  ;;  %v7788_v13 = vsel %vm1039_vm6, 1.0, %v10540_v12  ;;  %vm1943_vm6 = vcmask 519168  }
 0x139   : > { %6641 = vmatpush3.msra.mxu1 %v627_v15  ;;  %v7793_v15 = vsel %vm1051_vm7, 1.0, %v10540_v12 }
 0x13a   : > { %v619_v16 = vpop.xlane.xlu0 %618  ;;  %6642 = vmatprep.subr.mxu1 %v10540_v12  ;;  %v613_v17 = vpop.xlane.xlu1 %612 }
 0x13b   : > { %v626_v18 = vmul.f32 0.015625, %v619_v16  ;;  %v624_v20 = vmul.f32 0.015625, %v613_v17  ;;  %v7796_v16 = vsel %vm1045_vm8, 1.0, %v10540_v12  ;;  %v1056_v17 = vadd.s32 1, %v1030_v63 }
 0x13d   : > { %6643 = vmatpush3.msra.mxu1 %v626_v18  ;;  %vm1058_vm9 = vcmp.lt.s32.totalorder %v1056_v17, 8  ;;  %v1068_v18 = vadd.s32 3, %v1030_v63 }
 0x13e   : > { %6644 = vmatprep.subr.mxu1 %v10540_v12  ;;  %v639_v21 = vpop.xlane.xlu0 %638  ;;  %v636_v23 = vpop.xlane.xlu1 %635 }
 0x13f   : > { %6645 = vmatpush3.msra.mxu1 %v625_v19  ;;  %v7806_v19 = vsel %vm1058_vm9, 1.0, %v10540_v12  ;;  %vm1070_vm10 = vcmp.lt.s32.totalorder %v1068_v18, 8 }
 0x140   : > { %6646 = vmatprep.subr.mxu1 %v10540_v12 }
 0x141   : > { %6647 = vmatpush3.msra.mxu1 %v624_v20  ;;  %v7813_v20 = vsel %vm1070_vm10, 1.0, %v10540_v12 }
 0x142   : > { %6649 = vmatmul.mubr.msk.f32.vlgmr.msra.gmra.mxu1 %vm640_vm2, %v593_v22  ;;  %6651 = vmatprep.subr.mxu1 %v10540_v12  ;;  %v633_v24 = vpop.xlane.xlu0 %632  ;;  %v630_v25 = vpop.xlane.xlu1 %629 }
 0x143   : > { %6652 = vmatpush3.msra.mxu1 %v639_v21  ;;  %6659 = vmatprep.mubr.msk.f32.mxu1 %vm7324_vm1, %v10540_v12 }
 0x144   : > { %6653 = vmatprep.subr.mxu1 %v10540_v12 }
 0x145   : > { %6654 = vmatpush3.msra.mxu1 %v636_v23 }
 0x146   : > { %6655 = vmatprep.subr.mxu1 %v10540_v12 }
 0x147   : > { %6656 = vmatpush3.msra.mxu1 %v633_v24 }
 0x148   : > { %6657 = vmatprep.subr.mxu1 %v10540_v12 }
 0x149   : > { %6658 = vmatpush3.msra.mxu1 %v630_v25 }
 0x14a   : > { %6660 = vmatmul.mubr.msk.f32.vlgmr.msra.gmra.mxu1 %vm640_vm2, %v593_v22 }
 0x14b   : > { %6664 = vmatprep.mubr.msk.f32.mxu1 %vm786_vm3, %v594_v26 }
 0x202   : > { %v710_v27 = vpop.f32.mrf.mxu1 }
 0x203   : > { %v714_v33 = vmax.f32 %v710_v27, 0.0 }
 0x204   : > { %v6650_v28 = vpop.f32.mrf.mxu1 }
 0x20a   : > { %v781_v29 = vpop.f32.mrf.mxu1 }
 0x20b   : > { %v785_v30 = vmax.f32 %v781_v29, 0.0 }
 0x20c   : > { %v6661_v31 = vpop.f32.mrf.mxu1 }
 0x20d   : > { %6662 = vmatprep.subr.msk.mxu1 %vm799_vm4, %v785_v30 }
 0x20e   : > { %6663 = vmatpush3.msk.msra.mxu1 %vm799_vm4, %v785_v30 }
 0x20f   : > { %6665 = vmatmul.mubr.msk.f32.vlgmr.msra.gmra.mxu1 %vm786_vm3, %v595_v32  ;;  %6670 = vmatprep.subr.msk.mxu1 %vm799_vm4, %v714_v33 }
 0x210   : > { %6671 = vmatpush3.msk.msra.mxu1 %vm799_vm4, %v714_v33  ;;  %6667 = vmatprep.mubr.msk.f32.mxu1 %vm786_vm3, %v596_v34 }
 0x213   : > { %6668 = vmatmul.mubr.msk.f32.gmra.mxu1 %vm786_vm3, %v597_v35 }
 0x214   : > { %6672 = vmatprep.mubr.msk.f32.mxu1 %vm786_vm3, %v594_v26 }
 0x217   : > { %6673 = vmatmul.mubr.msk.f32.vlgmr.msra.gmra.mxu1 %vm786_vm3, %v595_v32 }
 0x218   : > { %6675 = vmatprep.mubr.msk.f32.mxu1 %vm786_vm3, %v596_v34 }
 0x21b   : > { %6676 = vmatmul.mubr.msk.f32.gmra.mxu1 %vm786_vm3, %v597_v35 }
 0x2cf   : > { %v6666_v37 = vpop.f32.mrf.mxu1 }
 0x2d1   : > { %v869_v38 = vpop.f32.mrf.mxu1 }
 0x2d3   : > { %v6669_v39 = vpop.f32.mrf.mxu1 }
 0x2d5   : > { %v879_v40 = vpop.f32.mrf.mxu1 }
 0x2d7   : > { %v6674_v41 = vpop.f32.mrf.mxu1 }
 0x2d8   : > { %v963_v42 = vadd.f32 %v6674_v41, %v6666_v37 }
 0x2d9   : > { %v957_v43 = vpop.f32.mrf.mxu1 }
 0x2da   : > { %v6031_v44 = vmul.f32 -1.442695, %v963_v42  ;;  %v958_v45 = vadd.f32 %v957_v43, %v869_v38 }
 0x2db   : > { %v6677_v46 = vpop.f32.mrf.mxu1 }
 0x2dc   : > { %7017 = vpow2.f32 %v6031_v44  ;;  %v6030_v47 = vmul.f32 -1.442695, %v958_v45  ;;  %v973_v48 = vadd.f32 %v6677_v46, %v6669_v39 }
 0x2dd   : > { %v967_v49 = vpop.f32.mrf.mxu1 }
 0x2de   : > { %7019 = vpow2.f32 %v6030_v47  ;;  %v6033_v50 = vmul.f32 -1.442695, %v973_v48  ;;  %v968_v51 = vadd.f32 %v967_v49, %v879_v40 }
 0x2e0   : > { %v6032_v52 = vmul.f32 -1.442695, %v968_v51  ;;  %7021 = vpow2.f32 %v6033_v50 }
 0x2e2   : > { %7023 = vpow2.f32 %v6032_v52 }
 0x2e9   : > { %v7018_v53 = vpop.eup %7017 }
 0x2ea   : > { %v989_v54 = vadd.f32 1.0, %v7018_v53 }
 0x2eb   : > { %v7020_v56 = vpop.eup %7019 }
 0x2ec   : > { %7025 = vrcp.f32 %v989_v54  ;;  %v988_v57 = vadd.f32 1.0, %v7020_v56 }
 0x2ed   : > { %v7022_v58 = vpop.eup %7021 }
 0x2ee   : > { %7027 = vrcp.f32 %v988_v57  ;;  %v991_v62 = vadd.f32 1.0, %v7022_v58 }
 0x2ef   : > { %v7024_v60 = vpop.eup %7023 }
 0x2f0   : > { %v990_v61 = vadd.f32 1.0, %v7024_v60 }
 0x2f2   : > { %7029 = vrcp.f32 %v990_v61 }
 0x2f3   : > { %7031 = vrcp.f32 %v991_v62 }
 0x2f9   : > { %v7026_v4 = vpop.eup %7025 }
 0x2fa   : > { %1007 = vperm.xlu1 %6945, %v7026_v4  }
 0x2fb   : > { %v7028_v7 = vpop.eup %7027 }
 0x2fc   : > { %1002 = vperm.xlu0 %6944, %v7028_v7  }
 0x2ff   : > { %v7030_v10 = vpop.eup %7029 }
 0x300   : > { %1012 = vperm.xlu1 %6945, %v7030_v10   ;;  %1199 = vrot.lane.b32.xlu0 %v7783_v8, %s10463_s28  ;;  %v7032_v14 = vpop.eup %7031  ;;  %s7903_s28 = sld [smem:[#allocation15 + $0x9]] }
 0x304   : > { %1017 = vperm.xlu1 %6945, %v7032_v14   ;;  %1233 = vrot.lane.b32.xlu0 %v7788_v13, %s10437_s4  ;;  %s10441_s4 = smov 44  }
 0x306   : > { %10694 = sst [smem:[#allocation45_spill]] %s7903_s28  ;;  %v1259_v4 = vstv %s7903_s28 }
 0x307   : > { %s8042_s28 = sld [smem:[#allocation15 + $0x2c]] }
 0x308   : > { %1265 = vrot.lane.b32.xlu0 %v7793_v15, %s10436_s23  ;;  %1136 = vrot.lane.b32.xlu1 %v7796_v16, %s10469_s5  ;;  %s10446_s23 = smov 34   ;;  %s7917_s5 = sld [smem:[#allocation15 + $0x1]] }
 0x30c   : > { %1309 = vrot.lane.b32.xlu0 %v7783_v8, %s7330_s10  ;;  %1153 = vrot.lane.b32.xlu1 %v7793_v15, %s10467_s12  ;;  %s10440_s10 = smov 29   ;;  %s7913_s12 = sld [smem:[#allocation15 + $0xe]] }
 0x30e   : > { %10700 = sst [smem:[#allocation51_spill]] %s7917_s5  ;;  %v1129_v14 = vstv %s7917_s5 }
 0x30f   : > { %s10771_s5 = sld [smem:[#allocation84_spill]] }
 0x310   : > { %1341 = vrot.lane.b32.xlu0 %v7788_v13, %s10452_s20  ;;  %1182 = vrot.lane.b32.xlu1 %v7806_v19, %s10466_s18  ;;  %s10456_s20 = smov 28   ;;  %s7911_s18 = sld [smem:[#allocation15 + $0x3d]] }
 0x312   : > { %10698 = sst [smem:[#allocation49_spill]] %s7913_s12  ;;  %v1335_v10 = vstv %s7913_s12 }
 0x313   : > { %s8048_s12 = sld [smem:[#allocation15 + $0x5d]] }
 0x314   : > { %1373 = vrot.lane.b32.xlu0 %v7793_v15, %s10470_s9  ;;  %1216 = vrot.lane.b32.xlu1 %v7813_v20, %s10461_s27  ;;  %s7899_s27 = sld [smem:[#allocation15 + $0x7]] }
 0x315   : > { %s7919_s9 = sld [smem:[#allocation15 + $0x32]] }
 0x316   : > { %10697 = sst [smem:[#allocation48_spill]] %s7911_s18  ;;  %v1306_v9 = vstv %s7911_s18  ;;  %s10571_s18 = smov 124  }
 0x318   : > { %1417 = vrot.lane.b32.xlu0 %v7783_v8, %s10450_s22  ;;  %s10455_s22 = smov 22  }
 0x31a   : > { %10692 = sst [smem:[#allocation43_spill]] %s7899_s27  ;;  %v1226_v63 = vstv %s7899_s27 }
 0x31b   : > { %10701 = sst [smem:[#allocation52_spill]] %s7919_s9  ;;  %v1132_v17 = vstv %s7919_s9 }
 0x31c   : > { %1449 = vrot.lane.b32.xlu0 %v7788_v13, %s7337_s21  ;;  %s10443_s21 = smov 45   ;;  %s10745_s27 = sld [smem:[#allocation62_spill]] }
 0x31d   : > { %10747 = sst [smem:[#allocation62_spill]] %s8042_s28 }
 0x31e   : > { %s8054_s9 = sld [smem:[#allocation15 + $0x2d]] }
 0x31f   : > { %s10757_s28 = sld [smem:[#allocation71_spill]] }
 0x320   : > { %1481 = vrot.lane.b32.xlu0 %v7793_v15, %s10439_s24  ;;  %s10442_s24 = smov 46  }
 0x324   : > { %1525 = vrot.lane.b32.xlu0 %v7783_v8, %s10440_s10  ;;  %s10444_s10 = smov 48  }
 0x328   : > { %1557 = vrot.lane.b32.xlu0 %v7788_v13, %s10448_s25  ;;  %s10454_s25 = smov 20  }
 0x32c   : > { %1589 = vrot.lane.b32.xlu0 %v7793_v15, %s10446_s23  ;;  %s10458_s23 = smov 17  }
 0x330   : > { %1725 = vrot.lane.b32.xlu0 %v7806_v19, %s10441_s4  ;;  %s10451_s4 = smov 27  }
 0x334   : > { %1741 = vrot.lane.b32.xlu0 %v7783_v8, %s10443_s21  ;;  %s7348_s21 = smov 12  }
 0x338   : > { %1757 = vrot.lane.b32.xlu0 %v7813_v20, %s10442_s24  ;;  %s10472_s24 = smov 9  }
 0x33c   : > { %1773 = vrot.lane.b32.xlu0 %v7788_v13, %s10444_s10  ;;  %s7349_s10 = smov 14  }
 0x375   : > { %v1008_v21 = vpop.permute.xlu1 %1007 }
 0x376   : > { %v7844_v24 = vmul.f32 %v1008_v21, %v7715_v2  ;;  %v1149_v21 = vstv %s7923_s1  ;;  %s8070_s1 = sld [smem:[#allocation15 + $0x2f]] }
 0x377   : > { %v1003_v22 = vpop.permute.xlu0 %1002 }
 0x378   : > { %v7841_v23 = vmul.f32 %v1003_v22, %v7721_v5  ;;  %v1075_v28 = vsel %vm610_vm0, %v7844_v24, 0.0  ;;  %v1090_v33 = vsel %vm610_vm0, %v7844_v24, -inf  ;;  %v1175_v22 = vstv %s7925_s7  ;;  %s10759_s7 = sld [smem:[#allocation73_spill]] }
 0x37a   : > { %v1074_v26 = vsel %vm610_vm0, %v7841_v23, 0.0  ;;  %v1089_v5 = vsel %vm610_vm0, %v7841_v23, -inf }
 0x37b   : > { %v1013_v25 = vpop.permute.xlu1 %1012  ;;  %v1076_v30 = vadd.f32 %v1075_v28, %v1074_v26  ;;  %v1093_v37 = vmax.f32 %v1089_v5, %v1090_v33  ;;  %v1209_v26 = vstv %s7929_s8  ;;  %v1212_v28 = vstv %s7931_s30  ;;  %s10758_s8 = sld [smem:[#allocation72_spill]]  ;;  %v8121_v55 = vpop.permute.xlu0 %1199 }
 0x37c   : > { %v7849_v27 = vmul.f32 %v1013_v25, %v7713_v1  ;;  %s8064_s30 = sld [smem:[#allocation15 + $0x5e]] }
 0x37e   : > { %v1077_v29 = vsel %vm610_vm0, %v7849_v27, 0.0  ;;  %v1091_v1 = vsel %vm610_vm0, %v7849_v27, -inf }
 0x37f   : > { %v1018_v31 = vpop.permute.xlu1 %1017  ;;  %v1078_v32 = vadd.f32 %v1077_v29, %v1076_v30  ;;  %v1719_v29 = vstv %s7935_s26  ;;  %v1722_v30 = vstv %s7933_s16  ;;  %s10760_s26 = sld [smem:[#allocation74_spill]] }
 0x380   : > { %v7858_v2 = vmul.f32 %v1018_v31, %v7711_v0  ;;  %s10761_s16 = sld [smem:[#allocation75_spill]] }
 0x382   : > { %v1079_v34 = vsel %vm610_vm0, %v7858_v2, 0.0  ;;  %v1092_v35 = vsel %vm610_vm0, %v7858_v2, -inf }
 0x383   : > { %v1080_v38 = vadd.f32 %v1079_v34, %v1078_v32  ;;  %v1094_v39 = vmax.f32 %v1091_v1, %v1092_v35  ;;  %v7951_v53 = vpop.permute.xlu1 %1136  ;;  %v1735_v1 = vstv %s10745_s27  ;;  %s10765_s27 = sld [smem:[#allocation78_spill]] }
 0x385   : > { %v1081_v40 = vrot.slane %v1080_v38, 4  ;;  %v1095_v41 = vmax.f32 %v1093_v37, %v1094_v39 }
 0x387   : > { %v1096_v0 = vrot.slane %v1095_v41, 4  ;;  %v1082_v42 = vadd.f32 %v1081_v40, %v1080_v38  ;;  %v7965_v54 = vpop.permute.xlu1 %1153 }
 0x389   : > { %v1097_v43 = vmax.f32 %v1095_v41, %v1096_v0  ;;  %v1083_v44 = vrot.slane %v1082_v42, 2 }
 0x38b   : > { %v1098_v45 = vrot.slane %v1097_v43, 2  ;;  %v1084_v46 = vadd.f32 %v1083_v44, %v1082_v42  ;;  %v7979_v56 = vpop.permute.xlu1 %1182 }
 0x38d   : > { %v1099_v47 = vmax.f32 %v1097_v43, %v1098_v45  ;;  %v1085_v48 = vrot.slane %v1084_v46, 1  ;;  %v1275_v43 = vstv %s10757_s28  ;;  %s10577_s28 = smov 127  }
 0x38f   : > { %v1100_v49 = vrot.slane %v1099_v47, 1  ;;  %v1086_v51 = vadd.f32 %v1085_v48, %v1084_v46  ;;  %v7993_v57 = vpop.permute.xlu1 %1216  ;;  %v1278_v46 = vstv %s10758_s8  ;;  %v1166_v48 = vstv %s10760_s26  ;;  %s10780_s8 = sld [smem:[#allocation93_spill]] }
 0x390   : > { %s10830_s26 = sld [smem:[#allocation89_spill]] }
 0x391   : > { %v1101_v50 = vmax.f32 %v1099_v47, %v1100_v49  ;;  %v1088_v52 = vmul.f32 0.03125, %v1086_v51  ;;  %v1163_v47 = vstv %s10759_s7  ;;  %v1535_v49 = vstv %s10761_s16  ;;  %s10810_s16 = sld [smem:[#allocation80_spill]] }
 0x392   : > { %s10817_s7 = sld [smem:[#allocation83_spill]] }
 0x393   : > { %1113 = vrot.lane.b32.xlu1 %v1101_v50, %s10451_s4  ;;  %v1538_v50 = vstv %s10762_s29  ;;  %s10782_s29 = sld [smem:[#allocation62_spill]] }
 0x395   : > { %v1783_v39 = vstv %s10780_s8 }
 0x397   : > { %1107 = vrot.lane.b32.xlu1 %v1088_v52, %s10451_s4  ;;  %s7353_s4 = smov 25  }
 0x399   : > { %v1799_v35 = vstv %s10782_s29  ;;  %s10818_s29 = sld [smem:[#allocation85_spill]] }
 0x39b   : > { %1249 = vrot.lane.b32.xlu1 %v7796_v16, %s10472_s24  ;;  %s7921_s24 = sld [smem:[#allocation15 + $0x2]] }
 0x39f   : > { %1293 = vrot.lane.b32.xlu1 %v7806_v19, %s7348_s21  ;;  %s10460_s21 = smov 33  }
 0x3a1   : > { %10702 = sst [smem:[#allocation53_spill]] %s7921_s24  ;;  %v1146_v18 = vstv %s7921_s24 }
 0x3a2   : > { %s10755_s24 = sld [smem:[#allocation70_spill]] }
 0x3a3   : > { %1325 = vrot.lane.b32.xlu1 %v7813_v20, %s7349_s10  ;;  %s10457_s10 = smov 30  }
 0x3a7   : > { %1357 = vrot.lane.b32.xlu1 %v7796_v16, %s10458_s23  ;;  %s7361_s23 = smov 41  }
 0x3a8   : > { %v1767_v42 = vstv %s10755_s24  ;;  %s10808_s24 = sld [smem:[#allocation79_spill]] }
 0x3ab   : > { %1401 = vrot.lane.b32.xlu1 %v7806_v19, %s10454_s25  ;;  %s10462_s25 = smov 36  }
 0x3af   : > { %1433 = vrot.lane.b32.xlu1 %v7813_v20, %s10455_s22  ;;  %s10464_s22 = smov 37  }
 0x3b3   : > { %1465 = vrot.lane.b32.xlu1 %v7796_v16, %s7353_s4  ;;  %s10465_s4 = smov 38  }
 0x3b7   : > { %1509 = vrot.lane.b32.xlu1 %v7806_v19, %s10456_s20  ;;  %s7360_s20 = smov 40  }
 0x3bb   : > { %1541 = vrot.lane.b32.xlu1 %v7813_v20, %s10457_s10  ;;  %s7894_s10 = sld [smem:[#allocation15 + $0x5]] }
 0x3bf   : > { %1573 = vrot.lane.b32.xlu1 %v7796_v16, %s10460_s21  ;;  %s7897_s21 = sld [smem:[#allocation15 + $0x36]] }
 0x3c1   : > { %10690 = sst [smem:[#allocation41_spill]] %s7894_s10  ;;  %v1192_v61 = vstv %s7894_s10 }
 0x3c2   : > { %s8036_s10 = sld [smem:[#allocation15 + $0x5c]] }
 0x3c3   : > { %1617 = vrot.lane.b32.xlu1 %v7806_v19, %s10462_s25  ;;  %s7901_s25 = sld [smem:[#allocation15 + $0x38]] }
 0x3c5   : > { %10691 = sst [smem:[#allocation42_spill]] %s7897_s21  ;;  %v1195_v62 = vstv %s7897_s21 }
 0x3c6   : > { %s10744_s21 = sld [smem:[#allocation60_spill]] }
 0x3c7   : > { %1633 = vrot.lane.b32.xlu1 %v7783_v8, %s10464_s22  ;;  %s10474_s22 = smov 42  }
 0x3c8   : > { %10743 = sst [smem:[#allocation94_spill]] %s8036_s10 }
 0x3c9   : > { %10693 = sst [smem:[#allocation44_spill]] %s7901_s25  ;;  %v1229_v3 = vstv %s7901_s25 }
 0x3ca   : > { %s10746_s25 = sld [smem:[#allocation61_spill]] }
 0x3cb   : > { %1649 = vrot.lane.b32.xlu1 %v7813_v20, %s10465_s4  ;;  %s7907_s4 = sld [smem:[#allocation15 + $0x3a]] }
 0x3cc   : > { %s10752_s10 = sld [smem:[#allocation66_spill]]  ;;  %v1243_v33 = vstv %s10744_s21 }
 0x3cd   : > { %10756 = sst [smem:[#allocation61_spill]] %s8054_s9  ;;  %s7363_s9 = smov 117  }
 0x3ce   : > { %s10775_s21 = sld [smem:[#allocation88_spill]] }
 0x3cf   : > { %1665 = vrot.lane.b32.xlu1 %v7788_v13, %s7360_s20  ;;  %s7909_s20 = sld [smem:[#allocation15 + $0xc]] }
 0x3d0   : > { %v1738_v34 = vstv %s10746_s25 }
 0x3d1   : > { %10695 = sst [smem:[#allocation46_spill]] %s7907_s4  ;;  %v1262_v6 = vstv %s7907_s4 }
 0x3d2   : > { %v1770_v40 = vstv %s10752_s10  ;;  %s10774_s4 = sld [smem:[#allocation87_spill]] }
 0x3d3   : > { %1681 = vrot.lane.b32.xlu1 %v7796_v16, %s7361_s23  ;;  %s7915_s23 = sld [smem:[#allocation15 + $0x3f]] }
 0x3d4   : > { %s8088_s10 = sld [smem:[#allocation15 + $0x61]] }
 0x3d5   : > { %10696 = sst [smem:[#allocation47_spill]] %s7909_s20  ;;  %v1303_v7 = vstv %s7909_s20 }
 0x3d6   : > { %s10750_s20 = sld [smem:[#allocation64_spill]] }
 0x3d7   : > { %1697 = vrot.lane.b32.xlu1 %v7793_v15, %s10474_s22  ;;  %s7927_s22 = sld [smem:[#allocation15 + $0x35]] }
 0x3d8   : > { %10764 = sst [smem:[#allocation64_spill]] %s8070_s1 }
 0x3d9   : > { %10699 = sst [smem:[#allocation50_spill]] %s7915_s23 }
 0x3da   : > { %s10753_s23 = sld [smem:[#allocation68_spill]] }
 0x3db   : > { %10767 = sst [smem:[#allocation68_spill]] %s8076_s13 }
 0x3dc   : > { %v1754_v38 = vstv %s10750_s20  ;;  %s10768_s20 = sld [smem:[#allocation81_spill]] }
 0x3dd   : > { %10705 = sst [smem:[#allocation56_spill]] %s7927_s22  ;;  %v1178_v25 = vstv %s7927_s22 }
 0x3de   : > { %s10763_s22 = sld [smem:[#allocation77_spill]] }
 0x3df   : > { %10776 = sst [smem:[#allocation71_spill]] %s8088_s10 }
 0x3e0   : > { %v1751_v41 = vstv %s10753_s23  ;;  %s8082_s23 = sld [smem:[#allocation15 + $0x30]] }
 0x3e1   : > { %s10778_s1 = sld [smem:[#allocation90_spill]] }
 0x3e2   : > { %s10783_s25 = sld [smem:[#allocation64_spill]] }
 0x3e3   : > { %s10784_s15 = sld [smem:[#allocation68_spill]] }
 0x3e4   : > { %v1567_v51 = vstv %s10763_s22  ;;  %s10781_s22 = sld [smem:[#allocation94_spill]] }
 0x3e5   : > { %s10806_s10 = sld [smem:[#allocation59_spill]] }
 0x3e6   : > { %10770 = sst [smem:[#allocation70_spill]] %s8082_s23 }
 0x3e7   : > { %s10807_s23 = sld [smem:[#allocation67_spill]] }
 0x3e8   : > { %v1843_v12 = vstv %s10783_s25  ;;  %s10811_s13 = sld [smem:[#allocation63_spill]] }
 0x3e9   : > { %s10850_s8 = sld [smem:[#allocation50_spill]] }
 0x3ea   : > { %s8403_s25 = sld [smem:[#allocation15 + $0x11]] }
 0x405   : > { %v1114_v58 = vpop.permute.xlu1 %1113 }
 0x406   : > { %1116 = vst.msk [vmem:[#allocation6 + $0x1] sm:$0x1] %vm1110_vm13, %v1114_v58 }
 0x409   : > { %v1108_v60 = vpop.permute.xlu1 %1107 }
 0x40a   : > { %1111 = vst.msk [vmem:[#allocation6] sm:$0x1] %vm1110_vm13, %v1108_v60 }
 0x40d   : > { %v8056_v5 = vld [vmem:[#allocation6 + $0x1] sm:$0x1]  ;;  %v8099_v11 = vpop.permute.xlu1 %1249 }
 0x40e   : > { %v1723_v45 = vmul.f32 %v1722_v30, %v8056_v5  ;;  %v1133_v37 = vmul.f32 %v1132_v17, %v8056_v5  ;;  %v1150_v0 = vmul.f32 %v1149_v21, %v8056_v5  ;;  %v1739_v36 = vmul.f32 %v1738_v34, %v8056_v5 }
 0x40f   : > { %v1755_v60 = vmul.f32 %v1754_v38, %v8056_v5 }
 0x411   : > { %v8058_v32 = vld [vmem:[#allocation6] sm:$0x1]  ;;  %v8135_v58 = vpop.permute.xlu1 %1293 }
 0x412   : > { %v1720_v44 = vmul.f32 %v1719_v29, %v8058_v32  ;;  %v1736_v30 = vmul.f32 %v1735_v1, %v8058_v32  ;;  %v1179_v29 = vmul.f32 %v1178_v25, %v8056_v5  ;;  %v1130_v31 = vmul.f32 %v1129_v14, %v8058_v32 }
 0x413   : > { %v1752_v17 = vmul.f32 %v1751_v41, %v8058_v32  ;;  %v1147_v21 = vmul.f32 %v1146_v18, %v8058_v32  ;;  %v1768_v34 = vmul.f32 %v1767_v42, %v8058_v32  ;;  %v1771_v25 = vmul.f32 %v1770_v40, %v8056_v5 }
 0x414   : > { %v8090_v52 = vadd.f32 %v1723_v45, %v1720_v44  ;;  %v1123_v44 = vstv %s8019_s6  ;;  %v1827_v45 = vstv %s8021_s17  ;;  %v8148_v1 = vadd.f32 %v1739_v36, %v1736_v30  ;;  %s10847_s6 = sld [smem:[#allocation70_spill]] }
 0x415   : > { %v1176_v14 = vmul.f32 %v1175_v22, %v8058_v32  ;;  %v8157_v41 = vadd.f32 %v1755_v60, %v1752_v17  ;;  %v1276_v38 = vmul.f32 %v1275_v43, %v8058_v32  ;;  %v1279_v36 = vmul.f32 %v1278_v46, %v8056_v5  ;;  %v8170_v22 = vpop.permute.xlu0 %1233  ;;  %s10848_s17 = sld [smem:[#allocation71_spill]] }
 0x416   : > { %v1193_v18 = vmul.f32 %v1192_v61, %v8058_v32  ;;  %v1210_v42 = vmul.f32 %v1209_v26, %v8058_v32  ;;  %v8167_v40 = vadd.f32 %v1771_v25, %v1768_v34  ;;  %v1164_v30 = vmul.f32 %v1163_v47, %v8058_v32  ;;  %v8190_v25 = vpop.permute.xlu1 %1325 }
 0x417   : > { %v1227_v43 = vmul.f32 %v1226_v63, %v8058_v32  ;;  %v1134_v60 = vadd.f32 %v1133_v37, %v1130_v31  ;;  %v1280_v46 = vadd.f32 %v1279_v36, %v1276_v38  ;;  %v1167_v17 = vmul.f32 %v1166_v48, %v8056_v5 }
 0x418   : > { %v1196_v61 = vmul.f32 %v1195_v62, %v8056_v5  ;;  %v1213_v26 = vmul.f32 %v1212_v28, %v8056_v5  ;;  %v1260_v47 = vmul.f32 %v1259_v4, %v8058_v32  ;;  %v1304_v34 = vmul.f32 %v1303_v7, %v8058_v32 }
 0x419   : > { %v1230_v63 = vmul.f32 %v1229_v3, %v8056_v5  ;;  %v1263_v31 = vmul.f32 %v1262_v6, %v8056_v5  ;;  %v1151_v37 = vadd.f32 %v1150_v0, %v1147_v21  ;;  %1282 = vrot.lane.b32.xlu1 %v1280_v46, %s7363_s9  ;;  %v1168_v62 = vadd.f32 %v1167_v17, %v1164_v30  ;;  %v1266_v38 = vpop.permute.xlu0 %1265  ;;  %s10820_s9 = sld [smem:[#allocation86_spill]] }
 0x41a   : > { %v1307_v4 = vmul.f32 %v1306_v9, %v8056_v5  ;;  %v8204_v7 = vmul.f32 %v1335_v10, %v8058_v32  ;;  %v1180_v28 = vadd.f32 %v1179_v29, %v1176_v14  ;;  %v1197_v3 = vadd.f32 %v1196_v61, %v1193_v18 }
 0x41b   : > { %v1214_v48 = vadd.f32 %v1213_v26, %v1210_v42  ;;  %v8206_v6 = vadd.f32 %v1230_v63, %v1227_v43  ;;  %v1139_v0 = vmul.f32 %v7951_v53, %v1134_v60  ;;  %1170 = vrot.lane.b32.xlu0 %v1168_v62, %s10581_s3  ;;  %v1536_v9 = vmul.f32 %v1535_v49, %v8058_v32  ;;  %v8237_v43 = vpop.permute.xlu1 %1357  ;;  %s10890_s3 = smov 37  }
 0x41c   : > { %v1264_v21 = vadd.f32 %v1263_v31, %v1260_v47  ;;  %v1308_v10 = vadd.f32 %v1307_v4, %v1304_v34  ;;  %v1539_v29 = vmul.f32 %v1538_v50, %v8056_v5  ;;  %v1568_v14 = vmul.f32 %v1567_v51, %v8058_v32 }
 0x41d   : > { %v8222_v53 = vmul.f32 %v1243_v33, %v8058_v32  ;;  %v10809_v36 = vstv %s10806_s10  ;;  %v1156_v49 = vmul.f32 %v7965_v54, %v1151_v37  ;;  %1141 = vrot.lane.b32.xlu1 %v1139_v0, %s10577_s28  ;;  %v10812_v50 = vstv %s7981_s19  ;;  %s10572_s19 = smov 126   ;;  %s8317_s10 = sld [smem:[#allocation15 + $0xf]] }
 0x41e   : > { %v8227_v18 = vmul.f32 %v10809_v36, %v8056_v5  ;;  %v1571_v51 = vmul.f32 %v10812_v50, %v8056_v5  ;;  %v10813_v42 = vstv %s10807_s23  ;;  %v8239_v33 = vadd.f32 %v1539_v29, %v1536_v9  ;;  %s8440_s23 = sld [smem:[#allocation15 + $0x15]]  ;;  %s10886_s28 = smov 32  }
 0x41f   : > { %v1288_v30 = vmul.f32 %v10813_v42, %v8058_v32  ;;  %v10814_v60 = vstv %s10765_s27  ;;  %v10815_v54 = vstv %s7985_s14  ;;  %v1185_v61 = vmul.f32 %v7979_v56, %v1180_v28  ;;  %1158 = vrot.lane.b32.xlu0 %v1156_v49, %s10572_s19  ;;  %s7367_s14 = smov 52   ;;  %s10824_s27 = sld [smem:[#allocation69_spill]] }
 0x420   : > { %v1612_v46 = vmul.f32 %v10814_v60, %v8058_v32  ;;  %v1615_v17 = vmul.f32 %v10815_v54, %v8056_v5  ;;  %v8249_v26 = vadd.f32 %v1571_v51, %v1568_v14  ;;  %v10819_v47 = vstv %s10808_s24  ;;  %s10843_s24 = sld [smem:[#allocation61_spill]] }
 0x421   : > { %v1628_v34 = vmul.f32 %v10819_v47, %v8058_v32  ;;  %v10821_v63 = vstv %s10810_s16  ;;  %v1202_v37 = vmul.f32 %v8121_v55, %v1197_v3  ;;  %v1219_v62 = vmul.f32 %v7993_v57, %v1214_v48  ;;  %1833 = vrot.lane.b32.xlu1 %v7806_v19, %s7367_s14  ;;  %s8405_s16 = sld [smem:[#allocation15 + $0x13]] }
 0x422   : > { %v1631_v31 = vmul.f32 %v10821_v63, %v8056_v5  ;;  %v10822_v56 = vstv %s10811_s13  ;;  %v8262_v28 = vadd.f32 %v1615_v17, %v1612_v46  ;;  %v10823_v9 = vstv %s10768_s20  ;;  %v1310_v46 = vpop.permute.xlu0 %1309  ;;  %s10831_s20 = sld [smem:[#allocation91_spill]]  ;;  %s7374_s13 = smov 120  }
 0x423   : > { %v1291_v4 = vmul.f32 %v10822_v56, %v8056_v5  ;;  %v1644_v29 = vmul.f32 %v10823_v9, %v8058_v32  ;;  %v10825_v55 = vstv %s10816_s11  ;;  %v10826_v3 = vstv %s10817_s7  ;;  %1187 = vrot.lane.b32.xlu0 %v1185_v61, %s10571_s18  ;;  %s8415_s11 = sld [smem:[#allocation15 + $0x42]]  ;;  %s10877_s18 = smov 4  }
 0x424   : > { %v8266_v0 = vadd.f32 %v1631_v31, %v1628_v34  ;;  %v1647_v57 = vmul.f32 %v10825_v55, %v8056_v5  ;;  %v1660_v48 = vmul.f32 %v10826_v3, %v8058_v32  ;;  %v10827_v36 = vstv %s10771_s5  ;;  %s10833_s5 = sld [smem:[#allocation92_spill]] }
 0x425   : > { %v1292_v14 = vadd.f32 %v1291_v4, %v1288_v30  ;;  %v1663_v49 = vmul.f32 %v10827_v36, %v8056_v5  ;;  %v10828_v50 = vstv %s10818_s29  ;;  %v10829_v42 = vstv %s10820_s9  ;;  %s8417_s7 = sld [smem:[#allocation15 + $0x44]]  ;;  %s7375_s29 = smov 114  }
 0x426   : > { %v1676_v51 = vmul.f32 %v10828_v50, %v8058_v32  ;;  %v1679_v60 = vmul.f32 %v10829_v42, %v8056_v5  ;;  %v1268_v54 = vmul.f32 %v1266_v38, %v1264_v21  ;;  %v8287_v17 = vadd.f32 %v1647_v57, %v1644_v29  ;;  %v8298_v21 = vpop.permute.xlu1 %1401  ;;  %s8421_s9 = sld [smem:[#allocation15 + $0x14]] }
 0x427   : > { %v10832_v30 = vstv %s10774_s4  ;;  %v10834_v34 = vstv %s10775_s21  ;;  %v1312_v31 = vmul.f32 %v1310_v46, %v1308_v10  ;;  %v10835_v56 = vstv %s10824_s27  ;;  %s10550_s4 = smov 118   ;;  %s10836_s21 = sld [smem:[#allocation65_spill]] }
 0x428   : > { %v1692_v47 = vmul.f32 %v10832_v30, %v8058_v32  ;;  %v1695_v63 = vmul.f32 %v10834_v34, %v8056_v5  ;;  %v1320_v4 = vmul.f32 %v10835_v56, %v8058_v32  ;;  %v8300_v38 = vadd.f32 %v1663_v49, %v1660_v48  ;;  %1270 = vrot.lane.b32.xlu1 %v1268_v54, %s10550_s4  ;;  %s8424_s27 = sld [smem:[#allocation15 + $0x12]]  ;;  %s10557_s4 = smov 91  }
 0x429   : > { %v8302_v61 = vadd.f32 %v1679_v60, %v1676_v51  ;;  %v10837_v10 = vstv %s10830_s26  ;;  %v10838_v55 = vstv %s10778_s1  ;;  %v10839_v3 = vstv %s10831_s20  ;;  %s10570_s1 = smov 123   ;;  %s10548_s26 = smov 119  }
 0x42a   : > { %v8305_v9 = vadd.f32 %v1695_v63, %v1692_v47  ;;  %v1600_v29 = vmul.f32 %v10837_v10, %v8058_v32  ;;  %v1603_v57 = vmul.f32 %v10838_v55, %v8056_v5  ;;  %v1708_v48 = vmul.f32 %v10839_v3, %v8058_v32  ;;  %1204 = vrot.lane.b32.xlu0 %v1202_v37, %s10570_s1  ;;  %v1342_v3 = vpop.permute.xlu0 %1341  ;;  %s8427_s20 = sld [smem:[#allocation15 + $0x45]] }
 0x42b   : > { %v1296_v36 = vmul.f32 %v8135_v58, %v1292_v14  ;;  %v10840_v49 = vstv %s10833_s5  ;;  %v10841_v51 = vstv %s8017_s0  ;;  %v1124_v60 = vmul.f32 %v1123_v44, %v8056_v5  ;;  %s8343_s0 = sld [smem:[#allocation15 + $0x40]] }
 0x42c   : > { %v1711_v50 = vmul.f32 %v10840_v49, %v8056_v5  ;;  %v1121_v42 = vmul.f32 %v10841_v51, %v8058_v32  ;;  %v8329_v46 = vadd.f32 %v1603_v57, %v1600_v29  ;;  %v1828_v58 = vmul.f32 %v1827_v45, %v8058_v32  ;;  %v8363_v49 = vpop.permute.xlu1 %1433  ;;  %s8429_s5 = sld [smem:[#allocation15 + $0x43]] }
 0x42d   : > { %v10844_v14 = vstv %s8024_s2  ;;  %v1784_v30 = vmul.f32 %v1783_v39, %v8058_v32  ;;  %v10845_v47 = vstv %s10836_s21  ;;  %v10846_v63 = vstv %s10781_s22  ;;  %s7371_s2 = smov 116   ;;  %s10563_s22 = smov 122  }
 0x42e   : > { %v1831_v54 = vmul.f32 %v10844_v14, %v8056_v5  ;;  %v1323_v44 = vmul.f32 %v10845_v47, %v8056_v5  ;;  %v8345_v34 = vadd.f32 %v1711_v50, %v1708_v48  ;;  %v8347_v37 = vadd.f32 %v1124_v60, %v1121_v42  ;;  %1298 = vrot.lane.b32.xlu1 %v1296_v36, %s7371_s2  ;;  %s10568_s21 = smov 112   ;;  %s8449_s2 = sld [smem:[#allocation15 + $0x46]] }
 0x42f   : > { %v1787_v45 = vmul.f32 %v10846_v63, %v8056_v5  ;;  %v1800_v56 = vmul.f32 %v1799_v35, %v8058_v32  ;;  %v10849_v10 = vstv %s8048_s12  ;;  %v10851_v55 = vstv %s10843_s24  ;;  %1221 = vrot.lane.b32.xlu0 %v1219_v62, %s10563_s22  ;;  %s8392_s12 = sld [smem:[#allocation15 + $0x41]]  ;;  %s7378_s24 = smov 49  }
 0x430   : > { %v8352_v39 = vadd.f32 %v1831_v54, %v1828_v58  ;;  %v1803_v29 = vmul.f32 %v10849_v10, %v8056_v5  ;;  %v1816_v57 = vmul.f32 %v10851_v55, %v8058_v32  ;;  %v1324_v48 = vadd.f32 %v1323_v44, %v1320_v4  ;;  %s10565_s22 = smov 74   ;;  %s10863_s19 = sld [smem:[#allocation132_spill]] }
 0x431   : > { %v8365_v50 = vadd.f32 %v1787_v45, %v1784_v30  ;;  %v10852_v36 = vstv %s8064_s30  ;;  %v1844_v42 = vmul.f32 %v1843_v12, %v8058_v32  ;;  %v10853_v60 = vstv %s10784_s15  ;;  %s8385_s30 = sld [smem:[#allocation15 + $0x10]]  ;;  %s7373_s15 = smov 115  }
 0x432   : > { %v1819_v51 = vmul.f32 %v10852_v36, %v8056_v5  ;;  %v8374_v35 = vadd.f32 %v1803_v29, %v1800_v56  ;;  %v1847_v58 = vmul.f32 %v10853_v60, %v8056_v5  ;;  %v10854_v4 = vstv %s10847_s6  ;;  %1314 = vrot.lane.b32.xlu1 %v1312_v31, %s7373_s15  ;;  %s7379_s6 = smov 111   ;;  %s8472_s15 = sld [smem:[#allocation15 + $0x17]] }
 0x433   : > { %v1860_v14 = vmul.f32 %v10854_v4, %v8058_v32  ;;  %v10855_v54 = vstv %s10848_s17  ;;  %v10856_v47 = vstv %s10850_s8  ;;  %v1248_v62 = vadd.f32 %v8227_v18, %v8222_v53  ;;  %v8410_v53 = vpop.permute.xlu0 %1373  ;;  %s8454_s17 = sld [smem:[#allocation15 + $0x1a]] }
 0x434   : > { %v1863_v30 = vmul.f32 %v10855_v54, %v8056_v5  ;;  %v1339_v12 = vmul.f32 %v10856_v47, %v8056_v5  ;;  %v8390_v44 = vadd.f32 %v1819_v51, %v1816_v57  ;;  %v1236_v63 = vmul.f32 %v8170_v22, %v8206_v6  ;;  %v8413_v6 = vpop.permute.xlu1 %1465  ;;  %s8457_s8 = sld [smem:[#allocation15 + $0x4b]] }
 0x435   : > { %v8398_v45 = vadd.f32 %v1847_v58, %v1844_v42  ;;  %v1351_v10 = vstv %s8317_s10  ;;  %v1328_v55 = vmul.f32 %v8190_v25, %v1324_v48  ;;  %v1354_v22 = vstv %s8343_s0  ;;  %s8435_s10 = sld [smem:[#allocation15 + $0x16]] }
 0x436   : > { %v8400_v56 = vadd.f32 %v1863_v30, %v1860_v14  ;;  %v1340_v29 = vadd.f32 %v1339_v12, %v8204_v7  ;;  %1238 = vrot.lane.b32.xlu0 %v1236_v63, %s7374_s13  ;;  %v1252_v18 = vmul.f32 %v8099_v11, %v1248_v62  ;;  %v1352_v31 = vmul.f32 %v1351_v10, %v8058_v32  ;;  %s8446_s0 = sld [smem:[#allocation15 + $0x47]] }
 0x437   : > { %1330 = vrot.lane.b32.xlu1 %v1328_v55, %s7375_s29  ;;  %v1355_v7 = vmul.f32 %v1354_v22, %v8056_v5  ;;  %v1367_v57 = vstv %s8385_s30  ;;  %v8433_v48 = vpop.permute.xlu0 %1417  ;;  %v1383_v36 = vstv %s8403_s25  ;;  %v1370_v42 = vstv %s8392_s12  ;;  %s7380_s30 = smov 50   ;;  %s8469_s12 = sld [smem:[#allocation15 + $0x18]] }
 0x438   : > { %v1344_v25 = vmul.f32 %v1342_v3, %v1340_v29  ;;  %v8437_v3 = vpop.permute.xlu1 %1509  ;;  %v1386_v60 = vstv %s8415_s11  ;;  %v1368_v58 = vmul.f32 %v1367_v57, %v8058_v32  ;;  %v1427_v4 = vstv %s8421_s9  ;;  %s7381_s25 = smov 53   ;;  %s8479_s11 = sld [smem:[#allocation15 + $0x49]] }
 0x439   : > { %v1356_v11 = vadd.f32 %v1355_v7, %v1352_v31  ;;  %v1387_v14 = vmul.f32 %v1386_v60, %v8056_v5  ;;  %v1395_v30 = vstv %s8424_s27  ;;  %v1430_v47 = vstv %s8427_s20  ;;  %s8481_s29 = sld [smem:[#allocation15 + $0x48]]  ;;  %s7383_s27 = smov 54  }
 0x43a   : > { %1254 = vrot.lane.b32.xlu0 %v1252_v18, %s10548_s26  ;;  %v1411_v62 = vstv %s8405_s16  ;;  %v1428_v10 = vmul.f32 %v1427_v4, %v8058_v32  ;;  %v1398_v55 = vstv %s8429_s5  ;;  %v1396_v18 = vmul.f32 %v1395_v30, %v8058_v32  ;;  %s10580_s16 = smov 109   ;;  %s8487_s9 = sld [smem:[#allocation15 + $0x1c]] }
 0x43b   : > { %1346 = vrot.lane.b32.xlu1 %v1344_v25, %s10568_s21  ;;  %v1360_v51 = vmul.f32 %v8237_v43, %v1356_v11  ;;  %v1384_v43 = vmul.f32 %v1383_v36, %v8058_v32  ;;  %v8463_v54 = vpop.permute.xlu0 %1449  ;;  %v1459_v22 = vstv %s8435_s10  ;;  %v1431_v31 = vmul.f32 %v1430_v47, %v8056_v5  ;;  %s8504_s20 = sld [smem:[#allocation15 + $0x1e]]  ;;  %s10575_s5 = smov 110  }
 0x43c   : > { %v8467_v12 = vpop.permute.xlu1 %1541  ;;  %v1414_v25 = vstv %s8417_s7  ;;  %v1412_v7 = vmul.f32 %v1411_v62, %v8058_v32  ;;  %v1399_v57 = vmul.f32 %v1398_v55, %v8056_v5  ;;  %s8499_s7 = sld [smem:[#allocation15 + $0x4d]]  ;;  %v1522_v30 = vstv %s8457_s8  ;;  %s7387_s8 = smov 103  }
 0x43d   : > { %v1388_v29 = vadd.f32 %v1387_v14, %v1384_v43  ;;  %v1432_v36 = vadd.f32 %v1431_v31, %v1428_v10  ;;  %v1519_v14 = vstv %s8454_s17  ;;  %s8512_s10 = sld [smem:[#allocation15 + $0x19]]  ;;  %v1491_v47 = vstv %s8469_s12  ;;  %s10562_s17 = smov 108  }
 0x43e   : > { %1789 = vrot.lane.b32.xlu0 %v7796_v16, %s7378_s24  ;;  %v1371_v16 = vmul.f32 %v1370_v42, %v8056_v5  ;;  %v1443_v42 = vstv %s8440_s23  ;;  %v1400_v43 = vadd.f32 %v1399_v57, %v1396_v18  ;;  %s8515_s23 = sld [smem:[#allocation15 + $0x4f]]  ;;  %v1494_v55 = vstv %s8479_s11  ;;  %s10560_s12 = smov 107  }
 0x43f   : > { %1362 = vrot.lane.b32.xlu1 %v1360_v51, %s7379_s6  ;;  %v1460_v51 = vmul.f32 %v1459_v22, %v8058_v32  ;;  %v8497_v60 = vpop.permute.xlu0 %1481  ;;  %v1436_v4 = vmul.f32 %v8363_v49, %v1432_v36  ;;  %v1444_v62 = vmul.f32 %v1443_v42, %v8058_v32  ;;  %v1520_v18 = vmul.f32 %v1519_v14, %v8058_v32  ;;  %s7390_s11 = smov 104   ;;  %s7401_s26 = smov 87  }
 0x440   : > { %v1372_v63 = vadd.f32 %v1371_v16, %v1368_v58  ;;  %v8501_v58 = vpop.permute.xlu1 %1573  ;;  %v1404_v49 = vmul.f32 %v8298_v21, %v1400_v43  ;;  %v1492_v21 = vmul.f32 %v1491_v47, %v8058_v32  ;;  %s10864_s1 = sld [smem:[#allocation134_spill]] }
 0x441   : > { %v1583_v14 = vstv %s8504_s20  ;;  %s7394_s20 = smov 100  }
 0x442   : > { %1805 = vrot.lane.b32.xlu0 %v7793_v15, %s7380_s30  ;;  %v1376_v11 = vmul.f32 %v8410_v53, %v1372_v63  ;;  %v1415_v53 = vmul.f32 %v1414_v25, %v8056_v5  ;;  %v1478_v25 = vstv %s8481_s29  ;;  %s7391_s29 = smov 99  }
 0x443   : > { %1849 = vrot.lane.b32.xlu1 %v7783_v8, %s7381_s25  ;;  %v1462_v8 = vstv %s8446_s0  ;;  %s10558_s0 = smov 106   ;;  %v1479_v43 = vmul.f32 %v1478_v25, %v8056_v5 }
 0x444   : > { %v1463_v16 = vmul.f32 %v1462_v8, %v8056_v5  ;;  %v1416_v63 = vadd.f32 %v1415_v53, %v1412_v7  ;;  %v1526_v7 = vpop.permute.xlu0 %1525  ;;  %v1551_v8 = vstv %s8487_s9  ;;  %v1618_v57 = vpop.permute.xlu1 %1617  ;;  %v1554_v53 = vstv %s8499_s7  ;;  %s7392_s9 = smov 102   ;;  %s7393_s7 = smov 96  }
 0x446   : > { %1390 = vrot.lane.b32.xlu0 %v1388_v29, %s10580_s16  ;;  %v1464_v10 = vadd.f32 %v1463_v16, %v1460_v51  ;;  %v1475_v29 = vstv %s8472_s15  ;;  %v1420_v42 = vmul.f32 %v8433_v48, %v1416_v63  ;;  %v1555_v48 = vmul.f32 %v1554_v53, %v8056_v5  ;;  %s7389_s15 = smov 101   ;;  %s10889_s16 = smov 36  }
 0x447   : > { %1865 = vrot.lane.b32.xlu1 %v7813_v20, %s7383_s27  ;;  %v1446_v20 = vstv %s8449_s2  ;;  %s8521_s2 = sld [smem:[#allocation15 + $0x4a]]  ;;  %v1476_v36 = vmul.f32 %v1475_v29, %v8058_v32  ;;  %v1620_v53 = vmul.f32 %v1618_v57, %v8262_v28 }
 0x448   : > { %v1447_v22 = vmul.f32 %v1446_v20, %v8056_v5  ;;  %v1468_v31 = vmul.f32 %v8413_v6, %v1464_v10  ;;  %v1495_v6 = vmul.f32 %v1494_v55, %v8056_v5  ;;  %v1558_v63 = vpop.permute.xlu0 %1557  ;;  %v1634_v29 = vpop.permute.xlu1 %1633  ;;  %v1584_v55 = vmul.f32 %v1583_v14, %v8058_v32 }
 0x449   : > { %v1480_v47 = vadd.f32 %v1479_v43, %v1476_v36 }
 0x44a   : > { %1378 = vrot.lane.b32.xlu0 %v1376_v11, %s10575_s5  ;;  %v1523_v11 = vmul.f32 %v1522_v30, %v8056_v5  ;;  %v1448_v51 = vadd.f32 %v1447_v22, %v1444_v62  ;;  %v1496_v20 = vadd.f32 %v1495_v6, %v1492_v21  ;;  %v1503_v30 = vstv %s8512_s10  ;;  %s10552_s10 = smov 94  }
 0x44b   : > { %1438 = vrot.lane.b32.xlu1 %v1436_v4, %s10558_s0  ;;  %v1552_v4 = vmul.f32 %v1551_v8, %v8058_v32  ;;  %v1484_v25 = vmul.f32 %v8497_v60, %v1480_v47  ;;  %s7408_s0 = smov 84  }
 0x44c   : > { %v1524_v16 = vadd.f32 %v1523_v11, %v1520_v18  ;;  %v1452_v62 = vmul.f32 %v8463_v54, %v1448_v51  ;;  %v1590_v51 = vpop.permute.xlu0 %1589 }
 0x44d   : > { %v1506_v10 = vstv %s8521_s2  ;;  %v1556_v22 = vadd.f32 %v1555_v48, %v1552_v4  ;;  %s10559_s2 = smov 92  }
 0x44e   : > { %1406 = vrot.lane.b32.xlu0 %v1404_v49, %s10562_s17  ;;  %v1586_v49 = vstv %s8515_s23  ;;  %v1528_v18 = vmul.f32 %v1526_v7, %v1524_v16  ;;  %v1507_v54 = vmul.f32 %v1506_v10, %v8056_v5  ;;  %v1650_v7 = vpop.permute.xlu1 %1649  ;;  %s7396_s23 = smov 98   ;;  %s10566_s17 = smov 76  }
 0x44f   : > { %1470 = vrot.lane.b32.xlu1 %v1468_v31, %s7387_s8  ;;  %v1504_v31 = vmul.f32 %v1503_v30, %v8058_v32  ;;  %v1587_v21 = vmul.f32 %v1586_v49, %v8056_v5  ;;  %v1560_v11 = vmul.f32 %v1558_v63, %v1556_v22  ;;  %v1544_v5 = vmul.f32 %v8467_v12, %v8239_v33  ;;  %s10554_s8 = smov 95  }
 0x450   : > { %v1726_v60 = vpop.permute.xlu0 %1725  ;;  %v1652_v43 = vmul.f32 %v1650_v7, %v8287_v17 }
 0x451   : > { %v1588_v8 = vadd.f32 %v1587_v21, %v1584_v55  ;;  %v1508_v36 = vadd.f32 %v1507_v54, %v1504_v31 }
 0x452   : > { %1422 = vrot.lane.b32.xlu0 %v1420_v42, %s10560_s12  ;;  %v1666_v6 = vpop.permute.xlu1 %1665  ;;  %s10567_s12 = smov 78  }
 0x453   : > { %1498 = vrot.lane.b32.xlu1 %v1496_v20, %s7389_s15  ;;  %v1512_v32 = vmul.f32 %v8437_v3, %v1508_v36  ;;  %v1592_v42 = vmul.f32 %v1590_v51, %v1588_v8  ;;  %v1576_v3 = vmul.f32 %v8501_v58, %v8249_v26  ;;  %v1636_v26 = vmul.f32 %v1634_v29, %v8266_v0 }
 0x454   : > { %v1742_v33 = vpop.permute.xlu0 %1741  ;;  %v1668_v17 = vmul.f32 %v1666_v6, %v8300_v38  ;;  %v1728_v38 = vmul.f32 %v1726_v60, %v8090_v52 }
 0x456   : > { %1454 = vrot.lane.b32.xlu0 %v1452_v62, %s7390_s11  ;;  %v1682_v12 = vpop.permute.xlu1 %1681  ;;  %s10556_s11 = smov 90  }
 0x457   : > { %1530 = vrot.lane.b32.xlu1 %v1528_v18, %s7391_s29  ;;  %v1684_v28 = vmul.f32 %v1682_v12, %v8302_v61  ;;  %s10579_s29 = smov 93   ;;  %v1744_v61 = vmul.f32 %v1742_v33, %v8148_v1 }
 0x458   : > { %v1758_v58 = vpop.permute.xlu0 %1757 }
 0x459   : > { %v1760_v1 = vmul.f32 %v1758_v58, %v8157_v41 }
 0x45a   : > { %1486 = vrot.lane.b32.xlu0 %v1484_v25, %s7392_s9  ;;  %v1698_v57 = vpop.permute.xlu1 %1697 }
 0x45b   : > { %1562 = vrot.lane.b32.xlu1 %v1560_v11, %s7393_s7  ;;  %v1700_v0 = vmul.f32 %v1698_v57, %v8305_v9 }
 0x45e   : > { %1514 = vrot.lane.b32.xlu0 %v1512_v32, %s7394_s20 }
 0x45f   : > { %1594 = vrot.lane.b32.xlu1 %v1592_v42, %s10552_s10  ;;  %s7403_s10 = smov 85  }
 0x462   : > { %1546 = vrot.lane.b32.xlu0 %v1544_v5, %s7396_s23 }
 0x463   : > { %1622 = vrot.lane.b32.xlu1 %v1620_v53, %s10559_s2  ;;  %s10574_s2 = smov 77  }
 0x466   : > { %1578 = vrot.lane.b32.xlu0 %v1576_v3, %s10554_s8  ;;  %s7404_s8 = smov 88  }
 0x467   : > { %1654 = vrot.lane.b32.xlu1 %v1652_v43, %s10556_s11  ;;  %s7405_s11 = smov 83  }
 0x46a   : > { %1606 = vrot.lane.b32.xlu0 %v8329_v46, %s10579_s29  ;;  %v1774_v46 = vpop.permute.xlu0 %1773  ;;  %s10888_s29 = smov 34  }
 0x46b   : > { %1686 = vrot.lane.b32.xlu1 %v1684_v28, %s7401_s26  ;;  %v1776_v4 = vmul.f32 %v1774_v46, %v8167_v40  ;;  %s7406_s26 = smov 86   ;;  %v1126_v40 = vmul.f32 %v7788_v13, %v8347_v37 }
 0x46e   : > { %1638 = vrot.lane.b32.xlu0 %v1636_v26, %s10557_s4  ;;  %s10619_s4 = smov 80  }
 0x46f   : > { %1714 = vrot.lane.b32.xlu1 %v8345_v34, %s7403_s10 }
 0x472   : > { %1670 = vrot.lane.b32.xlu0 %v1668_v17, %s7404_s8  ;;  %s7409_s8 = smov 82  }
 0x473   : > { %1746 = vrot.lane.b32.xlu1 %v1744_v61, %s7405_s11  ;;  %s10561_s11 = smov 79  }
 0x476   : > { %1702 = vrot.lane.b32.xlu0 %v1700_v0, %s7406_s26 }
 0x477   : > { %1778 = vrot.lane.b32.xlu1 %v1776_v4, %s10619_s4 }
 0x47a   : > { %1730 = vrot.lane.b32.xlu0 %v1728_v38, %s7408_s0 }
 0x47e   : > { %1762 = vrot.lane.b32.xlu0 %v1760_v1, %s7409_s8 }
 0x48b   : > { %v1283_v9 = vpop.permute.xlu1 %1282 }
 0x48d   : > { %v1171_v34 = vpop.permute.xlu0 %1170 }
 0x48f   : > { %v1142_v16 = vpop.permute.xlu1 %1141 }
 0x490   : > { %v1144_v20 = vadd.f32 %v1142_v16, %v1126_v40 }
 0x491   : > { %v1159_v14 = vpop.permute.xlu0 %1158 }
 0x492   : > { %v1161_v30 = vadd.f32 %v1159_v14, %v1144_v20 }
 0x493   : > { %v1834_v52 = vpop.permute.xlu1 %1833 }
 0x494   : > { %v1173_v62 = vadd.f32 %v1171_v34, %v1161_v30  ;;  %v1836_v3 = vmul.f32 %v1834_v52, %v8352_v39 }
 0x495   : > { %v1188_v48 = vpop.permute.xlu0 %1187 }
 0x496   : > { %v1190_v10 = vadd.f32 %v1188_v48, %v1173_v62 }
 0x49a   : > { %v1271_v47 = vpop.permute.xlu1 %1270 }
 0x49c   : > { %v1205_v63 = vpop.permute.xlu0 %1204 }
 0x49d   : > { %v1207_v55 = vadd.f32 %v1205_v63, %v1190_v10 }
 0x4a0   : > { %v1299_v49 = vpop.permute.xlu1 %1298 }
 0x4a1   : > { %v1222_v41 = vpop.permute.xlu0 %1221 }
 0x4a2   : > { %v1224_v18 = vadd.f32 %v1222_v41, %v1207_v55 }
 0x4a4   : > { %v1315_v29 = vpop.permute.xlu1 %1314 }
 0x4a8   : > { %v1239_v22 = vpop.permute.xlu0 %1238 }
 0x4a9   : > { %v1331_v31 = vpop.permute.xlu1 %1330  ;;  %v1241_v21 = vadd.f32 %v1239_v22, %v1224_v18 }
 0x4ac   : > { %v1255_v25 = vpop.permute.xlu0 %1254 }
 0x4ad   : > { %v1257_v13 = vadd.f32 %v1255_v25, %v1241_v21  ;;  %v1347_v37 = vpop.permute.xlu1 %1346 }
 0x4af   : > { %v1273_v54 = vadd.f32 %v1271_v47, %v1257_v13 }
 0x4b0   : > { %v1790_v8 = vpop.permute.xlu0 %1789 }
 0x4b1   : > { %v1285_v11 = vadd.f32 %v1283_v9, %v1273_v54  ;;  %v1792_v36 = vmul.f32 %v1790_v8, %v8365_v50  ;;  %v1363_v51 = vpop.permute.xlu1 %1362 }
 0x4b3   : > { %v1301_v7 = vadd.f32 %v1299_v49, %v1285_v11  ;;  %1794 = vrot.lane.b32.xlu0 %v1792_v36, %s10561_s11  ;;  %s10564_s11 = smov 75  }
 0x4b4   : > { %v1806_v32 = vpop.permute.xlu0 %1805 }
 0x4b5   : > { %v1317_v42 = vadd.f32 %v1315_v29, %v1301_v7  ;;  %v1808_v5 = vmul.f32 %v1806_v32, %v8374_v35  ;;  %v1850_v60 = vpop.permute.xlu1 %1849 }
 0x4b6   : > { %v1852_v50 = vmul.f32 %v1850_v60, %v8398_v45 }
 0x4b7   : > { %v1333_v6 = vadd.f32 %v1331_v31, %v1317_v42  ;;  %1822 = vrot.lane.b32.xlu0 %v8390_v44, %s10574_s2  ;;  %1810 = vrot.lane.b32.xlu1 %v1808_v5, %s10567_s12 }
 0x4b8   : > { %v1391_v53 = vpop.permute.xlu0 %1390 }
 0x4b9   : > { %v1349_v43 = vadd.f32 %v1347_v37, %v1333_v6  ;;  %v1866_v33 = vpop.permute.xlu1 %1865  ;;  %v10857_v37 = vmov 0.0  }
 0x4ba   : > { %v1868_v35 = vmul.f32 %v1866_v33, %v8400_v56  ;;  %1892 = vst.msk [vmem:[#allocation5 + $0x18] sm:$0xff] %vm1888_vm14, %v10857_v37  ;;  %1889 = vst.msk [vmem:[#allocation5] sm:$0xff] %vm1888_vm14, %v10857_v37 }
 0x4bb   : > { %1854 = vrot.lane.b32.xlu0 %v1852_v50, %s10564_s11  ;;  %1838 = vrot.lane.b32.xlu1 %v1836_v3, %s10566_s17  ;;  %v1365_v12 = vadd.f32 %v1363_v51, %v1349_v43  ;;  %1890 = vst.msk [vmem:[#allocation5 + $0x8] sm:$0xff] %vm1888_vm14, %v10857_v37  ;;  %1891 = vst.msk [vmem:[#allocation5 + $0x10] sm:$0xff] %vm1888_vm14, %v10857_v37  ;;  %s10858_s11 = sld [smem:[#allocation35_spill]]  ;;  %s10862_s17 = smov 18  }
 0x4bc   : > { %v1379_v44 = vpop.permute.xlu0 %1378  ;;  %1897 = vst.msk [vmem:[#allocation5 + $0x18] sm:$0xff] %vm1893_vm15, %v10857_v37  ;;  %1896 = vst.msk [vmem:[#allocation5 + $0x10] sm:$0xff] %vm1893_vm15, %v10857_v37 }
 0x4bd   : > { %v1381_v28 = vadd.f32 %v1379_v44, %v1365_v12  ;;  %v1439_v57 = vpop.permute.xlu1 %1438  ;;  %1894 = vst.msk [vmem:[#allocation5] sm:$0xff] %vm1893_vm15, %v10857_v37  ;;  %1895 = vst.msk [vmem:[#allocation5 + $0x8] sm:$0xff] %vm1893_vm15, %v10857_v37 }
 0x4bf   : > { %1870 = vrot.lane.b32.xlu1 %v1868_v35, %s10565_s22  ;;  %v1393_v26 = vadd.f32 %v1391_v53, %v1381_v28  ;;  %s10861_s22 = smov 9  }
 0x4c0   : > { %v1407_v45 = vpop.permute.xlu0 %1406 }
 0x4c1   : > { %v1409_v39 = vadd.f32 %v1407_v45, %v1393_v26  ;;  %v1471_v4 = vpop.permute.xlu1 %1470  ;;  %p583_p7 = scmp.lt.s32.totalorder %s10858_s11, 1 }
 0x4c3   : > { %s584_s12 = scalar_select %p583_p7, %s10858_s11, 1 }
 0x4c4   : > { %v1423_v58 = vpop.permute.xlu0 %1422 }
 0x4c5   : > { %v1425_v17 = vadd.f32 %v1423_v58, %v1409_v39  ;;  %v1499_v56 = vpop.permute.xlu1 %1498  ;;  %s6457_s21 = sshll.u32 %s584_s12, 6  ;;  %s10865_s12 = sld [smem:[#allocation135_spill]] }
 0x4c6   : > { %s587_s2 = scalar_lea.vmem %s10863_s19, %s6457_s21  ;;  %s10876_s19 = smov 2  }
 0x4c7   : > { %v1441_v61 = vadd.f32 %v1439_v57, %v1425_v17  ;;  %s10881_s21 = smov 16  }
 0x4c8   : > { %v1455_v46 = vpop.permute.xlu0 %1454 }
 0x4c9   : > { %v1457_v0 = vadd.f32 %v1455_v46, %v1441_v61  ;;  %v1531_v20 = vpop.permute.xlu1 %1530 }
 0x4cb   : > { %v1473_v38 = vadd.f32 %v1471_v4, %v1457_v0 }
 0x4cc   : > { %v1487_v1 = vpop.permute.xlu0 %1486 }
 0x4cd   : > { %v1489_v9 = vadd.f32 %v1487_v1, %v1473_v38  ;;  %v1563_v48 = vpop.permute.xlu1 %1562  ;;  %v10859_v38 = vlaneseq }
 0x4cf   : > { %v1501_v34 = vadd.f32 %v1499_v56, %v1489_v9  ;;  %v8606_v1 = vshrl.u32 %v10859_v38, 7 }
 0x4d0   : > { %v1515_v40 = vpop.permute.xlu0 %1514 }
 0x4d1   : > { %v1517_v16 = vadd.f32 %v1515_v40, %v1501_v34  ;;  %v1595_v49 = vpop.permute.xlu1 %1594  ;;  %10860 = vst [vmem:[#allocation95_spill] sm:$0xff] %v8606_v1  ;;  %v10582_v9 = vsub.s32 0, %v8606_v1 }
 0x4d3   : > { %v1533_v14 = vadd.f32 %v1531_v20, %v1517_v16 }
 0x4d4   : > { %v1547_v52 = vpop.permute.xlu0 %1546 }
 0x4d5   : > { %v1549_v30 = vadd.f32 %v1547_v52, %v1533_v14  ;;  %v1623_v55 = vpop.permute.xlu1 %1622 }
 0x4d7   : > { %v1565_v47 = vadd.f32 %v1563_v48, %v1549_v30  ;;  %v8638_v48 = vld [vmem:[%s587_s2 + $0x10] sm:$0xff] }
 0x4d8   : > { %v1579_v62 = vpop.permute.xlu0 %1578 }
 0x4d9   : > { %v1581_v63 = vadd.f32 %v1579_v62, %v1565_v47  ;;  %v1655_v21 = vpop.permute.xlu1 %1654  ;;  %v8640_v47 = vld [vmem:[%s587_s2 + $0x18] sm:$0xff]  ;;  %v8642_v62 = vld [vmem:[%s587_s2] sm:$0xff] }
 0x4db   : > { %v1597_v10 = vadd.f32 %v1595_v49, %v1581_v63  ;;  %v8644_v63 = vld [vmem:[%s587_s2 + $0x8] sm:$0xff]  ;;  %v2573_v49 = vadd.f32 %v8640_v47, %v8638_v48 }
 0x4dc   : > { %v1607_v41 = vpop.permute.xlu0 %1606 }
 0x4dd   : > { %v1609_v29 = vadd.f32 %v1607_v41, %v1597_v10  ;;  %v1687_v8 = vpop.permute.xlu1 %1686  ;;  %v2570_v10 = vadd.f32 %v8644_v63, %v8642_v62 }
 0x4df   : > { %v1625_v22 = vadd.f32 %v1623_v55, %v1609_v29 }
 0x4e0   : > { %v1639_v18 = vpop.permute.xlu0 %1638 }
 0x4e1   : > { %v1641_v31 = vadd.f32 %v1639_v18, %v1625_v22  ;;  %v1715_v7 = vpop.permute.xlu1 %1714 }
 0x4e3   : > { %v1657_v25 = vadd.f32 %v1655_v21, %v1641_v31 }
 0x4e4   : > { %v1671_v13 = vpop.permute.xlu0 %1670 }
 0x4e5   : > { %v1673_v54 = vadd.f32 %v1671_v13, %v1657_v25  ;;  %v1747_v60 = vpop.permute.xlu1 %1746 }
 0x4e7   : > { %v1689_v11 = vadd.f32 %v1687_v8, %v1673_v54 }
 0x4e8   : > { %v1703_v36 = vpop.permute.xlu0 %1702 }
 0x4e9   : > { %v1705_v51 = vadd.f32 %v1703_v36, %v1689_v11  ;;  %v1779_v3 = vpop.permute.xlu1 %1778 }
 0x4eb   : > { %v1717_v32 = vadd.f32 %v1715_v7, %v1705_v51 }
 0x4ec   : > { %v1731_v42 = vpop.permute.xlu0 %1730 }
 0x4ed   : > { %v1733_v5 = vadd.f32 %v1731_v42, %v1717_v32 }
 0x4ef   : > { %v1749_v6 = vadd.f32 %v1747_v60, %v1733_v5 }
 0x4f0   : > { %v1763_v50 = vpop.permute.xlu0 %1762 }
 0x4f1   : > { %v1765_v53 = vadd.f32 %v1763_v50, %v1749_v6 }
 0x4f3   : > { %v1781_v33 = vadd.f32 %v1779_v3, %v1765_v53 }
 0x525   : > { %v1795_v43 = vpop.permute.xlu0 %1794 }
 0x526   : > { %v1797_v35 = vadd.f32 %v1795_v43, %v1781_v33 }
 0x529   : > { %v1811_v12 = vpop.permute.xlu1 %1810  ;;  %v1823_v44 = vpop.permute.xlu0 %1822 }
 0x52a   : > { %v1813_v28 = vadd.f32 %v1811_v12, %v1797_v35  ;;  %v6973_v12 = vld [vmem:[#allocation17 + $0x8] ss:$12 sps:$4 sm:$0xff]  }
 0x52b   : > { %6682 = vmatprep.mubr.msk.bf16.mxu1 %vm640_vm2, %v6973_v12 }
 0x52c   : > { %v1825_v45 = vadd.f32 %v1823_v44, %v1813_v28  ;;  %v2590_v28 = vmax.f32 %v8638_v48, %v8640_v47 }
 0x52d   : > { %v1839_v26 = vpop.permute.xlu1 %1838  ;;  %v1855_v39 = vpop.permute.xlu0 %1854 }
 0x52e   : > { %v1841_v58 = vadd.f32 %v1839_v26, %v1825_v45  ;;  %v2587_v45 = vmax.f32 %v8642_v62, %v8644_v63 }
 0x530   : > { %v1857_v17 = vadd.f32 %v1855_v39, %v1841_v58 }
 0x531   : > { %v1871_v57 = vpop.permute.xlu1 %1870 }
 0x532   : > { %v1873_v61 = vadd.f32 %v1871_v57, %v1857_v17 }
 0x534   : > { %v6137_v46 = vmul.f32 -1.442695, %v1873_v61 }
 0x536   : > { %7033 = vpow2.f32 %v6137_v46 }
 0x543   : > { %v7034_v0 = vpop.eup %7033 }
 0x544   : > { %v1877_v4 = vadd.f32 1.0, %v7034_v0 }
 0x546   : > { %7035 = vrcp.f32 %v1877_v4 }
 0x553   : > { %v7036_v56 = vpop.eup %7035 }
 0x554   : > { %v1883_v34 = vrot.slane %v7036_v56, %v10582_v9 }
 0x556   : > { %v1887_v40 = vmul.f32 %v1883_v34, %v7858_v2  ;;  %v1886_v16 = vmul.f32 %v1883_v34, %v7849_v27  ;;  %v1885_v20 = vmul.f32 %v1883_v34, %v7844_v24  ;;  %v1884_v14 = vmul.f32 %v1883_v34, %v7841_v23  ;;  %v8626_v27 = vld [vmem:[%s587_s2 + $0x20] sm:$0xff]  ;;  %v8628_v2 = vld [vmem:[%s587_s2 + $0x28] sm:$0xff]  ;;  %v8630_v24 = vld [vmem:[%s587_s2 + $0x30] sm:$0xff] }
 0x557   : > { %v8632_v23 = vld [vmem:[%s587_s2 + $0x38] sm:$0xff]  ;;  %v2576_v52 = vadd.f32 %v8628_v2, %v8626_v27  ;;  %v2593_v29 = vmax.f32 %v8626_v27, %v8628_v2  ;;  %s10875_s2 = smov 1  }
 0x558   : > { %1908 = vrot.lane.b32.xlu1 %v1887_v40, %s10861_s22  ;;  %1906 = vrot.lane.b32.xlu0 %v1886_v16, %s10861_s22  ;;  %v2579_v30 = vadd.f32 %v8632_v23, %v8630_v24  ;;  %v2596_v41 = vmax.f32 %v8630_v24, %v8632_v23  ;;  %v6974_v16 = vld [vmem:[#allocation17 + $0x20] ss:$12 sps:$4 sm:$0xff]  }
 0x55c   : > { %1904 = vrot.lane.b32.xlu1 %v1885_v20, %s10861_s22  ;;  %1902 = vrot.lane.b32.xlu0 %v1884_v14, %s10861_s22  ;;  %s10880_s22 = smov 6  }
 0x560   : > { %2204 = vrot.lane.b32.xlu0 %v7806_v19, %s10862_s17 }
 0x57f   : > { %2577 = vadd.xlane.f32.xlu0 %v2576_v52 }
 0x580   : > { %2580 = vadd.xlane.f32.xlu1 %v2579_v30 }
 0x583   : > { %2574 = vadd.xlane.f32.xlu0 %v2573_v49  ;;  %v2553_v49 = vld [vmem:[%s10864_s1] sm:$0x3]  ;;  %s10878_s1 = smov 5  }
 0x584   : > { %2571 = vadd.xlane.f32.xlu1 %v2570_v10 }
 0x587   : > { %2597 = vmax.xlane.f32.xlu0 %v2596_v41 }
 0x588   : > { %2594 = vmax.xlane.f32.xlu1 %v2593_v29  ;;  %v2554_v29 = vld [vmem:[%s10865_s12] sm:$0xff] }
 0x5ca   : > { %v1909_v55 = vpop.permute.xlu1 %1908  ;;  %v1907_v22 = vpop.permute.xlu0 %1906 }
 0x5cb   : > { %1918 = vst.msk [vmem:[#allocation5 + $0x18] sm:$0xff] %vm1914_vm5, %v1909_v55  ;;  %1917 = vst.msk [vmem:[#allocation5 + $0x10] sm:$0xff] %vm1914_vm5, %v1907_v22 }
 0x5ce   : > { %v1905_v18 = vpop.permute.xlu1 %1904  ;;  %v1903_v31 = vpop.permute.xlu0 %1902 }
 0x5cf   : > { %1916 = vst.msk [vmem:[#allocation5 + $0x8] sm:$0xff] %vm1914_vm5, %v1905_v18  ;;  %1915 = vst.msk [vmem:[#allocation5] sm:$0xff] %vm1914_vm5, %v1903_v31 }
 0x5d2   : > { %v8654_v21 = vld [vmem:[#allocation5 + $0x18] sm:$0xff]  ;;  %v8656_v25 = vld [vmem:[#allocation5 + $0x10] sm:$0xff]  ;;  %v2205_v13 = vpop.permute.xlu0 %2204 }
 0x5d3   : > { %v1926_v54 = vmul.f32 %v7793_v15, %v8654_v21  ;;  %v1925_v8 = vmul.f32 %v7793_v15, %v8656_v25  ;;  %v2210_v11 = vmul.f32 %v2205_v13, %v8654_v21  ;;  %v2209_v36 = vmul.f32 %v2205_v13, %v8656_v25 }
 0x5d5   : > { %v6461_v51 = vpack.c.bf16 %v1926_v54, %v1926_v54  ;;  %v6460_v7 = vpack.c.bf16 %v1925_v8, %v1925_v8  ;;  %v6493_v32 = vpack.c.bf16 %v2210_v11, %v2210_v11  ;;  %v6492_v42 = vpack.c.bf16 %v2209_v36, %v2209_v36 }
 0x5d6   : > { %v1920_v5 = vld [vmem:[#allocation5 + $0x8] sm:$0xff]  ;;  %v1919_v60 = vld [vmem:[#allocation5] sm:$0xff] }
 0x5d7   : > { %v1924_v6 = vmul.f32 %v7793_v15, %v1920_v5  ;;  %v1923_v50 = vmul.f32 %v7793_v15, %v1919_v60  ;;  %2229 = vrot.lane.b32.xlu0 %v6493_v32, %s10575_s5  ;;  %2227 = vrot.lane.b32.xlu1 %v6492_v42, %s10575_s5  ;;  %v2208_v53 = vmul.f32 %v2205_v13, %v1920_v5  ;;  %v2556_v32 = vld [vmem:[%s10865_s12 + $0x10] sm:$0xff]  ;;  %v2557_v42 = vld [vmem:[%s10865_s12 + $0x18] sm:$0xff]  ;;  %v10870_v5 = vmov 0  }
 0x5d8   : > { %1946 = vst.msk [vmem:[#allocation7 + $0x8] sm:$0xf] %vm1943_vm6, %v6460_v7  ;;  %1947 = vst.msk [vmem:[#allocation7 + $0xc] sm:$0xf] %vm1943_vm6, %v6461_v51  ;;  %v2207_v3 = vmul.f32 %v2205_v13, %v1919_v60  ;;  %v2555_v51 = vld [vmem:[%s10865_s12 + $0x8] sm:$0xff] }
 0x5d9   : > { %v6459_v43 = vpack.c.bf16 %v1924_v6, %v1924_v6  ;;  %v6458_v33 = vpack.c.bf16 %v1923_v50, %v1923_v50  ;;  %v6491_v35 = vpack.c.bf16 %v2208_v53, %v2208_v53 }
 0x5da   : > { %v6490_v44 = vpack.c.bf16 %v2207_v3, %v2207_v3 }
 0x5db   : > { %2225 = vrot.lane.b32.xlu0 %v6491_v35, %s10575_s5  ;;  %1944 = vst.msk [vmem:[#allocation7] sm:$0xf] %vm1943_vm6, %v6458_v33  ;;  %1945 = vst.msk [vmem:[#allocation7 + $0x4] sm:$0xf] %vm1943_vm6, %v6459_v43 }
 0x5dc   : > { %2223 = vrot.lane.b32.xlu1 %v6490_v44, %s10575_s5  ;;  %s10885_s5 = smov 22  }
 0x5fa   : > { %2591 = vmax.xlane.f32.xlu0 %v2590_v28 }
 0x600   : > { %2588 = vmax.xlane.f32.xlu1 %v2587_v45 }
 0x608   : > { %v2578_v58 = vpop.xlane.xlu0 %2577 }
 0x609   : > { %v2581_v26 = vpop.xlane.xlu1 %2580  ;;  %v2585_v14 = vmul.f32 0.00390625, %v2578_v58 }
 0x60a   : > { %v2586_v20 = vmul.f32 0.00390625, %v2581_v26 }
 0x60c   : > { %v2575_v39 = vpop.xlane.xlu0 %2574 }
 0x60d   : > { %v2572_v17 = vpop.xlane.xlu1 %2571  ;;  %v2584_v52 = vmul.f32 0.00390625, %v2575_v39 }
 0x60e   : > { %v2583_v30 = vmul.f32 0.00390625, %v2572_v17 }
 0x610   : > { %v2598_v57 = vpop.xlane.xlu0 %2597 }
 0x611   : > { %v2595_v61 = vpop.xlane.xlu1 %2594 }
 0x649   : > { %v2230_v46 = vpop.permute.xlu0 %2229  ;;  %v2228_v0 = vpop.permute.xlu1 %2227 }
 0x64a   : > { %2238 = vst.msk [vmem:[#allocation7 + $0x8c] sm:$0xf] %vm1943_vm6, %v2230_v46  ;;  %2237 = vst.msk [vmem:[#allocation7 + $0x88] sm:$0xf] %vm1943_vm6, %v2228_v0 }
 0x64d   : > { %v2226_v4 = vpop.permute.xlu0 %2225 }
 0x64e   : > { %2236 = vst.msk [vmem:[#allocation7 + $0x84] sm:$0xf] %vm1943_vm6, %v2226_v4  ;;  %v2224_v56 = vpop.permute.xlu1 %2223 }
 0x64f   : > { %2235 = vst.msk [vmem:[#allocation7 + $0x80] sm:$0xf] %vm1943_vm6, %v2224_v56 }
 0x651   : > { %v6971_v34 = vld [vmem:[#allocation7 + $0x88] sm:$0xff]  }
 0x652   : > { %6678 = vmatprep.subr.bf16.mxu1 %v6971_v34 }
 0x653   : > { %6679 = vmatpush3.bf16.msra.mxu1 %v6971_v34 }
 0x656   : > { %v6972_v40 = vld [vmem:[#allocation7 + $0x80] sm:$0xff]  }
 0x657   : > { %6680 = vmatprep.subr.bf16.mxu1 %v6972_v40 }
 0x658   : > { %6681 = vmatpush3.bf16.msra.mxu1 %v6972_v40 }
 0x659   : > { %6686 = vmatprep.subr.mxu1 %v10857_v37 }
 0x65b   : > { %6683 = vmatmul.mubr.msk.bf16.vlgmr.msra.gmra.mxu1 %vm640_vm2, %v6974_v16 }
 0x65c   : > { %6687 = vmatpush3.msra.mxu1 %v2586_v20  ;;  %6694 = vmatprep.mubr.msk.f32.mxu1 %vm7324_vm1, %v10857_v37 }
 0x65d   : > { %6688 = vmatprep.subr.mxu1 %v10857_v37 }
 0x65e   : > { %6689 = vmatpush3.msra.mxu1 %v2585_v14 }
 0x65f   : > { %6690 = vmatprep.subr.mxu1 %v10857_v37 }
 0x660   : > { %6691 = vmatpush3.msra.mxu1 %v2584_v52 }
 0x661   : > { %6692 = vmatprep.subr.mxu1 %v10857_v37 }
 0x662   : > { %6693 = vmatpush3.msra.mxu1 %v2583_v30 }
 0x663   : > { %6697 = vmatprep.subr.mxu1 %v10857_v37  ;;  %6695 = vmatmul.mubr.msk.f32.vlgmr.msra.gmra.mxu1 %vm640_vm2, %v2553_v49 }
 0x664   : > { %6698 = vmatpush3.msra.mxu1 %v2598_v57  ;;  %6705 = vmatprep.mubr.msk.f32.mxu1 %vm7324_vm1, %v10857_v37  ;;  %v2984_v57 = vadd.s32 128, %v7779_v59 }
 0x665   : > { %6699 = vmatprep.subr.mxu1 %v10857_v37 }
 0x666   : > { %6700 = vmatpush3.msra.mxu1 %v2595_v61  ;;  %v2989_v61 = vand.u32 15, %v7779_v59  ;;  %v2996_v46 = vand.u32 15, %v2984_v57 }
 0x667   : > { %6701 = vmatprep.subr.mxu1 %v10857_v37 }
 0x668   : > { %v3021_v40 = vadd.s32 4294967294, %v2989_v61  ;;  %v3022_v16 = vadd.s32 4294967294, %v2996_v46  ;;  %v3033_v14 = vadd.s32 4294967295, %v2989_v61  ;;  %v3034_v52 = vadd.s32 4294967295, %v2996_v46 }
 0x669   : > { %v3045_v59 = vadd.s32 1, %v2989_v61 }
 0x66a   : > { %vm3023_vm1 = vcmp.ge.s32.totalorder %v3021_v40, 0  ;;  %vm3035_vm7 = vcmp.ge.s32.totalorder %v3033_v14, 0  ;;  %vm3036_vm8 = vcmp.ge.s32.totalorder %v3034_v52, 0 }
 0x66b   : > { %vm3049_vm9 = vcmp.lt.s32.totalorder %v3045_v59, 16 }
 0x683   : > { %v2592_v10 = vpop.xlane.xlu0 %2591 }
 0x684   : > { %6702 = vmatpush3.msra.mxu1 %v2592_v10  ;;  %v7416_v10 = vmov 1966171168  }
 0x685   : > { %6703 = vmatprep.subr.mxu1 %v10857_v37 }
 0x689   : > { %v2589_v41 = vpop.xlane.xlu1 %2588 }
 0x68a   : > { %6704 = vmatpush3.msra.mxu1 %v2589_v41  ;;  %v3127_v41 = vunpack.c.l.s4 %v7416_v10 }
 0x68b   : > { %6706 = vmatmul.mubr.msk.f32.vlgmr.msra.gmra.mxu1 %vm640_vm2, %v2553_v49 }
 0x68c   : > { %6710 = vmatprep.mubr.msk.f32.mxu1 %vm786_vm3, %v2554_v29 }
 0x71b   : > { %v8705_v55 = vpop.f32.mrf.mxu1 }
 0x71c   : > { %10866 = vst [vmem:[#allocation96_spill] sm:$0xff] %v8705_v55 }
 0x71d   : > { %v8707_v22 = vpop.f32.mrf.mxu1 }
 0x71e   : > { %10867 = vst [vmem:[#allocation97_spill] sm:$0xff] %v8707_v22 }
 0x71f   : > { %v8709_v18 = vpop.f32.mrf.mxu1 }
 0x720   : > { %10868 = vst [vmem:[#allocation98_spill] sm:$0xff] %v8709_v18 }
 0x721   : > { %v8711_v31 = vpop.f32.mrf.mxu1 }
 0x722   : > { %10869 = vst [vmem:[#allocation99_spill] sm:$0xff] %v8711_v31 }
 0x723   : > { %v2668_v13 = vpop.f32.mrf.mxu1 }
 0x724   : > { %v2672_v7 = vmax.f32 %v2668_v13, 0.0  ;;  %v3046_v13 = vadd.s32 1, %v2996_v46 }
 0x725   : > { %v6696_v54 = vpop.f32.mrf.mxu1 }
 0x726   : > { %v3057_v54 = vadd.s32 2, %v2989_v61  ;;  %vm3050_vm10 = vcmp.lt.s32.totalorder %v3046_v13, 16 }
 0x728   : > { %vm3061_vm11 = vcmp.lt.s32.totalorder %v3057_v54, 16 }
 0x74b   : > { %v2739_v8 = vpop.f32.mrf.mxu1 }
 0x74c   : > { %v2743_v11 = vmax.f32 %v2739_v8, 0.0  ;;  %v3058_v8 = vadd.s32 2, %v2996_v46 }
 0x74d   : > { %v6707_v36 = vpop.f32.mrf.mxu1 }
 0x74e   : > { %6708 = vmatprep.subr.msk.mxu1 %vm799_vm4, %v2743_v11  ;;  %v6218_v36 = vsel %vm3023_vm1, 1.0, %v10857_v37  ;;  %vm3062_vm12 = vcmp.lt.s32.totalorder %v3058_v8, 16  ;;  %vm3459_vm1 = vcmask 138240  }
 0x74f   : > { %6709 = vmatpush3.msk.msra.mxu1 %vm799_vm4, %v2743_v11  ;;  %v3128_v11 = vunpack.c.0.s8 %v3127_v41  ;;  %4395 = vst.msk [vmem:[#allocation2] sm:$0xff] %vm3459_vm1, %v10857_v37  ;;  %4396 = vst.msk [vmem:[#allocation2 + $0x18] sm:$0xff] %vm3459_vm1, %v10857_v37 }
 0x750   : > { %6711 = vmatmul.mubr.msk.f32.vlgmr.msra.gmra.mxu1 %vm786_vm3, %v2555_v51  ;;  %6716 = vmatprep.subr.msk.mxu1 %vm799_vm4, %v2672_v7  ;;  %4397 = vst.msk [vmem:[#allocation2 + $0x30] sm:$0xff] %vm3459_vm1, %v10857_v37  ;;  %4398 = vst.msk [vmem:[#allocation2 + $0x48] sm:$0xff] %vm3459_vm1, %v10857_v37 }
 0x751   : > { %6717 = vmatpush3.msk.msra.mxu1 %vm799_vm4, %v2672_v7  ;;  %6713 = vmatprep.mubr.msk.f32.mxu1 %vm786_vm3, %v2556_v32  ;;  %vm3024_vm4 = vcmp.ge.s32.totalorder %v3022_v16, 0  ;;  %v8739_v7 = vsel %vm3035_vm7, 1.0, %v10857_v37  ;;  %vm3121_vm7 = vcmask 828824  }
 0x752   : > { %10871 = vst [vmem:[#allocation100_spill] sm:$0xff] %v8739_v7  ;;  %3122 = vst.msk [vmem:[#allocation3 + $0x4] sm:$0x3] %vm3121_vm7, %v10857_v37  ;;  %vm3522_vm7 = vcmask 162816  }
 0x754   : > { %6714 = vmatmul.mubr.msk.f32.gmra.mxu1 %vm786_vm3, %v2557_v42 }
 0x755   : > { %6718 = vmatprep.mubr.msk.f32.mxu1 %vm786_vm3, %v2554_v29 }
 0x758   : > { %6719 = vmatmul.mubr.msk.f32.vlgmr.msra.gmra.mxu1 %vm786_vm3, %v2555_v51  ;;  %v6219_v51 = vsel %vm3024_vm4, 1.0, %v10857_v37  ;;  %vm3119_vm4 = vcmask 410624  }
 0x759   : > { %6721 = vmatprep.mubr.msk.f32.mxu1 %vm786_vm3, %v2556_v32  ;;  %v8742_v32 = vsel %vm3036_vm8, 1.0, %v10857_v37  ;;  %3120 = vst.msk [vmem:[#allocation3] sm:$0x3] %vm3119_vm4, %v10857_v37  ;;  %vm3147_vm8 = vcmp.ge.s32.totalorder %v10859_v38, 51  ;;  %vm3483_vm4 = vcmask 146432  }
 0x75a   : > { %10872 = vst [vmem:[#allocation101_spill] sm:$0xff] %v8742_v32 }
 0x75c   : > { %6722 = vmatmul.mubr.msk.f32.gmra.mxu1 %vm786_vm3, %v2557_v42  ;;  %v3069_v42 = vadd.s32 3, %v2989_v61 }
 0x75d   : > { %5639 = vmatprep.mubr.bf16.mxu1 %v10870_v5 }
 0x75e   : > { %vm3073_vm13 = vcmp.lt.s32.totalorder %v3069_v42, 16 }
 0x75f   : > { %v6226_v57 = vsel %vm3073_vm13, 1.0, %v10857_v37  ;;  %vm3329_vm13 = vcmask 31744  }
 0x810   : > { %v6712_v60 = vpop.f32.mrf.mxu1 }
 0x812   : > { %v2825_v6 = vpop.f32.mrf.mxu1 }
 0x814   : > { %v6715_v50 = vpop.f32.mrf.mxu1 }
 0x816   : > { %v2835_v53 = vpop.f32.mrf.mxu1 }
 0x818   : > { %v6720_v3 = vpop.f32.mrf.mxu1 }
 0x819   : > { %v2919_v43 = vadd.f32 %v6720_v3, %v6712_v60  ;;  %v3070_v60 = vadd.s32 3, %v2996_v46  ;;  %v3215_v3 = vcombine.low %v6218_v36, %v6219_v51 }
 0x81a   : > { %v2913_v33 = vpop.f32.mrf.mxu1 }
 0x81b   : > { %v6213_v35 = vmul.f32 -1.442695, %v2919_v43  ;;  %v2914_v12 = vadd.f32 %v2913_v33, %v2825_v6  ;;  %v3009_v6 = vadd.s32 4294967293, %v2989_v61  ;;  %v3256_v43 = vcombine.low %v8739_v7, %v8742_v32 }
 0x81c   : > { %v6723_v44 = vpop.f32.mrf.mxu1  ;;  %v8750_v33 = vsel %vm3049_vm9, 1.0, %v10857_v37  ;;  %vm3074_vm14 = vcmp.lt.s32.totalorder %v3070_v60, 16  ;;  %vm3148_vm9 = vcmp.lt.s32.totalorder %v10859_v38, 307 }
 0x81d   : > { %7037 = vpow2.f32 %v6213_v35  ;;  %v6212_v28 = vmul.f32 -1.442695, %v2914_v12  ;;  %v2929_v45 = vadd.f32 %v6723_v44, %v6715_v50  ;;  %v3010_v50 = vadd.s32 4294967293, %v2996_v46  ;;  %10873 = vst [vmem:[#allocation102_spill] sm:$0xff] %v8750_v33 }
 0x81e   : > { %v2923_v26 = vpop.f32.mrf.mxu1  ;;  %v8753_v35 = vsel %vm3050_vm10, 1.0, %v10857_v37  ;;  %v6224_v44 = vsel %vm3061_vm11, 1.0, %v10857_v37  ;;  %vm3011_vm15 = vcmp.ge.s32.totalorder %v3009_v6, 0  ;;  %v6227_v61 = vsel %vm3074_vm14, 1.0, %v10857_v37  ;;  %vm3149_vm11 = vmand %vm3147_vm8, %vm3148_vm9 }
 0x81f   : > { %7039 = vpow2.f32 %v6212_v28  ;;  %v6215_v58 = vmul.f32 -1.442695, %v2929_v45  ;;  %v2924_v39 = vadd.f32 %v2923_v26, %v2835_v53  ;;  %v8745_v53 = vsub.s32 %v3128_v11, %v8606_v1  ;;  %10874 = vst [vmem:[#allocation103_spill] sm:$0xff] %v8753_v35 }
 0x820   : > { %v6225_v28 = vsel %vm3062_vm12, 1.0, %v10857_v37  ;;  %vm3012_vm5 = vcmp.ge.s32.totalorder %v3010_v50, 0  ;;  %v6216_v46 = vsel %vm3011_vm15, 1.0, %v10857_v37  ;;  %v3393_v14 = vcombine.low %v6226_v57, %v6227_v61 }
 0x821   : > { %7041 = vpow2.f32 %v6215_v58  ;;  %v6214_v17 = vmul.f32 -1.442695, %v2924_v39  ;;  %v3222_v26 = vrot.slane %v3215_v3, %v8745_v53  ;;  %v3263_v58 = vrot.slane %v3256_v43, %v8745_v53 }
 0x822   : > { %v3311_v39 = vcombine.low %v8750_v33, %v8753_v35  ;;  %v3400_v10 = vrot.slane %v3393_v14, %v8745_v53  ;;  %vm3143_vm10 = vcmask 416768   ;;  %v9062_v35 = vld [vmem:[#allocation5 + $0x18] sm:$0xff]  ;;  %vm3233_vm12 = vcmask 7168  }
 0x823   : > { %7043 = vpow2.f32 %v6214_v17  ;;  %v3352_v17 = vcombine.low %v6224_v44, %v6225_v28  ;;  %v8769_v40 = vrot.slane %v3263_v58, %v8745_v53  ;;  %vm3370_vm14 = vcmask 39936  }
 0x824   : > { %v3318_v16 = vrot.slane %v3311_v39, %v8745_v53  ;;  %vm3411_vm15 = vcmask 48128   ;;  %vm3546_vm8 = vcmask 171008   ;;  %vm3570_vm9 = vcmask 179200  }
 0x82a   : > { %v7038_v0 = vpop.eup %7037 }
 0x82b   : > { %v2945_v4 = vadd.f32 1.0, %v7038_v0  ;;  %v6217_v0 = vsel %vm3012_vm5, 1.0, %v10857_v37  ;;  %vm3435_vm5 = vcmask 130048  }
 0x82c   : > { %v7040_v56 = vpop.eup %7039  ;;  %v3186_v52 = vcombine.low %v6216_v46, %v6217_v0 }
 0x82d   : > { %7045 = vrcp.f32 %v2945_v4  ;;  %v2944_v34 = vadd.f32 1.0, %v7040_v56 }
 0x82e   : > { %v7042_v20 = vpop.eup %7041  ;;  %v3193_v41 = vrot.slane %v3186_v52, %v8745_v53 }
 0x82f   : > { %7047 = vrcp.f32 %v2944_v34  ;;  %v2947_v30 = vadd.f32 1.0, %v7042_v20  ;;  %v8766_v34 = vrot.slane %v3222_v26, %v8745_v53  ;;  %v3359_v20 = vrot.slane %v3352_v17, %v8745_v53 }
 0x830   : > { %v7044_v49 = vpop.eup %7043  ;;  %v8793_v59 = vrot.slane %v3193_v41, %v8745_v53 }
 0x831   : > { %v2946_v29 = vadd.f32 1.0, %v7044_v49  ;;  %7049 = vrcp.f32 %v2947_v30  ;;  %v8774_v30 = vrot.slane %v3318_v16, %v8745_v53  ;;  %v8781_v49 = vrot.slane %v3359_v20, %v8745_v53 }
 0x832   : > { %10879 = vst [vmem:[#allocation104_spill] sm:$0xff] %v8793_v59 }
 0x833   : > { %7051 = vrcp.f32 %v2946_v29  ;;  %v8790_v29 = vrot.slane %v3400_v10, %v8745_v53 }
 0x83a   : > { %v7046_v12 = vpop.eup %7045 }
 0x83b   : > { %2963 = vperm.xlu1 %6945, %v7046_v12  }
 0x83c   : > { %v7048_v45 = vpop.eup %7047 }
 0x83d   : > { %2958 = vperm.xlu0 %6944, %v7048_v45  }
 0x83e   : > { %v7050_v4 = vpop.eup %7049 }
 0x840   : > { %v7052_v56 = vpop.eup %7051 }
 0x841   : > { %2968 = vperm.xlu1 %6945, %v7052_v56   ;;  %2973 = vperm.xlu0 %6944, %v7050_v4  }
 0x845   : > { %3230 = vrot.lane.b32.xlu1 %v8766_v34, %s10875_s2  ;;  %3271 = vrot.lane.b32.xlu0 %v8769_v40, %s10876_s19  ;;  %s10882_s2 = smov 17  }
 0x849   : > { %3326 = vrot.lane.b32.xlu1 %v8774_v30, %s10877_s18  ;;  %3367 = vrot.lane.b32.xlu0 %v8781_v49, %s10878_s1  ;;  %s10883_s18 = smov 20   ;;  %s10884_s1 = smov 21  }
 0x84d   : > { %3408 = vrot.lane.b32.xlu1 %v8790_v29, %s10880_s22  ;;  %3432 = vrot.lane.b32.xlu0 %v8793_v59, %s10881_s21  ;;  %s10887_s22 = smov 33  }
 0x851   : > { %3456 = vrot.lane.b32.xlu1 %v8766_v34, %s10882_s2  ;;  %3480 = vrot.lane.b32.xlu0 %v8769_v40, %s10862_s17 }
 0x855   : > { %3519 = vrot.lane.b32.xlu1 %v8774_v30, %s10883_s18  ;;  %3543 = vrot.lane.b32.xlu0 %v8781_v49, %s10884_s1  ;;  %s10891_s18 = smov 38   ;;  %s10892_s1 = smov 48  }
 0x859   : > { %3567 = vrot.lane.b32.xlu1 %v8790_v29, %s10885_s5  ;;  %3591 = vrot.lane.b32.xlu0 %v8793_v59, %s10886_s28  ;;  %s7424_s5 = smov 81  }
 0x85d   : > { %3614 = vrot.lane.b32.xlu1 %v8766_v34, %s10887_s22  ;;  %3638 = vrot.lane.b32.xlu0 %v8769_v40, %s10888_s29  ;;  %s6320_s22 = sld [smem:[#allocation12 + $0x5f]] }
 0x861   : > { %3677 = vrot.lane.b32.xlu1 %v8774_v30, %s10889_s16  ;;  %3701 = vrot.lane.b32.xlu0 %v8781_v49, %s10890_s3  ;;  %s10618_s3 = smov 64   ;;  %s7418_s16 = smov 65  }
 0x865   : > { %3725 = vrot.lane.b32.xlu1 %v8790_v29, %s10891_s18  ;;  %3749 = vrot.lane.b32.xlu0 %v8793_v59, %s10892_s1  ;;  %s6233_s18 = sld [smem:[#allocation12 + $0x3]] }
 0x869   : > { %3773 = vrot.lane.b32.xlu1 %v8766_v34, %s7378_s24  ;;  %3797 = vrot.lane.b32.xlu0 %v8769_v40, %s7380_s30  ;;  %s7420_s24 = smov 66   ;;  %s7421_s30 = smov 68  }
 0x86b   : > { %v3288_v33 = vstv %s6233_s18  ;;  %s9107_s18 = sld [smem:[#allocation12 + $0x4]] }
 0x86d   : > { %3836 = vrot.lane.b32.xlu1 %v8774_v30, %s7367_s14  ;;  %3860 = vrot.lane.b32.xlu0 %v8781_v49, %s7381_s25  ;;  %s7419_s14 = smov 51   ;;  %s7422_s25 = smov 69  }
 0x871   : > { %3884 = vrot.lane.b32.xlu1 %v8790_v29, %s7383_s27  ;;  %3908 = vrot.lane.b32.xlu0 %v8793_v59, %s10618_s3  ;;  %s7423_s27 = smov 70   ;;  %s9247_s3 = sld [smem:[#allocation12 + $0x41]] }
 0x875   : > { %3930 = vrot.lane.b32.xlu1 %v8766_v34, %s7418_s16  ;;  %s9040_s16 = sld [smem:[#allocation12 + $0x1]] }
 0x8b6   : > { %v2964_v13 = vpop.permute.xlu1 %2963 }
 0x8b7   : > { %v8853_v36 = vmul.f32 %v2964_v13, %v8638_v48  ;;  %v8856_v51 = vmul.f32 %v2964_v13, %v8640_v47 }
 0x8b8   : > { %v2959_v54 = vpop.permute.xlu0 %2958 }
 0x8b9   : > { %v8847_v8 = vmul.f32 %v2959_v54, %v8642_v62  ;;  %v8850_v11 = vmul.f32 %v2959_v54, %v8644_v63  ;;  %10895 = vst [vmem:[#allocation107_spill] sm:$0xff] %v8853_v36  ;;  %10896 = vst [vmem:[#allocation108_spill] sm:$0xff] %v8856_v51 }
 0x8bb   : > { %10893 = vst [vmem:[#allocation105_spill] sm:$0xff] %v8847_v8  ;;  %10894 = vst [vmem:[#allocation106_spill] sm:$0xff] %v8850_v11  ;;  %v3081_v42 = vadd.f32 %v8853_v36, %v8847_v8  ;;  %v3090_v60 = vadd.f32 %v8856_v51, %v8850_v11 }
 0x8bc   : > { %v2969_v6 = vpop.permute.xlu1 %2968  ;;  %v2974_v50 = vpop.permute.xlu0 %2973 }
 0x8bd   : > { %v8863_v62 = vmul.f32 %v2969_v6, %v8626_v27  ;;  %v8866_v63 = vmul.f32 %v2969_v6, %v8628_v2  ;;  %v8869_v48 = vmul.f32 %v2974_v50, %v8630_v24  ;;  %v8872_v47 = vmul.f32 %v2974_v50, %v8632_v23 }
 0x8bf   : > { %10897 = vst [vmem:[#allocation109_spill] sm:$0xff] %v8863_v62  ;;  %10898 = vst [vmem:[#allocation110_spill] sm:$0xff] %v8866_v63  ;;  %v3082_v3 = vadd.f32 %v3081_v42, %v8863_v62  ;;  %v3091_v43 = vadd.f32 %v3090_v60, %v8866_v63  ;;  %v3101_v12 = vmax.f32 %v8847_v8, %v8863_v62 }
 0x8c0   : > { %10899 = vst [vmem:[#allocation111_spill] sm:$0xff] %v8869_v48  ;;  %10900 = vst [vmem:[#allocation112_spill] sm:$0xff] %v8872_v47  ;;  %v3110_v27 = vmax.f32 %v8850_v11, %v8866_v63  ;;  %v3102_v2 = vmax.f32 %v8853_v36, %v8869_v48  ;;  %v3111_v24 = vmax.f32 %v8856_v51, %v8872_v47 }
 0x8c1   : > { %v3083_v44 = vadd.f32 %v3082_v3, %v8869_v48  ;;  %v3092_v23 = vadd.f32 %v3091_v43, %v8872_v47 }
 0x8c2   : > { %v3103_v28 = vmax.f32 %v3101_v12, %v3102_v2  ;;  %v3112_v45 = vmax.f32 %v3110_v27, %v3111_v24 }
 0x8c3   : > { %v3084_v26 = vrot.slane %v3083_v44, 4  ;;  %v3093_v58 = vrot.slane %v3092_v23, 4 }
 0x8c4   : > { %v3104_v39 = vrot.slane %v3103_v28, 4  ;;  %v3113_v17 = vrot.slane %v3112_v45, 4 }
 0x8c5   : > { %v3085_v57 = vadd.f32 %v3084_v26, %v3083_v44  ;;  %v3094_v61 = vadd.f32 %v3093_v58, %v3092_v23 }
 0x8c6   : > { %v3105_v46 = vmax.f32 %v3103_v28, %v3104_v39  ;;  %v3114_v0 = vmax.f32 %v3112_v45, %v3113_v17 }
 0x8c7   : > { %v3086_v4 = vrot.slane %v3085_v57, 2  ;;  %v3095_v56 = vrot.slane %v3094_v61, 2 }
 0x8c8   : > { %v3106_v16 = vrot.slane %v3105_v46, 2  ;;  %v3115_v20 = vrot.slane %v3114_v0, 2 }
 0x8c9   : > { %v3087_v14 = vadd.f32 %v3086_v4, %v3085_v57  ;;  %v3096_v52 = vadd.f32 %v3095_v56, %v3094_v61 }
 0x8ca   : > { %v3107_v10 = vmax.f32 %v3105_v46, %v3106_v16  ;;  %v3116_v41 = vmax.f32 %v3114_v0, %v3115_v20 }
 0x8cb   : > { %v3088_v13 = vrot.slane %v3087_v14, 1  ;;  %v3097_v54 = vrot.slane %v3096_v52, 1 }
 0x8cc   : > { %v3108_v42 = vrot.slane %v3107_v10, 1  ;;  %v3117_v60 = vrot.slane %v3116_v41, 1 }
 0x8cd   : > { %v3089_v6 = vadd.f32 %v3088_v13, %v3087_v14  ;;  %v3098_v50 = vadd.f32 %v3097_v54, %v3096_v52 }
 0x8ce   : > { %v3109_v3 = vmax.f32 %v3107_v10, %v3108_v42  ;;  %v3118_v43 = vmax.f32 %v3116_v41, %v3117_v60 }
 0x8cf   : > { %v3099_v12 = vmul.f32 0.03125, %v3089_v6  ;;  %v3100_v27 = vmul.f32 0.03125, %v3098_v50 }
 0x8d0   : > { %v3153_v2 = vcombine.low %v3109_v3, %v3118_v43 }
 0x8d1   : > { %v3125_v24 = vcombine.low %v3099_v12, %v3100_v27 }
 0x8d2   : > { %v3160_v44 = vrot.slane %v3153_v2, %v8745_v53 }
 0x8d3   : > { %v3132_v23 = vrot.slane %v3125_v24, %v8745_v53 }
 0x8d4   : > { %v3167_v28 = vrot.slane %v3160_v44, %v8745_v53 }
 0x8d5   : > { %v3139_v45 = vrot.slane %v3132_v23, %v8745_v53  ;;  %v8920_v53 = vpop.permute.xlu1 %3230 }
 0x8d6   : > { %3168 = vrot.lane.b32.xlu0 %v3167_v28, %s7419_s14 }
 0x8d7   : > { %3140 = vrot.lane.b32.xlu1 %v3139_v45, %s7419_s14  ;;  %s9042_s14 = sld [smem:[#allocation12 + $0x34]] }
 0x8da   : > { %3954 = vrot.lane.b32.xlu0 %v8769_v40, %s7420_s24  ;;  %s9044_s24 = sld [smem:[#allocation12 + $0x32]] }
 0x8db   : > { %3993 = vrot.lane.b32.xlu1 %v8774_v30, %s7421_s30  ;;  %s9050_s30 = sld [smem:[#allocation12 + $0x1f]] }
 0x8de   : > { %4150 = vrot.lane.b32.xlu0 %v8774_v30, %s7408_s0  ;;  %s7425_s0 = smov 97  }
 0x8df   : > { %4017 = vrot.lane.b32.xlu1 %v8781_v49, %s7422_s25  ;;  %s9052_s25 = sld [smem:[#allocation12 + $0xa]] }
 0x8e2   : > { %4174 = vrot.lane.b32.xlu0 %v8781_v49, %s7403_s10  ;;  %s10901_s10 = smov 8  }
 0x8e3   : > { %4041 = vrot.lane.b32.xlu1 %v8790_v29, %s7423_s27  ;;  %s9055_s27 = sld [smem:[#allocation12 + $0x50]] }
 0x8e6   : > { %4198 = vrot.lane.b32.xlu0 %v8790_v29, %s7406_s26  ;;  %s10902_s26 = smov 10  }
 0x8e7   : > { %4065 = vrot.lane.b32.xlu1 %v8793_v59, %s10619_s4  ;;  %s10933_s4 = smov 122  }
 0x8ea   : > { %4222 = vrot.lane.b32.xlu0 %v8793_v59, %s7393_s7  ;;  %v3291_v59 = vstv %s9042_s14  ;;  %s10922_s14 = smov 125  }
 0x8eb   : > { %4087 = vrot.lane.b32.xlu1 %v8766_v34, %s7424_s5  ;;  %s9058_s5 = sld [smem:[#allocation12 + $0x3b]] }
 0x8ee   : > { %4244 = vrot.lane.b32.xlu0 %v8766_v34, %s7425_s0  ;;  %v6488_v34 = vpack.c.bf16 %v8656_v25, %v8656_v25  ;;  %s9064_s0 = sld [smem:[#allocation12 + $0x2d]] }
 0x8ef   : > { %4111 = vrot.lane.b32.xlu1 %v8769_v40, %s7409_s8  ;;  %s6319_s8 = sld [smem:[#allocation12 + $0x2e]] }
 0x8f2   : > { %4268 = vrot.lane.b32.xlu0 %v8769_v40, %s7396_s23  ;;  %v8927_v40 = vpop.permute.xlu1 %3326  ;;  %s6306_s23 = sld [smem:[#allocation12 + $0x58]] }
 0x8f3   : > { %4307 = vrot.lane.b32.xlu1 %v8774_v30, %s7394_s20  ;;  %v6489_v30 = vpack.c.bf16 %v8654_v21, %v8654_v21  ;;  %s6305_s20 = sld [smem:[#allocation12 + $0x27]] }
 0x8f6   : > { %2023 = vrot.lane.b32.xlu0 %v7793_v15, %s10901_s10 }
 0x8f7   : > { %2133 = vrot.lane.b32.xlu1 %v7793_v15, %s10881_s21  ;;  %v8931_v15 = vpop.permute.xlu0 %3271 }
 0x8f8   : > { %v4147_v55 = vstv %s6306_s23  ;;  %s9094_s23 = sld [smem:[#allocation12 + $0x18]] }
 0x8f9   : > { %v4144_v9 = vstv %s6305_s20  ;;  %s9084_s20 = sld [smem:[#allocation12 + $0x2]] }
 0x8fa   : > { %4331 = vrot.lane.b32.xlu0 %v8781_v49, %s7389_s15  ;;  %v8936_v49 = vpop.permute.xlu1 %3408  ;;  %s6292_s15 = sld [smem:[#allocation12 + $0x51]] }
 0x8fb   : > { %2094 = vrot.lane.b32.xlu1 %v7806_v19, %s10902_s26  ;;  %v8938_v25 = vpop.permute.xlu0 %3367  ;;  %s9072_s26 = sld [smem:[#allocation12 + $0x11]] }
 0x8fe   : > { %4355 = vrot.lane.b32.xlu0 %v8790_v29, %s7392_s9  ;;  %v8940_v26 = vpop.permute.xlu1 %3456  ;;  %s6291_s9 = sld [smem:[#allocation12 + $0x20]] }
 0x8ff   : > { %2188 = vrot.lane.b32.xlu1 %v6488_v34, %s7379_s6  ;;  %v8942_v29 = vpop.permute.xlu0 %3432 }
 0x902   : > { %1984 = vrot.lane.b32.xlu0 %v7806_v19, %s10876_s19  ;;  %v8944_v58 = vpop.permute.xlu1 %3519 }
 0x903   : > { %v8946_v39 = vpop.permute.xlu0 %3480 }
 0x906   : > { %2190 = vrot.lane.b32.xlu0 %v6489_v30, %s7379_s6  ;;  %v8948_v19 = vpop.permute.xlu1 %3567 }
 0x907   : > { %v8950_v17 = vpop.permute.xlu0 %3543 }
 0x90a   : > { %v8952_v57 = vpop.permute.xlu1 %3614 }
 0x90b   : > { %v8954_v21 = vpop.permute.xlu0 %3591 }
 0x90e   : > { %v8956_v61 = vpop.permute.xlu1 %3677 }
 0x90f   : > { %v8958_v46 = vpop.permute.xlu0 %3638 }
 0x912   : > { %v8960_v0 = vpop.permute.xlu1 %3725 }
 0x913   : > { %v8962_v4 = vpop.permute.xlu0 %3701 }
 0x916   : > { %v8964_v56 = vpop.permute.xlu1 %3773 }
 0x917   : > { %v8966_v16 = vpop.permute.xlu0 %3749 }
 0x91a   : > { %v8968_v20 = vpop.permute.xlu1 %3836 }
 0x91b   : > { %v8970_v14 = vpop.permute.xlu0 %3797 }
 0x91e   : > { %v8972_v52 = vpop.permute.xlu1 %3884 }
 0x91f   : > { %v8974_v10 = vpop.permute.xlu0 %3860 }
 0x922   : > { %v8976_v41 = vpop.permute.xlu1 %3930 }
 0x923   : > { %v8978_v13 = vpop.permute.xlu0 %3908 }
 0x948   : > { %v3169_v54 = vpop.permute.xlu0 %3168 }
 0x949   : > { %v3170_v42 = vrot.slane %v3169_v54, 7  ;;  %v3141_v60 = vpop.permute.xlu1 %3140 }
 0x94a   : > { %v3142_v6 = vrot.slane %v3141_v60, 7 }
 0x94b   : > { %v3171_v50 = vsel %vm3143_vm10, %v3170_v42, %v3169_v54 }
 0x94c   : > { %3174 = vst.msk [vmem:[#allocation3 + $0x1] ss:$2 sm:$0x7] %vm3149_vm11, %v3171_v50  ;;  %v3144_v3 = vsel %vm3143_vm10, %v3142_v6, %v3141_v60  ;;  %v8982_v43 = vpop.permute.xlu0 %3954  ;;  %v3987_v50 = vstv %s6291_s9  ;;  %s9082_s9 = sld [smem:[#allocation12 + $0x42]]  ;;  %vm3680_vm10 = vcmask 293888  }
 0x94d   : > { %3150 = vst.msk [vmem:[#allocation3] ss:$2 sm:$0x7] %vm3149_vm11, %v3144_v3  ;;  %v8984_v12 = vpop.permute.xlu1 %3993  ;;  %v3990_v3 = vstv %s6292_s15  ;;  %s9079_s15 = sld [smem:[#allocation12 + $0x5e]]  ;;  %vm3728_vm11 = vcmask 310272  }
 0x94e   : > { %10903 = vst [vmem:[#allocation113_spill] sm:$0xff] %v8984_v12 }
 0x950   : > { %v8986_v27 = vpop.permute.xlu0 %4150 }
 0x951   : > { %10904 = vst [vmem:[#allocation114_spill] sm:$0xff] %v8986_v27  ;;  %v8988_v2 = vpop.permute.xlu1 %4017 }
 0x953   : > { %v9018_v31 = vld [vmem:[#allocation3 + $0x1] ss:$2 sm:$0x7]  ;;  %v4289_v27 = vstv %s9079_s15  ;;  %s9156_s15 = sld [smem:[#allocation12 + $0x7]] }
 0x954   : > { %v8990_v24 = vpop.permute.xlu0 %4174  ;;  %v9016_v22 = vld [vmem:[#allocation3] ss:$2 sm:$0x7]  ;;  %v3991_v51 = vmul.f32 %v3990_v3, %v9018_v31  ;;  %v9026_v11 = vld [vmem:[#allocation3 + $0x1] ss:$2 sm:$0x7] }
 0x955   : > { %10905 = vst [vmem:[#allocation115_spill] sm:$0xff] %v8990_v24  ;;  %v8992_v38 = vpop.permute.xlu1 %4041  ;;  %v3988_v36 = vmul.f32 %v3987_v50, %v9016_v22  ;;  %v9024_v8 = vld [vmem:[#allocation3] ss:$2 sm:$0x7]  ;;  %v4148_v47 = vmul.f32 %v4147_v55, %v9026_v11 }
 0x956   : > { %10906 = vst [vmem:[#allocation116_spill] sm:$0xff] %v8992_v38  ;;  %v4145_v48 = vmul.f32 %v4144_v9, %v9024_v8  ;;  %v9046_v55 = vld [vmem:[#allocation3] ss:$2 sm:$0x7]  ;;  %v3248_v38 = vstv %s9084_s20  ;;  %s9164_s20 = sld [smem:[#allocation12 + $0x37]] }
 0x957   : > { %v9030_v62 = vadd.f32 %v3991_v51, %v3988_v36  ;;  %v4301_v36 = vstv %s6319_s8  ;;  %v4304_v51 = vstv %s6320_s22  ;;  %s9096_s8 = sld [smem:[#allocation12 + $0x33]] }
 0x958   : > { %v8994_v44 = vpop.permute.xlu0 %4198  ;;  %v9034_v1 = vadd.f32 %v4148_v47, %v4145_v48  ;;  %v4302_v48 = vmul.f32 %v4301_v36, %v9046_v55  ;;  %v9070_v36 = vld [vmem:[#allocation5 + $0x10] sm:$0xff]  ;;  %s9104_s22 = sld [smem:[#allocation12 + $0x49]] }
 0x959   : > { %10907 = vst [vmem:[#allocation117_spill] sm:$0xff] %v8994_v44  ;;  %v8996_v23 = vpop.permute.xlu1 %4065  ;;  %10917 = vst [vmem:[#allocation127_spill] sm:$0xff] %v9030_v62  ;;  %v9115_v44 = vld [vmem:[#allocation3] ss:$2 sm:$0x7] }
 0x95a   : > { %10908 = vst [vmem:[#allocation118_spill] sm:$0xff] %v8996_v23  ;;  %10919 = vst [vmem:[#allocation129_spill] sm:$0xff] %v9034_v1  ;;  %v4286_v1 = vstv %s9064_s0  ;;  %v9139_v23 = vld [vmem:[#allocation3] ss:$2 sm:$0x7]  ;;  %s10923_s0 = smov 109  }
 0x95c   : > { %v8998_v28 = vpop.permute.xlu0 %4222 }
 0x95d   : > { %10909 = vst [vmem:[#allocation119_spill] sm:$0xff] %v8998_v28  ;;  %v9000_v45 = vpop.permute.xlu1 %4087  ;;  %v3501_v28 = vstv %s9058_s5  ;;  %s9145_s5 = sld [smem:[#allocation12 + $0x36]] }
 0x95e   : > { %10910 = vst [vmem:[#allocation120_spill] sm:$0xff] %v9000_v45  ;;  %v9129_v45 = vld [vmem:[#allocation3 + $0x1] ss:$2 sm:$0x7] }
 0x960   : > { %v9002_v34 = vpop.permute.xlu0 %4244 }
 0x961   : > { %10911 = vst [vmem:[#allocation121_spill] sm:$0xff] %v9002_v34  ;;  %v9004_v30 = vpop.permute.xlu1 %4111  ;;  %v3204_v34 = vld [vmem:[#allocation3] ss:$2 sm:$0x7] }
 0x962   : > { %10912 = vst [vmem:[#allocation122_spill] sm:$0xff] %v9004_v30  ;;  %v3245_v30 = vld [vmem:[#allocation3] ss:$2 sm:$0x7] }
 0x964   : > { %v9006_v54 = vpop.permute.xlu0 %4268 }
 0x965   : > { %10913 = vst [vmem:[#allocation123_spill] sm:$0xff] %v9006_v54  ;;  %v9008_v42 = vpop.permute.xlu1 %4307  ;;  %v9091_v54 = vld [vmem:[#allocation5] sm:$0xff] }
 0x966   : > { %10914 = vst [vmem:[#allocation124_spill] sm:$0xff] %v9008_v42  ;;  %v9111_v24 = vpack.c.bf16 %v9091_v54, %v9091_v54 }
 0x968   : > { %v9010_v60 = vpop.permute.xlu0 %2023  ;;  %10921 = vst [vmem:[#allocation131_spill] sm:$0xff] %v9111_v24 }
 0x969   : > { %v9012_v6 = vpop.permute.xlu1 %2133  ;;  %v2029_v32 = vmul.f32 %v9010_v60, %v9062_v35  ;;  %v2028_v7 = vmul.f32 %v9010_v60, %v9070_v36 }
 0x96c   : > { %v9014_v18 = vpop.permute.xlu0 %4331 }
 0x96d   : > { %10915 = vst [vmem:[#allocation125_spill] sm:$0xff] %v9014_v18  ;;  %v9020_v5 = vpop.permute.xlu1 %2094 }
 0x96e   : > { %10916 = vst [vmem:[#allocation126_spill] sm:$0xff] %v9020_v5  ;;  %v9087_v5 = vld [vmem:[#allocation3] ss:$2 sm:$0x7] }
 0x970   : > { %v9032_v63 = vpop.permute.xlu0 %4355 }
 0x971   : > { %10918 = vst [vmem:[#allocation128_spill] sm:$0xff] %v9032_v63  ;;  %v2189_v37 = vpop.permute.xlu1 %2188  ;;  %v6473_v63 = vpack.c.bf16 %v2029_v32, %v2029_v32  ;;  %v3498_v32 = vstv %s9052_s25  ;;  %s9133_s25 = sld [smem:[#allocation12 + $0x57]] }
 0x972   : > { %2198 = vst.msk [vmem:[#allocation7 + $0x78] sm:$0xf] %vm1943_vm6, %v2189_v37  ;;  %v9048_v37 = vld [vmem:[#allocation3 + $0x1] ss:$2 sm:$0x7] }
 0x973   : > { %v4305_v47 = vmul.f32 %v4304_v51, %v9048_v37  ;;  %v9074_v51 = vld [vmem:[#allocation3 + $0x1] ss:$2 sm:$0x7]  ;;  %2048 = vrot.lane.b32.xlu0 %v6473_v63, %s7374_s13 }
 0x974   : > { %v9037_v50 = vpop.permute.xlu0 %1984  ;;  %v3292_v42 = vmul.f32 %v3291_v59, %v9074_v51  ;;  %v3207_v59 = vstv %s9040_s16  ;;  %s9120_s16 = sld [smem:[#allocation12 + $0x26]] }
 0x975   : > { %v3208_v62 = vmul.f32 %v3207_v59, %v3204_v34  ;;  %v3815_v34 = vstv %s9094_s23  ;;  %v3246_v59 = vld [vmem:[#allocation3 + $0x1] ss:$2 sm:$0x7]  ;;  %s10925_s23 = smov 93  }
 0x978   : > { %v2191_v3 = vpop.permute.xlu0 %2190 }
 0x979   : > { %2199 = vst.msk [vmem:[#allocation7 + $0x7c] sm:$0xf] %vm1943_vm6, %v2191_v3  ;;  %v9060_v3 = vld [vmem:[#allocation3] ss:$2 sm:$0x7] }
 0x980   : > { %v6975_v9 = vld [vmem:[#allocation7 + $0x78] sm:$0xff]  }
 0x981   : > { %6588 = vmatprep.subr.bf16.mxu0 %v6975_v9  ;;  %v9066_v9 = vadd.f32 %v4305_v47, %v4302_v48  ;;  %v3289_v48 = vmul.f32 %v3288_v33, %v9060_v3  ;;  %v6472_v47 = vpack.c.bf16 %v2028_v7, %v2028_v7  ;;  %v3975_v7 = vstv %s9055_s27  ;;  %v9100_v33 = vld [vmem:[#allocation3 + $0x1] ss:$2 sm:$0x7]  ;;  %s7426_s27 = smov 61  }
 0x983   : > { %10920 = vst [vmem:[#allocation130_spill] sm:$0xff] %v9066_v9  ;;  %v3972_v9 = vstv %s9050_s30  ;;  %2046 = vrot.lane.b32.xlu1 %v6472_v47, %s7374_s13  ;;  %v3293_v18 = vadd.f32 %v3292_v42, %v3289_v48  ;;  %v3499_v47 = vmul.f32 %v3498_v32, %v9087_v5  ;;  %v3656_v42 = vstv %s9072_s26  ;;  %s9123_s30 = sld [smem:[#allocation12 + $0x35]]  ;;  %v3205_v48 = vld [vmem:[#allocation3 + $0x1] ss:$2 sm:$0x7] }
 0x984   : > { %v3973_v63 = vmul.f32 %v3972_v9, %v9016_v22  ;;  %v3976_v22 = vmul.f32 %v3975_v7, %v9018_v31  ;;  %v3210_v9 = vstv %s9044_s24  ;;  %v3502_v32 = vmul.f32 %v3501_v28, %v9100_v33  ;;  %s9136_s24 = sld [smem:[#allocation12 + $0x5]] }
 0x985   : > { %3295 = vrot.lane.b32.xlu0 %v3293_v18, %s10922_s14  ;;  %v4287_v31 = vmul.f32 %v4286_v1, %v9046_v55  ;;  %v3659_v7 = vstv %s9082_s9  ;;  %v3211_v28 = vmul.f32 %v3210_v9, %v3205_v48  ;;  %v4290_v1 = vmul.f32 %v4289_v27, %v9048_v37  ;;  %s9153_s26 = sld [smem:[#allocation12 + $0x6]]  ;;  %s10924_s9 = smov 29  }
 0x986   : > { %v3977_v18 = vadd.f32 %v3976_v22, %v3973_v63  ;;  %v3503_v12 = vadd.f32 %v3502_v32, %v3499_v47  ;;  %v3232_v55 = vrot.slane %v8920_v53, 7  ;;  %v3251_v63 = vstv %s9096_s8  ;;  %v9149_v22 = vld [vmem:[#allocation3 + $0x1] ss:$2 sm:$0x7]  ;;  %s9168_s8 = sld [smem:[#allocation12 + $0x38]] }
 0x987   : > { %2184 = vrot.lane.b32.xlu1 %v9111_v24, %s7379_s6  ;;  %v3657_v24 = vmul.f32 %v3656_v42, %v9115_v44  ;;  %v3660_v47 = vmul.f32 %v3659_v7, %v9129_v45  ;;  %v3249_v42 = vmul.f32 %v3248_v38, %v3245_v30  ;;  %v3212_v9 = vadd.f32 %v3211_v28, %v3208_v62  ;;  %s9182_s14 = sld [smem:[#allocation12 + $0x39]] }
 0x988   : > { %v4291_v48 = vadd.f32 %v4290_v1, %v4287_v31  ;;  %v3818_v32 = vstv %s9104_s22  ;;  %v3303_v27 = vstv %s9107_s18  ;;  %v4129_v7 = vstv %s9120_s16  ;;  %s9174_s22 = sld [smem:[#allocation12 + $0x8]]  ;;  %s10926_s18 = smov 127  }
 0x989   : > { %3979 = vrot.lane.b32.xlu0 %v3977_v18, %s7426_s27  ;;  %v3661_v37 = vadd.f32 %v3660_v47, %v3657_v24  ;;  %v3816_v18 = vmul.f32 %v3815_v34, %v9139_v23  ;;  %v3234_v38 = vsel %vm3233_vm12, %v3232_v55, %v8920_v53  ;;  %v3273_v62 = vrot.slane %v8931_v15, 7  ;;  %s10927_s16 = smov 77   ;;  %s10928_s27 = smov 126  }
 0x98a   : > { %v3306_v30 = vstv %s9123_s30  ;;  %v3819_v24 = vmul.f32 %v3818_v32, %v9149_v22  ;;  %v3304_v31 = vmul.f32 %v3303_v27, %v9060_v3  ;;  %v3236_v1 = vmul.f32 %v3234_v38, %v3212_v9  ;;  %v3342_v9 = vld [vmem:[#allocation3 + $0x1] ss:$2 sm:$0x7]  ;;  %s9186_s30 = sld [smem:[#allocation12 + $0x9]] }
 0x98b   : > { %3505 = vrot.lane.b32.xlu1 %v3503_v12, %s10923_s0  ;;  %v3252_v12 = vmul.f32 %v3251_v63, %v3246_v59  ;;  %v4132_v34 = vstv %s9133_s25  ;;  %v3344_v63 = vstv %s9136_s24  ;;  %v3341_v59 = vld [vmem:[#allocation3] ss:$2 sm:$0x7]  ;;  %v4130_v55 = vmul.f32 %v4129_v7, %v9024_v8  ;;  %s9189_s25 = sld [smem:[#allocation12 + $0x3a]]  ;;  %s10929_s0 = smov 45  }
 0x98c   : > { %v3820_v53 = vadd.f32 %v3819_v24, %v3816_v18  ;;  %v3307_v47 = vmul.f32 %v3306_v30, %v9074_v51  ;;  %v3328_v3 = vrot.slane %v8927_v40, 7  ;;  %v4133_v8 = vmul.f32 %v4132_v34, %v9026_v11  ;;  %s9194_s24 = sld [smem:[#allocation12 + $0xb]]  ;;  %v3423_v38 = vld [vmem:[#allocation3] ss:$2 sm:$0x7] }
 0x98d   : > { %4293 = vrot.lane.b32.xlu0 %v4291_v48, %s10924_s9  ;;  %v3253_v28 = vadd.f32 %v3252_v12, %v3249_v42  ;;  %v3274_v48 = vsel %vm786_vm3, %v3273_v62, %v8931_v15  ;;  %v3347_v42 = vstv %s9145_s5  ;;  %v3345_v51 = vmul.f32 %v3344_v63, %v3341_v59  ;;  %v3382_v15 = vld [vmem:[#allocation3] ss:$2 sm:$0x7]  ;;  %s9201_s5 = sld [smem:[#allocation12 + $0x3c]] }
 0x98e   : > { %v3308_v32 = vadd.f32 %v3307_v47, %v3304_v31  ;;  %v4134_v18 = vadd.f32 %v4133_v8, %v4130_v55  ;;  %v2026_v12 = vmul.f32 %v9091_v54, %v9010_v60  ;;  %v3426_v7 = vstv %s9156_s15  ;;  %v3383_v31 = vld [vmem:[#allocation3 + $0x1] ss:$2 sm:$0x7]  ;;  %s9207_s15 = sld [smem:[#allocation12 + $0x3d]] }
 0x98f   : > { %3663 = vrot.lane.b32.xlu1 %v3661_v37, %s10925_s23  ;;  %v3276_v27 = vmul.f32 %v3274_v48, %v3253_v28  ;;  %v3385_v37 = vstv %s9153_s26  ;;  %v3348_v11 = vmul.f32 %v3347_v42, %v3342_v9  ;;  %v3330_v62 = vsel %vm3329_vm13, %v3328_v3, %v8927_v40  ;;  %s9205_s26 = sld [smem:[#allocation12 + $0xc]]  ;;  %v3424_v28 = vld [vmem:[#allocation3 + $0x1] ss:$2 sm:$0x7] }
 0x990   : > { %v3369_v30 = vrot.slane %v8938_v25, 7  ;;  %v3388_v24 = vstv %s9164_s20  ;;  %v3429_v54 = vstv %s9168_s8  ;;  %v3332_v63 = vmul.f32 %v3330_v62, %v3308_v32  ;;  %s9212_s9 = sld [smem:[#allocation12 + $0xd]]  ;;  %v3447_v48 = vld [vmem:[#allocation3] ss:$2 sm:$0x7]  ;;  %s10930_s20 = smov 124  }
 0x991   : > { %3238 = vrot.lane.b32.xlu0 %v3236_v1, %s10926_s18  ;;  %v3386_v1 = vmul.f32 %v3385_v37, %v3382_v15  ;;  %v3349_v34 = vadd.f32 %v3348_v11, %v3345_v51  ;;  %v3427_v40 = vmul.f32 %v3426_v7, %v3423_v38  ;;  %v6470_v59 = vpack.c.bf16 %v2026_v12, %v2026_v12  ;;  %s9218_s23 = sld [smem:[#allocation12 + $0x3e]]  ;;  %v3448_v32 = vld [vmem:[#allocation3 + $0x1] ss:$2 sm:$0x7]  ;;  %v9236_v62 = vld [vmem:[#allocation5 + $0x8] sm:$0xff] }
 0x992   : > { %v3450_v55 = vstv %s9174_s22  ;;  %v3389_v47 = vmul.f32 %v3388_v24, %v3383_v31  ;;  %v3371_v3 = vsel %vm3370_vm14, %v3369_v30, %v8938_v25  ;;  %v3410_v42 = vrot.slane %v8936_v49, 7  ;;  %s9223_s8 = sld [smem:[#allocation12 + $0xe]]  ;;  %v3471_v7 = vld [vmem:[#allocation3] ss:$2 sm:$0x7] }
 0x993   : > { %3822 = vrot.lane.b32.xlu1 %v3820_v53, %s10927_s16  ;;  %v2139_v53 = vmul.f32 %v9012_v6, %v9062_v35  ;;  %v3430_v9 = vmul.f32 %v3429_v54, %v3424_v28  ;;  %v3434_v8 = vrot.slane %v8942_v29, 7  ;;  %v3453_v51 = vstv %s9182_s14  ;;  %s9225_s22 = sld [smem:[#allocation12 + $0x3f]]  ;;  %v3472_v54 = vld [vmem:[#allocation3 + $0x1] ss:$2 sm:$0x7] }
 0x994   : > { %v3373_v37 = vmul.f32 %v3371_v3, %v3349_v34  ;;  %v3451_v25 = vmul.f32 %v3450_v55, %v3447_v48  ;;  %v3474_v12 = vstv %s9186_s30  ;;  %s9228_s16 = sld [smem:[#allocation12 + $0xf]]  ;;  %v3412_v11 = vsel %vm3411_vm15, %v3410_v42, %v8936_v49  ;;  %v3582_v3 = vld [vmem:[#allocation3] ss:$2 sm:$0x7] }
 0x995   : > { %3278 = vrot.lane.b32.xlu0 %v3276_v27, %s10928_s27  ;;  %v3390_v27 = vadd.f32 %v3389_v47, %v3386_v1  ;;  %v3431_v15 = vadd.f32 %v3430_v9, %v3427_v40  ;;  %s9233_s14 = sld [smem:[#allocation12 + $0x40]]  ;;  %v3454_v38 = vmul.f32 %v3453_v51, %v3448_v32  ;;  %v3436_v30 = vsel %vm3435_vm5, %v3434_v8, %v8942_v29 }
 0x996   : > { %v3458_v24 = vrot.slane %v8940_v26, 7  ;;  %v3477_v31 = vstv %s9189_s25  ;;  %s9242_s30 = sld [smem:[#allocation12 + $0x10]]  ;;  %v3475_v49 = vmul.f32 %v3474_v12, %v3471_v7  ;;  %v3482_v29 = vrot.slane %v8946_v39, 7 }
 0x997   : > { %4136 = vrot.lane.b32.xlu1 %v4134_v18, %s10929_s0  ;;  %v6485_v18 = vpack.c.bf16 %v2139_v53, %v2139_v53  ;;  %s10931_s0 = smov 123   ;;  %v3414_v28 = vmul.f32 %v3412_v11, %v3390_v27  ;;  %v3455_v1 = vadd.f32 %v3454_v38, %v3451_v25  ;;  %v3438_v34 = vmul.f32 %v3436_v30, %v3431_v15  ;;  %s9251_s25 = sld [smem:[#allocation12 + $0x43]] }
 0x998   : > { %v3478_v40 = vmul.f32 %v3477_v31, %v3472_v54  ;;  %v3460_v53 = vsel %vm3459_vm1, %v3458_v24, %v8940_v26  ;;  %v3516_v55 = vstv %s9201_s5  ;;  %v2027_v47 = vmul.f32 %v9236_v62, %v9010_v60  ;;  %s9271_s5 = sld [smem:[#allocation12 + $0x45]]  ;;  %v3534_v26 = vld [vmem:[#allocation3] ss:$2 sm:$0x7] }
 0x999   : > { %3334 = vrot.lane.b32.xlu0 %v3332_v63, %s10930_s20  ;;  %s10932_s20 = smov 112   ;;  %v3513_v63 = vstv %s9194_s24  ;;  %v3585_v48 = vstv %s9223_s8  ;;  %s9266_s24 = sld [smem:[#allocation12 + $0x14]]  ;;  %v3462_v8 = vmul.f32 %v3460_v53, %v3455_v1  ;;  %v3537_v51 = vstv %s9205_s26  ;;  %v3559_v53 = vld [vmem:[#allocation3 + $0x1] ss:$2 sm:$0x7] }
 0x99a   : > { %v3514_v42 = vmul.f32 %v3513_v63, %v9087_v5  ;;  %v3479_v9 = vadd.f32 %v3478_v40, %v3475_v49  ;;  %v3540_v32 = vstv %s9207_s15  ;;  %v3484_v60 = vsel %vm3483_vm4, %v3482_v29, %v8946_v39  ;;  %s9279_s8 = sld [smem:[#allocation12 + $0x44]]  ;;  %v3583_v5 = vld [vmem:[#allocation3 + $0x1] ss:$2 sm:$0x7] }
 0x99b   : > { %2042 = vrot.lane.b32.xlu1 %v6470_v59, %s7374_s13  ;;  %v9256_v59 = vpack.c.bf16 %v9236_v62, %v9236_v62  ;;  %v3561_v27 = vstv %s9212_s9  ;;  %v3517_v25 = vmul.f32 %v3516_v55, %v9100_v33  ;;  %v3521_v15 = vrot.slane %v8944_v58, 7  ;;  %s9284_s26 = sld [smem:[#allocation12 + $0x15]] }
 0x99c   : > { %v3586_v39 = vmul.f32 %v3585_v48, %v3582_v3  ;;  %v6471_v12 = vpack.c.bf16 %v2027_v47, %v2027_v47  ;;  %v2138_v7 = vmul.f32 %v9012_v6, %v9070_v36  ;;  %s9289_s15 = sld [smem:[#allocation12 + $0x16]]  ;;  %v3538_v33 = vmul.f32 %v3537_v51, %v3534_v26 }
 0x99d   : > { %3375 = vrot.lane.b32.xlu0 %v3373_v37, %s10931_s0  ;;  %s9244_s0 = sld [smem:[#allocation12 + $0x12]]  ;;  %v3588_v37 = vstv %s9225_s22  ;;  %v3518_v38 = vadd.f32 %v3517_v25, %v3514_v42  ;;  %v3486_v30 = vmul.f32 %v3484_v60, %v3479_v9  ;;  %v3564_v24 = vstv %s9218_s23  ;;  %v3716_v42 = vld [vmem:[#allocation3] ss:$2 sm:$0x7] }
 0x99e   : > { %v3608_v31 = vstv %s9228_s16  ;;  %v3611_v54 = vstv %s9233_s14  ;;  %s9294_s9 = sld [smem:[#allocation12 + $0x47]]  ;;  %v3589_v49 = vmul.f32 %v3588_v37, %v3583_v5  ;;  %v3545_v1 = vrot.slane %v8950_v17, 7  ;;  %v3605_v60 = vld [vmem:[#allocation3] ss:$2 sm:$0x7] }
 0x99f   : > { %2158 = vrot.lane.b32.xlu1 %v6485_v18, %s10932_s20  ;;  %v3535_v18 = vld [vmem:[#allocation3 + $0x1] ss:$2 sm:$0x7]  ;;  %v3674_v63 = vstv %s9251_s25  ;;  %s9300_s22 = sld [smem:[#allocation12 + $0x46]]  ;;  %v3523_v40 = vsel %vm3522_vm7, %v3521_v15, %v8944_v58  ;;  %v6484_v48 = vpack.c.bf16 %v2138_v7, %v2138_v7  ;;  %vm3617_vm12 = vcmask 269312  }
 0x9a0   : > { %v3541_v29 = vmul.f32 %v3540_v32, %v3535_v18  ;;  %s9305_s23 = sld [smem:[#allocation12 + $0x17]]  ;;  %v3590_v47 = vadd.f32 %v3589_v49, %v3586_v39  ;;  %v3719_v3 = vstv %s9266_s24  ;;  %v3525_v51 = vmul.f32 %v3523_v40, %v3518_v38  ;;  %v3717_v25 = vld [vmem:[#allocation3 + $0x1] ss:$2 sm:$0x7] }
 0x9a1   : > { %3416 = vrot.lane.b32.xlu0 %v3414_v28, %s10933_s4  ;;  %s9261_s4 = sld [smem:[#allocation12 + $0x13]]  ;;  %v3558_v28 = vld [vmem:[#allocation3] ss:$2 sm:$0x7]  ;;  %v3632_v32 = vstv %s9242_s30  ;;  %v3635_v26 = vstv %s9247_s3  ;;  %v3722_v58 = vstv %s9271_s5  ;;  %v3675_v37 = vmul.f32 %v3674_v63, %v9129_v45  ;;  %s10935_s30 = smov 108  }
 0x9a2   : > { %v3562_v9 = vmul.f32 %v3561_v27, %v3558_v28  ;;  %s9314_s16 = sld [smem:[#allocation12 + $0x19]]  ;;  %v3679_v27 = vrot.slane %v8956_v61, 7  ;;  %v3565_v15 = vmul.f32 %v3564_v24, %v3559_v53  ;;  %v3547_v18 = vsel %vm3546_vm8, %v3545_v1, %v8950_v17  ;;  %v3606_v45 = vld [vmem:[#allocation3 + $0x1] ss:$2 sm:$0x7] }
 0x9a3   : > { %3440 = vrot.lane.b32.xlu1 %v3438_v34, %s10932_s20  ;;  %v3671_v11 = vstv %s9244_s0  ;;  %v3593_v34 = vrot.slane %v8954_v21, 7  ;;  %s10934_s0 = smov 110   ;;  %vm3776_vm13 = vcmask 400384   ;;  %s9325_s25 = sld [smem:[#allocation12 + $0x4a]]  ;;  %v3720_v39 = vmul.f32 %v3719_v3, %v3716_v42 }
 0x9a4   : > { %v3672_v55 = vmul.f32 %v3671_v11, %v9115_v44  ;;  %v3569_v44 = vrot.slane %v8948_v19, 7  ;;  %vm3641_vm14 = vcmask 277504   ;;  %s9328_s24 = sld [smem:[#allocation12 + $0x1a]]  ;;  %v3764_v11 = vld [vmem:[#allocation3] ss:$2 sm:$0x7]  ;;  %v3566_v38 = vadd.f32 %v3565_v15, %v3562_v9 }
 0x9a5   : > { %2186 = vrot.lane.b32.xlu0 %v9256_v59, %s7379_s6  ;;  %v3594_v5 = vsel %vm640_vm2, %v3593_v34, %v8954_v21  ;;  %v3767_v21 = vstv %s9289_s15  ;;  %v3698_v28 = vstv %s9279_s8  ;;  %v3770_v17 = vstv %s9294_s9  ;;  %s9333_s5 = sld [smem:[#allocation12 + $0x1b]]  ;;  %v3629_v49 = vld [vmem:[#allocation3] ss:$2 sm:$0x7]  ;;  %s10941_s8 = smov 79  }
 0x9a6   : > { %v3596_v7 = vmul.f32 %v3594_v5, %v3590_v47  ;;  %v3723_v1 = vmul.f32 %v3722_v58, %v3717_v25  ;;  %v3571_v34 = vsel %vm3570_vm9, %v3569_v44, %v8948_v19  ;;  %v3681_v63 = vsel %vm3680_vm10, %v3679_v27, %v8956_v61  ;;  %s9345_s15 = sld [smem:[#allocation12 + $0x4b]]  ;;  %v3630_v19 = vld [vmem:[#allocation3 + $0x1] ss:$2 sm:$0x7] }
 0x9a7   : > { %3464 = vrot.lane.b32.xlu1 %v3462_v8, %s7379_s6  ;;  %v3542_v8 = vadd.f32 %v3541_v29, %v3538_v33  ;;  %v3609_v33 = vmul.f32 %v3608_v31, %v3605_v60  ;;  %v3695_v24 = vstv %s9261_s4  ;;  %v3727_v31 = vrot.slane %v8960_v0, 7  ;;  %v3765_v29 = vld [vmem:[#allocation3 + $0x1] ss:$2 sm:$0x7]  ;;  %s10936_s4 = smov 107   ;;  %s9348_s9 = sld [smem:[#allocation12 + $0x4c]] }
 0x9a8   : > { %v3612_v40 = vmul.f32 %v3611_v54, %v3606_v45  ;;  %v3616_v53 = vrot.slane %v8952_v57, 7  ;;  %vm3704_vm15 = vcmask 302080   ;;  %vm3800_vm7 = vcmask 408576   ;;  %v3788_v3 = vld [vmem:[#allocation3] ss:$2 sm:$0x7] }
 0x9a9   : > { %2044 = vrot.lane.b32.xlu0 %v6471_v12, %s7374_s13  ;;  %s9309_s13 = sld [smem:[#allocation12 + $0x48]]  ;;  %v3676_v12 = vadd.f32 %v3675_v37, %v3672_v55  ;;  %v3768_v55 = vmul.f32 %v3767_v21, %v3764_v11  ;;  %v3724_v47 = vadd.f32 %v3723_v1, %v3720_v39  ;;  %v3633_v54 = vmul.f32 %v3632_v32, %v3629_v49  ;;  %v3692_v60 = vld [vmem:[#allocation3] ss:$2 sm:$0x7] }
 0x9aa   : > { %v3613_v42 = vadd.f32 %v3612_v40, %v3609_v33  ;;  %v3573_v9 = vmul.f32 %v3571_v34, %v3566_v38  ;;  %vm3839_vm8 = vcmask 424960   ;;  %s9353_s14 = sld [smem:[#allocation12 + $0x1d]]  ;;  %v3771_v37 = vmul.f32 %v3770_v17, %v3765_v29  ;;  %v3789_v27 = vld [vmem:[#allocation3 + $0x1] ss:$2 sm:$0x7] }
 0x9ab   : > { %3488 = vrot.lane.b32.xlu1 %v3486_v30, %s10934_s0  ;;  %v3549_v30 = vmul.f32 %v3547_v18, %v3542_v8  ;;  %v3683_v61 = vmul.f32 %v3681_v63, %v3676_v12  ;;  %v3743_v8 = vstv %s9284_s26  ;;  %v3640_v44 = vrot.slane %v8958_v46, 7  ;;  %s10938_s26 = smov 106   ;;  %v3693_v18 = vld [vmem:[#allocation3 + $0x1] ss:$2 sm:$0x7]  ;;  %s9371_s3 = sld [smem:[#allocation12 + $0x4d]] }
 0x9ac   : > { %v3729_v5 = vsel %vm3728_vm11, %v3727_v31, %v8960_v0  ;;  %v3775_v32 = vrot.slane %v8964_v56, 7  ;;  %v3636_v25 = vmul.f32 %v3635_v26, %v3630_v19  ;;  %v3618_v15 = vsel %vm3617_vm12, %v3616_v53, %v8952_v57  ;;  %v3741_v63 = vld [vmem:[#allocation3 + $0x1] ss:$2 sm:$0x7] }
 0x9ad   : > { %2156 = vrot.lane.b32.xlu0 %v6484_v48, %s10932_s20  ;;  %v3791_v48 = vstv %s9305_s23  ;;  %vm3752_vm9 = vcmask 392192   ;;  %v3772_v39 = vadd.f32 %v3771_v37, %v3768_v55  ;;  %v3731_v12 = vmul.f32 %v3729_v5, %v3724_v47  ;;  %s10939_s23 = smov 90   ;;  %v3875_v53 = vld [vmem:[#allocation3] ss:$2 sm:$0x7] }
 0x9ae   : > { %v3792_v45 = vmul.f32 %v3791_v48, %v3788_v3  ;;  %vm3887_vm10 = vcmask 441344   ;;  %v3696_v0 = vmul.f32 %v3695_v24, %v3692_v60  ;;  %v3637_v21 = vadd.f32 %v3636_v25, %v3633_v54  ;;  %v3851_v54 = vld [vmem:[#allocation3] ss:$2 sm:$0x7] }
 0x9af   : > { %3527 = vrot.lane.b32.xlu1 %v3525_v51, %s10935_s30  ;;  %v3746_v51 = vstv %s9300_s22  ;;  %v3794_v58 = vstv %s9309_s13  ;;  %s10937_s30 = smov 92   ;;  %s9366_s22 = sld [smem:[#allocation12 + $0x1c]]  ;;  %v3620_v11 = vmul.f32 %v3618_v15, %v3613_v42  ;;  %v3833_v26 = vstv %s9325_s25  ;;  %v3921_v5 = vld [vmem:[#allocation3] ss:$2 sm:$0x7] }
 0x9b0   : > { %v3854_v33 = vstv %s9328_s24  ;;  %v3878_v38 = vstv %s9333_s5  ;;  %v3795_v57 = vmul.f32 %v3794_v58, %v3789_v27  ;;  %v3703_v17 = vrot.slane %v8962_v4, 7  ;;  %s9378_s13 = sld [smem:[#allocation12 + $0x4e]]  ;;  %s10942_s25 = smov 94  }
 0x9b1   : > { %3598 = vrot.lane.b32.xlu0 %v3596_v7, %s7393_s7  ;;  %v3830_v7 = vstv %s9314_s16  ;;  %v3777_v49 = vsel %vm3776_vm13, %v3775_v32, %v8964_v56  ;;  %v3799_v24 = vrot.slane %v8970_v14, 7  ;;  %v3699_v1 = vmul.f32 %v3698_v28, %v3693_v18  ;;  %s10940_s16 = smov 95   ;;  %s9399_s24 = sld [smem:[#allocation12 + $0x4f]]  ;;  %v3899_v18 = vld [vmem:[#allocation3] ss:$2 sm:$0x7] }
 0x9b2   : > { %v3642_v34 = vsel %vm3641_vm14, %v3640_v44, %v8958_v46  ;;  %v3831_v31 = vmul.f32 %v3830_v7, %v9139_v23  ;;  %v3796_v29 = vadd.f32 %v3795_v57, %v3792_v45  ;;  %v3779_v40 = vmul.f32 %v3777_v49, %v3772_v39  ;;  %s9403_s5 = sld [smem:[#allocation12 + $0x21]] }
 0x9b3   : > { %3551 = vrot.lane.b32.xlu1 %v3549_v30, %s10936_s4  ;;  %v3740_v30 = vld [vmem:[#allocation3] ss:$2 sm:$0x7]  ;;  %v3838_v56 = vrot.slane %v8968_v20, 7  ;;  %v3700_v55 = vadd.f32 %v3699_v1, %v3696_v0  ;;  %v3644_v47 = vmul.f32 %v3642_v34, %v3637_v21  ;;  %v3881_v48 = vstv %s9348_s9  ;;  %s9407_s4 = sld [smem:[#allocation12 + $0x1e]] }
 0x9b4   : > { %v3744_v19 = vmul.f32 %v3743_v8, %v3740_v30  ;;  %v3924_v3 = vstv %s9353_s14  ;;  %v3834_v28 = vmul.f32 %v3833_v26, %v9149_v22  ;;  %v3705_v46 = vsel %vm3704_vm15, %v3703_v17, %v8962_v4  ;;  %v3852_v22 = vld [vmem:[#allocation3 + $0x1] ss:$2 sm:$0x7]  ;;  %s9414_s9 = sld [smem:[#allocation12 + $0x52]]  ;;  %s10944_s14 = smov 91  }
 0x9b5   : > { %3685 = vrot.lane.b32.xlu0 %v3683_v61, %s10937_s30  ;;  %v3857_v61 = vstv %s9345_s15  ;;  %v3751_v23 = vrot.slane %v8966_v16, 7  ;;  %v3801_v42 = vsel %vm3800_vm7, %v3799_v24, %v8970_v14  ;;  %v3747_v8 = vmul.f32 %v3746_v51, %v3741_v63  ;;  %s10943_s15 = smov 78   ;;  %v3900_v21 = vld [vmem:[#allocation3 + $0x1] ss:$2 sm:$0x7]  ;;  %s10945_s30 = smov 76  }
 0x9b6   : > { %v3886_v58 = vrot.slane %v8972_v52, 7  ;;  %v3879_v60 = vmul.f32 %v3878_v38, %v3875_v53  ;;  %v3835_v37 = vadd.f32 %v3834_v28, %v3831_v31  ;;  %v3803_v44 = vmul.f32 %v3801_v42, %v3796_v29  ;;  %v3945_v53 = vld [vmem:[#allocation3] ss:$2 sm:$0x7] }
 0x9b7   : > { %3575 = vrot.lane.b32.xlu1 %v3573_v9, %s10938_s26  ;;  %v3876_v9 = vld [vmem:[#allocation3 + $0x1] ss:$2 sm:$0x7]  ;;  %v3840_v4 = vsel %vm3839_vm8, %v3838_v56, %v8968_v20  ;;  %v3855_v14 = vmul.f32 %v3854_v33, %v3851_v54  ;;  %v3748_v32 = vadd.f32 %v3747_v8, %v3744_v19  ;;  %v3707_v27 = vmul.f32 %v3705_v46, %v3700_v55  ;;  %s9421_s26 = sld [smem:[#allocation12 + $0x23]] }
 0x9b8   : > { %vm3863_vm11 = vcmask 433152   ;;  %v3902_v51 = vstv %s9366_s22  ;;  %v3905_v25 = vstv %s9371_s3  ;;  %v3882_v15 = vmul.f32 %v3881_v48, %v3876_v9  ;;  %s10946_s22 = smov 80   ;;  %s9427_s3 = sld [smem:[#allocation12 + $0x54]] }
 0x9b9   : > { %3733 = vrot.lane.b32.xlu0 %v3731_v12, %s10939_s23  ;;  %v3753_v45 = vsel %vm3752_vm9, %v3751_v23, %v8966_v16  ;;  %v3862_v20 = vrot.slane %v8974_v10, 7  ;;  %v3927_v39 = vstv %s9378_s13  ;;  %v3922_v12 = vld [vmem:[#allocation3 + $0x1] ss:$2 sm:$0x7]  ;;  %v3858_v7 = vmul.f32 %v3857_v61, %v3852_v22  ;;  %s9431_s23 = sld [smem:[#allocation12 + $0x53]] }
 0x9ba   : > { %v3888_v0 = vsel %vm3887_vm10, %v3886_v58, %v8972_v52  ;;  %v3883_v26 = vadd.f32 %v3882_v15, %v3879_v60  ;;  %v3842_v33 = vmul.f32 %v3840_v4, %v3835_v37  ;;  %v3932_v38 = vrot.slane %v8976_v41, 7  ;;  %s9434_s13 = sld [smem:[#allocation12 + $0x22]]  ;;  %v3946_v61 = vld [vmem:[#allocation3 + $0x1] ss:$2 sm:$0x7] }
 0x9bb   : > { %3622 = vrot.lane.b32.xlu1 %v3620_v11, %s10940_s16  ;;  %v3925_v11 = vmul.f32 %v3924_v3, %v3921_v5  ;;  %v3903_v30 = vmul.f32 %v3902_v51, %v3899_v18  ;;  %v3859_v16 = vadd.f32 %v3858_v7, %v3855_v14  ;;  %v3755_v57 = vmul.f32 %v3753_v45, %v3748_v32  ;;  %v4057_v4 = vld [vmem:[#allocation3 + $0x1] ss:$2 sm:$0x7]  ;;  %v10950_v5 = vld [vmem:[#allocation118_spill] sm:$0xff] }
 0x9bc   : > { %vm3933_vm12 = vcmask 531456   ;;  %v3928_v17 = vmul.f32 %v3927_v39, %v3922_v12  ;;  %v3906_v49 = vmul.f32 %v3905_v25, %v3900_v21  ;;  %v3864_v52 = vsel %vm3863_vm11, %v3862_v20, %v8974_v10  ;;  %v4032_v25 = vld [vmem:[#allocation3] ss:$2 sm:$0x7] }
 0x9bd   : > { %3781 = vrot.lane.b32.xlu0 %v3779_v40, %s10941_s8  ;;  %v3910_v24 = vrot.slane %v8978_v13, 7  ;;  %v3890_v34 = vmul.f32 %v3888_v0, %v3883_v26  ;;  %v3934_v63 = vsel %vm3933_vm12, %v3932_v38, %v8976_v41  ;;  %v3866_v29 = vmul.f32 %v3864_v52, %v3859_v16  ;;  %v4008_v40 = vld [vmem:[#allocation3] ss:$2 sm:$0x7]  ;;  %s10947_s8 = smov 74  }
 0x9be   : > { %v3929_v1 = vadd.f32 %v3928_v17, %v3925_v11  ;;  %v3907_v31 = vadd.f32 %v3906_v49, %v3903_v30  ;;  %v4011_v56 = vstv %s9403_s5  ;;  %v3948_v19 = vstv %s9407_s4  ;;  %s9444_s5 = sld [smem:[#allocation12 + $0x56]]  ;;  %v4102_v20 = vld [vmem:[#allocation3] ss:$2 sm:$0x7]  ;;  %v10952_v30 = vld [vmem:[#allocation122_spill] sm:$0xff] }
 0x9bf   : > { %3646 = vrot.lane.b32.xlu1 %v3644_v47, %s10942_s25  ;;  %v3951_v10 = vstv %s9399_s24  ;;  %v4014_v55 = vstv %s9414_s9  ;;  %v4009_v47 = vld [vmem:[#allocation3 + $0x1] ss:$2 sm:$0x7]  ;;  %v3911_v41 = vsel %vm610_vm0, %v3910_v24, %v8978_v13  ;;  %v4012_v3 = vmul.f32 %v4011_v56, %v4008_v40  ;;  %s9449_s24 = sld [smem:[#allocation12 + $0x59]]  ;;  %s7427_s9 = smov 63   ;;  %v10954_v40 = vld [vmem:[#allocation127_spill] sm:$0xff] }
 0x9c0   : > { %v3936_v48 = vmul.f32 %v3934_v63, %v3929_v1  ;;  %v1989_v28 = vmul.f32 %v9070_v36, %v9037_v50  ;;  %v3949_v54 = vmul.f32 %v3948_v19, %v3945_v53  ;;  %v3913_v46 = vmul.f32 %v3911_v41, %v3907_v31  ;;  %s9453_s4 = sld [smem:[#allocation12 + $0x28]]  ;;  %v4056_v36 = vld [vmem:[#allocation3] ss:$2 sm:$0x7] }
 0x9c1   : > { %3805 = vrot.lane.b32.xlu0 %v3803_v44, %s10943_s15  ;;  %s9439_s15 = sld [smem:[#allocation12 + $0x25]]  ;;  %v4019_v23 = vrot.slane %v8988_v2, 7  ;;  %v1990_v42 = vmul.f32 %v9062_v35, %v9037_v50  ;;  %vm4020_vm13 = vcmask 564224   ;;  %v4015_v13 = vmul.f32 %v4014_v55, %v4009_v47  ;;  %v4033_v7 = vld [vmem:[#allocation3 + $0x1] ss:$2 sm:$0x7] }
 0x9c2   : > { %v3952_v9 = vmul.f32 %v3951_v10, %v3946_v61  ;;  %vm3957_vm15 = vcmask 539648   ;;  %v4059_v8 = vstv %s9421_s26  ;;  %v3956_v58 = vrot.slane %v8982_v43, 7  ;;  %s9476_s26 = sld [smem:[#allocation12 + $0x5a]]  ;;  %v4103_v38 = vld [vmem:[#allocation3 + $0x1] ss:$2 sm:$0x7] }
 0x9c3   : > { %3709 = vrot.lane.b32.xlu1 %v3707_v27, %s10944_s14  ;;  %s10948_s14 = smov 75   ;;  %v4016_v22 = vadd.f32 %v4015_v13, %v4012_v3  ;;  %v4062_v60 = vstv %s9427_s3  ;;  %v6468_v35 = vpack.c.bf16 %v1989_v28, %v1989_v28  ;;  %v4021_v44 = vsel %vm4020_vm13, %v4019_v23, %v8988_v2  ;;  %v10951_v27 = vld [vmem:[#allocation113_spill] sm:$0xff]  ;;  %s9481_s3 = sld [smem:[#allocation12 + $0x2a]]  ;;  %v4078_v63 = vld [vmem:[#allocation3] ss:$2 sm:$0x7] }
 0x9c4   : > { %v3953_v37 = vadd.f32 %v3952_v9, %v3949_v54  ;;  %v4067_v14 = vrot.slane %v10950_v5, 7  ;;  %v6469_v32 = vpack.c.bf16 %v1990_v42, %v1990_v42  ;;  %v3995_v51 = vrot.slane %v10951_v27, 7  ;;  %v4165_v53 = vld [vmem:[#allocation3] ss:$2 sm:$0x7]  ;;  %v10956_v54 = vld [vmem:[#allocation114_spill] sm:$0xff] }
 0x9c5   : > { %3844 = vrot.lane.b32.xlu0 %v3842_v33, %s10945_s30  ;;  %s9455_s30 = sld [smem:[#allocation12 + $0x29]]  ;;  %v4035_v15 = vstv %s9434_s13  ;;  %vm3760_vm7 = vcmask 654336   ;;  %v4060_v18 = vmul.f32 %v4059_v8, %v4056_v36  ;;  %vm3996_vm8 = vcmask 556032   ;;  %s7428_s13 = smov 59  }
 0x9c6   : > { %v4038_v45 = vstv %s9431_s23  ;;  %vm4114_vm10 = vcmask 670720   ;;  %v3958_v2 = vsel %vm3957_vm15, %v3956_v58, %v8982_v43  ;;  %v4023_v12 = vmul.f32 %v4021_v44, %v4016_v22  ;;  %s9487_s23 = sld [smem:[#allocation12 + $0x5b]]  ;;  %v4079_v61 = vld [vmem:[#allocation3 + $0x1] ss:$2 sm:$0x7] }
 0x9c7   : > { %3757 = vrot.lane.b32.xlu1 %v3755_v57, %s10946_s22  ;;  %s10949_s22 = smov 64   ;;  %v4105_v39 = vstv %s9439_s15  ;;  %v4063_v0 = vmul.f32 %v4062_v60, %v4057_v4  ;;  %v4108_v21 = vstv %s9444_s5  ;;  %v3960_v11 = vmul.f32 %v3958_v2, %v3953_v37  ;;  %v10953_v57 = vld [vmem:[#allocation116_spill] sm:$0xff]  ;;  %s9489_s15 = sld [smem:[#allocation12 + $0x2b]] }
 0x9c8   : > { %v4036_v26 = vmul.f32 %v4035_v15, %v4032_v25  ;;  %v4068_v33 = vsel %vm3760_vm7, %v4067_v14, %v10950_v5  ;;  %v4113_v16 = vrot.slane %v10952_v30, 7  ;;  %v3997_v43 = vsel %vm3996_vm8, %v3995_v51, %v10951_v27  ;;  %s7429_s5 = smov 62   ;;  %v4189_v23 = vld [vmem:[#allocation3] ss:$2 sm:$0x7] }
 0x9c9   : > { %3892 = vrot.lane.b32.xlu0 %v3890_v34, %s10947_s8  ;;  %s9461_s8 = sld [smem:[#allocation12 + $0x24]]  ;;  %v4043_v17 = vrot.slane %v10953_v57, 7  ;;  %v4064_v49 = vadd.f32 %v4063_v0, %v4060_v18  ;;  %v4106_v52 = vmul.f32 %v4105_v39, %v4102_v20  ;;  %vm4153_vm11 = vcmask 687104   ;;  %v4166_v9 = vld [vmem:[#allocation3 + $0x1] ss:$2 sm:$0x7] }
 0x9ca   : > { %vm4044_vm12 = vcmask 572416   ;;  %v4039_v24 = vmul.f32 %v4038_v45, %v4033_v7  ;;  %v4171_v1 = vstv %s9449_s24  ;;  %v3999_v56 = vmul.f32 %v3997_v43, %v10954_v40  ;;  %s7430_s24 = smov 60   ;;  %v4190_v60 = vld [vmem:[#allocation3 + $0x1] ss:$2 sm:$0x7]  ;;  %v10959_v45 = vld [vmem:[#allocation129_spill] sm:$0xff] }
 0x9cb   : > { %3868 = vrot.lane.b32.xlu1 %v3866_v29, %s10948_s14  ;;  %s9466_s14 = sld [smem:[#allocation12 + $0x55]]  ;;  %v4070_v34 = vmul.f32 %v4068_v33, %v4064_v49  ;;  %v4109_v29 = vmul.f32 %v4108_v21, %v4103_v38  ;;  %v4168_v19 = vstv %s9453_s4  ;;  %v4115_v55 = vsel %vm4114_vm10, %v4113_v16, %v10952_v30  ;;  %v4235_v15 = vld [vmem:[#allocation3] ss:$2 sm:$0x7]  ;;  %v10960_v39 = vld [vmem:[#allocation115_spill] sm:$0xff]  ;;  %v10961_v38 = vld [vmem:[#allocation121_spill] sm:$0xff] }
 0x9cc   : > { %v4040_v10 = vadd.f32 %v4039_v24, %v4036_v26  ;;  %v4045_v47 = vsel %vm4044_vm12, %v4043_v17, %v10953_v57  ;;  %v4192_v42 = vstv %s9455_s30  ;;  %vm4090_vm13 = vcmask 662528   ;;  %s9514_s4 = sld [smem:[#allocation12 + $0x5d]]  ;;  %s10958_s30 = smov 46   ;;  %v4213_v7 = vld [vmem:[#allocation3] ss:$2 sm:$0x7] }
 0x9cd   : > { %3938 = vrot.lane.b32.xlu0 %v3936_v48, %s7427_s9  ;;  %s9493_s9 = sld [smem:[#allocation12 + $0x5c]]  ;;  %v10955_v48 = vld [vmem:[#allocation120_spill] sm:$0xff]  ;;  %v4110_v28 = vadd.f32 %v4109_v29, %v4106_v52  ;;  %vm4177_vm15 = vcmask 695296   ;;  %v4195_v36 = vstv %s9476_s26  ;;  %vm4201_vm8 = vcmask 703488   ;;  %v10962_v57 = vld [vmem:[#allocation119_spill] sm:$0xff]  ;;  %s10963_s26 = smov 44  }
 0x9ce   : > { %v4089_v3 = vrot.slane %v10955_v48, 7  ;;  %v4169_v58 = vmul.f32 %v4168_v19, %v4165_v53  ;;  %v4047_v22 = vmul.f32 %v4045_v47, %v4040_v10  ;;  %v4193_v4 = vmul.f32 %v4192_v42, %v4189_v23  ;;  %v4236_v33 = vld [vmem:[#allocation3 + $0x1] ss:$2 sm:$0x7] }
 0x9cf   : > { %3915 = vrot.lane.b32.xlu1 %v3913_v46, %s10949_s22  ;;  %v4081_v31 = vstv %s9461_s8  ;;  %v4152_v46 = vrot.slane %v10956_v54, 7  ;;  %v4117_v8 = vmul.f32 %v4115_v55, %v4110_v28  ;;  %v4216_v5 = vstv %s9481_s3  ;;  %s9520_s22 = sld [smem:[#allocation12 + $0x2f]]  ;;  %s7431_s8 = smov 58   ;;  %v4214_v43 = vld [vmem:[#allocation3 + $0x1] ss:$2 sm:$0x7] }
 0x9d0   : > { %v4082_v13 = vmul.f32 %v4081_v31, %v4078_v63  ;;  %v4219_v14 = vstv %s9487_s23  ;;  %v4172_v51 = vmul.f32 %v4171_v1, %v4166_v9  ;;  %v4238_v18 = vstv %s9489_s15  ;;  %s7432_s3 = smov 47   ;;  %s10964_s23 = smov 42   ;;  %v4322_v19 = vld [vmem:[#allocation3] ss:$2 sm:$0x7] }
 0x9d1   : > { %2007 = vrot.lane.b32.xlu0 %v6468_v35, %s10928_s27  ;;  %v4084_v41 = vstv %s9466_s14  ;;  %v10957_v35 = vld [vmem:[#allocation117_spill] sm:$0xff]  ;;  %v4154_v27 = vsel %vm4153_vm11, %v4152_v46, %v10956_v54  ;;  %v4176_v2 = vrot.slane %v10960_v39, 7  ;;  %v4246_v30 = vrot.slane %v10961_v38, 7  ;;  %s9528_s14 = sld [smem:[#allocation12 + $0x60]]  ;;  %s7434_s15 = smov 31  }
 0x9d2   : > { %v4200_v37 = vrot.slane %v10957_v35, 7  ;;  %v4085_v44 = vmul.f32 %v4084_v41, %v4079_v61  ;;  %v4156_v20 = vmul.f32 %v4154_v27, %v10959_v45  ;;  %v4173_v21 = vadd.f32 %v4172_v51, %v4169_v58  ;;  %v4259_v47 = vld [vmem:[#allocation3] ss:$2 sm:$0x7]  ;;  %v9540_v61 = vld [vmem:[#allocation5] sm:$0xff] }
 0x9d3   : > { %2009 = vrot.lane.b32.xlu1 %v6469_v32, %s10928_s27  ;;  %v4091_v32 = vsel %vm4090_vm13, %v4089_v3, %v10955_v48  ;;  %v4241_v0 = vstv %s9493_s9  ;;  %v4224_v17 = vrot.slane %v10962_v57, 7  ;;  %v4239_v49 = vmul.f32 %v4238_v18, %v4235_v15  ;;  %v4323_v28 = vld [vmem:[#allocation3 + $0x1] ss:$2 sm:$0x7]  ;;  %v10965_v46 = vld [vmem:[#allocation125_spill] sm:$0xff]  ;;  %s9556_s9 = sld [smem:[#allocation12 + $0x61]] }
 0x9d4   : > { %v4086_v25 = vadd.f32 %v4085_v44, %v4082_v13  ;;  %vm4247_vm10 = vcmask 793600   ;;  %vm10624_vm11 = vcmask 785408   ;;  %v4217_v52 = vmul.f32 %v4216_v5, %v4213_v7  ;;  %v4260_v13 = vld [vmem:[#allocation3 + $0x1] ss:$2 sm:$0x7]  ;;  %v10970_v7 = vld [vmem:[#allocation126_spill] sm:$0xff] }
 0x9d5   : > { %4025 = vrot.lane.b32.xlu0 %v4023_v12, %s7428_s13  ;;  %v4196_v12 = vmul.f32 %v4195_v36, %v4190_v60  ;;  %v4178_v24 = vsel %vm4177_vm15, %v4176_v2, %v10960_v39  ;;  %v4220_v31 = vmul.f32 %v4219_v14, %v4214_v43  ;;  %v4248_v29 = vsel %vm4247_vm10, %v4246_v30, %v10961_v38  ;;  %s7433_s13 = smov 43   ;;  %v10966_v36 = vld [vmem:[#allocation123_spill] sm:$0xff]  ;;  %v10967_v5 = vld [vmem:[#allocation124_spill] sm:$0xff] }
 0x9d6   : > { %v4093_v26 = vmul.f32 %v4091_v32, %v4086_v25  ;;  %v4180_v63 = vmul.f32 %v4178_v24, %v4173_v21  ;;  %v4225_v40 = vsel %vm10624_vm11, %v4224_v17, %v10962_v57  ;;  %v4325_v10 = vstv %s9520_s22  ;;  %v4346_v45 = vld [vmem:[#allocation3] ss:$2 sm:$0x7]  ;;  %v10971_v21 = vld [vmem:[#allocation130_spill] sm:$0xff]  ;;  %s9578_s22 = sld [smem:[#allocation12 + $0x31]] }
 0x9d7   : > { %3962 = vrot.lane.b32.xlu1 %v3960_v11, %s7429_s5  ;;  %v4202_v11 = vsel %vm4201_vm8, %v4200_v37, %v10957_v35  ;;  %v4197_v16 = vadd.f32 %v4196_v12, %v4193_v4  ;;  %v4221_v53 = vadd.f32 %v4220_v31, %v4217_v52  ;;  %v2136_v48 = vmul.f32 %v9540_v61, %v9012_v6  ;;  %s9551_s5 = sld [smem:[#allocation12 + $0x30]]  ;;  %v7058_v12 = vld [vmem:[#allocation5 + $0x10] sm:$0xff]  ;;  %v4347_v38 = vld [vmem:[#allocation3 + $0x1] ss:$2 sm:$0x7] }
 0x9d8   : > { %v4328_v54 = vstv %s9528_s14  ;;  %v4333_v23 = vrot.slane %v10965_v46, 7  ;;  %v2137_v42 = vmul.f32 %v9236_v62, %v9012_v6  ;;  %v4265_v9 = vstv %s9514_s4  ;;  %s9571_s4 = sld [smem:[#allocation12]]  ;;  %s10975_s14 = smov 26  }
 0x9d9   : > { %4072 = vrot.lane.b32.xlu0 %v4070_v34, %s10892_s1  ;;  %s9508_s1 = sld [smem:[#allocation12 + $0x2c]]  ;;  %v4204_v1 = vmul.f32 %v4202_v11, %v4197_v16  ;;  %v4242_v34 = vmul.f32 %v4241_v0, %v4236_v33  ;;  %v4227_v3 = vmul.f32 %v4225_v40, %v4221_v53  ;;  %v4326_v58 = vmul.f32 %v4325_v10, %v4322_v19  ;;  %v10972_v16 = vld [vmem:[#allocation128_spill] sm:$0xff] }
 0x9da   : > { %vm4334_vm12 = vcmask 826368   ;;  %vm4271_vm13 = vcmask 801792   ;;  %v4329_v60 = vmul.f32 %v4328_v54, %v4323_v28  ;;  %v6482_v35 = vpack.c.bf16 %v2136_v48, %v2136_v48  ;;  %v7059_v53 = vld [vmem:[#allocation5 + $0x18] sm:$0xff] }
 0x9db   : > { %4001 = vrot.lane.b32.xlu1 %v3999_v56, %s7430_s24  ;;  %v4243_v56 = vadd.f32 %v4242_v34, %v4239_v49  ;;  %v4266_v37 = vmul.f32 %v4265_v9, %v4260_v13  ;;  %v4335_v44 = vsel %vm4334_vm12, %v4333_v23, %v10965_v46  ;;  %v6483_v6 = vpack.c.bf16 %v2137_v42, %v2137_v42  ;;  %s10968_s24 = smov 27   ;;  %v3175_v10 = vld [vmem:[#allocation3] ss:$2 sm:$0x3] }
 0x9dc   : > { %v4309_v14 = vrot.slane %v10967_v5, 7  ;;  %v4330_v32 = vadd.f32 %v4329_v60, %v4326_v58  ;;  %vm4310_vm15 = vcmask 818176   ;;  %v1987_v25 = vmul.f32 %v9540_v61, %v9037_v50 }
 0x9dd   : > { %4119 = vrot.lane.b32.xlu0 %v4117_v8, %s10958_s30  ;;  %v4250_v55 = vmul.f32 %v4248_v29, %v4243_v56  ;;  %v4270_v8 = vrot.slane %v10966_v36, 7  ;;  %v2099_v0 = vmul.f32 %v7058_v12, %v10970_v7  ;;  %v1988_v33 = vmul.f32 %v9236_v62, %v9037_v50  ;;  %s10973_s30 = smov 28  }
 0x9de   : > { %v4337_v51 = vmul.f32 %v4335_v44, %v4330_v32  ;;  %v4311_v18 = vsel %vm4310_vm15, %v4309_v14, %v10967_v5  ;;  %v6466_v2 = vpack.c.bf16 %v1987_v25, %v1987_v25  ;;  %v4352_v30 = vstv %s9556_s9 }
 0x9df   : > { %4049 = vrot.lane.b32.xlu1 %v4047_v22, %s7431_s8  ;;  %v4262_v41 = vstv %s9508_s1  ;;  %v4272_v4 = vsel %vm4271_vm13, %v4270_v8, %v10966_v36  ;;  %s10969_s1 = smov 30   ;;  %v4313_v11 = vmul.f32 %v4311_v18, %v10971_v21  ;;  %v4357_v43 = vrot.slane %v10972_v16, 7  ;;  %s10974_s8 = smov 118   ;;  %v7060_v8 = vld [vmem:[#allocation5 + $0x8] sm:$0xff] }
 0x9e0   : > { %v4263_v22 = vmul.f32 %v4262_v41, %v4259_v47  ;;  %vm4358_vm8 = vcmask 834560   ;;  %v6480_v49 = vpack.c.bf16 %v2099_v0, %v2099_v0  ;;  %v4353_v50 = vmul.f32 %v4352_v30, %v4347_v38  ;;  %v3176_v47 = vld [vmem:[#allocation3 + $0x1] ss:$2 sm:$0x3] }
 0x9e1   : > { %4158 = vrot.lane.b32.xlu0 %v4156_v20, %s10963_s26  ;;  %v4349_v20 = vstv %s9551_s5  ;;  %v6467_v52 = vpack.c.bf16 %v1988_v33, %v1988_v33  ;;  %v4359_v24 = vsel %vm4358_vm8, %v4357_v43, %v10972_v16  ;;  %v2097_v31 = vmul.f32 %v9540_v61, %v10970_v7  ;;  %s10978_s26 = smov 119  }
 0x9e2   : > { %v4267_v27 = vadd.f32 %v4266_v37, %v4263_v22  ;;  %v4350_v57 = vmul.f32 %v4349_v20, %v4346_v45  ;;  %v2100_v19 = vmul.f32 %v7059_v53, %v10970_v7  ;;  %v3181_v41 = vstv %s9578_s22  ;;  %v10976_v22 = vld [vmem:[#allocation131_spill] sm:$0xff]  ;;  %v10979_v45 = vld [vmem:[#allocation100_spill] sm:$0xff]  ;;  %v10980_v20 = vld [vmem:[#allocation101_spill] sm:$0xff]  ;;  %s6563_s22 = sshll.u32 %s10858_s11, 9 }
 0x9e3   : > { %4095 = vrot.lane.b32.xlu1 %v4093_v26, %s7432_s3  ;;  %v3182_v46 = vmul.f32 %v3181_v41, %v3176_v47  ;;  %vm3241_vm10 = vcmask 1039360   ;;  %v6465_v36 = vpack.c.bf16 %v7059_v53, %v7059_v53  ;;  %v2098_v58 = vmul.f32 %v7060_v8, %v10970_v7 }
 0x9e4   : > { %v4274_v15 = vmul.f32 %v4272_v4, %v4267_v27  ;;  %v6481_v54 = vpack.c.bf16 %v2100_v19, %v2100_v19  ;;  %vm10620_vm12 = vcmask 1031168   ;;  %vm3298_vm13 = vcmask 1022976  }
 0x9e5   : > { %4206 = vrot.lane.b32.xlu0 %v4204_v1, %s10964_s23  ;;  %v2049_v39 = vpop.permute.xlu0 %2048  ;;  %v4354_v1 = vadd.f32 %v4353_v50, %v4350_v57  ;;  %v6479_v5 = vpack.c.bf16 %v2098_v58, %v2098_v58  ;;  %vm3337_vm15 = vcmask 1014784   ;;  %vm3378_vm8 = vcmask 1006592  }
 0x9e6   : > { %2057 = vst.msk [vmem:[#allocation7 + $0x3c] sm:$0xf] %vm1943_vm6, %v2049_v39  ;;  %v6946_v39 = vpack.i.bf16 %v10980_v20, %v10979_v45 }
 0x9e7   : > { %4182 = vrot.lane.b32.xlu1 %v4180_v63, %s7433_s13  ;;  %v6464_v63 = vpack.c.bf16 %v7058_v12, %v7058_v12  ;;  %v4361_v29 = vmul.f32 %v4359_v24, %v4354_v1 }
 0x9e9   : > { %4252 = vrot.lane.b32.xlu0 %v4250_v55, %s7434_s15  ;;  %v3178_v55 = vstv %s9571_s4 }
 0x9ea   : > { %v3179_v61 = vmul.f32 %v3178_v55, %v3175_v10 }
 0x9eb   : > { %4229 = vrot.lane.b32.xlu1 %v4227_v3, %s10886_s28  ;;  %v6478_v3 = vpack.c.bf16 %v2097_v31, %v2097_v31 }
 0x9ec   : > { %v3183_v23 = vadd.f32 %v3182_v46, %v3179_v61 }
 0x9ed   : > { %2152 = vrot.lane.b32.xlu0 %v6482_v35, %s10932_s20  ;;  %v10977_v35 = vld [vmem:[#allocation104_spill] sm:$0xff] }
 0x9ee   : > { %v3202_v37 = vmul.f32 %v10977_v35, %v3183_v23 }
 0x9ef   : > { %2154 = vrot.lane.b32.xlu1 %v6483_v6, %s10932_s20 }
 0x9f1   : > { %4339 = vrot.lane.b32.xlu0 %v4337_v51, %s10968_s24  ;;  %s11056_s24 = sld [smem:[#allocation40_spill]] }
 0x9f3   : > { %4276 = vrot.lane.b32.xlu1 %v4274_v15, %s10969_s1 }
 0x9f5   : > { %v2047_v26 = vpop.permute.xlu1 %2046  ;;  %2003 = vrot.lane.b32.xlu0 %v6466_v2, %s10928_s27 }
 0x9f6   : > { %2056 = vst.msk [vmem:[#allocation7 + $0x38] sm:$0xf] %vm1943_vm6, %v2047_v26 }
 0x9f7   : > { %4315 = vrot.lane.b32.xlu1 %v4313_v11, %s10973_s30  ;;  %v9580_v17 = vpop.permute.xlu0 %3295  ;;  %s11059_s1 = sshll.u32 %s11056_s24, 5  ;;  %s11062_s30 = sld [smem:[#allocation38_spill]] }
 0x9f8   : > { %v3297_v32 = vrot.slane %v9580_v17, 1  ;;  %s582_s4 = scalar_lea.vmem [#allocation21], %s11059_s1 }
 0x9f9   : > { %v2185_v62 = vpop.permute.xlu1 %2184  ;;  %2117 = vrot.lane.b32.xlu0 %v6480_v49, %s10974_s8  ;;  %v10982_v49 = vld [vmem:[#allocation103_spill] sm:$0xff] }
 0x9fa   : > { %2196 = vst.msk [vmem:[#allocation7 + $0x70] sm:$0xf] %vm1943_vm6, %v2185_v62  ;;  %v3299_v2 = vsel %vm3298_vm13, %v9580_v17, %v3297_v32  ;;  %v10981_v17 = vld [vmem:[#allocation102_spill] sm:$0xff]  ;;  %vm10621_vm13 = vcmask 916480  }
 0x9fb   : > { %2005 = vrot.lane.b32.xlu1 %v6467_v52, %s10928_s27  ;;  %v9586_v34 = vpop.permute.xlu0 %3979  ;;  %v6966_v50 = vpack.i.bf16 %v10982_v49, %v10981_v17 }
 0x9fd   : > { %v9590_v40 = vpop.permute.xlu1 %3505  ;;  %v6976_v56 = vld [vmem:[#allocation7 + $0x38] sm:$0xff]   ;;  %1968 = vrot.lane.b32.xlu0 %v6464_v63, %s10926_s18  ;;  %p11064_p10 = scmp.ne.s32.totalorder %s11062_s30, 0 }
 0x9fe   : > { %6589 = vmatpush3.bf16.msra.mxu0 %v6976_v56  ;;  %v3507_v55 = vrot.slane %v9590_v40, 1 }
 0x9ff   : > { %4363 = vrot.lane.b32.xlu1 %v4361_v29, %s10975_s14  ;;  %v9597_v48 = vpop.permute.xlu0 %4293 }
 0xa01   : > { %v9599_v28 = vpop.permute.xlu1 %3663  ;;  %2113 = vrot.lane.b32.xlu0 %v6478_v3, %s10974_s8 }
 0xa03   : > { %2119 = vrot.lane.b32.xlu1 %v6481_v54, %s10974_s8  ;;  %v3239_v42 = vpop.permute.xlu0 %3238 }
 0xa04   : > { %v3240_v9 = vrot.slane %v3239_v42, 1 }
 0xa05   : > { %v9603_v13 = vpop.permute.xlu1 %3822  ;;  %1964 = vrot.lane.b32.xlu0 %v10976_v22, %s10926_s18 }
 0xa06   : > { %v3242_v60 = vsel %vm3241_vm10, %v3239_v42, %v3240_v9 }
 0xa07   : > { %1970 = vrot.lane.b32.xlu1 %v6465_v36, %s10926_s18  ;;  %v3279_v44 = vpop.permute.xlu0 %3278  ;;  %v3244_v14 = vadd.f32 %v3242_v60, %v3202_v37 }
 0xa08   : > { %v3280_v4 = vrot.slane %v3279_v44, 1 }
 0xa09   : > { %v9611_v6 = vpop.permute.xlu1 %4136  ;;  %2078 = vrot.lane.b32.xlu0 %v6464_v63, %s10978_s26 }
 0xa0a   : > { %v3282_v27 = vsel %vm10620_vm12, %v3279_v44, %v3280_v4  ;;  %vm3419_vm12 = vcmask 998400   ;;  %v10983_v44 = vmov 0.0  }
 0xa0b   : > { %2115 = vrot.lane.b32.xlu1 %v6479_v5, %s10974_s8  ;;  %v3284_v51 = vadd.f32 %v3282_v27, %v3244_v14  ;;  %v3335_v25 = vpop.permute.xlu0 %3334 }
 0xa0c   : > { %v3336_v18 = vrot.slane %v3335_v25, 1 }
 0xa0d   : > { %v2043_v15 = vpop.permute.xlu1 %2042  ;;  %2074 = vrot.lane.b32.xlu0 %v10976_v22, %s10978_s26  ;;  %v3301_v12 = vadd.f32 %v3299_v2, %v3284_v51 }
 0xa0e   : > { %2054 = vst.msk [vmem:[#allocation7 + $0x30] sm:$0xf] %vm1943_vm6, %v2043_v15  ;;  %v3338_v0 = vsel %vm3337_vm15, %v3335_v25, %v3336_v18  ;;  %vm10622_vm15 = vcmask 908288  }
 0xa0f   : > { %1966 = vrot.lane.b32.xlu1 %v9256_v59, %s10926_s18  ;;  %v3376_v7 = vpop.permute.xlu0 %3375  ;;  %v3340_v33 = vadd.f32 %v3338_v0, %v3301_v12 }
 0xa10   : > { %v3377_v11 = vrot.slane %v3376_v7, 1 }
 0xa11   : > { %v2159_v21 = vpop.permute.xlu1 %2158  ;;  %6947 = vrot.lane.b32.xlu0 %v6946_v39, %s10881_s21 }
 0xa12   : > { %2167 = vst.msk [vmem:[#allocation7 + $0x6c] sm:$0xf] %vm1943_vm6, %v2159_v21  ;;  %v3379_v26 = vsel %vm3378_vm8, %v3376_v7, %v3377_v11  ;;  %vm3508_vm8 = vcmask 891904   ;;  %v3665_v21 = vrot.slane %v9599_v28, 1 }
 0xa13   : > { %2080 = vrot.lane.b32.xlu1 %v6465_v36, %s10978_s26  ;;  %v3417_v38 = vpop.permute.xlu0 %3416  ;;  %v3381_v43 = vadd.f32 %v3379_v26, %v3340_v33  ;;  %v3509_v23 = vsel %vm3508_vm8, %v9590_v40, %v3507_v55  ;;  %vm3578_vm8 = vcmask 867328  }
 0xa14   : > { %v3418_v16 = vrot.slane %v3417_v38, 1 }
 0xa15   : > { %v3441_v30 = vpop.permute.xlu1 %3440  ;;  %6957 = vrot.lane.b32.xlu0 %v6946_v39, %s10886_s28 }
 0xa16   : > { %v3442_v57 = vrot.slane %v3441_v30, 1  ;;  %v3420_v62 = vsel %vm3419_vm12, %v3417_v38, %v3418_v16  ;;  %vm10623_vm12 = vcmask 900096  }
 0xa17   : > { %2076 = vrot.lane.b32.xlu1 %v9256_v59, %s10978_s26  ;;  %v3422_v52 = vadd.f32 %v3420_v62, %v3381_v43  ;;  %v2187_v24 = vpop.permute.xlu0 %2186  ;;  %s11063_s26 = sld [smem:[#allocation146_spill]] }
 0xa18   : > { %2197 = vst.msk [vmem:[#allocation7 + $0x74] sm:$0xf] %vm1943_vm6, %v2187_v24  ;;  %v3444_v63 = vsel %vm10621_vm13, %v3441_v30, %v3442_v57  ;;  %vm3530_vm13 = vcmask 883712  }
 0xa19   : > { %v3465_v1 = vpop.permute.xlu1 %3464  ;;  %6967 = vrot.lane.b32.xlu0 %v6966_v50, %s10862_s17  ;;  %v3446_v29 = vadd.f32 %v3444_v63, %v3422_v52  ;;  %s5828_s17 = sshll.u32 %s582_s4, 4  ;;  %s10322_s17 = int_to_ptr.vmem [resolvable:$true] %s5828_s17 }
 0xa1a   : > { %v3466_v31 = vrot.slane %v3465_v1, 1 }
 0xa1b   : > { %6952 = vrot.lane.b32.xlu1 %v6966_v50, %s10876_s19  ;;  %v2045_v53 = vpop.permute.xlu0 %2044  ;;  %s7197_s19 = scalar_lea.vmem %s10322_s17, 512 }
 0xa1c   : > { %v3468_v56 = vsel %vm10622_vm15, %v3465_v1, %v3466_v31  ;;  %2055 = vst.msk [vmem:[#allocation7 + $0x34] sm:$0xf] %vm1943_vm6, %v2045_v53  ;;  %vm3554_vm15 = vcmask 875520   ;;  %p7198_p13 = scmp.ne.s32.totalorder %s10322_s17, %s7197_s19 }
 0xa1d   : > { %v3489_v19 = vpop.permute.xlu1 %3488  ;;  %v3470_v10 = vadd.f32 %v3468_v56, %v3446_v29  ;;  %s10320_s28 = scalar_lea.hbm %s11063_s26, %s6563_s22 }
 0xa1e   : > { %v3490_v59 = vrot.slane %v3489_v19, 1  ;;  %p7199_p3 = pnand %p7198_p13, %p11064_p10 }
 0xa1f   : > { %6962 = vrot.lane.b32.xlu1 %v6966_v50, %s10888_s29  ;;  %v2157_v41 = vpop.permute.xlu0 %2156  ;;  %v6977_v3 = vld [vmem:[#allocation7 + $0x70] sm:$0xff]   ;;  %s5799_s29 = scalar_lea.sflag [#allocation22], %s11056_s24 }
 0xa20   : > { %v3492_v47 = vsel %vm10623_vm12, %v3489_v19, %v3490_v59  ;;  %2166 = vst.msk [vmem:[#allocation7 + $0x68] sm:$0xf] %vm1943_vm6, %v2157_v41  ;;  %6590 = vmatprep.subr.bf16.mxu0 %v6977_v3  ;;  %vm4399_vm12 = vcmask 277640   ;;  %v3824_v41 = vrot.slane %v9603_v13, 1  ;;  %p7200_p5 = pneg %p7199_p3 }
 0xa21   : > { %v3494_v61 = vadd.f32 %v3492_v47, %v3470_v10  ;;  %v3528_v54 = vpop.permute.xlu1 %3527  ;;  %4402 = vst.msk [vmem:[#allocation2 + $0x40] sm:$0xff] %vm4399_vm12, %v10983_v44  ;;  %4400 = vst.msk [vmem:[#allocation2 + $0x10] sm:$0xff] %vm4399_vm12, %v10983_v44 }
 0xa22   : > { %v3529_v46 = vrot.slane %v3528_v54, 1  ;;  %4401 = vst.msk [vmem:[#allocation2 + $0x28] sm:$0xff] %vm4399_vm12, %v10983_v44  ;;  %4403 = vst.msk [vmem:[#allocation2 + $0x58] sm:$0xff] %vm4399_vm12, %v10983_v44  ;;  %vm3666_vm12 = vcmask 760832  }
 0xa23   : > { %v3599_v42 = vpop.permute.xlu0 %3598  ;;  %v6978_v9 = vld [vmem:[#allocation7 + $0x30] sm:$0xff]   ;;  %v3511_v36 = vadd.f32 %v3509_v23, %v3494_v61  ;;  %v3667_v57 = vsel %vm3666_vm12, %v9599_v28, %v3665_v21  ;;  %vm3808_vm12 = vcmask 637952  }
 0xa24   : > { %v3531_v58 = vsel %vm3530_vm13, %v3528_v54, %v3529_v46  ;;  %6591 = vmatpush3.bf16.msra.mxu0 %v6978_v9  ;;  %v3600_v5 = vrot.slane %v3599_v42, 1  ;;  %vm10625_vm13 = vcmask 777216  }
 0xa25   : > { %v3552_v8 = vpop.permute.xlu1 %3551  ;;  %v3533_v40 = vadd.f32 %v3531_v58, %v3511_v36 }
 0xa26   : > { %v3553_v22 = vrot.slane %v3552_v8, 1  ;;  %v3602_v18 = vsel %vm10624_vm11, %v3599_v42, %v3600_v5  ;;  %vm3712_vm11 = vcmask 744448  }
 0xa27   : > { %v3686_v35 = vpop.permute.xlu0 %3685  ;;  %v6979_v37 = vld [vmem:[#allocation7 + $0x68] sm:$0xff]  }
 0xa28   : > { %v3555_v60 = vsel %vm3554_vm15, %v3552_v8, %v3553_v22  ;;  %6592 = vmatprep.subr.bf16.mxu0 %v6979_v37  ;;  %vm10626_vm15 = vcmask 769024   ;;  %v3687_v33 = vrot.slane %v3686_v35, 1 }
 0xa29   : > { %v3576_v4 = vpop.permute.xlu1 %3575  ;;  %v3557_v32 = vadd.f32 %v3555_v60, %v3533_v40 }
 0xa2a   : > { %v3577_v14 = vrot.slane %v3576_v4, 1 }
 0xa2b   : > { %v3734_v51 = vpop.permute.xlu0 %3733 }
 0xa2c   : > { %v3579_v27 = vsel %vm3578_vm8, %v3576_v4, %v3577_v14  ;;  %vm3688_vm8 = vcmask 752640   ;;  %v3735_v62 = vrot.slane %v3734_v51, 1 }
 0xa2d   : > { %v3581_v25 = vadd.f32 %v3579_v27, %v3557_v32  ;;  %v3623_v15 = vpop.permute.xlu1 %3622  ;;  %v3689_v50 = vsel %vm3688_vm8, %v3686_v35, %v3687_v33  ;;  %vm3825_vm8 = vcmask 629760  }
 0xa2e   : > { %v3624_v39 = vrot.slane %v3623_v15, 1  ;;  %v3826_v36 = vsel %vm3825_vm8, %v9603_v13, %v3824_v41  ;;  %vm3982_vm8 = vcmask 498688  }
 0xa2f   : > { %v3604_v2 = vadd.f32 %v3602_v18, %v3581_v25  ;;  %v3782_v7 = vpop.permute.xlu0 %3781 }
 0xa30   : > { %v3626_v12 = vsel %vm10625_vm13, %v3623_v15, %v3624_v39  ;;  %vm3736_vm13 = vcmask 736256   ;;  %v3783_v53 = vrot.slane %v3782_v7, 1 }
 0xa31   : > { %v3647_v0 = vpop.permute.xlu1 %3646  ;;  %v3628_v26 = vadd.f32 %v3626_v12, %v3604_v2  ;;  %v3737_v56 = vsel %vm3736_vm13, %v3734_v51, %v3735_v62  ;;  %vm3871_vm13 = vcmask 613376  }
 0xa32   : > { %v3648_v11 = vrot.slane %v3647_v0, 1 }
 0xa33   : > { %v3806_v30 = vpop.permute.xlu0 %3805 }
 0xa34   : > { %v3650_v38 = vsel %vm10626_vm15, %v3647_v0, %v3648_v11  ;;  %vm3784_vm15 = vcmask 646144   ;;  %v3807_v55 = vrot.slane %v3806_v30, 1 }
 0xa35   : > { %v3652_v16 = vadd.f32 %v3650_v38, %v3628_v26  ;;  %v3710_v43 = vpop.permute.xlu1 %3709  ;;  %v3785_v3 = vsel %vm3784_vm15, %v3782_v7, %v3783_v53  ;;  %vm3941_vm15 = vcmask 515072   ;;  %v3981_v7 = vrot.slane %v9586_v34, 1 }
 0xa36   : > { %v3711_v17 = vrot.slane %v3710_v43, 1  ;;  %v3809_v23 = vsel %vm3808_vm12, %v3806_v30, %v3807_v55  ;;  %vm3965_vm12 = vcmask 506880   ;;  %v4138_v55 = vrot.slane %v9611_v6, 1 }
 0xa37   : > { %v3669_v49 = vadd.f32 %v3667_v57, %v3652_v16  ;;  %v3845_v52 = vpop.permute.xlu0 %3844  ;;  %v3983_v16 = vsel %vm3982_vm8, %v9586_v34, %v3981_v7  ;;  %vm4139_vm8 = vcmask 367616  }
 0xa38   : > { %v3713_v63 = vsel %vm3712_vm11, %v3710_v43, %v3711_v17  ;;  %v3846_v42 = vrot.slane %v3845_v52, 1  ;;  %vm3847_vm11 = vcmask 621568  }
 0xa39   : > { %v3691_v24 = vadd.f32 %v3689_v50, %v3669_v49  ;;  %v3758_v1 = vpop.permute.xlu1 %3757 }
 0xa3a   : > { %v3759_v31 = vrot.slane %v3758_v1, 1  ;;  %v3848_v35 = vsel %vm3847_vm11, %v3845_v52, %v3846_v42  ;;  %vm4004_vm11 = vcmask 490496  }
 0xa3b   : > { %v3715_v29 = vadd.f32 %v3713_v63, %v3691_v24  ;;  %v3893_v19 = vpop.permute.xlu0 %3892 }
 0xa3c   : > { %v3761_v28 = vsel %vm3760_vm7, %v3758_v1, %v3759_v31  ;;  %v3894_v37 = vrot.slane %v3893_v19, 1  ;;  %vm3895_vm7 = vcmask 605184  }
 0xa3d   : > { %v3739_v59 = vadd.f32 %v3737_v56, %v3715_v29  ;;  %v3869_v10 = vpop.permute.xlu1 %3868 }
 0xa3e   : > { %v3870_v8 = vrot.slane %v3869_v10, 1  ;;  %v3896_v27 = vsel %vm3895_vm7, %v3893_v19, %v3894_v37  ;;  %vm4052_vm7 = vcmask 474112  }
 0xa3f   : > { %v3763_v47 = vadd.f32 %v3761_v28, %v3739_v59  ;;  %v3939_v61 = vpop.permute.xlu0 %3938 }
 0xa40   : > { %v3872_v40 = vsel %vm3871_vm13, %v3869_v10, %v3870_v8  ;;  %v3940_v13 = vrot.slane %v3939_v61, 1  ;;  %vm4028_vm13 = vcmask 482304  }
 0xa41   : > { %v3787_v54 = vadd.f32 %v3785_v3, %v3763_v47  ;;  %v3916_v46 = vpop.permute.xlu1 %3915 }
 0xa42   : > { %v3917_v4 = vrot.slane %v3916_v46, 1  ;;  %v3942_v0 = vsel %vm3941_vm15, %v3939_v61, %v3940_v13  ;;  %vm4098_vm15 = vcmask 384000  }
 0xa43   : > { %v3811_v9 = vadd.f32 %v3809_v23, %v3787_v54  ;;  %v2008_v58 = vpop.permute.xlu0 %2007  ;;  %v4140_v23 = vsel %vm4139_vm8, %v9611_v6, %v4138_v55  ;;  %vm4318_vm8 = vcmask 228352  }
 0xa44   : > { %2017 = vst.msk [vmem:[#allocation7 + $0x28] sm:$0xf] %vm1943_vm6, %v2008_v58  ;;  %v3918_v25 = vsel %vm610_vm0, %v3916_v46, %v3917_v4 }
 0xa45   : > { %v3828_v22 = vadd.f32 %v3826_v36, %v3811_v9  ;;  %v2010_v60 = vpop.permute.xlu1 %2009 }
 0xa46   : > { %2018 = vst.msk [vmem:[#allocation7 + $0x2c] sm:$0xf] %vm1943_vm6, %v2010_v60 }
 0xa47   : > { %v3850_v44 = vadd.f32 %v3848_v35, %v3828_v22  ;;  %v4026_v5 = vpop.permute.xlu0 %4025 }
 0xa48   : > { %v4027_v43 = vrot.slane %v4026_v5, 1 }
 0xa49   : > { %v3874_v14 = vadd.f32 %v3872_v40, %v3850_v44  ;;  %v3963_v32 = vpop.permute.xlu1 %3962 }
 0xa4a   : > { %v3964_v15 = vrot.slane %v3963_v32, 1  ;;  %v4029_v24 = vsel %vm4028_vm13, %v4026_v5, %v4027_v43  ;;  %vm4209_vm13 = vcmask 343040  }
 0xa4b   : > { %v3898_v51 = vadd.f32 %v3896_v27, %v3874_v14  ;;  %v4073_v18 = vpop.permute.xlu0 %4072 }
 0xa4c   : > { %v3966_v11 = vsel %vm3965_vm12, %v3963_v32, %v3964_v15  ;;  %v4074_v1 = vrot.slane %v4073_v18, 1  ;;  %vm4122_vm12 = vcmask 375808  }
 0xa4d   : > { %v3920_v39 = vadd.f32 %v3918_v25, %v3898_v51  ;;  %v4002_v2 = vpop.permute.xlu1 %4001  ;;  %v6980_v12 = vld [vmem:[#allocation7 + $0x28] sm:$0xff]  }
 0xa4e   : > { %6593 = vmatpush3.bf16.msra.mxu0 %v6980_v12  ;;  %v4003_v26 = vrot.slane %v4002_v2, 1  ;;  %v4075_v34 = vsel %vm3752_vm9, %v4073_v18, %v4074_v1  ;;  %vm4185_vm9 = vcmask 351232   ;;  %v4295_v18 = vrot.slane %v9597_v48, 1 }
 0xa4f   : > { %v3944_v21 = vadd.f32 %v3942_v0, %v3920_v39  ;;  %v4120_v33 = vpop.permute.xlu0 %4119 }
 0xa50   : > { %v4005_v17 = vsel %vm4004_vm11, %v4002_v2, %v4003_v26  ;;  %v4121_v59 = vrot.slane %v4120_v33, 1  ;;  %vm4161_vm11 = vcmask 359424  }
 0xa51   : > { %v3968_v38 = vadd.f32 %v3966_v11, %v3944_v21  ;;  %v4050_v30 = vpop.permute.xlu1 %4049 }
 0xa52   : > { %v4051_v49 = vrot.slane %v4050_v30, 1  ;;  %v4123_v61 = vsel %vm4122_vm12, %v4120_v33, %v4121_v59  ;;  %vm4296_vm12 = vcmask 236544  }
 0xa53   : > { %v3985_v57 = vadd.f32 %v3983_v16, %v3968_v38  ;;  %v4159_v50 = vpop.permute.xlu0 %4158  ;;  %v4297_v26 = vsel %vm4296_vm12, %v9597_v48, %v4295_v18  ;;  %v10993_v18 = vld [vmem:[#allocation107_spill] sm:$0xff] }
 0xa54   : > { %v4053_v31 = vsel %vm4052_vm7, %v4050_v30, %v4051_v49  ;;  %v4160_v54 = vrot.slane %v4159_v50, 1  ;;  %vm4255_vm7 = vcmask 252928  }
 0xa55   : > { %v4007_v62 = vadd.f32 %v4005_v17, %v3985_v57  ;;  %v4096_v52 = vpop.permute.xlu1 %4095 }
 0xa56   : > { %v4097_v29 = vrot.slane %v4096_v52, 1  ;;  %v4162_v58 = vsel %vm4161_vm11, %v4159_v50, %v4160_v54  ;;  %vm4342_vm11 = vcmask 220160  }
 0xa57   : > { %v4031_v63 = vadd.f32 %v4029_v24, %v4007_v62  ;;  %v4207_v56 = vpop.permute.xlu0 %4206 }
 0xa58   : > { %v4099_v28 = vsel %vm4098_vm15, %v4096_v52, %v4097_v29  ;;  %v4208_v22 = vrot.slane %v4207_v56, 1  ;;  %vm4279_vm15 = vcmask 244736  }
 0xa59   : > { %v4055_v53 = vadd.f32 %v4053_v31, %v4031_v63  ;;  %v4183_v19 = vpop.permute.xlu1 %4182 }
 0xa5a   : > { %v4184_v42 = vrot.slane %v4183_v19, 1  ;;  %v4210_v5 = vsel %vm4209_vm13, %v4207_v56, %v4208_v22 }
 0xa5b   : > { %v4077_v10 = vadd.f32 %v4075_v34, %v4055_v53  ;;  %v4253_v47 = vpop.permute.xlu0 %4252 }
 0xa5c   : > { %v4186_v35 = vsel %vm4185_vm9, %v4183_v19, %v4184_v42  ;;  %v4254_v6 = vrot.slane %v4253_v47, 1  ;;  %vm4366_vm9 = vcmask 211968   ;;  %v6990_v42 = vld [vmem:[#allocation7] sm:$0xff]  }
 0xa5d   : > { %v4101_v41 = vadd.f32 %v4099_v28, %v4077_v10  ;;  %v4230_v3 = vpop.permute.xlu1 %4229 }
 0xa5e   : > { %v4231_v37 = vrot.slane %v4230_v3, 1  ;;  %v4256_v39 = vsel %vm4255_vm7, %v4253_v47, %v4254_v6  ;;  %v10989_v6 = vld [vmem:[#allocation111_spill] sm:$0xff]  ;;  %vm11022_vm7 = vcmask 916480  }
 0xa5f   : > { %v4125_v46 = vadd.f32 %v4123_v61, %v4101_v41  ;;  %v2153_v9 = vpop.permute.xlu0 %2152  ;;  %vm11024_vm12 = vmmov %vm11022_vm7 }
 0xa60   : > { %2164 = vst.msk [vmem:[#allocation7 + $0x60] sm:$0xf] %vm1943_vm6, %v2153_v9  ;;  %v4232_v32 = vsel %vm640_vm2, %v4230_v3, %v4231_v37  ;;  %v10984_v9 = vld [vmem:[#allocation95_spill] sm:$0xff] }
 0xa61   : > { %v4142_v36 = vadd.f32 %v4140_v23, %v4125_v46  ;;  %v2155_v8 = vpop.permute.xlu1 %2154  ;;  %v6988_v46 = vld [vmem:[#allocation7 + $0x8] sm:$0xff]   ;;  %v10985_v22 = vsub.s32 0, %v10984_v9 }
 0xa62   : > { %2165 = vst.msk [vmem:[#allocation7 + $0x64] sm:$0xf] %vm1943_vm6, %v2155_v8 }
 0xa63   : > { %v4164_v60 = vadd.f32 %v4162_v58, %v4142_v36  ;;  %v4340_v44 = vpop.permute.xlu0 %4339  ;;  %v4383_v36 = vsub.s32 1, %v10984_v9 }
 0xa64   : > { %v4341_v33 = vrot.slane %v4340_v44, 1 }
 0xa65   : > { %v4188_v40 = vadd.f32 %v4186_v35, %v4164_v60  ;;  %v4277_v4 = vpop.permute.xlu1 %4276  ;;  %v10986_v35 = vld [vmem:[#allocation110_spill] sm:$0xff] }
 0xa66   : > { %v4278_v27 = vrot.slane %v4277_v4, 1  ;;  %v4343_v17 = vsel %vm4342_vm11, %v4340_v44, %v4341_v33  ;;  %v10987_v44 = vld [vmem:[#allocation109_spill] sm:$0xff]  ;;  %vm11026_vm11 = vcmask 1031168  }
 0xa67   : > { %v4212_v14 = vadd.f32 %v4210_v5, %v4188_v40  ;;  %v2004_v13 = vpop.permute.xlu0 %2003 }
 0xa68   : > { %2015 = vst.msk [vmem:[#allocation7 + $0x20] sm:$0xf] %vm1943_vm6, %v2004_v13  ;;  %v4280_v12 = vsel %vm4279_vm15, %v4277_v4, %v4278_v27  ;;  %v10988_v4 = vld [vmem:[#allocation112_spill] sm:$0xff]  ;;  %v10991_v13 = vld [vmem:[#allocation105_spill] sm:$0xff]  ;;  %vm11023_vm15 = vmmov %vm11022_vm7 }
 0xa69   : > { %v4234_v51 = vadd.f32 %v4232_v32, %v4212_v14  ;;  %v4316_v25 = vpop.permute.xlu1 %4315  ;;  %v6981_v15 = vld [vmem:[#allocation7 + $0x60] sm:$0xff]   ;;  %v10990_v32 = vld [vmem:[#allocation106_spill] sm:$0xff] }
 0xa6a   : > { %6594 = vmatprep.subr.bf16.mxu0 %v6981_v15  ;;  %v4317_v7 = vrot.slane %v4316_v25, 1 }
 0xa6b   : > { %v4258_v2 = vadd.f32 %v4256_v39, %v4234_v51  ;;  %v2118_v0 = vpop.permute.xlu0 %2117 }
 0xa6c   : > { %2127 = vst.msk [vmem:[#allocation7 + $0x58] sm:$0xf] %vm1943_vm6, %v2118_v0  ;;  %v4319_v30 = vsel %vm4318_vm8, %v4316_v25, %v4317_v7  ;;  %v10992_v25 = vld [vmem:[#allocation108_spill] sm:$0xff]  ;;  %vm11025_vm8 = vmmov %vm11022_vm7 }
 0xa6d   : > { %v4282_v21 = vadd.f32 %v4280_v12, %v4258_v2  ;;  %v2006_v11 = vpop.permute.xlu1 %2005  ;;  %v6991_v2 = vld [vmem:[#allocation17] ss:$12 sps:$4 sm:$0xff]   ;;  %v6993_v12 = vld [vmem:[#allocation17 + $0x4] ss:$12 sps:$4 sm:$0xff]   ;;  %v6994_v7 = vld [vmem:[#allocation17 + $0x1c] ss:$12 sps:$4 sm:$0xff]  }
 0xa6e   : > { %2016 = vst.msk [vmem:[#allocation7 + $0x24] sm:$0xf] %vm1943_vm6, %v2006_v11  ;;  %2471 = vmatprep.mubr.bf16.mxu0 %v6993_v12  ;;  %v6996_v0 = vld [vmem:[#allocation17 + $0x18] ss:$12 sps:$4 sm:$0xff]  }
 0xa6f   : > { %v4299_v38 = vadd.f32 %v4297_v26, %v4282_v21  ;;  %v1969_v16 = vpop.permute.xlu0 %1968 }
 0xa70   : > { %1978 = vst.msk [vmem:[#allocation7 + $0x18] sm:$0xf] %vm1943_vm6, %v1969_v16 }
 0xa71   : > { %v4321_v43 = vadd.f32 %v4319_v30, %v4299_v38  ;;  %v4364_v57 = vpop.permute.xlu1 %4363 }
 0xa72   : > { %v4365_v49 = vrot.slane %v4364_v57, 1 }
 0xa73   : > { %v4345_v50 = vadd.f32 %v4343_v17, %v4321_v43  ;;  %v2114_v52 = vpop.permute.xlu0 %2113 }
 0xa74   : > { %v4367_v62 = vsel %vm4366_vm9, %v4364_v57, %v4365_v49  ;;  %2125 = vst.msk [vmem:[#allocation7 + $0x50] sm:$0xf] %vm1943_vm6, %v2114_v52  ;;  %vm11027_vm9 = vmmov %vm11026_vm11 }
 0xa75   : > { %v4369_v24 = vadd.f32 %v4367_v62, %v4345_v50  ;;  %v2120_v1 = vpop.permute.xlu1 %2119  ;;  %v6982_v48 = vld [vmem:[#allocation7 + $0x20] sm:$0xff]  }
 0xa76   : > { %2128 = vst.msk [vmem:[#allocation7 + $0x5c] sm:$0xf] %vm1943_vm6, %v2120_v1  ;;  %6595 = vmatpush3.bf16.msra.mxu0 %v6982_v48 }
 0xa77   : > { %v6325_v63 = vmul.f32 -1.442695, %v4369_v24  ;;  %v1965_v31 = vpop.permute.xlu0 %1964 }
 0xa78   : > { %1976 = vst.msk [vmem:[#allocation7 + $0x10] sm:$0xf] %vm1943_vm6, %v1965_v31 }
 0xa79   : > { %7053 = vpow2.f32 %v6325_v63  ;;  %v1971_v29 = vpop.permute.xlu1 %1970 }
 0xa7a   : > { %1979 = vst.msk [vmem:[#allocation7 + $0x1c] sm:$0xf] %vm1943_vm6, %v1971_v29 }
 0xa7b   : > { %v2079_v56 = vpop.permute.xlu0 %2078 }
 0xa7c   : > { %2088 = vst.msk [vmem:[#allocation7 + $0x48] sm:$0xf] %vm1943_vm6, %v2079_v56 }
 0xa7d   : > { %v2116_v53 = vpop.permute.xlu1 %2115  ;;  %v6983_v19 = vld [vmem:[#allocation7 + $0x58] sm:$0xff]  }
 0xa7e   : > { %2126 = vst.msk [vmem:[#allocation7 + $0x54] sm:$0xf] %vm1943_vm6, %v2116_v53  ;;  %6596 = vmatprep.subr.bf16.mxu0 %v6983_v19 }
 0xa7f   : > { %v2075_v34 = vpop.permute.xlu0 %2074 }
 0xa80   : > { %2086 = vst.msk [vmem:[#allocation7 + $0x40] sm:$0xf] %vm1943_vm6, %v2075_v34 }
 0xa81   : > { %v1967_v59 = vpop.permute.xlu1 %1966  ;;  %v6984_v10 = vld [vmem:[#allocation7 + $0x18] sm:$0xff]  }
 0xa82   : > { %1977 = vst.msk [vmem:[#allocation7 + $0x14] sm:$0xf] %vm1943_vm6, %v1967_v59  ;;  %6597 = vmatpush3.bf16.msra.mxu0 %v6984_v10 }
 0xa83   : > { %v9702_v21 = vpop.permute.xlu0 %6947 }
 0xa85   : > { %v2081_v55 = vpop.permute.xlu1 %2080  ;;  %v6985_v28 = vld [vmem:[#allocation7 + $0x50] sm:$0xff]  }
 0xa86   : > { %v7054_v47 = vpop.eup %7053  ;;  %2089 = vst.msk [vmem:[#allocation7 + $0x4c] sm:$0xf] %vm1943_vm6, %v2081_v55  ;;  %6598 = vmatprep.subr.bf16.mxu0 %v6985_v28 }
 0xa87   : > { %v4373_v41 = vadd.f32 1.0, %v7054_v47  ;;  %v6958_v26 = vpop.permute.xlu0 %6957 }
 0xa88   : > { %v9706_v30 = vunpack.i.h.bf16 %v6958_v26  ;;  %v9708_v16 = vunpack.i.l.bf16 %v6958_v26 }
 0xa89   : > { %7055 = vrcp.f32 %v4373_v41  ;;  %v2077_v3 = vpop.permute.xlu1 %2076  ;;  %v6986_v61 = vld [vmem:[#allocation7 + $0x10] sm:$0xff]  }
 0xa8a   : > { %2087 = vst.msk [vmem:[#allocation7 + $0x44] sm:$0xf] %vm1943_vm6, %v2077_v3  ;;  %6599 = vmatpush3.bf16.msra.mxu0 %v6986_v61  ;;  %vm4444_vm6 = vcmask 1047688   ;;  %v5003_v49 = vsel %vm640_vm2, %v9708_v16, %v9706_v30 }
 0xa8b   : > { %v6968_v38 = vpop.permute.xlu0 %6967 }
 0xa8d   : > { %v6987_v54 = vld [vmem:[#allocation7 + $0x48] sm:$0xff]   ;;  %v9704_v11 = vpop.permute.xlu1 %6952 }
 0xa8e   : > { %6600 = vmatprep.subr.bf16.mxu0 %v6987_v54 }
 0xa8f   : > { %6601 = vmatpush3.bf16.msra.mxu0 %v6988_v46 }
 0xa91   : > { %v6989_v23 = vld [vmem:[#allocation7 + $0x40] sm:$0xff]   ;;  %v6963_v33 = vpop.permute.xlu1 %6962 }
 0xa92   : > { %6602 = vmatprep.subr.bf16.mxu0 %v6989_v23 }
 0xa93   : > { %6603 = vmatpush3.bf16.msra.mxu0 %v6990_v42 }
 0xa96   : > { %v7056_v8 = vpop.eup %7055  ;;  %2472 = vmatmul.mubr.bf16.vlgmr.msra.gmra.mxu0 %v6991_v2 }
 0xa97   : > { %v4384_v58 = vrot.slane %v7056_v8, %v4383_v36  ;;  %v4380_v60 = vrot.slane %v7056_v8, %v10985_v22  ;;  %2479 = vmatprep.mubr.bf16.mxu0 %v6994_v7  ;;  %v9809_v22 = vunpack.i.h.bf16 %v6963_v33 }
 0xa99   : > { %v4392_v37 = vmul.f32 %v4384_v58, %v10986_v35  ;;  %v4391_v40 = vmul.f32 %v4380_v60, %v10987_v44  ;;  %v4394_v5 = vmul.f32 %v4384_v58, %v10988_v4  ;;  %v4393_v14 = vmul.f32 %v4380_v60, %v10989_v6 }
 0xa9a   : > { %v4388_v27 = vmul.f32 %v4384_v58, %v10990_v32  ;;  %v4387_v51 = vmul.f32 %v4380_v60, %v10991_v13  ;;  %v4390_v15 = vmul.f32 %v4384_v58, %v10992_v25  ;;  %v4389_v39 = vmul.f32 %v4380_v60, %v10993_v18 }
 0xa9b   : > { %4422 = vrot.lane.b32.xlu1 %v4392_v37, %s10882_s2  ;;  %4420 = vrot.lane.b32.xlu0 %v4391_v40, %s10882_s2  ;;  %v6964_v60 = vunpack.i.l.bf16 %v6963_v33  ;;  %v9829_v6 = vunpack.i.h.bf16 %v6968_v38 }
 0xa9e   : > { %2480 = vmatmul.mubr.bf16.gmra.mxu0 %v6996_v0 }
 0xa9f   : > { %4426 = vrot.lane.b32.xlu1 %v4394_v5, %s10882_s2  ;;  %4424 = vrot.lane.b32.xlu0 %v4393_v14, %s10882_s2  ;;  %v6969_v14 = vunpack.i.l.bf16 %v6968_v38 }
 0xaa1   : > { %v4898_v26 = vsel %vm3483_vm4, %v6969_v14, %v9829_v6 }
 0xaa3   : > { %4414 = vrot.lane.b32.xlu1 %v4388_v27, %s10882_s2  ;;  %4412 = vrot.lane.b32.xlu0 %v4387_v51, %s10882_s2  ;;  %v5193_v51 = vsel %vm3641_vm14, %v6964_v60, %v9809_v22 }
 0xaa7   : > { %4418 = vrot.lane.b32.xlu1 %v4390_v15, %s10882_s2  ;;  %4416 = vrot.lane.b32.xlu0 %v4389_v39, %s10882_s2 }
 0xb0d   : > { %v4423_v43 = vpop.permute.xlu1 %4422  ;;  %v4421_v57 = vpop.permute.xlu0 %4420 }
 0xb0e   : > { %4453 = vst.msk [vmem:[#allocation2 + $0x40] sm:$0xff] %vm3459_vm1, %v4423_v43  ;;  %v9712_v17 = vsel %vm3459_vm1, %v4421_v57, %v4423_v43 }
 0xb0f   : > { %4451 = vst.msk [vmem:[#allocation2 + $0x30] sm:$0xff] %vm4444_vm6, %v4421_v57  ;;  %v9719_v50 = vmul.f32 %v5003_v49, %v9712_v17  ;;  %v9857_v39 = vmul.f32 %v5193_v51, %v9712_v17 }
 0xb11   : > { %v4427_v62 = vpop.permute.xlu1 %4426  ;;  %v4425_v52 = vpop.permute.xlu0 %4424 }
 0xb12   : > { %4456 = vst.msk [vmem:[#allocation2 + $0x58] sm:$0xff] %vm3459_vm1, %v4427_v62  ;;  %v9723_v24 = vsel %vm3459_vm1, %v4425_v52, %v4427_v62 }
 0xb13   : > { %4454 = vst.msk [vmem:[#allocation2 + $0x48] sm:$0xff] %vm4444_vm6, %v4425_v52  ;;  %v9727_v1 = vmul.f32 %v5003_v49, %v9723_v24  ;;  %v9863_v12 = vmul.f32 %v5193_v51, %v9723_v24  ;;  %v9887_v43 = vmul.f32 %v4898_v26, %v9723_v24 }
 0xb15   : > { %v4415_v48 = vpop.permute.xlu1 %4414  ;;  %v4413_v63 = vpop.permute.xlu0 %4412  ;;  %v9729_v31 = vld [vmem:[#allocation2 + $0x40] sm:$0xff] }
 0xb16   : > { %v9731_v29 = vld [vmem:[#allocation2 + $0x30] sm:$0xff]  ;;  %4447 = vst.msk [vmem:[#allocation2 + $0x10] sm:$0xff] %vm3459_vm1, %v4415_v48  ;;  %v9735_v56 = vsel %vm3459_vm1, %v4413_v63, %v4415_v48  ;;  %v9740_v53 = vpack.c.bf16 %v9729_v31, %v9729_v31  ;;  %v9752_v34 = vmul.f32 %v9706_v30, %v9729_v31  ;;  %v9902_v48 = vmul.f32 %v10980_v20, %v9723_v24 }
 0xb17   : > { %4445 = vst.msk [vmem:[#allocation2] sm:$0xff] %vm4444_vm6, %v4413_v63  ;;  %v9744_v19 = vpack.c.bf16 %v9712_v17, %v9731_v29  ;;  %v9760_v47 = vmul.f32 %v9708_v16, %v9731_v29  ;;  %v9836_v32 = vmul.f32 %v5003_v49, %v9735_v56  ;;  %v9854_v18 = vmul.f32 %v6964_v60, %v9731_v29 }
 0xb18   : > { %4555 = vrot.lane.b32.xlu0 %v9740_v53, %s10926_s18  ;;  %v9878_v38 = vmul.f32 %v6969_v14, %v9731_v29  ;;  %v9895_v62 = vmul.f32 %v5193_v51, %v9735_v56  ;;  %v9923_v33 = vmul.f32 %v4898_v26, %v9735_v56 }
 0xb19   : > { %4553 = vrot.lane.b32.xlu1 %v9744_v19, %s10926_s18  ;;  %v4419_v59 = vpop.permute.xlu1 %4418  ;;  %v4417_v10 = vpop.permute.xlu0 %4416  ;;  %v9754_v55 = vld [vmem:[#allocation2 + $0x58] sm:$0xff] }
 0xb1a   : > { %v9756_v28 = vld [vmem:[#allocation2 + $0x48] sm:$0xff]  ;;  %4450 = vst.msk [vmem:[#allocation2 + $0x28] sm:$0xff] %vm3459_vm1, %v4419_v59  ;;  %v9764_v41 = vsel %vm3459_vm1, %v4417_v10, %v4419_v59  ;;  %v9769_v3 = vpack.c.bf16 %v9754_v55, %v9754_v55  ;;  %v9795_v36 = vmul.f32 %v9706_v30, %v9754_v55  ;;  %vm11016_vm1 = vcmask 777216  }
 0xb1b   : > { %4448 = vst.msk [vmem:[#allocation2 + $0x18] sm:$0xff] %vm4444_vm6, %v4417_v10  ;;  %v9773_v61 = vpack.c.bf16 %v9723_v24, %v9756_v28  ;;  %v9799_v8 = vmul.f32 %v9708_v16, %v9756_v28  ;;  %v9851_v15 = vmul.f32 %v5003_v49, %v9764_v41  ;;  %v9860_v2 = vmul.f32 %v6964_v60, %v9756_v28  ;;  %vm11018_vm4 = vmmov %vm11016_vm1 }
 0xb1c   : > { %4559 = vrot.lane.b32.xlu0 %v9769_v3, %s10926_s18  ;;  %v9913_v10 = vmul.f32 %v5193_v51, %v9764_v41  ;;  %v9931_v59 = vmul.f32 %v4898_v26, %v9764_v41  ;;  %v9949_v63 = vmul.f32 %v10979_v45, %v9756_v28  ;;  %v9953_v51 = vmul.f32 %v10980_v20, %v9735_v56  ;;  %vm11019_vm14 = vmmov %vm11016_vm1 }
 0xb1d   : > { %4557 = vrot.lane.b32.xlu1 %v9773_v61, %s10926_s18  ;;  %v9779_v54 = vld [vmem:[#allocation2 + $0x10] sm:$0xff]  ;;  %v9957_v25 = vmul.f32 %v10980_v20, %v9764_v41  ;;  %vm11028_vm6 = vmmov %vm11027_vm9 }
 0xb1e   : > { %v9781_v46 = vld [vmem:[#allocation2] sm:$0xff]  ;;  %v9787_v42 = vpack.c.bf16 %v9779_v54, %v9779_v54  ;;  %v9807_v58 = vmul.f32 %v9706_v30, %v9779_v54  ;;  %10996 = vst [vmem:[#allocation122_spill] sm:$0xff] %v9949_v63  ;;  %10997 = vst [vmem:[#allocation116_spill] sm:$0xff] %v9953_v51  ;;  %v6955_v63 = vunpack.i.h.bf16 %v9704_v11 }
 0xb1f   : > { %v9791_v9 = vpack.c.bf16 %v9735_v56, %v9781_v46  ;;  %v9827_v5 = vmul.f32 %v9708_v16, %v9781_v46  ;;  %v9890_v57 = vmul.f32 %v6964_v60, %v9781_v46  ;;  %v9920_v49 = vmul.f32 %v6969_v14, %v9781_v46  ;;  %10998 = vst [vmem:[#allocation127_spill] sm:$0xff] %v9957_v25 }
 0xb20   : > { %4547 = vrot.lane.b32.xlu0 %v9787_v42, %s10926_s18  ;;  %v9961_v7 = vmul.f32 %v10979_v45, %v9781_v46 }
 0xb21   : > { %4545 = vrot.lane.b32.xlu1 %v9791_v9, %s10926_s18  ;;  %v9811_v35 = vld [vmem:[#allocation2 + $0x28] sm:$0xff] }
 0xb22   : > { %v9813_v37 = vld [vmem:[#allocation2 + $0x18] sm:$0xff]  ;;  %v9819_v40 = vpack.c.bf16 %v9811_v35, %v9811_v35  ;;  %v9840_v27 = vmul.f32 %v9706_v30, %v9811_v35  ;;  %v9881_v30 = vmul.f32 %v4898_v26, %v9712_v17  ;;  %10999 = vst [vmem:[#allocation120_spill] sm:$0xff] %v9961_v7 }
 0xb23   : > { %v9823_v4 = vpack.c.bf16 %v9764_v41, %v9813_v37  ;;  %v9844_v13 = vmul.f32 %v9708_v16, %v9813_v37  ;;  %v9884_v16 = vmul.f32 %v6969_v14, %v9756_v28  ;;  %v9898_v52 = vmul.f32 %v6964_v60, %v9813_v37 }
 0xb24   : > { %4551 = vrot.lane.b32.xlu0 %v9819_v40, %s10926_s18  ;;  %v9917_v60 = vmul.f32 %v10980_v20, %v9712_v17  ;;  %v9926_v0 = vmul.f32 %v6969_v14, %v9813_v37  ;;  %v9943_v14 = vmul.f32 %v10979_v45, %v9731_v29  ;;  %v9965_v44 = vmul.f32 %v10979_v45, %v9813_v37 }
 0xb25   : > { %4549 = vrot.lane.b32.xlu1 %v9823_v4, %s10926_s18  ;;  %v6949_v45 = vunpack.i.l.bf16 %v9702_v21 }
 0xb26   : > { %10994 = vst [vmem:[#allocation118_spill] sm:$0xff] %v9917_v60  ;;  %10995 = vst [vmem:[#allocation113_spill] sm:$0xff] %v9943_v14  ;;  %v6950_v60 = vunpack.i.h.bf16 %v9702_v21 }
 0xb27   : > { %11000 = vst [vmem:[#allocation114_spill] sm:$0xff] %v9965_v44  ;;  %v4718_v26 = vmul.f32 %v6949_v45, %v9731_v29 }
 0xb28   : > { %5146 = vrot.lane.b32.xlu0 %v9740_v53, %s10940_s16  ;;  %v4720_v23 = vmul.f32 %v6950_v60, %v9729_v31  ;;  %v4708_v51 = vsel %vm3435_vm5, %v6949_v45, %v6950_v60  ;;  %vm11017_vm5 = vmmov %vm11016_vm1 }
 0xb29   : > { %5144 = vrot.lane.b32.xlu1 %v9744_v19, %s10940_s16  ;;  %v4719_v21 = vmul.f32 %v4708_v51, %v9712_v17  ;;  %v4722_v44 = vmul.f32 %v4708_v51, %v9723_v24 }
 0xb2a   : > { %v6519_v20 = vpack.c.bf16 %v4720_v23, %v4720_v23  ;;  %v4713_v23 = vmul.f32 %v4708_v51, %v9735_v56 }
 0xb2b   : > { %v6518_v7 = vpack.c.bf16 %v4719_v21, %v4718_v26 }
 0xb2c   : > { %5150 = vrot.lane.b32.xlu0 %v9769_v3, %s10940_s16 }
 0xb2d   : > { %5148 = vrot.lane.b32.xlu1 %v9773_v61, %s10940_s16 }
 0xb30   : > { %5138 = vrot.lane.b32.xlu0 %v9787_v42, %s10940_s16 }
 0xb31   : > { %5136 = vrot.lane.b32.xlu1 %v9791_v9, %s10940_s16 }
 0xb34   : > { %5142 = vrot.lane.b32.xlu0 %v9819_v40, %s10940_s16 }
 0xb35   : > { %5140 = vrot.lane.b32.xlu1 %v9823_v4, %s10940_s16  ;;  %s11014_s16 = sld [smem:[#allocation138_spill]] }
 0xb38   : > { %4851 = vrot.lane.b32.xlu0 %v9740_v53, %s7379_s6  ;;  %v4723_v53 = vmul.f32 %v6950_v60, %v9754_v55 }
 0xb39   : > { %4849 = vrot.lane.b32.xlu1 %v9744_v19, %s7379_s6  ;;  %v4721_v19 = vmul.f32 %v6949_v45, %v9756_v28 }
 0xb3a   : > { %v6521_v25 = vpack.c.bf16 %v4723_v53, %v4723_v53 }
 0xb3b   : > { %v6520_v14 = vpack.c.bf16 %v4722_v44, %v4721_v19  ;;  %v6954_v44 = vunpack.i.l.bf16 %v9704_v11  ;;  %v4615_v19 = vmul.f32 %v6955_v63, %v9729_v31 }
 0xb3c   : > { %4855 = vrot.lane.b32.xlu0 %v9769_v3, %s7379_s6  ;;  %v4714_v3 = vmul.f32 %v6950_v60, %v9779_v54 }
 0xb3d   : > { %4853 = vrot.lane.b32.xlu1 %v9773_v61, %s7379_s6  ;;  %v4712_v61 = vmul.f32 %v6949_v45, %v9781_v46 }
 0xb3e   : > { %v6515_v26 = vpack.c.bf16 %v4714_v3, %v4714_v3  ;;  %v4613_v3 = vmul.f32 %v6954_v44, %v9731_v29 }
 0xb3f   : > { %v6514_v21 = vpack.c.bf16 %v4713_v23, %v4712_v61  ;;  %v4618_v23 = vmul.f32 %v6955_v63, %v9754_v55 }
 0xb40   : > { %4766 = vrot.lane.b32.xlu0 %v6519_v20, %s10932_s20  ;;  %v4717_v20 = vmul.f32 %v6950_v60, %v9811_v35  ;;  %v4603_v60 = vsel %vm786_vm3, %v6954_v44, %v6955_v63  ;;  %vm4569_vm3 = vcmask 1043456  }
 0xb41   : > { %4764 = vrot.lane.b32.xlu1 %v6518_v7, %s10932_s20  ;;  %v4715_v7 = vmul.f32 %v6949_v45, %v9813_v37  ;;  %v4614_v11 = vmul.f32 %v4603_v60, %v9712_v17  ;;  %v6511_v45 = vpack.c.bf16 %v4615_v19, %v4615_v19  ;;  %v4617_v29 = vmul.f32 %v4603_v60, %v9723_v24 }
 0xb42   : > { %v6517_v53 = vpack.c.bf16 %v4717_v20, %v4717_v20  ;;  %v4609_v20 = vmul.f32 %v6955_v63, %v9779_v54  ;;  %v4608_v17 = vmul.f32 %v4603_v60, %v9735_v56  ;;  %v4611_v24 = vmul.f32 %v4603_v60, %v9764_v41 }
 0xb43   : > { %v6510_v61 = vpack.c.bf16 %v4614_v11, %v4613_v3  ;;  %v6543_v56 = vpack.c.bf16 %v9752_v34, %v9752_v34  ;;  %v6539_v34 = vpack.c.bf16 %v9807_v58, %v9807_v58  ;;  %v5208_v58 = vmul.f32 %v9809_v22, %v9754_v55 }
 0xb44   : > { %4770 = vrot.lane.b32.xlu0 %v6521_v25, %s10932_s20  ;;  %v4716_v25 = vmul.f32 %v4708_v51, %v9764_v41  ;;  %v4616_v51 = vmul.f32 %v6954_v44, %v9756_v28  ;;  %v11002_v41 = vpack.c.bf16 %v9727_v1, %v9799_v8  ;;  %v11004_v1 = vpack.c.bf16 %v9851_v15, %v9844_v13 }
 0xb45   : > { %4768 = vrot.lane.b32.xlu1 %v6520_v14, %s10932_s20  ;;  %v11006_v13 = vpack.c.bf16 %v9863_v12, %v9860_v2  ;;  %v11008_v2 = vpack.c.bf16 %v9887_v43, %v9884_v16  ;;  %v4904_v3 = vmul.f32 %v9829_v6, %v9779_v54  ;;  %v11010_v16 = vpack.c.bf16 %v9913_v10, %v9898_v52  ;;  %v7003_v10 = vld [vmem:[#allocation13 + $0x4] ss:$12 sps:$4 sm:$0xff]  }
 0xb46   : > { %v6516_v14 = vpack.c.bf16 %v4716_v25, %v4715_v7  ;;  %v4607_v7 = vmul.f32 %v6954_v44, %v9781_v46  ;;  %v6507_v25 = vpack.c.bf16 %v4609_v20, %v4609_v20  ;;  %v11012_v52 = vpack.c.bf16 %v9931_v59, %v9926_v0  ;;  %5586 = vmatprep.mubr.bf16.mxu0 %v7003_v10 }
 0xb47   : > { %v6531_v43 = vpack.c.bf16 %v4904_v3, %v4904_v3 }
 0xb48   : > { %4758 = vrot.lane.b32.xlu0 %v6515_v26, %s10932_s20  ;;  %v6513_v26 = vpack.c.bf16 %v4618_v23, %v4618_v23  ;;  %v6506_v28 = vpack.c.bf16 %v4608_v17, %v4607_v7 }
 0xb49   : > { %4756 = vrot.lane.b32.xlu1 %v6514_v21, %s10932_s20  ;;  %v6512_v21 = vpack.c.bf16 %v4617_v29, %v4616_v51 }
 0xb4c   : > { %4762 = vrot.lane.b32.xlu0 %v6517_v53, %s10932_s20  ;;  %v4612_v53 = vmul.f32 %v6955_v63, %v9811_v35  ;;  %v6545_v63 = vpack.c.bf16 %v9795_v36, %v9795_v36  ;;  %v5205_v36 = vmul.f32 %v9809_v22, %v9729_v31 }
 0xb4d   : > { %4760 = vrot.lane.b32.xlu1 %v6516_v14, %s10932_s20  ;;  %v4610_v14 = vmul.f32 %v6954_v44, %v9813_v37  ;;  %v11001_v37 = vpack.c.bf16 %v9719_v50, %v9760_v47  ;;  %v11003_v50 = vpack.c.bf16 %v9836_v32, %v9827_v5  ;;  %v6541_v47 = vpack.c.bf16 %v9840_v27, %v9840_v27 }
 0xb4e   : > { %v6509_v19 = vpack.c.bf16 %v4612_v53, %v4612_v53  ;;  %v6559_v8 = vpack.c.bf16 %v5205_v36, %v5205_v36  ;;  %v11005_v5 = vpack.c.bf16 %v9857_v39, %v9854_v18  ;;  %v6561_v32 = vpack.c.bf16 %v5208_v58, %v5208_v58  ;;  %v2567_v36 = vld [vmem:[%s11014_s16 + $0x8] sm:$0xff] }
 0xb4f   : > { %v6508_v46 = vpack.c.bf16 %v4611_v24, %v4610_v14  ;;  %v4910_v27 = vmul.f32 %v9829_v6, %v9729_v31  ;;  %v4913_v44 = vmul.f32 %v9829_v6, %v9754_v55  ;;  %v11007_v18 = vpack.c.bf16 %v9881_v30, %v9878_v38 }
 0xb50   : > { %4661 = vrot.lane.b32.xlu0 %v6511_v45, %s10928_s27  ;;  %v5199_v31 = vmul.f32 %v9809_v22, %v9779_v54  ;;  %v5202_v55 = vmul.f32 %v9809_v22, %v9811_v35  ;;  %v11009_v38 = vpack.c.bf16 %v9895_v62, %v9890_v57  ;;  %v4907_v22 = vmul.f32 %v9829_v6, %v9811_v35 }
 0xb51   : > { %4659 = vrot.lane.b32.xlu1 %v6510_v61, %s10928_s27  ;;  %v6535_v15 = vpack.c.bf16 %v4910_v27, %v4910_v27  ;;  %v6537_v39 = vpack.c.bf16 %v4913_v44, %v4913_v44  ;;  %v11011_v57 = vpack.c.bf16 %v9923_v33, %v9920_v49 }
 0xb52   : > { %v6555_v12 = vpack.c.bf16 %v5199_v31, %v5199_v31  ;;  %v6557_v30 = vpack.c.bf16 %v5202_v55, %v5202_v55  ;;  %v6533_v60 = vpack.c.bf16 %v4907_v22, %v4907_v22 }
 0xb54   : > { %4665 = vrot.lane.b32.xlu0 %v6513_v26, %s10928_s27 }
 0xb55   : > { %4663 = vrot.lane.b32.xlu1 %v6512_v21, %s10928_s27 }
 0xb58   : > { %4653 = vrot.lane.b32.xlu0 %v6507_v25, %s10928_s27 }
 0xb59   : > { %4651 = vrot.lane.b32.xlu1 %v6506_v28, %s10928_s27 }
 0xb5c   : > { %4657 = vrot.lane.b32.xlu0 %v6509_v19, %s10928_s27 }
 0xb5d   : > { %4655 = vrot.lane.b32.xlu1 %v6508_v46, %s10928_s27 }
 0xb60   : > { %5061 = vrot.lane.b32.xlu0 %v6543_v56, %s7393_s7 }
 0xb61   : > { %5059 = vrot.lane.b32.xlu1 %v11001_v37, %s7393_s7 }
 0xb64   : > { %5065 = vrot.lane.b32.xlu0 %v6545_v63, %s7393_s7 }
 0xb65   : > { %5063 = vrot.lane.b32.xlu1 %v11002_v41, %s7393_s7 }
 0xb68   : > { %5053 = vrot.lane.b32.xlu0 %v6539_v34, %s7393_s7 }
 0xb69   : > { %5051 = vrot.lane.b32.xlu1 %v11003_v50, %s7393_s7 }
 0xb6c   : > { %5057 = vrot.lane.b32.xlu0 %v6541_v47, %s7393_s7 }
 0xb6d   : > { %5055 = vrot.lane.b32.xlu1 %v11004_v1, %s7393_s7  ;;  %s11013_s7 = sld [smem:[#allocation143_spill]] }
 0xb70   : > { %5251 = vrot.lane.b32.xlu0 %v6559_v8, %s10942_s25 }
 0xb71   : > { %5249 = vrot.lane.b32.xlu1 %v11005_v5, %s10942_s25 }
 0xb73   : > { %v606_v17 = vld [vmem:[%s11013_s7] sm:$0xff]  ;;  %v609_v24 = vld [vmem:[%s11013_s7 + $0x18] sm:$0xff]  ;;  %v608_v19 = vld [vmem:[%s11013_s7 + $0x10] sm:$0xff] }
 0xb74   : > { %5255 = vrot.lane.b32.xlu0 %v6561_v32, %s10942_s25 }
 0xb75   : > { %5253 = vrot.lane.b32.xlu1 %v11006_v13, %s10942_s25 }
 0xb78   : > { %4956 = vrot.lane.b32.xlu0 %v6535_v15, %s10934_s0 }
 0xb79   : > { %4954 = vrot.lane.b32.xlu1 %v11007_v18, %s10934_s0 }
 0xb7c   : > { %4960 = vrot.lane.b32.xlu0 %v6537_v39, %s10934_s0 }
 0xb7d   : > { %4958 = vrot.lane.b32.xlu1 %v11008_v2, %s10934_s0 }
 0xb80   : > { %5243 = vrot.lane.b32.xlu0 %v6555_v12, %s10942_s25 }
 0xb81   : > { %5241 = vrot.lane.b32.xlu1 %v11009_v38, %s10942_s25 }
 0xb84   : > { %5247 = vrot.lane.b32.xlu0 %v6557_v30, %s10942_s25 }
 0xb85   : > { %5245 = vrot.lane.b32.xlu1 %v11010_v16, %s10942_s25  ;;  %s11015_s25 = smov %s11014_s16 }
 0xb86   : > { %v2566_v1 = vld [vmem:[%s11015_s25] sm:$0xff]  ;;  %v2569_v15 = vld [vmem:[%s11015_s25 + $0x18] sm:$0xff]  ;;  %v2568_v44 = vld [vmem:[%s11015_s25 + $0x10] sm:$0xff] }
 0xb88   : > { %4948 = vrot.lane.b32.xlu0 %v6531_v43, %s10934_s0 }
 0xb89   : > { %4946 = vrot.lane.b32.xlu1 %v11011_v57, %s10934_s0 }
 0xb8a   : > { %v4556_v62 = vpop.permute.xlu0 %4555 }
 0xb8b   : > { %v4554_v54 = vpop.permute.xlu1 %4553  ;;  %v4566_v11 = vrot.slane %v4556_v62, 4 }
 0xb8c   : > { %v4565_v45 = vrot.slane %v4554_v54, 4  ;;  %4952 = vrot.lane.b32.xlu0 %v6533_v60, %s10934_s0 }
 0xb8d   : > { %4950 = vrot.lane.b32.xlu1 %v11012_v52, %s10934_s0 }
 0xb8e   : > { %v4575_v35 = vsel %vm4569_vm3, %v4565_v45, %v4566_v11  ;;  %v4560_v33 = vpop.permute.xlu0 %4559 }
 0xb8f   : > { %v10117_v6 = vsel %vm3241_vm10, %v4554_v54, %v4575_v35  ;;  %v4558_v49 = vpop.permute.xlu1 %4557  ;;  %v4568_v61 = vrot.slane %v4560_v33, 4 }
 0xb90   : > { %v4567_v23 = vrot.slane %v4558_v49, 4  ;;  %4843 = vrot.lane.b32.xlu0 %v9787_v42, %s7379_s6 }
 0xb91   : > { %4841 = vrot.lane.b32.xlu1 %v9791_v9, %s7379_s6  ;;  %v607_v9 = vld [vmem:[%s11013_s7 + $0x8] sm:$0xff] }
 0xb92   : > { %v4577_v51 = vsel %vm4569_vm3, %v4567_v23, %v4568_v61  ;;  %v4548_v59 = vpop.permute.xlu0 %4547 }
 0xb93   : > { %v10125_v0 = vsel %vm3241_vm10, %v4558_v49, %v4577_v51  ;;  %v4546_v29 = vpop.permute.xlu1 %4545  ;;  %v4562_v20 = vrot.slane %v4548_v59, 4 }
 0xb94   : > { %v6406_v26 = vcombine.low %v10117_v6, %v10125_v0  ;;  %v6407_v21 = vcombine.high %v10117_v6, %v10125_v0  ;;  %v4561_v7 = vrot.slane %v4546_v29, 4  ;;  %4847 = vrot.lane.b32.xlu0 %v9819_v40, %s7379_s6  ;;  %v11032_v6 = vld [vmem:[#allocation122_spill] sm:$0xff]  ;;  %v11033_v0 = vld [vmem:[#allocation113_spill] sm:$0xff] }
 0xb95   : > { %4845 = vrot.lane.b32.xlu1 %v9823_v4, %s7379_s6  ;;  %s7435_s6 = smov [#allocation21]  }
 0xb96   : > { %v4570_v42 = vsel %vm4569_vm3, %v4561_v7, %v4562_v20  ;;  %v4552_v28 = vpop.permute.xlu0 %4551  ;;  %s7201_s2 = sshll.u32 %s7435_s6, 4  ;;  %s7202_s2 = int_to_ptr.vmem [resolvable:$false] %s7201_s2 }
 0xb97   : > { %v10143_v25 = vsel %vm3241_vm10, %v4546_v29, %v4570_v42  ;;  %v4550_v53 = vpop.permute.xlu1 %4549  ;;  %v4564_v14 = vrot.slane %v4552_v28, 4  ;;  %s7203_s18 = scalar_lea.vmem %s7202_s2, 1024  ;;  %p7204_p6 = scmp.lt.s32.totalorder %s10322_s17, %s7202_s2 }
 0xb98   : > { %v4563_v40 = vrot.slane %v4550_v53, 4  ;;  %2282 = vperm.xlu0 %6944, %v607_v9   ;;  %p7205_p11 = scmp.lt.s32.totalorder %s7203_s18, %s7197_s19 }
 0xb99   : > { %2277 = vperm.xlu1 %6945, %v606_v17  }
 0xb9a   : > { %v4573_v4 = vsel %vm4569_vm3, %v4563_v40, %v4564_v14  ;;  %v5147_v56 = vpop.permute.xlu0 %5146  ;;  %p7206_p12 = por %p7205_p11, %p7204_p6 }
 0xb9b   : > { %v10153_v46 = vsel %vm3241_vm10, %v4550_v53, %v4573_v4  ;;  %v5145_v37 = vpop.permute.xlu1 %5144  ;;  %v5157_v34 = vrot.slane %v5147_v56, 4  ;;  %vm11020_vm10 = vcmask 908288  }
 0xb9c   : > { %v6404_v63 = vcombine.low %v10143_v25, %v10153_v46  ;;  %v6405_v41 = vcombine.high %v10143_v25, %v10153_v46  ;;  %v5156_v50 = vrot.slane %v5145_v37, 4  ;;  %2292 = vperm.xlu0 %6944, %v609_v24   ;;  %vm11021_vm13 = vmmov %vm11020_vm10  ;;  %p7207_p1 = pnand %p7206_p12, %p7200_p5 }
 0xb9d   : > { %2287 = vperm.xlu1 %6945, %v608_v19  }
 0xb9e   : > { %v5165_v47 = vsel %vm4569_vm3, %v5156_v50, %v5157_v34  ;;  %v5151_v58 = vpop.permute.xlu0 %5150 }
 0xb9f   : > { %v10167_v8 = vsel %vm11016_vm1, %v5145_v37, %v5165_v47  ;;  %v5149_v5 = vpop.permute.xlu1 %5148  ;;  %v5159_v32 = vrot.slane %v5151_v58, 4  ;;  %vm11029_vm1 = vmmov %vm11028_vm6 }
 0xba0   : > { %v5158_v27 = vrot.slane %v5149_v5, 4  ;;  %5325 = vperm.xlu0 %6944, %v2567_v36  }
 0xba1   : > { %5320 = vperm.xlu1 %6945, %v2566_v1  }
 0xba2   : > { %v5167_v13 = vsel %vm4569_vm3, %v5158_v27, %v5159_v32  ;;  %v5139_v39 = vpop.permute.xlu0 %5138 }
 0xba3   : > { %v10177_v18 = vsel %vm11017_vm5, %v5149_v5, %v5167_v13  ;;  %v5137_v31 = vpop.permute.xlu1 %5136  ;;  %v5153_v55 = vrot.slane %v5139_v39, 4  ;;  %vm11041_vm5 = vcmask 785408  }
 0xba4   : > { %v6430_v2 = vcombine.low %v10167_v8, %v10177_v18  ;;  %v6431_v12 = vcombine.high %v10167_v8, %v10177_v18  ;;  %v5152_v38 = vrot.slane %v5137_v31, 4  ;;  %5335 = vperm.xlu0 %6944, %v2569_v15  }
 0xba5   : > { %5330 = vperm.xlu1 %6945, %v2568_v44  }
 0xba6   : > { %v5160_v30 = vsel %vm4569_vm3, %v5152_v38, %v5153_v55  ;;  %v5143_v16 = vpop.permute.xlu0 %5142 }
 0xba7   : > { %v10185_v3 = vsel %vm11018_vm4, %v5137_v31, %v5160_v30  ;;  %v5141_v43 = vpop.permute.xlu1 %5140  ;;  %v5155_v22 = vrot.slane %v5143_v16, 4  ;;  %vm11042_vm4 = vcmask 769024  }
 0xba8   : > { %v5154_v57 = vrot.slane %v5141_v43, 4 }
 0xbaa   : > { %v5163_v62 = vsel %vm4569_vm3, %v5154_v57, %v5155_v22  ;;  %v4852_v60 = vpop.permute.xlu0 %4851 }
 0xbab   : > { %v10189_v54 = vsel %vm11019_vm14, %v5141_v43, %v5163_v62  ;;  %v4850_v11 = vpop.permute.xlu1 %4849  ;;  %v4862_v35 = vrot.slane %v4852_v60, 4  ;;  %vm11043_vm14 = vmmov %vm11042_vm4 }
 0xbac   : > { %v6428_v45 = vcombine.low %v10185_v3, %v10189_v54  ;;  %v6429_v52 = vcombine.high %v10185_v3, %v10189_v54  ;;  %v4861_v33 = vrot.slane %v4850_v11, 4 }
 0xbae   : > { %v4870_v49 = vsel %vm4569_vm3, %v4861_v33, %v4862_v35  ;;  %v4856_v61 = vpop.permute.xlu0 %4855 }
 0xbaf   : > { %v10197_v10 = vsel %vm11020_vm10, %v4850_v11, %v4870_v49  ;;  %v4854_v23 = vpop.permute.xlu1 %4853  ;;  %v4864_v51 = vrot.slane %v4856_v61, 4  ;;  %vm11044_vm10 = vmmov %vm11041_vm5 }
 0xbb0   : > { %v4863_v59 = vrot.slane %v4854_v23, 4 }
 0xbb2   : > { %v4872_v29 = vsel %vm4569_vm3, %v4863_v59, %v4864_v51  ;;  %v4767_v7 = vpop.permute.xlu0 %4766 }
 0xbb3   : > { %v10201_v20 = vsel %vm11021_vm13, %v4854_v23, %v4872_v29  ;;  %v4765_v42 = vpop.permute.xlu1 %4764  ;;  %v4777_v28 = vrot.slane %v4767_v7, 4  ;;  %vm11045_vm13 = vmmov %vm11041_vm5 }
 0xbb4   : > { %v6418_v9 = vcombine.low %v10197_v10, %v10201_v20  ;;  %v6419_v17 = vcombine.high %v10197_v10, %v10201_v20  ;;  %v4776_v53 = vrot.slane %v4765_v42, 4 }
 0xbb6   : > { %v4771_v14 = vpop.permute.xlu0 %4770  ;;  %v4785_v4 = vsel %vm4569_vm3, %v4776_v53, %v4777_v28 }
 0xbb7   : > { %v4769_v40 = vpop.permute.xlu1 %4768  ;;  %v4779_v24 = vrot.slane %v4771_v14, 4  ;;  %v4786_v37 = vsel %vm11022_vm7, %v4765_v42, %v4785_v4  ;;  %vm11046_vm7 = vmmov %vm11041_vm5 }
 0xbb8   : > { %v4778_v19 = vrot.slane %v4769_v40, 4 }
 0xbba   : > { %v4787_v56 = vsel %vm4569_vm3, %v4778_v19, %v4779_v24  ;;  %v4759_v50 = vpop.permute.xlu0 %4758 }
 0xbbb   : > { %v4788_v34 = vsel %vm11023_vm15, %v4769_v40, %v4787_v56  ;;  %v4757_v47 = vpop.permute.xlu1 %4756  ;;  %v4773_v58 = vrot.slane %v4759_v50, 4  ;;  %vm11047_vm15 = vcmask 900096  }
 0xbbc   : > { %v6414_v36 = vcombine.low %v4786_v37, %v4788_v34  ;;  %v6415_v1 = vcombine.high %v4786_v37, %v4788_v34  ;;  %v4772_v5 = vrot.slane %v4757_v47, 4 }
 0xbbe   : > { %5554 = vmatprep.subr.bf16.mxu0 %v6415_v1  ;;  %v4763_v32 = vpop.permute.xlu0 %4762  ;;  %v4780_v13 = vsel %vm4569_vm3, %v4772_v5, %v4773_v58 }
 0xbbf   : > { %5555 = vmatpush1.bf16.msra.mxu0 %v6414_v36  ;;  %v4761_v27 = vpop.permute.xlu1 %4760  ;;  %v4775_v15 = vrot.slane %v4763_v32, 4  ;;  %v4782_v31 = vsel %vm11024_vm12, %v4757_v47, %v4780_v13  ;;  %vm11048_vm12 = vmmov %vm11047_vm15 }
 0xbc0   : > { %v4774_v44 = vrot.slane %v4761_v27, 4 }
 0xbc2   : > { %v4783_v39 = vsel %vm4569_vm3, %v4774_v44, %v4775_v15  ;;  %v4662_v38 = vpop.permute.xlu0 %4661  ;;  %v11030_v15 = vld [vmem:[#allocation118_spill] sm:$0xff] }
 0xbc3   : > { %v4784_v55 = vsel %vm11025_vm8, %v4761_v27, %v4783_v39  ;;  %v4660_v30 = vpop.permute.xlu1 %4659  ;;  %v4672_v22 = vrot.slane %v4662_v38, 4  ;;  %v11031_v44 = vpack.c.bf16 %v9902_v48, %v11030_v15  ;;  %vm11049_vm8 = vmmov %vm11042_vm4 }
 0xbc4   : > { %v6412_v16 = vcombine.low %v4782_v31, %v4784_v55  ;;  %v6413_v43 = vcombine.high %v4782_v31, %v4784_v55  ;;  %v4671_v57 = vrot.slane %v4660_v30, 4 }
 0xbc6   : > { %5556 = vmatprep.subr.bf16.mxu0 %v6413_v43  ;;  %v4666_v62 = vpop.permute.xlu0 %4665  ;;  %v4680_v11 = vsel %vm4569_vm3, %v4671_v57, %v4672_v22  ;;  %v11038_v57 = vld [vmem:[#allocation114_spill] sm:$0xff] }
 0xbc7   : > { %5557 = vmatpush1.bf16.msra.mxu0 %v6412_v16  ;;  %v4664_v60 = vpop.permute.xlu1 %4663  ;;  %v4674_v35 = vrot.slane %v4666_v62, 4  ;;  %v4681_v61 = vsel %vm11026_vm11, %v4660_v30, %v4680_v11  ;;  %v11035_v30 = vld [vmem:[#allocation127_spill] sm:$0xff]  ;;  %v11036_v16 = vld [vmem:[#allocation116_spill] sm:$0xff]  ;;  %vm11050_vm11 = vmmov %vm11042_vm4 }
 0xbc8   : > { %v4673_v33 = vrot.slane %v4664_v60, 4  ;;  %v11037_v43 = vpack.c.bf16 %v11035_v30, %v11036_v16  ;;  %v11039_v62 = vld [vmem:[#allocation120_spill] sm:$0xff] }
 0xbca   : > { %v4682_v49 = vsel %vm4569_vm3, %v4673_v33, %v4674_v35  ;;  %v4654_v51 = vpop.permute.xlu0 %4653 }
 0xbcb   : > { %v4683_v23 = vsel %vm11027_vm9, %v4664_v60, %v4682_v49  ;;  %v4652_v59 = vpop.permute.xlu1 %4651  ;;  %v4668_v42 = vrot.slane %v4654_v51, 4  ;;  %v11040_v60 = vpack.c.bf16 %v11038_v57, %v11039_v62  ;;  %v7000_v57 = vld [vmem:[#allocation18 + $0x34] ss:$8 sps:$4 sm:$0xff]   ;;  %vm11051_vm9 = vmmov %vm11048_vm12 }
 0xbcc   : > { %v6410_v29 = vcombine.low %v4681_v61, %v4683_v23  ;;  %v6411_v7 = vcombine.high %v4681_v61, %v4683_v23  ;;  %v4667_v28 = vrot.slane %v4652_v59, 4  ;;  %v6997_v62 = vld [vmem:[#allocation13 + $0x8] ss:$12 sps:$4 sm:$0xff]  }
 0xbce   : > { %5558 = vmatprep.subr.bf16.mxu0 %v6411_v7  ;;  %v4658_v53 = vpop.permute.xlu0 %4657  ;;  %v4675_v40 = vsel %vm4569_vm3, %v4667_v28, %v4668_v42 }
 0xbcf   : > { %5559 = vmatpush1.bf16.msra.mxu0 %v6410_v29  ;;  %v4656_v14 = vpop.permute.xlu1 %4655  ;;  %v4670_v4 = vrot.slane %v4658_v53, 4  ;;  %v4677_v56 = vsel %vm11028_vm6, %v4652_v59, %v4675_v40  ;;  %vm11052_vm6 = vmmov %vm11051_vm9 }
 0xbd0   : > { %v4669_v24 = vrot.slane %v4656_v14, 4 }
 0xbd2   : > { %v4678_v19 = vsel %vm4569_vm3, %v4669_v24, %v4670_v4  ;;  %v5062_v34 = vpop.permute.xlu0 %5061 }
 0xbd3   : > { %v4679_v37 = vsel %vm11029_vm1, %v4656_v14, %v4678_v19  ;;  %v5060_v50 = vpop.permute.xlu1 %5059  ;;  %v5072_v25 = vrot.slane %v5062_v34, 4  ;;  %vm11054_vm1 = vcmask 908288  }
 0xbd4   : > { %v6408_v47 = vcombine.low %v4677_v56, %v4679_v37  ;;  %v6409_v36 = vcombine.high %v4677_v56, %v4679_v37  ;;  %v5071_v46 = vrot.slane %v5060_v50, 4 }
 0xbd6   : > { %5560 = vmatprep.subr.bf16.mxu0 %v6409_v36  ;;  %v5066_v1 = vpop.permute.xlu0 %5065  ;;  %v5080_v23 = vsel %vm4569_vm3, %v5071_v46, %v5072_v25 }
 0xbd7   : > { %5561 = vmatpush1.bf16.msra.mxu0 %v6408_v47  ;;  %v5064_v58 = vpop.permute.xlu1 %5063  ;;  %v5081_v24 = vsel %vm11044_vm10, %v5060_v50, %v5080_v23 }
 0xbd8   : > { %5562 = vmatprep.subr.bf16.mxu0 %v6407_v21  ;;  %v5074_v21 = vrot.slane %v5066_v1, 4  ;;  %v5073_v39 = vrot.slane %v5064_v58, 4 }
 0xbda   : > { %v5054_v5 = vpop.permute.xlu0 %5053 }
 0xbdb   : > { %5563 = vmatpush1.bf16.msra.mxu0 %v6406_v26  ;;  %v5052_v32 = vpop.permute.xlu1 %5051  ;;  %v11034_v26 = vpack.c.bf16 %v11032_v6, %v11033_v0  ;;  %v5068_v51 = vrot.slane %v5054_v5, 4 }
 0xbdc   : > { %5564 = vmatprep.subr.bf16.mxu0 %v6405_v41  ;;  %v5067_v59 = vrot.slane %v5052_v32, 4 }
 0xbde   : > { %v5058_v27 = vpop.permute.xlu0 %5057  ;;  %v5075_v56 = vsel %vm4569_vm3, %v5067_v59, %v5068_v51  ;;  %v7006_v51 = vld [vmem:[#allocation18 + $0x24] ss:$8 sps:$4 sm:$0xff]  }
 0xbdf   : > { %5565 = vmatpush1.bf16.msra.mxu0 %v6404_v63  ;;  %v5056_v13 = vpop.permute.xlu1 %5055  ;;  %v5082_v63 = vsel %vm4569_vm3, %v5073_v39, %v5074_v21  ;;  %v5070_v48 = vrot.slane %v5058_v27, 4  ;;  %v5077_v50 = vsel %vm11046_vm7, %v5052_v32, %v5075_v56  ;;  %v10275_v39 = vpop.f32.mrf.mxu0  ;;  %v7010_v56 = vld [vmem:[#allocation18 + $0x14] ss:$8 sps:$4 sm:$0xff]  }
 0xbe0   : > { %5566 = vmatprep.subr.bf16.mxu0 %v11031_v44  ;;  %v5069_v35 = vrot.slane %v5056_v13, 4  ;;  %v5083_v7 = vsel %vm11041_vm5, %v5064_v58, %v5082_v63  ;;  %vm11055_vm5 = vmmov %vm11054_vm1 }
 0xbe1   : > { %v6427_v19 = vcombine.high %v5081_v24, %v5083_v7 }
 0xbe2   : > { %v5252_v31 = vpop.permute.xlu0 %5251 }
 0xbe3   : > { %5567 = vmatpush1.bf16.msra.mxu0 %v11034_v26  ;;  %v5250_v55 = vpop.permute.xlu1 %5249  ;;  %v5262_v38 = vrot.slane %v5252_v31, 4 }
 0xbe4   : > { %v5261_v41 = vrot.slane %v5250_v55, 4  ;;  %5568 = vmatprep.subr.bf16.mxu0 %v11037_v43 }
 0xbe6   : > { %v5256_v22 = vpop.permute.xlu0 %5255  ;;  %v5270_v33 = vsel %vm4569_vm3, %v5261_v41, %v5262_v38  ;;  %v10279_v41 = vpop.f32.mrf.mxu0 }
 0xbe7   : > { %5569 = vmatpush1.bf16.msra.mxu0 %v11040_v60  ;;  %v5254_v11 = vpop.permute.xlu1 %5253  ;;  %v5264_v49 = vrot.slane %v5256_v22, 4  ;;  %v5271_v42 = vsel %vm11042_vm4, %v5250_v55, %v5270_v33  ;;  %v6998_v33 = vld [vmem:[#allocation18 + $0x30] ss:$8 sps:$4 sm:$0xff]  }
 0xbe8   : > { %v5263_v61 = vrot.slane %v5254_v11, 4  ;;  %5570 = vmatprep.subr.bf16.mxu0 %v6431_v12  ;;  %v5078_v12 = vsel %vm4569_vm3, %v5069_v35, %v5070_v48  ;;  %v6607_v60 = vpop.f32.mrf.mxu0 }
 0xbe9   : > { %v5079_v8 = vsel %vm11045_vm13, %v5056_v13, %v5078_v12  ;;  %v7004_v12 = vld [vmem:[#allocation18 + $0x20] ss:$8 sps:$4 sm:$0xff]  }
 0xbea   : > { %v5272_v29 = vsel %vm4569_vm3, %v5263_v61, %v5264_v49  ;;  %v4957_v53 = vpop.permute.xlu0 %4956  ;;  %v6425_v1 = vcombine.high %v5077_v50, %v5079_v8 }
 0xbeb   : > { %v5273_v28 = vsel %vm11043_vm14, %v5254_v11, %v5272_v29  ;;  %5571 = vmatpush2.bf16.msra.mxu0 %v6430_v2  ;;  %v4955_v14 = vpop.permute.xlu1 %4954  ;;  %v4967_v37 = vrot.slane %v4957_v53, 4  ;;  %v6608_v29 = vpop.f32.mrf.mxu0 }
 0xbec   : > { %v6434_v40 = vcombine.low %v5271_v42, %v5273_v28  ;;  %v6435_v4 = vcombine.high %v5271_v42, %v5273_v28  ;;  %5572 = vmatprep.subr.bf16.mxu0 %v6429_v52  ;;  %v4966_v34 = vrot.slane %v4955_v14, 4  ;;  %v6426_v52 = vcombine.low %v5081_v24, %v5083_v7 }
 0xbed   : > { %v6609_v10 = vadd.f32 %v6608_v29, %v6607_v60 }
 0xbee   : > { %5619 = vmatprep.subr.bf16.mxu1 %v6435_v4  ;;  %v4961_v18 = vpop.permute.xlu0 %4960  ;;  %v4975_v58 = vsel %vm4569_vm3, %v4966_v34, %v4967_v37  ;;  %v6610_v37 = vpop.f32.mrf.mxu0  ;;  %v7007_v34 = vld [vmem:[#allocation13 + $0x20] ss:$12 sps:$4 sm:$0xff]  }
 0xbef   : > { %5573 = vmatpush2.bf16.msra.mxu0 %v6428_v45  ;;  %5620 = vmatpush1.bf16.msra.mxu1 %v6434_v40  ;;  %v4959_v2 = vpop.permute.xlu1 %4958  ;;  %v4969_v47 = vrot.slane %v4961_v18, 4  ;;  %v6424_v45 = vcombine.low %v5077_v50, %v5079_v8  ;;  %v4976_v44 = vsel %vm11048_vm12, %v4955_v14, %v4975_v58  ;;  %v11053_v14 = vmov 0   ;;  %v7015_v50 = vld [vmem:[#allocation18 + $0x4] ss:$8 sps:$4 sm:$0xff]  }
 0xbf0   : > { %v4968_v36 = vrot.slane %v4959_v2, 4  ;;  %5574 = vmatprep.subr.bf16.mxu0 %v6427_v19 }
 0xbf2   : > { %v4977_v5 = vsel %vm4569_vm3, %v4968_v36, %v4969_v47  ;;  %v5244_v13 = vpop.permute.xlu0 %5243 }
 0xbf3   : > { %v4978_v27 = vsel %vm11047_vm15, %v4959_v2, %v4977_v5  ;;  %5575 = vmatpush2.bf16.msra.mxu0 %v6426_v52  ;;  %v5242_v15 = vpop.permute.xlu1 %5241  ;;  %v5258_v3 = vrot.slane %v5244_v13, 4  ;;  %v7008_v2 = vld [vmem:[#allocation18 + $0x10] ss:$8 sps:$4 sm:$0xff]   ;;  %v7013_v13 = vld [vmem:[#allocation18] ss:$8 sps:$4 sm:$0xff]  }
 0xbf4   : > { %v5257_v54 = vrot.slane %v5242_v15, 4  ;;  %5576 = vmatprep.subr.bf16.mxu0 %v6425_v1  ;;  %v6423_v21 = vcombine.high %v4976_v44, %v4978_v27  ;;  %v6422_v55 = vcombine.low %v4976_v44, %v4978_v27  ;;  %v6611_v27 = vpop.f32.mrf.mxu0  ;;  %v6606_v44 = vadd.f32 %v10279_v41, %v10275_v39 }
 0xbf6   : > { %v5248_v32 = vpop.permute.xlu0 %5247  ;;  %v5265_v6 = vsel %vm4569_vm3, %v5257_v54, %v5258_v3  ;;  %v6613_v54 = vpop.f32.mrf.mxu0 }
 0xbf7   : > { %5577 = vmatpush2.bf16.msra.mxu0 %v6424_v45  ;;  %v5246_v31 = vpop.permute.xlu1 %5245  ;;  %v5260_v0 = vrot.slane %v5248_v32, 4  ;;  %v5267_v30 = vsel %vm11049_vm8, %v5242_v15, %v5265_v6  ;;  %v7011_v45 = vld [vmem:[#allocation13 + $0x1c] ss:$12 sps:$4 sm:$0xff]   ;;  %v7016_v6 = vld [vmem:[#allocation13 + $0x18] ss:$12 sps:$4 sm:$0xff]  }
 0xbf8   : > { %v5259_v26 = vrot.slane %v5246_v31, 4  ;;  %5578 = vmatprep.subr.bf16.mxu0 %v6423_v21  ;;  %v6614_v20 = vpop.f32.mrf.mxu0 }
 0xbfa   : > { %v5268_v38 = vsel %vm4569_vm3, %v5259_v26, %v5260_v0  ;;  %v4949_v43 = vpop.permute.xlu0 %4948  ;;  %v6612_v0 = vadd.f32 %v6611_v27, %v6610_v37  ;;  %v11057_v26 = vld [vmem:[#allocation99_spill] sm:$0xff] }
 0xbfb   : > { %v5269_v16 = vsel %vm11050_vm11, %v5246_v31, %v5268_v38  ;;  %5579 = vmatpush2.bf16.msra.mxu0 %v6422_v55  ;;  %v4947_v25 = vpop.permute.xlu1 %4946  ;;  %v4963_v48 = vrot.slane %v4949_v43, 4  ;;  %v11058_v38 = vld [vmem:[#allocation97_spill] sm:$0xff] }
 0xbfc   : > { %v6432_v46 = vcombine.low %v5267_v30, %v5269_v16  ;;  %v6433_v63 = vcombine.high %v5267_v30, %v5269_v16  ;;  %v4962_v22 = vrot.slane %v4947_v25, 4  ;;  %v6615_v16 = vadd.f32 %v6614_v20, %v6613_v54 }
 0xbfe   : > { %5621 = vmatprep.subr.bf16.mxu1 %v6433_v63  ;;  %v4953_v11 = vpop.permute.xlu0 %4952  ;;  %v4970_v49 = vsel %vm4569_vm3, %v4962_v22, %v4963_v48  ;;  %v11060_v22 = vld [vmem:[#allocation98_spill] sm:$0xff] }
 0xbff   : > { %5622 = vmatpush1.bf16.msra.mxu1 %v6432_v46  ;;  %v4951_v35 = vpop.permute.xlu1 %4950  ;;  %v4965_v61 = vrot.slane %v4953_v11, 4  ;;  %v4972_v7 = vsel %vm11051_vm9, %v4947_v25, %v4970_v49 }
 0xc00   : > { %v4964_v23 = vrot.slane %v4951_v35, 4  ;;  %5732 = vmatprep.subr.bf16.mxu1 %v7000_v57 }
 0xc02   : > { %v4973_v59 = vsel %vm4569_vm3, %v4964_v23, %v4965_v61  ;;  %6436 = vmatmul.mubr.msk.bf16.vlgmr.msra.gmra.mxu1 %vm640_vm2, %v6997_v62  ;;  %v4844_v28 = vpop.permute.xlu0 %4843  ;;  %v11061_v62 = vld [vmem:[#allocation96_spill] sm:$0xff] }
 0xc03   : > { %v4974_v42 = vsel %vm11052_vm6, %v4951_v35, %v4973_v59  ;;  %v4842_v53 = vpop.permute.xlu1 %4841  ;;  %5733 = vmatpush1.bf16.msra.mxu1 %v6998_v33  ;;  %5649 = vmatprep.mubr.bf16.mxu1 %v11053_v14  ;;  %v4858_v24 = vrot.slane %v4844_v28, 4 }
 0xc04   : > { %v6420_v40 = vcombine.low %v4972_v7, %v4974_v42  ;;  %v6421_v4 = vcombine.high %v4972_v7, %v4974_v42  ;;  %v4857_v19 = vrot.slane %v4842_v53, 4  ;;  %5734 = vmatprep.subr.bf16.mxu1 %v7006_v51 }
 0xc06   : > { %5580 = vmatprep.subr.bf16.mxu0 %v6421_v4  ;;  %v4848_v8 = vpop.permute.xlu0 %4847  ;;  %v4865_v47 = vsel %vm4569_vm3, %v4857_v19, %v4858_v24 }
 0xc07   : > { %5581 = vmatpush2.bf16.msra.mxu0 %v6420_v40  ;;  %v4846_v18 = vpop.permute.xlu1 %4845  ;;  %5735 = vmatpush1.bf16.msra.mxu1 %v7004_v12  ;;  %v4860_v36 = vrot.slane %v4848_v8, 4  ;;  %v4867_v58 = vsel %vm11054_vm1, %v4842_v53, %v4865_v47 }
 0xc08   : > { %v4859_v52 = vrot.slane %v4846_v18, 4  ;;  %5582 = vmatprep.subr.bf16.mxu0 %v6419_v17  ;;  %5736 = vmatprep.subr.bf16.mxu1 %v7010_v56  ;;  %v7001_v17 = vld [vmem:[#allocation13] ss:$12 sps:$4 sm:$0xff]  }
 0xc0a   : > { %v4868_v1 = vsel %vm4569_vm3, %v4859_v52, %v4860_v36  ;;  %6437 = vmatmul.mubr.msk.bf16.gmra.mxu1 %vm640_vm2, %v7007_v34 }
 0xc0b   : > { %v4869_v5 = vsel %vm11055_vm5, %v4846_v18, %v4868_v1  ;;  %5583 = vmatpush2.bf16.msra.mxu0 %v6418_v9  ;;  %5737 = vmatpush1.bf16.msra.mxu1 %v7008_v2 }
 0xc0c   : > { %v6416_v15 = vcombine.low %v4867_v58, %v4869_v5  ;;  %v6417_v3 = vcombine.high %v4867_v58, %v4869_v5  ;;  %5738 = vmatprep.subr.bf16.mxu1 %v7015_v50  ;;  %5756 = vmatprep.mubr.bf16.mxu1 %v11053_v14 }
 0xc0e   : > { %5584 = vmatprep.subr.bf16.mxu0 %v6417_v3 }
 0xc0f   : > { %5585 = vmatpush2.bf16.msra.mxu0 %v6416_v15  ;;  %5739 = vmatpush1.bf16.msra.mxu1 %v7013_v13 }
 0xc12   : > { %5587 = vmatmul.mubr.bf16.vlgmr.msra.gmra.mxu0 %v7001_v17 }
 0xc13   : > { %5596 = vmatprep.mubr.bf16.mxu0 %v7011_v45  ;;  %v2283_v9 = vpop.permute.xlu0 %2282 }
 0xc14   : > { %v2278_v21 = vpop.permute.xlu1 %2277  ;;  %v2477_v32 = vadd.f32 %v6609_v10, %v2283_v9 }
 0xc15   : > { %v2474_v31 = vadd.f32 %v6606_v44, %v2278_v21 }
 0xc16   : > { %v2526_v55 = vadd.f32 %v11057_v26, %v2477_v32 }
 0xc17   : > { %v2523_v30 = vadd.f32 %v11058_v38, %v2474_v31  ;;  %v2293_v43 = vpop.permute.xlu0 %2292 }
 0xc18   : > { %v2288_v25 = vpop.permute.xlu1 %2287  ;;  %v2538_v46 = vmax.f32 %v2526_v55, 0.0  ;;  %v2485_v39 = vadd.f32 %v6615_v16, %v2293_v43 }
 0xc19   : > { %v2537_v63 = vmax.f32 %v2523_v30, 0.0  ;;  %v2482_v41 = vadd.f32 %v6612_v0, %v2288_v25 }
 0xc1a   : > { %5597 = vmatmul.mubr.bf16.gmra.mxu0 %v7016_v6  ;;  %2542 = vst.msk [vmem:[%s582_s4 + $0x8] sm:$0xff] %vm610_vm0, %v2538_v46  ;;  %v2534_v57 = vadd.f32 %v11060_v22, %v2485_v39 }
 0xc1b   : > { %2541 = vst.msk [vmem:[%s582_s4] sm:$0xff] %vm610_vm0, %v2537_v63  ;;  %v5668_v48 = vpack.c.bf16 %v2538_v46, %v2537_v63  ;;  %v2531_v60 = vadd.f32 %v11061_v62, %v2482_v41 }
 0xc1c   : > { %v2540_v11 = vmax.f32 %v2534_v57, 0.0 }
 0xc1d   : > { %v2539_v35 = vmax.f32 %v2531_v60, 0.0  ;;  %6446 = vmatmul.mubr.msk.bf16.vlgmr.msra.gmra.mxu1 %vm610_vm0, %v5668_v48 }
 0xc1e   : > { %5766 = vmatprep.mubr.bf16.mxu1 %v11053_v14  ;;  %2544 = vst.msk [vmem:[%s582_s4 + $0x18] sm:$0xff] %vm610_vm0, %v2540_v11 }
 0xc1f   : > { %2543 = vst.msk [vmem:[%s582_s4 + $0x10] sm:$0xff] %vm610_vm0, %v2539_v35  ;;  %v5669_v33 = vpack.c.bf16 %v2540_v11, %v2539_v35 }
 0xc25   : > { %6447 = vmatmul.mubr.msk.bf16.gmra.mxu1 %vm610_vm0, %v5669_v33 }
 0xc26   : > { %7210 = shalt.err (!%p7207_p1)
}
 0xc27   : > { %s7211_s27 = scalar_lea.hbm %s10320_s28, 512  ;;  %s7215_s16 = scalar_lea.hbm %s11063_s26, 1024 }
 0xc28   : > { %p7212_p4 = scmp.ne.s32.totalorder %s10320_s28, %s7211_s27  ;;  %p7216_p9 = scmp.lt.s32.totalorder %s10320_s28, %s11063_s26 }
 0xc29   : > { %p7217_p8 = scmp.lt.s32.totalorder %s7215_s16, %s7211_s27 }
 0xc2a   : > { %p7213_p0 = pnand %p7212_p4, %p11064_p10 }
 0xc2b   : > { %p7218_p7 = por %p7217_p8, %p7216_p9 }
 0xc2c   : > { %p7214_p2 = pneg %p7213_p0 }
 0xc2e   : > { %p7219_p13 = pnand %p7218_p7, %p7214_p2 }
 0xc30   : > { %7222 = shalt.err (!%p7219_p13)
}
 0xc31   : > { %s7436_s13 = smov 128   ;;  %v5321_v7 = vpop.permute.xlu1 %5320  ;;  %v5326_v40 = vpop.permute.xlu0 %5325  ;;  %s6562_s5 = sshll.u32 %s10858_s11, 10 }
 0xc32   : > { %6747 = dma.vmem_to_hbm [thread:$0]  (%p11064_p10), %s10322_s17, 512, %s10320_s28, %s5799_s29, %s7436_s13, %s7436_s13, %s10901_s10  }
 0xc33   : > { %s6014_s10 = sshll.u32 %s11056_s24, 6  ;;  %s11065_s22 = sld [smem:[#allocation145_spill]] }
 0xc34   : > { %s10349_s15 = scalar_lea.vmem [#allocation20], %s6014_s10  ;;  %s5794_s11 = scalar_lea.sflag [#allocation10], %s11056_s24 }
 0xc35   : > { %v5331_v18 = vpop.permute.xlu1 %5330  ;;  %v5336_v3 = vpop.permute.xlu0 %5335  ;;  %s5812_s9 = sshll.u32 %s10349_s15, 4  ;;  %s7437_s28 = smov [#allocation20]   ;;  %s10365_s9 = int_to_ptr.vmem [resolvable:$true] %s5812_s9 }
 0xc36   : > { %s7223_s14 = scalar_lea.vmem %s10365_s9, 1024  ;;  %s7227_s17 = sshll.u32 %s7437_s28, 4  ;;  %s7228_s17 = int_to_ptr.vmem [resolvable:$false] %s7227_s17 }
 0xc37   : > { %p7224_p3 = scmp.ne.s32.totalorder %s10365_s9, %s7223_s14  ;;  %s7229_s29 = scalar_lea.vmem %s7228_s17, 2048 }
 0xc38   : > { %p7230_p11 = scmp.lt.s32.totalorder %s10365_s9, %s7228_s17  ;;  %p7231_p12 = scmp.lt.s32.totalorder %s7229_s29, %s7223_s14 }
 0xc39   : > { %s10362_s8 = scalar_lea.hbm %s11065_s22, %s6562_s5  ;;  %p7225_p5 = pnand %p7224_p3, %p11064_p10 }
 0xc3a   : > { %p7232_p1 = por %p7231_p12, %p7230_p11 }
 0xc3b   : > { %p7226_p6 = pneg %p7225_p5 }
 0xc3d   : > { %p7233_p4 = pnand %p7232_p1, %p7226_p6 }
 0xcc2   : > { %v5641_v49 = vpop.f32.mrf.mxu1 }
 0xcc4   : > { %v5643_v61 = vpop.f32.mrf.mxu1 }
 0xcc6   : > { %v5645_v23 = vpop.f32.mrf.mxu1 }
 0xcc8   : > { %v5647_v51 = vpop.f32.mrf.mxu1 }
 0xcca   : > { %v5651_v59 = vpop.f32.mrf.mxu1 }
 0xccc   : > { %v5653_v42 = vpop.f32.mrf.mxu1 }
 0xcce   : > { %v5655_v4 = vpop.f32.mrf.mxu1 }
 0xcd0   : > { %v5657_v2 = vpop.f32.mrf.mxu1 }
 0xcd2   : > { %v5588_v29 = vpop.f32.mrf.mxu0 }
 0xcd3   : > { %v5589_v28 = vadd.f32 %v5588_v29, %v5321_v7 }
 0xcd4   : > { %v5590_v53 = vpop.f32.mrf.mxu0 }
 0xcd5   : > { %v5591_v14 = vadd.f32 %v5590_v53, %v5321_v7  ;;  %v5642_v24 = vadd.f32 %v5641_v49, %v5589_v28 }
 0xcd6   : > { %v5592_v12 = vpop.f32.mrf.mxu0 }
 0xcd7   : > { %v5593_v19 = vadd.f32 %v5592_v12, %v5326_v40  ;;  %v5644_v37 = vadd.f32 %v5643_v61, %v5591_v14  ;;  %v5660_v50 = vmax.f32 %v5642_v24, 0.0 }
 0xcd8   : > { %v5594_v56 = vpop.f32.mrf.mxu0 }
 0xcd9   : > { %v5595_v34 = vadd.f32 %v5594_v56, %v5326_v40  ;;  %v5646_v47 = vadd.f32 %v5645_v23, %v5593_v19  ;;  %v5661_v15 = vmax.f32 %v5644_v37, 0.0 }
 0xcda   : > { %v5598_v8 = vpop.f32.mrf.mxu0 }
 0xcdb   : > { %v5599_v36 = vadd.f32 %v5598_v8, %v5331_v18  ;;  %v5648_v58 = vadd.f32 %v5647_v51, %v5595_v34  ;;  %v5662_v20 = vmax.f32 %v5646_v47, 0.0 }
 0xcdc   : > { %v5600_v52 = vpop.f32.mrf.mxu0 }
 0xcdd   : > { %v5758_v1 = vpop.f32.mrf.mxu1  ;;  %v5601_v5 = vadd.f32 %v5600_v52, %v5331_v18  ;;  %v5652_v54 = vadd.f32 %v5651_v59, %v5599_v36  ;;  %v5663_v6 = vmax.f32 %v5648_v58, 0.0 }
 0xcde   : > { %v5777_v27 = vadd.f32 %v5758_v1, %v5660_v50  ;;  %v5602_v13 = vpop.f32.mrf.mxu0 }
 0xcdf   : > { %v5760_v17 = vpop.f32.mrf.mxu1  ;;  %v5603_v45 = vadd.f32 %v5602_v13, %v5336_v3  ;;  %v5654_v21 = vadd.f32 %v5653_v42, %v5601_v5  ;;  %v5664_v38 = vmax.f32 %v5652_v54, 0.0 }
 0xce0   : > { %5785 = vst [vmem:[%s10349_s15] sm:$0xff] %v5777_v27  ;;  %v5778_v44 = vadd.f32 %v5760_v17, %v5661_v15  ;;  %v5604_v10 = vpop.f32.mrf.mxu0 }
 0xce1   : > { %v5762_v9 = vpop.f32.mrf.mxu1  ;;  %v5605_v32 = vadd.f32 %v5604_v10, %v5336_v3  ;;  %v5656_v26 = vadd.f32 %v5655_v4, %v5603_v45  ;;  %v5665_v25 = vmax.f32 %v5654_v21, 0.0 }
 0xce2   : > { %5786 = vst [vmem:[%s10349_s15 + $0x8] sm:$0xff] %v5778_v44  ;;  %v5779_v31 = vadd.f32 %v5762_v9, %v5662_v20 }
 0xce3   : > { %v5764_v0 = vpop.f32.mrf.mxu1  ;;  %v5658_v16 = vadd.f32 %v5657_v2, %v5605_v32  ;;  %v5666_v39 = vmax.f32 %v5656_v26, 0.0 }
 0xce4   : > { %5787 = vst [vmem:[%s10349_s15 + $0x10] sm:$0xff] %v5779_v31  ;;  %v5780_v55 = vadd.f32 %v5764_v0, %v5663_v6 }
 0xce5   : > { %v5768_v30 = vpop.f32.mrf.mxu1  ;;  %v5667_v22 = vmax.f32 %v5658_v16, 0.0 }
 0xce6   : > { %5788 = vst [vmem:[%s10349_s15 + $0x18] sm:$0xff] %v5780_v55  ;;  %v5781_v43 = vadd.f32 %v5768_v30, %v5664_v38 }
 0xce7   : > { %v5770_v46 = vpop.f32.mrf.mxu1 }
 0xce8   : > { %5789 = vst [vmem:[%s10349_s15 + $0x20] sm:$0xff] %v5781_v43  ;;  %v5782_v63 = vadd.f32 %v5770_v46, %v5665_v25 }
 0xce9   : > { %v5772_v41 = vpop.f32.mrf.mxu1 }
 0xcea   : > { %5790 = vst [vmem:[%s10349_s15 + $0x28] sm:$0xff] %v5782_v63  ;;  %v5783_v48 = vadd.f32 %v5772_v41, %v5666_v39 }
 0xceb   : > { %v5774_v57 = vpop.f32.mrf.mxu1 }
 0xcec   : > { %5791 = vst [vmem:[%s10349_s15 + $0x30] sm:$0xff] %v5783_v48  ;;  %v5784_v62 = vadd.f32 %v5774_v57, %v5667_v22 }
 0xcee   : > { %5792 = vst [vmem:[%s10349_s15 + $0x38] sm:$0xff] %v5784_v62 }
 0xcef   : > { %7236 = shalt.err (!%p7233_p4)
}
 0xcf0   : > { %s7237_s19 = scalar_lea.hbm %s10362_s8, 1024  ;;  %s7241_s18 = scalar_lea.hbm %s11065_s22, 2048 }
 0xcf1   : > { %p7238_p0 = scmp.ne.s32.totalorder %s10362_s8, %s7237_s19  ;;  %p7242_p8 = scmp.lt.s32.totalorder %s10362_s8, %s11065_s22 }
 0xcf2   : > { %p7243_p7 = scmp.lt.s32.totalorder %s7241_s18, %s7237_s19 }
 0xcf3   : > { %p7239_p2 = pnand %p7238_p0, %p11064_p10 }
 0xcf4   : > { %p7244_p13 = por %p7243_p7, %p7242_p8 }
 0xcf5   : > { %p7240_p9 = pneg %p7239_p2 }
 0xcf7   : > { %p7245_p3 = pnand %p7244_p13, %p7240_p9 }
 0xcf9   : > { %7248 = shalt.err (!%p7245_p3)
}
 0xcfa   : > { %s7438_s0 = smov 256  }
 0xcfb   : > { %6746 = dma.vmem_to_hbm [thread:$0]  (%p11064_p10), %s10365_s9, 1024, %s10362_s8, %s5794_s11, %s7438_s0, %s7438_s0, %s10881_s21  }
 0xcfc PF: > { %s11066_s16 = sld [smem:[#allocation31_spill]] }
 0xcfd   : > { %s11067_s3 = sld [smem:[#allocation39_spill]] }
 0xcfe   : > { %s11068_s23 = sld [smem:[#allocation34_spill]] }
 0xd02   : > { %s5843_s13 = sand.u32 1, %s11066_s16  }
 0xd03   : > { %p11069_p5 = scmp.ne.s32.totalorder %s11067_s3, 0  ;;  %s5844_s10 = scalar_lea.sflag [#allocation10], %s5843_s13 }
 0xd04   : > { %p11070_p6 = scmp.ge.s32.totalorder %s11068_s23, 2 }
 0xd06   : > { %p6771_p11 = pnand %p11070_p6, %p11069_p5 }
 0xd08   : > { %p6772_p12 = pneg %p6771_p11 }
 0xd0a   : > { %7290 = dma.done.wait (%p6772_p12), %s5844_s10, 1024  }
 0xd0b   : > { %7292 = vsyncadd (%p6772_p12), %s5844_s10, 4294966272  ;;  %s5853_s15 = scalar_lea.sflag [#allocation22], %s5843_s13 }
 0xd0c   : > { %7294 = dma.done.wait (%p6772_p12), %s5853_s15, 512  }
 0xd0d   : > { %7296 = vsyncadd (%p6772_p12), %s5853_s15, 4294966784  ;;  %s11071_s16 = sld [smem:[#allocation36_spill]] }
 0xd0e   : > { %s11072_s29 = sld [smem:[#allocation32_spill]] }
 0xd0f   : > { %s11073_s30 = sld [smem:[#allocation33_spill]] }
 0xd10   : > { %s11074_s15 = sld [smem:[#allocation37_spill]] }
 0xd13   : > { %p35_p10 = scmp.ge.s32.totalorder %s11071_s16, 4  }
 0xd15   :  { %37 = sbr.rel (!%p35_p10) target bundleno = 27 (0x1b), region = 159 }
 0xd1a   :  { %5858 = vsyncpa [#allocation9], 1 }
 0xd1b   :  { %5860 = vsyncpa [#allocation9 + $0x1], 1 }
 0xd1c   :  { %5861 = vsyncpa [#allocation14], 1 }
 0xd1d   :  { %5862 = vsyncpa [#allocation19], 1 }
 0xd1e   :  { %5863 = vsyncpa [#allocation10], 1 }
 0xd1f   :  { %5865 = vsyncpa [#allocation10 + $0x1], 1 }
 0xd20   :  { %5866 = vsyncpa [#allocation22], 1 }
 0xd21   :  { %5868 = vsyncpa [#allocation22 + $0x1], 1 }
 0xd22   :  { %5869 = vsyncpa [#allocation11], 1 }
 0xd23   :  { %5871 = vsyncpa [#allocation11 + $0x1], 1 }
 0xd24   :  { %5872 = vsyncpa [#allocation16], 1 }

</bundles_post_ra>
